<compile_context>
chip_gen: v5e
topology: v5e:2x2
jax: 0.10.0
libtpu: 0.0.40
codegen_flags: <defaults>
</compile_context>

<pallas_src>
import jax
import jax.numpy as jnp
from functools import partial
from jax.experimental import pallas as pl
from jax.experimental.pallas import tpu as pltpu

VMEM_LIMIT = 48 * 1024 * 1024  # <= 64 MiB/TC on v7x, well below v5e/v6e's 128


def _round_up(x, m):
    return (x + m - 1) // m * m


def _tile_and_pad(dim, unit, tmax):
    """Pick (tile, padded_dim): tile is a multiple of `unit`, <= tmax.

    Prefers tiles that divide round_up(dim, unit) exactly (no host-side pad /
    slice copy and no wasted grid steps); otherwise minimizes padding over
    tiles in [tmax/4, tmax]."""
    dp = _round_up(dim, unit)
    if dp <= tmax:
        return dp, dp
    tmax = tmax // unit * unit
    floor = max(unit, (tmax // 4) // unit * unit)
    best_t, best_p = None, None
    t = tmax
    while t >= floor:
        p = _round_up(dp, t)
        if best_p is None or p < best_p:
            best_t, best_p = t, p
            if p == dp:
                break
        t -= unit
    return best_t, best_p


# ----------------- fused matmul (BN/ReLU prologue + epilogue) ---------------

def _mm_kernel(*refs, prologue, pre_relu, epilogue, post_relu):
    pos = 0
    a_ref = refs[pos]; pos += 1
    b_ref = refs[pos]; pos += 1
    if prologue:
        ps_ref, pb_ref = refs[pos], refs[pos + 1]; pos += 2
    if epilogue:
        es_ref, eb_ref = refs[pos], refs[pos + 1]; pos += 2
    o_ref, acc_ref = refs[pos], refs[pos + 1]

    k = pl.program_id(2)

    @pl.when(k == 0)
    def _():
        acc_ref[...] = jnp.zeros_like(acc_ref)

    a = a_ref[...]
    if prologue:
        # fused pre-activation BatchNorm + ReLU on the LHS tile (per K column)
        a = a.astype(jnp.float32) * ps_ref[...] + pb_ref[...]
        if pre_relu:
            a = jnp.maximum(a, 0.0)
        a = a.astype(jnp.bfloat16)
    acc_ref[...] += jnp.dot(a, b_ref[...], preferred_element_type=jnp.float32)

    @pl.when(k == pl.num_programs(2) - 1)
    def _():
        y = acc_ref[...]
        if epilogue:
            y = y * es_ref[...] + eb_ref[...]
            if post_relu:
                y = jnp.maximum(y, 0.0)
        o_ref[...] = y.astype(o_ref.dtype)


def fused_matmul(a, b, *, pre_scale=None, pre_shift=None, pre_relu=False,
                 post_scale=None, post_shift=None, post_relu=False,
                 out_dtype=jnp.bfloat16, tm=512, tn=512, tk=512):
    """out = epilogue( prologue(a[:, :K]) @ b ) on the MXU (bf16 in, f32 acc).

    a: (M, Ka) with Ka >= K := b.shape[0]; only the first K columns take part
       (the DenseNet concat buffer is passed directly; extra columns are never
       fetched and padded weight rows are zero).
    prologue: per-K-column scale/shift (+ReLU) fused on the LHS tile.
    epilogue: per-N-column scale/shift (+ReLU) applied on the last K step.
    """
    M, Ka = a.shape
    K, N = b.shape
    assert Ka >= K
    a = a.astype(jnp.bfloat16)
    b = b.astype(jnp.bfloat16)
    prologue = pre_scale is not None or pre_shift is not None
    epilogue = post_scale is not None or post_shift is not None

    # --- K tiling (divisor-aware: no zero K-steps, no LHS pad pass) ---
    if Ka == K and K <= tk:
        tk_eff, Kp = K, K                       # single full-dim K block
    else:
        tk_eff, Kp = _tile_and_pad(K, 128, tk)
        if Ka < Kp:
            a = jnp.pad(a, ((0, 0), (0, Kp - Ka)))
        if Kp > K:
            b = jnp.pad(b, ((0, Kp - K), (0, 0)))
    # --- M tiling ---
    tm_eff, Mp = _tile_and_pad(M, 8, tm)
    if Mp > M:
        a = jnp.pad(a, ((0, Mp - M), (0, 0)))
    # --- N tiling ---
    if N <= tn:
        tn_eff, Np = N, N                       # single full-dim N block
    else:
        tn_eff, Np = _tile_and_pad(N, 128, tn)
        if Np > N:
            b = jnp.pad(b, ((0, 0), (0, Np - N)))

    # keep both v7x TensorCores busy when the grid would otherwise be 1x1
    if (Mp // tm_eff == 1 and Np // tn_eff == 1 and tm_eff >= 256
            and (tm_eff // 2) % 8 == 0):
        tm_eff //= 2

    grid = (Mp // tm_eff, Np // tn_eff, Kp // tk_eff)

    operands = [a, b]
    in_specs = [pl.BlockSpec((tm_eff, tk_eff), lambda i, j, k: (i, k)),
                pl.BlockSpec((tk_eff, tn_eff), lambda i, j, k: (k, j))]
    if prologue:
        ps = (jnp.ones((K,), jnp.float32) if pre_scale is None
              else pre_scale.astype(jnp.float32))
        pb = (jnp.zeros((K,), jnp.float32) if pre_shift is None
              else pre_shift.astype(jnp.float32))
        if Kp > K:
            ps = jnp.pad(ps, (0, Kp - K))
            pb = jnp.pad(pb, (0, Kp - K))
        operands += [ps.reshape(1, Kp), pb.reshape(1, Kp)]
        in_specs += [pl.BlockSpec((1, tk_eff), lambda i, j, k: (0, k)),
                     pl.BlockSpec((1, tk_eff), lambda i, j, k: (0, k))]
    if epilogue:
        es = (jnp.ones((N,), jnp.float32) if post_scale is None
              else post_scale.astype(jnp.float32))
        eb = (jnp.zeros((N,), jnp.float32) if post_shift is None
              else post_shift.astype(jnp.float32))
        if Np > N:
            es = jnp.pad(es, (0, Np - N))
            eb = jnp.pad(eb, (0, Np - N))
        operands += [es.reshape(1, Np), eb.reshape(1, Np)]
        in_specs += [pl.BlockSpec((1, tn_eff), lambda i, j, k: (0, j)),
                     pl.BlockSpec((1, tn_eff), lambda i, j, k: (0, j))]

    out = pl.pallas_call(
        partial(_mm_kernel, prologue=prologue, pre_relu=pre_relu,
                epilogue=epilogue, post_relu=post_relu),
        out_shape=jax.ShapeDtypeStruct((Mp, Np), out_dtype),
        grid_spec=pltpu.PrefetchScalarGridSpec(
            num_scalar_prefetch=0,
            grid=grid,
            in_specs=in_specs,
            out_specs=pl.BlockSpec((tm_eff, tn_eff), lambda i, j, k: (i, j)),
            # f32 accumulator scratch so the HBM output can be bf16.
            scratch_shapes=[pltpu.VMEM((tm_eff, tn_eff), jnp.float32)]),
        compiler_params=pltpu.CompilerParams(
            dimension_semantics=("parallel", "parallel", "arbitrary"),
            vmem_limit_bytes=VMEM_LIMIT),
    )(*operands)
    if Mp > M or Np > N:
        out = out[:M, :N]
    return out


# ------------------------------ conv wrappers -------------------------------

def conv2d_im2col(x, w, stride, pad, post_scale=None, post_shift=None,
                  post_relu=False, out_dtype=jnp.bfloat16):
    """General KxK conv via im2col; only used for the 7x7 / 3-channel stem."""
    N, H, W, Cin = x.shape
    Cout, Cin2, KH, KW = w.shape
    assert Cin == Cin2
    OH = (H + 2 * pad - KH) // stride + 1
    OW = (W + 2 * pad - KW) // stride + 1
    xb = x.astype(jnp.bfloat16)
    xp = jnp.pad(xb, ((0, 0), (pad, pad), (pad, pad), (0, 0)))
    cols = [xp[:, i:i + stride * OH:stride, j:j + stride * OW:stride, :]
            for i in range(KH) for j in range(KW)]
    lhs = jnp.concatenate(cols, axis=-1).reshape(N * OH * OW, KH * KW * Cin)
    wm = jnp.transpose(w, (2, 3, 1, 0)).reshape(KH * KW * Cin, Cout)
    out = fused_matmul(lhs, wm, post_scale=post_scale, post_shift=post_shift,
                       post_relu=post_relu, out_dtype=out_dtype)
    return out.reshape(N, OH, OW, Cout)


def conv1x1_fused(lhs2d, cin, w, pre_scale, pre_shift,
                  post_scale=None, post_shift=None, post_relu=False,
                  out_dtype=jnp.bfloat16):
    """1x1 conv, one kernel: pre-activation BN+ReLU (prologue) -> matmul ->
    optional BN+ReLU (epilogue). lhs2d is the (M, Cb) view of the concat
    buffer; only its first `cin` channels participate."""
    cout = w.shape[0]
    wm = w.reshape(cout, cin).T          # (cin, cout)
    return fused_matmul(lhs2d, wm, pre_scale=pre_scale, pre_shift=pre_shift,
                        pre_relu=True, post_scale=post_scale,
                        post_shift=post_shift, post_relu=post_relu,
                        out_dtype=out_dtype)


def conv3x3_s1p1(x, w, out_dtype=jnp.bfloat16):
    """3x3 / stride 1 / pad 1 conv without im2col: one (M,Cin)@(Cin,9*Cout)
    matmul on the spatially padded activation, then a 9-way shifted
    accumulation (Cout < Cin in DenseNet, so this intermediate is much smaller
    than the 9*Cin im2col matrix)."""
    N, H, W, Cin = x.shape
    Cout = w.shape[0]
    xp = jnp.pad(x.astype(jnp.bfloat16), ((0, 0), (1, 1), (1, 1), (0, 0)))
    w_all = jnp.transpose(w, (1, 2, 3, 0)).reshape(Cin, 9 * Cout)
    t = fused_matmul(xp.reshape(N * (H + 2) * (W + 2), Cin), w_all,
                     out_dtype=jnp.bfloat16)
    t = t.reshape(N, H + 2, W + 2, 3, 3, Cout)
    y = None
    for dy in range(3):
        for dx in range(3):
            s = t[:, dy:dy + H, dx:dx + W, dy, dx, :].astype(jnp.float32)
            y = s if y is None else y + s
    # TODO(synk): the shifted accumulation is left to XLA (one fused pass); a
    # fully in-kernel implicit GEMM over window offsets would also fold this.
    return y.astype(out_dtype)


def max_pool2d_nhwc(x, k, s, p):
    N, H, W, C = x.shape
    xp = jnp.pad(x, ((0, 0), (p, p), (p, p), (0, 0)),
                 constant_values=-jnp.inf)
    OH = (H + 2 * p - k) // s + 1
    OW = (W + 2 * p - k) // s + 1
    out = None
    for i in range(k):
        for j in range(k):
            patch = xp[:, i:i + s * OH:s, j:j + s * OW:s, :]
            out = patch if out is None else jnp.maximum(out, patch)
    return out


def avg_pool_2x2_nhwc(x):
    N, H, W, C = x.shape
    x = x[:, :H // 2 * 2, :W // 2 * 2, :].astype(jnp.float32)
    y = x.reshape(N, H // 2, 2, W // 2, 2, C).mean(axis=(2, 4))
    return y.astype(jnp.bfloat16)


def _bn_scale_shift(bn, eps=1e-5):
    scale = bn['gamma'] / jnp.sqrt(bn['var'] + eps)
    shift = bn['beta'] - bn['mean'] * scale
    return scale, shift


# -------------------------------- parameters --------------------------------

def _kaiming_conv(key, cout, cin, kh, kw):
    fan_in = cin * kh * kw
    std = (2.0 / fan_in) ** 0.5
    return jax.random.normal(key, (cout, cin, kh, kw), jnp.float32) * std


def _bn_params(c):
    return dict(gamma=jnp.ones((c,), jnp.float32),
                beta=jnp.zeros((c,), jnp.float32),
                mean=jnp.zeros((c,), jnp.float32),
                var=jnp.ones((c,), jnp.float32))


def init_densenet(key, growth_rate=32, block_config=(6, 12, 24, 16),
                  num_init_features=64, bn_size=4, num_classes=1000):
    keys = iter(jax.random.split(key, 4 * sum(block_config) + 16))
    params = {}
    params['conv0'] = _kaiming_conv(next(keys), num_init_features, 3, 7, 7)
    params['norm0'] = _bn_params(num_init_features)
    num_features = num_init_features
    blocks, transitions = [], []
    for i, num_layers in enumerate(block_config):
        layers = []
        for l in range(num_layers):
            cin = num_features + l * growth_rate
            layers.append(dict(
                norm1=_bn_params(cin),
                conv1=_kaiming_conv(next(keys), bn_size * growth_rate, cin, 1, 1),
                norm2=_bn_params(bn_size * growth_rate),
                conv2=_kaiming_conv(next(keys), growth_rate,
                                    bn_size * growth_rate, 3, 3)))
        blocks.append(layers)
        num_features += num_layers * growth_rate
        if i != len(block_config) - 1:
            transitions.append(dict(
                norm=_bn_params(num_features),
                conv=_kaiming_conv(next(keys), num_features // 2,
                                   num_features, 1, 1)))
            num_features //= 2
    params['blocks'] = blocks
    params['transitions'] = transitions
    params['norm5'] = _bn_params(num_features)
    bound = 1.0 / (num_features ** 0.5)
    # pre-transposed classifier weight: (num_features, num_classes)
    params['fc_w'] = jax.random.uniform(next(keys), (num_features, num_classes),
                                        jnp.float32, -bound, bound)
    params['fc_b'] = jnp.zeros((num_classes,), jnp.float32)
    return params


# --------------------------------- forward ----------------------------------

def densenet_forward(x, params):
    # single layout change at the network input: NCHW -> NHWC; bf16 activations
    x = jnp.transpose(x, (0, 2, 3, 1)).astype(jnp.bfloat16)

    # stem: conv0 -> norm0 -> relu0 fused in one kernel, then maxpool
    s0, b0 = _bn_scale_shift(params['norm0'])
    x = conv2d_im2col(x, params['conv0'], stride=2, pad=3,
                      post_scale=s0, post_shift=b0, post_relu=True)
    x = max_pool2d_nhwc(x, k=3, s=2, p=1)

    n_blocks = len(params['blocks'])
    pooled = None
    for bi, block in enumerate(params['blocks']):
        N, H, W, C0 = x.shape
        growth = block[0]['conv2'].shape[0]
        c_final = C0 + len(block) * growth
        Cb = _round_up(c_final, 128)          # lane-aligned concat buffer
        buf = jnp.zeros((N, H, W, Cb), jnp.bfloat16)
        buf = jax.lax.dynamic_update_slice(buf, x, (0, 0, 0, 0))
        c = C0
        for layer in block:
            # whole bottleneck first half in ONE pallas_call:
            #   norm1+relu1 (LHS prologue) -> conv1 -> norm2+relu2 (epilogue)
            s1, b1 = _bn_scale_shift(layer['norm1'])
            s2, b2 = _bn_scale_shift(layer['norm2'])
            h = conv1x1_fused(buf.reshape(N * H * W, Cb), c, layer['conv1'],
                              s1, b1, post_scale=s2, post_shift=b2,
                              post_relu=True)
            h = h.reshape(N, H, W, -1)
            new = conv3x3_s1p1(h, layer['conv2'])
            # TODO(synk): drop_rate > 0 dropout path not implemented (default 0).
            # TODO(synk): could alias buf as the conv2 pallas_call output
            # (input_output_aliases) to skip this update copy.
            buf = jax.lax.dynamic_update_slice(buf, new, (0, 0, 0, c))
            c += growth

        if bi != n_blocks - 1:
            t = params['transitions'][bi]
            st, bt = _bn_scale_shift(t['norm'])
            # transition norm+relu fused as the 1x1-conv prologue
            y = conv1x1_fused(buf.reshape(N * H * W, Cb), c_final, t['conv'],
                              st, bt)
            x = avg_pool_2x2_nhwc(y.reshape(N, H, W, -1))
        else:
            # norm5 + final ReLU folded into the global average pool (single
            # fused XLA pass over the small final feature map).
            s5, b5 = _bn_scale_shift(params['norm5'])
            feats = buf[..., :c_final].astype(jnp.float32)
            feats = jnp.maximum(feats * s5 + b5, 0.0)
            pooled = jnp.mean(feats, axis=(1, 2))     # (N, num_features) f32

    # classifier: Linear, bias fused as the epilogue shift; weights
    # pre-transposed at init so no per-call HBM transpose.
    logits = fused_matmul(pooled, params['fc_w'],
                          post_shift=params['fc_b'], out_dtype=jnp.float32)
    return logits


if __name__ == "__main__":
    key = jax.random.PRNGKey(0)
    pkey, xkey = jax.random.split(key)
    # small DenseNet-BC config (constructor args of the PyTorch module)
    params = init_densenet(pkey, growth_rate=8, block_config=(2, 2, 2, 2),
                           num_init_features=16, bn_size=2, num_classes=10)
    x = jax.random.normal(xkey, (2, 3, 64, 64), jnp.float32)
    fwd = jax.jit(densenet_forward)
    logits = fwd(x, params)
    jax.block_until_ready(logits)
    assert logits.shape == (2, 10) and logits.dtype == jnp.float32
    print("KERNEL_OK")
</pallas_src>

<mosaic_0001>
module attributes {stable_mosaic.version = 11 : i64} {
  func.func @_mm_kernel(%arg0: i32, %arg1: i32, %arg2: i32, %arg3: memref<512x147xbf16, #tpu.memory_space<vmem>>, %arg4: memref<147x16xbf16, #tpu.memory_space<vmem>>, %arg5: memref<1x16xf32, #tpu.memory_space<vmem>>, %arg6: memref<1x16xf32, #tpu.memory_space<vmem>>, %arg7: memref<512x16xbf16, #tpu.memory_space<vmem>>, %arg8: memref<512x16xf32, #tpu.memory_space<vmem>>) attributes {dimension_semantics = [#tpu.dimension_semantics<parallel>, #tpu.dimension_semantics<parallel>, #tpu.dimension_semantics<arbitrary>], iteration_bounds = array<i64: 4, 1, 1>, scalar_prefetch = 0 : i64, scratch_operands = 1 : i64, tpu.core_type = #tpu.core_type<tc>, window_params = [{transform_indices = @transform_0, window_bounds = array<i64: 512, 147>}, {transform_indices = @transform_1, window_bounds = array<i64: 147, 16>}, {transform_indices = @transform_2, window_bounds = array<i64: 1, 16>}, {transform_indices = @transform_3, window_bounds = array<i64: 1, 16>}, {transform_indices = @transform_4, window_bounds = array<i64: 512, 16>}]} {
    %c0_i32 = arith.constant 0 : i32
    %0 = arith.cmpi eq, %arg2, %c0_i32 : i32
    %1 = arith.extui %0 : i1 to i32
    %c0_i32_0 = arith.constant 0 : i32
    %2 = arith.cmpi ne, %1, %c0_i32_0 : i32
    scf.if %2 {
      %cst_10 = arith.constant 0.000000e+00 : f32
      %12 = vector.broadcast %cst_10 : f32 to vector<512x16xf32>
      %c0_11 = arith.constant 0 : index
      %c0_12 = arith.constant 0 : index
      %13 = vector.load %arg8[%c0_11, %c0_12] : memref<512x16xf32, #tpu.memory_space<vmem>>, vector<512x16xf32>
      tpu.vector_store %arg8[%c0_11, %c0_12], %12 {strides = array<i32>} : memref<512x16xf32, #tpu.memory_space<vmem>>, vector<512x16xf32>,
    } else {
    }
    %c0 = arith.constant 0 : index
    %c0_1 = arith.constant 0 : index
    %3 = vector.load %arg3[%c0, %c0_1] : memref<512x147xbf16, #tpu.memory_space<vmem>>, vector<512x147xbf16>
    %c0_2 = arith.constant 0 : index
    %c0_3 = arith.constant 0 : index
    %4 = vector.load %arg8[%c0_2, %c0_3] : memref<512x16xf32, #tpu.memory_space<vmem>>, vector<512x16xf32>
    %c0_4 = arith.constant 0 : index
    %c0_5 = arith.constant 0 : index
    %5 = vector.load %arg4[%c0_4, %c0_5] : memref<147x16xbf16, #tpu.memory_space<vmem>>, vector<147x16xbf16>
    %cst = arith.constant dense<0.000000e+00> : vector<512x16xf32>
    %6 = tpu.matmul %3, %5, %cst {dimension_numbers = #tpu.dot_dimension_numbers<[1], [0], [0], [1], [0, 0, 1, 1], [], []>} : vector<512x147xbf16>, vector<147x16xbf16>, vector<512x16xf32> -> vector<512x16xf32>
    %7 = arith.addf %4, %6 : vector<512x16xf32>
    %c0_6 = arith.constant 0 : index
    %c0_7 = arith.constant 0 : index
    %8 = vector.load %arg8[%c0_6, %c0_7] : memref<512x16xf32, #tpu.memory_space<vmem>>, vector<512x16xf32>
    tpu.vector_store %arg8[%c0_6, %c0_7], %7 {strides = array<i32>} : memref<512x16xf32, #tpu.memory_space<vmem>>, vector<512x16xf32>,
    %c0_i32_8 = arith.constant 0 : i32
    %9 = arith.cmpi eq, %arg2, %c0_i32_8 : i32
    %10 = arith.extui %9 : i1 to i32
    %c0_i32_9 = arith.constant 0 : i32
    %11 = arith.cmpi ne, %10, %c0_i32_9 : i32
    scf.if %11 {
      %c0_10 = arith.constant 0 : index
      %c0_11 = arith.constant 0 : index
      %12 = vector.load %arg8[%c0_10, %c0_11] : memref<512x16xf32, #tpu.memory_space<vmem>>, vector<512x16xf32>
      %c0_12 = arith.constant 0 : index
      %c0_13 = arith.constant 0 : index
      %13 = vector.load %arg5[%c0_12, %c0_13] : memref<1x16xf32, #tpu.memory_space<vmem>>, vector<1x16xf32>
      %14 = vector.broadcast %13 : vector<1x16xf32> to vector<512x16xf32>
      %15 = arith.mulf %12, %14 : vector<512x16xf32>
      %c0_14 = arith.constant 0 : index
      %c0_15 = arith.constant 0 : index
      %16 = vector.load %arg6[%c0_14, %c0_15] : memref<1x16xf32, #tpu.memory_space<vmem>>, vector<1x16xf32>
      %17 = vector.broadcast %16 : vector<1x16xf32> to vector<512x16xf32>
      %18 = arith.addf %15, %17 : vector<512x16xf32>
      %cst_16 = arith.constant 0.000000e+00 : f32
      %19 = vector.broadcast %cst_16 : f32 to vector<512x16xf32>
      %20 = arith.maximumf %18, %19 : vector<512x16xf32>
      %21 = arith.truncf %20 : vector<512x16xf32> to vector<512x16xbf16>
      %c0_17 = arith.constant 0 : index
      %c0_18 = arith.constant 0 : index
      %22 = vector.load %arg7[%c0_17, %c0_18] : memref<512x16xbf16, #tpu.memory_space<vmem>>, vector<512x16xbf16>
      tpu.vector_store %arg7[%c0_17, %c0_18], %21 {strides = array<i32>} : memref<512x16xbf16, #tpu.memory_space<vmem>>, vector<512x16xbf16>,
    } else {
    }
    return
  }
  func.func @transform_0(%arg0: i32, %arg1: i32, %arg2: i32) -> (i32, i32) {
    %c0_i32 = arith.constant 0 : i32
    return %arg0, %arg2 : i32, i32
  }
  func.func @transform_1(%arg0: i32, %arg1: i32, %arg2: i32) -> (i32, i32) {
    %c0_i32 = arith.constant 0 : i32
    return %arg2, %arg1 : i32, i32
  }
  func.func @transform_2(%arg0: i32, %arg1: i32, %arg2: i32) -> (i32, i32) {
    %c0_i32 = arith.constant 0 : i32
    %c0_i32_0 = arith.constant 0 : i32
    return %c0_i32, %arg1 : i32, i32
  }
  func.func @transform_3(%arg0: i32, %arg1: i32, %arg2: i32) -> (i32, i32) {
    %c0_i32 = arith.constant 0 : i32
    %c0_i32_0 = arith.constant 0 : i32
    return %c0_i32, %arg1 : i32, i32
  }
  func.func @transform_4(%arg0: i32, %arg1: i32, %arg2: i32) -> (i32, i32) {
    %c0_i32 = arith.constant 0 : i32
    return %arg0, %arg1 : i32, i32
  }
}

module attributes {stable_mosaic.version = 11 : i64} {
  func.func @_mm_kernel(%arg0: i32, %arg1: i32, %arg2: i32, %arg3: memref<256x128xbf16, #tpu.memory_space<vmem>>, %arg4: memref<128x16xbf16, #tpu.memory_space<vmem>>, %arg5: memref<1x128xf32, #tpu.memory_space<vmem>>, %arg6: memref<1x128xf32, #tpu.memory_space<vmem>>, %arg7: memref<1x16xf32, #tpu.memory_space<vmem>>, %arg8: memref<1x16xf32, #tpu.memory_space<vmem>>, %arg9: memref<256x16xbf16, #tpu.memory_space<vmem>>, %arg10: memref<256x16xf32, #tpu.memory_space<vmem>>) attributes {dimension_semantics = [#tpu.dimension_semantics<parallel>, #tpu.dimension_semantics<parallel>, #tpu.dimension_semantics<arbitrary>], iteration_bounds = array<i64: 2, 1, 1>, scalar_prefetch = 0 : i64, scratch_operands = 1 : i64, tpu.core_type = #tpu.core_type<tc>, window_params = [{transform_indices = @transform_0, window_bounds = array<i64: 256, 128>}, {transform_indices = @transform_1, window_bounds = array<i64: 128, 16>}, {transform_indices = @transform_2, window_bounds = array<i64: 1, 128>}, {transform_indices = @transform_3, window_bounds = array<i64: 1, 128>}, {transform_indices = @transform_4, window_bounds = array<i64: 1, 16>}, {transform_indices = @transform_5, window_bounds = array<i64: 1, 16>}, {transform_indices = @transform_6, window_bounds = array<i64: 256, 16>}]} {
    %c0_i32 = arith.constant 0 : i32
    %0 = arith.cmpi eq, %arg2, %c0_i32 : i32
    %1 = arith.extui %0 : i1 to i32
    %c0_i32_0 = arith.constant 0 : i32
    %2 = arith.cmpi ne, %1, %c0_i32_0 : i32
    scf.if %2 {
      %cst_15 = arith.constant 0.000000e+00 : f32
      %22 = vector.broadcast %cst_15 : f32 to vector<256x16xf32>
      %c0_16 = arith.constant 0 : index
      %c0_17 = arith.constant 0 : index
      %23 = vector.load %arg10[%c0_16, %c0_17] : memref<256x16xf32, #tpu.memory_space<vmem>>, vector<256x16xf32>
      tpu.vector_store %arg10[%c0_16, %c0_17], %22 {strides = array<i32>} : memref<256x16xf32, #tpu.memory_space<vmem>>, vector<256x16xf32>,
    } else {
    }
    %c0 = arith.constant 0 : index
    %c0_1 = arith.constant 0 : index
    %3 = vector.load %arg3[%c0, %c0_1] : memref<256x128xbf16, #tpu.memory_space<vmem>>, vector<256x128xbf16>
    %4 = arith.extf %3 : vector<256x128xbf16> to vector<256x128xf32>
    %c0_2 = arith.constant 0 : index
    %c0_3 = arith.constant 0 : index
    %5 = vector.load %arg5[%c0_2, %c0_3] : memref<1x128xf32, #tpu.memory_space<vmem>>, vector<1x128xf32>
    %6 = vector.broadcast %5 : vector<1x128xf32> to vector<256x128xf32>
    %7 = arith.mulf %4, %6 : vector<256x128xf32>
    %c0_4 = arith.constant 0 : index
    %c0_5 = arith.constant 0 : index
    %8 = vector.load %arg6[%c0_4, %c0_5] : memref<1x128xf32, #tpu.memory_space<vmem>>, vector<1x128xf32>
    %9 = vector.broadcast %8 : vector<1x128xf32> to vector<256x128xf32>
    %10 = arith.addf %7, %9 : vector<256x128xf32>
    %cst = arith.constant 0.000000e+00 : f32
    %11 = vector.broadcast %cst : f32 to vector<256x128xf32>
    %12 = arith.maximumf %10, %11 : vector<256x128xf32>
    %13 = arith.truncf %12 : vector<256x128xf32> to vector<256x128xbf16>
    %c0_6 = arith.constant 0 : index
    %c0_7 = arith.constant 0 : index
    %14 = vector.load %arg10[%c0_6, %c0_7] : memref<256x16xf32, #tpu.memory_space<vmem>>, vector<256x16xf32>
    %c0_8 = arith.constant 0 : index
    %c0_9 = arith.constant 0 : index
    %15 = vector.load %arg4[%c0_8, %c0_9] : memref<128x16xbf16, #tpu.memory_space<vmem>>, vector<128x16xbf16>
    %cst_10 = arith.constant dense<0.000000e+00> : vector<256x16xf32>
    %16 = tpu.matmul %13, %15, %cst_10 {dimension_numbers = #tpu.dot_dimension_numbers<[1], [0], [0], [1], [0, 0, 1, 1], [], []>} : vector<256x128xbf16>, vector<128x16xbf16>, vector<256x16xf32> -> vector<256x16xf32>
    %17 = arith.addf %14, %16 : vector<256x16xf32>
    %c0_11 = arith.constant 0 : index
    %c0_12 = arith.constant 0 : index
    %18 = vector.load %arg10[%c0_11, %c0_12] : memref<256x16xf32, #tpu.memory_space<vmem>>, vector<256x16xf32>
    tpu.vector_store %arg10[%c0_11, %c0_12], %17 {strides = array<i32>} : memref<256x16xf32, #tpu.memory_space<vmem>>, vector<256x16xf32>,
    %c0_i32_13 = arith.constant 0 : i32
    %19 = arith.cmpi eq, %arg2, %c0_i32_13 : i32
    %20 = arith.extui %19 : i1 to i32
    %c0_i32_14 = arith.constant 0 : i32
    %21 = arith.cmpi ne, %20, %c0_i32_14 : i32
    scf.if %21 {
      %c0_15 = arith.constant 0 : index
      %c0_16 = arith.constant 0 : index
      %22 = vector.load %arg10[%c0_15, %c0_16] : memref<256x16xf32, #tpu.memory_space<vmem>>, vector<256x16xf32>
      %c0_17 = arith.constant 0 : index
      %c0_18 = arith.constant 0 : index
      %23 = vector.load %arg7[%c0_17, %c0_18] : memref<1x16xf32, #tpu.memory_space<vmem>>, vector<1x16xf32>
      %24 = vector.broadcast %23 : vector<1x16xf32> to vector<256x16xf32>
      %25 = arith.mulf %22, %24 : vector<256x16xf32>
      %c0_19 = arith.constant 0 : index
      %c0_20 = arith.constant 0 : index
      %26 = vector.load %arg8[%c0_19, %c0_20] : memref<1x16xf32, #tpu.memory_space<vmem>>, vector<1x16xf32>
      %27 = vector.broadcast %26 : vector<1x16xf32> to vector<256x16xf32>
      %28 = arith.addf %25, %27 : vector<256x16xf32>
      %cst_21 = arith.constant 0.000000e+00 : f32
      %29 = vector.broadcast %cst_21 : f32 to vector<256x16xf32>
      %30 = arith.maximumf %28, %29 : vector<256x16xf32>
      %31 = arith.truncf %30 : vector<256x16xf32> to vector<256x16xbf16>
      %c0_22 = arith.constant 0 : index
      %c0_23 = arith.constant 0 : index
      %32 = vector.load %arg9[%c0_22, %c0_23] : memref<256x16xbf16, #tpu.memory_space<vmem>>, vector<256x16xbf16>
      tpu.vector_store %arg9[%c0_22, %c0_23], %31 {strides = array<i32>} : memref<256x16xbf16, #tpu.memory_space<vmem>>, vector<256x16xbf16>,
    } else {
    }
    return
  }
  func.func @transform_0(%arg0: i32, %arg1: i32, %arg2: i32) -> (i32, i32) {
    %c0_i32 = arith.constant 0 : i32
    return %arg0, %arg2 : i32, i32
  }
  func.func @transform_1(%arg0: i32, %arg1: i32, %arg2: i32) -> (i32, i32) {
    %c0_i32 = arith.constant 0 : i32
    return %arg2, %arg1 : i32, i32
  }
  func.func @transform_2(%arg0: i32, %arg1: i32, %arg2: i32) -> (i32, i32) {
    %c0_i32 = arith.constant 0 : i32
    %c0_i32_0 = arith.constant 0 : i32
    return %c0_i32, %arg2 : i32, i32
  }
  func.func @transform_3(%arg0: i32, %arg1: i32, %arg2: i32) -> (i32, i32) {
    %c0_i32 = arith.constant 0 : i32
    %c0_i32_0 = arith.constant 0 : i32
    return %c0_i32, %arg2 : i32, i32
  }
  func.func @transform_4(%arg0: i32, %arg1: i32, %arg2: i32) -> (i32, i32) {
    %c0_i32 = arith.constant 0 : i32
    %c0_i32_0 = arith.constant 0 : i32
    return %c0_i32, %arg1 : i32, i32
  }
  func.func @transform_5(%arg0: i32, %arg1: i32, %arg2: i32) -> (i32, i32) {
    %c0_i32 = arith.constant 0 : i32
    %c0_i32_0 = arith.constant 0 : i32
    return %c0_i32, %arg1 : i32, i32
  }
  func.func @transform_6(%arg0: i32, %arg1: i32, %arg2: i32) -> (i32, i32) {
    %c0_i32 = arith.constant 0 : i32
    return %arg0, %arg1 : i32, i32
  }
}

module attributes {stable_mosaic.version = 11 : i64} {
  func.func @_mm_kernel(%arg0: i32, %arg1: i32, %arg2: i32, %arg3: memref<216x16xbf16, #tpu.memory_space<vmem>>, %arg4: memref<16x72xbf16, #tpu.memory_space<vmem>>, %arg5: memref<216x72xbf16, #tpu.memory_space<vmem>>, %arg6: memref<216x72xf32, #tpu.memory_space<vmem>>) attributes {dimension_semantics = [#tpu.dimension_semantics<parallel>, #tpu.dimension_semantics<parallel>, #tpu.dimension_semantics<arbitrary>], iteration_bounds = array<i64: 3, 1, 1>, scalar_prefetch = 0 : i64, scratch_operands = 1 : i64, tpu.core_type = #tpu.core_type<tc>, window_params = [{transform_indices = @transform_0, window_bounds = array<i64: 216, 16>}, {transform_indices = @transform_1, window_bounds = array<i64: 16, 72>}, {transform_indices = @transform_2, window_bounds = array<i64: 216, 72>}]} {
    %c0_i32 = arith.constant 0 : i32
    %0 = arith.cmpi eq, %arg2, %c0_i32 : i32
    %1 = arith.extui %0 : i1 to i32
    %c0_i32_0 = arith.constant 0 : i32
    %2 = arith.cmpi ne, %1, %c0_i32_0 : i32
    scf.if %2 {
      %cst_10 = arith.constant 0.000000e+00 : f32
      %12 = vector.broadcast %cst_10 : f32 to vector<216x72xf32>
      %c0_11 = arith.constant 0 : index
      %c0_12 = arith.constant 0 : index
      %13 = vector.load %arg6[%c0_11, %c0_12] : memref<216x72xf32, #tpu.memory_space<vmem>>, vector<216x72xf32>
      tpu.vector_store %arg6[%c0_11, %c0_12], %12 {strides = array<i32>} : memref<216x72xf32, #tpu.memory_space<vmem>>, vector<216x72xf32>,
    } else {
    }
    %c0 = arith.constant 0 : index
    %c0_1 = arith.constant 0 : index
    %3 = vector.load %arg3[%c0, %c0_1] : memref<216x16xbf16, #tpu.memory_space<vmem>>, vector<216x16xbf16>
    %c0_2 = arith.constant 0 : index
    %c0_3 = arith.constant 0 : index
    %4 = vector.load %arg6[%c0_2, %c0_3] : memref<216x72xf32, #tpu.memory_space<vmem>>, vector<216x72xf32>
    %c0_4 = arith.constant 0 : index
    %c0_5 = arith.constant 0 : index
    %5 = vector.load %arg4[%c0_4, %c0_5] : memref<16x72xbf16, #tpu.memory_space<vmem>>, vector<16x72xbf16>
    %cst = arith.constant dense<0.000000e+00> : vector<216x72xf32>
    %6 = tpu.matmul %3, %5, %cst {dimension_numbers = #tpu.dot_dimension_numbers<[1], [0], [0], [1], [0, 0, 1, 1], [], []>} : vector<216x16xbf16>, vector<16x72xbf16>, vector<216x72xf32> -> vector<216x72xf32>
    %7 = arith.addf %4, %6 : vector<216x72xf32>
    %c0_6 = arith.constant 0 : index
    %c0_7 = arith.constant 0 : index
    %8 = vector.load %arg6[%c0_6, %c0_7] : memref<216x72xf32, #tpu.memory_space<vmem>>, vector<216x72xf32>
    tpu.vector_store %arg6[%c0_6, %c0_7], %7 {strides = array<i32>} : memref<216x72xf32, #tpu.memory_space<vmem>>, vector<216x72xf32>,
    %c0_i32_8 = arith.constant 0 : i32
    %9 = arith.cmpi eq, %arg2, %c0_i32_8 : i32
    %10 = arith.extui %9 : i1 to i32
    %c0_i32_9 = arith.constant 0 : i32
    %11 = arith.cmpi ne, %10, %c0_i32_9 : i32
    scf.if %11 {
      %c0_10 = arith.constant 0 : index
      %c0_11 = arith.constant 0 : index
      %12 = vector.load %arg6[%c0_10, %c0_11] : memref<216x72xf32, #tpu.memory_space<vmem>>, vector<216x72xf32>
      %13 = arith.truncf %12 : vector<216x72xf32> to vector<216x72xbf16>
      %c0_12 = arith.constant 0 : index
      %c0_13 = arith.constant 0 : index
      %14 = vector.load %arg5[%c0_12, %c0_13] : memref<216x72xbf16, #tpu.memory_space<vmem>>, vector<216x72xbf16>
      tpu.vector_store %arg5[%c0_12, %c0_13], %13 {strides = array<i32>} : memref<216x72xbf16, #tpu.memory_space<vmem>>, vector<216x72xbf16>,
    } else {
    }
    return
  }
  func.func @transform_0(%arg0: i32, %arg1: i32, %arg2: i32) -> (i32, i32) {
    %c0_i32 = arith.constant 0 : i32
    return %arg0, %arg2 : i32, i32
  }
  func.func @transform_1(%arg0: i32, %arg1: i32, %arg2: i32) -> (i32, i32) {
    %c0_i32 = arith.constant 0 : i32
    return %arg2, %arg1 : i32, i32
  }
  func.func @transform_2(%arg0: i32, %arg1: i32, %arg2: i32) -> (i32, i32) {
    %c0_i32 = arith.constant 0 : i32
    return %arg0, %arg1 : i32, i32
  }
}

module attributes {stable_mosaic.version = 11 : i64} {
  func.func @_mm_kernel(%arg0: i32, %arg1: i32, %arg2: i32, %arg3: memref<256x128xbf16, #tpu.memory_space<vmem>>, %arg4: memref<128x16xbf16, #tpu.memory_space<vmem>>, %arg5: memref<1x128xf32, #tpu.memory_space<vmem>>, %arg6: memref<1x128xf32, #tpu.memory_space<vmem>>, %arg7: memref<256x16xbf16, #tpu.memory_space<vmem>>, %arg8: memref<256x16xf32, #tpu.memory_space<vmem>>) attributes {dimension_semantics = [#tpu.dimension_semantics<parallel>, #tpu.dimension_semantics<parallel>, #tpu.dimension_semantics<arbitrary>], iteration_bounds = array<i64: 2, 1, 1>, scalar_prefetch = 0 : i64, scratch_operands = 1 : i64, tpu.core_type = #tpu.core_type<tc>, window_params = [{transform_indices = @transform_0, window_bounds = array<i64: 256, 128>}, {transform_indices = @transform_1, window_bounds = array<i64: 128, 16>}, {transform_indices = @transform_2, window_bounds = array<i64: 1, 128>}, {transform_indices = @transform_3, window_bounds = array<i64: 1, 128>}, {transform_indices = @transform_4, window_bounds = array<i64: 256, 16>}]} {
    %c0_i32 = arith.constant 0 : i32
    %0 = arith.cmpi eq, %arg2, %c0_i32 : i32
    %1 = arith.extui %0 : i1 to i32
    %c0_i32_0 = arith.constant 0 : i32
    %2 = arith.cmpi ne, %1, %c0_i32_0 : i32
    scf.if %2 {
      %cst_15 = arith.constant 0.000000e+00 : f32
      %22 = vector.broadcast %cst_15 : f32 to vector<256x16xf32>
      %c0_16 = arith.constant 0 : index
      %c0_17 = arith.constant 0 : index
      %23 = vector.load %arg8[%c0_16, %c0_17] : memref<256x16xf32, #tpu.memory_space<vmem>>, vector<256x16xf32>
      tpu.vector_store %arg8[%c0_16, %c0_17], %22 {strides = array<i32>} : memref<256x16xf32, #tpu.memory_space<vmem>>, vector<256x16xf32>,
    } else {
    }
    %c0 = arith.constant 0 : index
    %c0_1 = arith.constant 0 : index
    %3 = vector.load %arg3[%c0, %c0_1] : memref<256x128xbf16, #tpu.memory_space<vmem>>, vector<256x128xbf16>
    %4 = arith.extf %3 : vector<256x128xbf16> to vector<256x128xf32>
    %c0_2 = arith.constant 0 : index
    %c0_3 = arith.constant 0 : index
    %5 = vector.load %arg5[%c0_2, %c0_3] : memref<1x128xf32, #tpu.memory_space<vmem>>, vector<1x128xf32>
    %6 = vector.broadcast %5 : vector<1x128xf32> to vector<256x128xf32>
    %7 = arith.mulf %4, %6 : vector<256x128xf32>
    %c0_4 = arith.constant 0 : index
    %c0_5 = arith.constant 0 : index
    %8 = vector.load %arg6[%c0_4, %c0_5] : memref<1x128xf32, #tpu.memory_space<vmem>>, vector<1x128xf32>
    %9 = vector.broadcast %8 : vector<1x128xf32> to vector<256x128xf32>
    %10 = arith.addf %7, %9 : vector<256x128xf32>
    %cst = arith.constant 0.000000e+00 : f32
    %11 = vector.broadcast %cst : f32 to vector<256x128xf32>
    %12 = arith.maximumf %10, %11 : vector<256x128xf32>
    %13 = arith.truncf %12 : vector<256x128xf32> to vector<256x128xbf16>
    %c0_6 = arith.constant 0 : index
    %c0_7 = arith.constant 0 : index
    %14 = vector.load %arg8[%c0_6, %c0_7] : memref<256x16xf32, #tpu.memory_space<vmem>>, vector<256x16xf32>
    %c0_8 = arith.constant 0 : index
    %c0_9 = arith.constant 0 : index
    %15 = vector.load %arg4[%c0_8, %c0_9] : memref<128x16xbf16, #tpu.memory_space<vmem>>, vector<128x16xbf16>
    %cst_10 = arith.constant dense<0.000000e+00> : vector<256x16xf32>
    %16 = tpu.matmul %13, %15, %cst_10 {dimension_numbers = #tpu.dot_dimension_numbers<[1], [0], [0], [1], [0, 0, 1, 1], [], []>} : vector<256x128xbf16>, vector<128x16xbf16>, vector<256x16xf32> -> vector<256x16xf32>
    %17 = arith.addf %14, %16 : vector<256x16xf32>
    %c0_11 = arith.constant 0 : index
    %c0_12 = arith.constant 0 : index
    %18 = vector.load %arg8[%c0_11, %c0_12] : memref<256x16xf32, #tpu.memory_space<vmem>>, vector<256x16xf32>
    tpu.vector_store %arg8[%c0_11, %c0_12], %17 {strides = array<i32>} : memref<256x16xf32, #tpu.memory_space<vmem>>, vector<256x16xf32>,
    %c0_i32_13 = arith.constant 0 : i32
    %19 = arith.cmpi eq, %arg2, %c0_i32_13 : i32
    %20 = arith.extui %19 : i1 to i32
    %c0_i32_14 = arith.constant 0 : i32
    %21 = arith.cmpi ne, %20, %c0_i32_14 : i32
    scf.if %21 {
      %c0_15 = arith.constant 0 : index
      %c0_16 = arith.constant 0 : index
      %22 = vector.load %arg8[%c0_15, %c0_16] : memref<256x16xf32, #tpu.memory_space<vmem>>, vector<256x16xf32>
      %23 = arith.truncf %22 : vector<256x16xf32> to vector<256x16xbf16>
      %c0_17 = arith.constant 0 : index
      %c0_18 = arith.constant 0 : index
      %24 = vector.load %arg7[%c0_17, %c0_18] : memref<256x16xbf16, #tpu.memory_space<vmem>>, vector<256x16xbf16>
      tpu.vector_store %arg7[%c0_17, %c0_18], %23 {strides = array<i32>} : memref<256x16xbf16, #tpu.memory_space<vmem>>, vector<256x16xbf16>,
    } else {
    }
    return
  }
  func.func @transform_0(%arg0: i32, %arg1: i32, %arg2: i32) -> (i32, i32) {
    %c0_i32 = arith.constant 0 : i32
    return %arg0, %arg2 : i32, i32
  }
  func.func @transform_1(%arg0: i32, %arg1: i32, %arg2: i32) -> (i32, i32) {
    %c0_i32 = arith.constant 0 : i32
    return %arg2, %arg1 : i32, i32
  }
  func.func @transform_2(%arg0: i32, %arg1: i32, %arg2: i32) -> (i32, i32) {
    %c0_i32 = arith.constant 0 : i32
    %c0_i32_0 = arith.constant 0 : i32
    return %c0_i32, %arg2 : i32, i32
  }
  func.func @transform_3(%arg0: i32, %arg1: i32, %arg2: i32) -> (i32, i32) {
    %c0_i32 = arith.constant 0 : i32
    %c0_i32_0 = arith.constant 0 : i32
    return %c0_i32, %arg2 : i32, i32
  }
  func.func @transform_4(%arg0: i32, %arg1: i32, %arg2: i32) -> (i32, i32) {
    %c0_i32 = arith.constant 0 : i32
    return %arg0, %arg1 : i32, i32
  }
}

module attributes {stable_mosaic.version = 11 : i64} {
  func.func @_mm_kernel(%arg0: i32, %arg1: i32, %arg2: i32, %arg3: memref<128x128xbf16, #tpu.memory_space<vmem>>, %arg4: memref<128x16xbf16, #tpu.memory_space<vmem>>, %arg5: memref<1x128xf32, #tpu.memory_space<vmem>>, %arg6: memref<1x128xf32, #tpu.memory_space<vmem>>, %arg7: memref<1x16xf32, #tpu.memory_space<vmem>>, %arg8: memref<1x16xf32, #tpu.memory_space<vmem>>, %arg9: memref<128x16xbf16, #tpu.memory_space<vmem>>, %arg10: memref<128x16xf32, #tpu.memory_space<vmem>>) attributes {dimension_semantics = [#tpu.dimension_semantics<parallel>, #tpu.dimension_semantics<parallel>, #tpu.dimension_semantics<arbitrary>], iteration_bounds = array<i64: 1, 1, 1>, scalar_prefetch = 0 : i64, scratch_operands = 1 : i64, tpu.core_type = #tpu.core_type<tc>, window_params = [{transform_indices = @transform_0, window_bounds = array<i64: 128, 128>}, {transform_indices = @transform_1, window_bounds = array<i64: 128, 16>}, {transform_indices = @transform_2, window_bounds = array<i64: 1, 128>}, {transform_indices = @transform_3, window_bounds = array<i64: 1, 128>}, {transform_indices = @transform_4, window_bounds = array<i64: 1, 16>}, {transform_indices = @transform_5, window_bounds = array<i64: 1, 16>}, {transform_indices = @transform_6, window_bounds = array<i64: 128, 16>}]} {
    %c0_i32 = arith.constant 0 : i32
    %0 = arith.cmpi eq, %arg2, %c0_i32 : i32
    %1 = arith.extui %0 : i1 to i32
    %c0_i32_0 = arith.constant 0 : i32
    %2 = arith.cmpi ne, %1, %c0_i32_0 : i32
    scf.if %2 {
      %cst_15 = arith.constant 0.000000e+00 : f32
      %22 = vector.broadcast %cst_15 : f32 to vector<128x16xf32>
      %c0_16 = arith.constant 0 : index
      %c0_17 = arith.constant 0 : index
      %23 = vector.load %arg10[%c0_16, %c0_17] : memref<128x16xf32, #tpu.memory_space<vmem>>, vector<128x16xf32>
      tpu.vector_store %arg10[%c0_16, %c0_17], %22 {strides = array<i32>} : memref<128x16xf32, #tpu.memory_space<vmem>>, vector<128x16xf32>,
    } else {
    }
    %c0 = arith.constant 0 : index
    %c0_1 = arith.constant 0 : index
    %3 = vector.load %arg3[%c0, %c0_1] : memref<128x128xbf16, #tpu.memory_space<vmem>>, vector<128x128xbf16>
    %4 = arith.extf %3 : vector<128x128xbf16> to vector<128x128xf32>
    %c0_2 = arith.constant 0 : index
    %c0_3 = arith.constant 0 : index
    %5 = vector.load %arg5[%c0_2, %c0_3] : memref<1x128xf32, #tpu.memory_space<vmem>>, vector<1x128xf32>
    %6 = vector.broadcast %5 : vector<1x128xf32> to vector<128x128xf32>
    %7 = arith.mulf %4, %6 : vector<128x128xf32>
    %c0_4 = arith.constant 0 : index
    %c0_5 = arith.constant 0 : index
    %8 = vector.load %arg6[%c0_4, %c0_5] : memref<1x128xf32, #tpu.memory_space<vmem>>, vector<1x128xf32>
    %9 = vector.broadcast %8 : vector<1x128xf32> to vector<128x128xf32>
    %10 = arith.addf %7, %9 : vector<128x128xf32>
    %cst = arith.constant 0.000000e+00 : f32
    %11 = vector.broadcast %cst : f32 to vector<128x128xf32>
    %12 = arith.maximumf %10, %11 : vector<128x128xf32>
    %13 = arith.truncf %12 : vector<128x128xf32> to vector<128x128xbf16>
    %c0_6 = arith.constant 0 : index
    %c0_7 = arith.constant 0 : index
    %14 = vector.load %arg10[%c0_6, %c0_7] : memref<128x16xf32, #tpu.memory_space<vmem>>, vector<128x16xf32>
    %c0_8 = arith.constant 0 : index
    %c0_9 = arith.constant 0 : index
    %15 = vector.load %arg4[%c0_8, %c0_9] : memref<128x16xbf16, #tpu.memory_space<vmem>>, vector<128x16xbf16>
    %cst_10 = arith.constant dense<0.000000e+00> : vector<128x16xf32>
    %16 = tpu.matmul %13, %15, %cst_10 {dimension_numbers = #tpu.dot_dimension_numbers<[1], [0], [0], [1], [0, 0, 1, 1], [], []>} : vector<128x128xbf16>, vector<128x16xbf16>, vector<128x16xf32> -> vector<128x16xf32>
    %17 = arith.addf %14, %16 : vector<128x16xf32>
    %c0_11 = arith.constant 0 : index
    %c0_12 = arith.constant 0 : index
    %18 = vector.load %arg10[%c0_11, %c0_12] : memref<128x16xf32, #tpu.memory_space<vmem>>, vector<128x16xf32>
    tpu.vector_store %arg10[%c0_11, %c0_12], %17 {strides = array<i32>} : memref<128x16xf32, #tpu.memory_space<vmem>>, vector<128x16xf32>,
    %c0_i32_13 = arith.constant 0 : i32
    %19 = arith.cmpi eq, %arg2, %c0_i32_13 : i32
    %20 = arith.extui %19 : i1 to i32
    %c0_i32_14 = arith.constant 0 : i32
    %21 = arith.cmpi ne, %20, %c0_i32_14 : i32
    scf.if %21 {
      %c0_15 = arith.constant 0 : index
      %c0_16 = arith.constant 0 : index
      %22 = vector.load %arg10[%c0_15, %c0_16] : memref<128x16xf32, #tpu.memory_space<vmem>>, vector<128x16xf32>
      %c0_17 = arith.constant 0 : index
      %c0_18 = arith.constant 0 : index
      %23 = vector.load %arg7[%c0_17, %c0_18] : memref<1x16xf32, #tpu.memory_space<vmem>>, vector<1x16xf32>
      %24 = vector.broadcast %23 : vector<1x16xf32> to vector<128x16xf32>
      %25 = arith.mulf %22, %24 : vector<128x16xf32>
      %c0_19 = arith.constant 0 : index
      %c0_20 = arith.constant 0 : index
      %26 = vector.load %arg8[%c0_19, %c0_20] : memref<1x16xf32, #tpu.memory_space<vmem>>, vector<1x16xf32>
      %27 = vector.broadcast %26 : vector<1x16xf32> to vector<128x16xf32>
      %28 = arith.addf %25, %27 : vector<128x16xf32>
      %cst_21 = arith.constant 0.000000e+00 : f32
      %29 = vector.broadcast %cst_21 : f32 to vector<128x16xf32>
      %30 = arith.maximumf %28, %29 : vector<128x16xf32>
      %31 = arith.truncf %30 : vector<128x16xf32> to vector<128x16xbf16>
      %c0_22 = arith.constant 0 : index
      %c0_23 = arith.constant 0 : index
      %32 = vector.load %arg9[%c0_22, %c0_23] : memref<128x16xbf16, #tpu.memory_space<vmem>>, vector<128x16xbf16>
      tpu.vector_store %arg9[%c0_22, %c0_23], %31 {strides = array<i32>} : memref<128x16xbf16, #tpu.memory_space<vmem>>, vector<128x16xbf16>,
    } else {
    }
    return
  }
  func.func @transform_0(%arg0: i32, %arg1: i32, %arg2: i32) -> (i32, i32) {
    %c0_i32 = arith.constant 0 : i32
    return %arg0, %arg2 : i32, i32
  }
  func.func @transform_1(%arg0: i32, %arg1: i32, %arg2: i32) -> (i32, i32) {
    %c0_i32 = arith.constant 0 : i32
    return %arg2, %arg1 : i32, i32
  }
  func.func @transform_2(%arg0: i32, %arg1: i32, %arg2: i32) -> (i32, i32) {
    %c0_i32 = arith.constant 0 : i32
    %c0_i32_0 = arith.constant 0 : i32
    return %c0_i32, %arg2 : i32, i32
  }
  func.func @transform_3(%arg0: i32, %arg1: i32, %arg2: i32) -> (i32, i32) {
    %c0_i32 = arith.constant 0 : i32
    %c0_i32_0 = arith.constant 0 : i32
    return %c0_i32, %arg2 : i32, i32
  }
  func.func @transform_4(%arg0: i32, %arg1: i32, %arg2: i32) -> (i32, i32) {
    %c0_i32 = arith.constant 0 : i32
    %c0_i32_0 = arith.constant 0 : i32
    return %c0_i32, %arg1 : i32, i32
  }
  func.func @transform_5(%arg0: i32, %arg1: i32, %arg2: i32) -> (i32, i32) {
    %c0_i32 = arith.constant 0 : i32
    %c0_i32_0 = arith.constant 0 : i32
    return %c0_i32, %arg1 : i32, i32
  }
  func.func @transform_6(%arg0: i32, %arg1: i32, %arg2: i32) -> (i32, i32) {
    %c0_i32 = arith.constant 0 : i32
    return %arg0, %arg1 : i32, i32
  }
}

module attributes {stable_mosaic.version = 11 : i64} {
  func.func @_mm_kernel(%arg0: i32, %arg1: i32, %arg2: i32, %arg3: memref<200x16xbf16, #tpu.memory_space<vmem>>, %arg4: memref<16x72xbf16, #tpu.memory_space<vmem>>, %arg5: memref<200x72xbf16, #tpu.memory_space<vmem>>, %arg6: memref<200x72xf32, #tpu.memory_space<vmem>>) attributes {dimension_semantics = [#tpu.dimension_semantics<parallel>, #tpu.dimension_semantics<parallel>, #tpu.dimension_semantics<arbitrary>], iteration_bounds = array<i64: 1, 1, 1>, scalar_prefetch = 0 : i64, scratch_operands = 1 : i64, tpu.core_type = #tpu.core_type<tc>, window_params = [{transform_indices = @transform_0, window_bounds = array<i64: 200, 16>}, {transform_indices = @transform_1, window_bounds = array<i64: 16, 72>}, {transform_indices = @transform_2, window_bounds = array<i64: 200, 72>}]} {
    %c0_i32 = arith.constant 0 : i32
    %0 = arith.cmpi eq, %arg2, %c0_i32 : i32
    %1 = arith.extui %0 : i1 to i32
    %c0_i32_0 = arith.constant 0 : i32
    %2 = arith.cmpi ne, %1, %c0_i32_0 : i32
    scf.if %2 {
      %cst_10 = arith.constant 0.000000e+00 : f32
      %12 = vector.broadcast %cst_10 : f32 to vector<200x72xf32>
      %c0_11 = arith.constant 0 : index
      %c0_12 = arith.constant 0 : index
      %13 = vector.load %arg6[%c0_11, %c0_12] : memref<200x72xf32, #tpu.memory_space<vmem>>, vector<200x72xf32>
      tpu.vector_store %arg6[%c0_11, %c0_12], %12 {strides = array<i32>} : memref<200x72xf32, #tpu.memory_space<vmem>>, vector<200x72xf32>,
    } else {
    }
    %c0 = arith.constant 0 : index
    %c0_1 = arith.constant 0 : index
    %3 = vector.load %arg3[%c0, %c0_1] : memref<200x16xbf16, #tpu.memory_space<vmem>>, vector<200x16xbf16>
    %c0_2 = arith.constant 0 : index
    %c0_3 = arith.constant 0 : index
    %4 = vector.load %arg6[%c0_2, %c0_3] : memref<200x72xf32, #tpu.memory_space<vmem>>, vector<200x72xf32>
    %c0_4 = arith.constant 0 : index
    %c0_5 = arith.constant 0 : index
    %5 = vector.load %arg4[%c0_4, %c0_5] : memref<16x72xbf16, #tpu.memory_space<vmem>>, vector<16x72xbf16>
    %cst = arith.constant dense<0.000000e+00> : vector<200x72xf32>
    %6 = tpu.matmul %3, %5, %cst {dimension_numbers = #tpu.dot_dimension_numbers<[1], [0], [0], [1], [0, 0, 1, 1], [], []>} : vector<200x16xbf16>, vector<16x72xbf16>, vector<200x72xf32> -> vector<200x72xf32>
    %7 = arith.addf %4, %6 : vector<200x72xf32>
    %c0_6 = arith.constant 0 : index
    %c0_7 = arith.constant 0 : index
    %8 = vector.load %arg6[%c0_6, %c0_7] : memref<200x72xf32, #tpu.memory_space<vmem>>, vector<200x72xf32>
    tpu.vector_store %arg6[%c0_6, %c0_7], %7 {strides = array<i32>} : memref<200x72xf32, #tpu.memory_space<vmem>>, vector<200x72xf32>,
    %c0_i32_8 = arith.constant 0 : i32
    %9 = arith.cmpi eq, %arg2, %c0_i32_8 : i32
    %10 = arith.extui %9 : i1 to i32
    %c0_i32_9 = arith.constant 0 : i32
    %11 = arith.cmpi ne, %10, %c0_i32_9 : i32
    scf.if %11 {
      %c0_10 = arith.constant 0 : index
      %c0_11 = arith.constant 0 : index
      %12 = vector.load %arg6[%c0_10, %c0_11] : memref<200x72xf32, #tpu.memory_space<vmem>>, vector<200x72xf32>
      %13 = arith.truncf %12 : vector<200x72xf32> to vector<200x72xbf16>
      %c0_12 = arith.constant 0 : index
      %c0_13 = arith.constant 0 : index
      %14 = vector.load %arg5[%c0_12, %c0_13] : memref<200x72xbf16, #tpu.memory_space<vmem>>, vector<200x72xbf16>
      tpu.vector_store %arg5[%c0_12, %c0_13], %13 {strides = array<i32>} : memref<200x72xbf16, #tpu.memory_space<vmem>>, vector<200x72xbf16>,
    } else {
    }
    return
  }
  func.func @transform_0(%arg0: i32, %arg1: i32, %arg2: i32) -> (i32, i32) {
    %c0_i32 = arith.constant 0 : i32
    return %arg0, %arg2 : i32, i32
  }
  func.func @transform_1(%arg0: i32, %arg1: i32, %arg2: i32) -> (i32, i32) {
    %c0_i32 = arith.constant 0 : i32
    return %arg2, %arg1 : i32, i32
  }
  func.func @transform_2(%arg0: i32, %arg1: i32, %arg2: i32) -> (i32, i32) {
    %c0_i32 = arith.constant 0 : i32
    return %arg0, %arg1 : i32, i32
  }
}

module attributes {stable_mosaic.version = 11 : i64} {
  func.func @_mm_kernel(%arg0: i32, %arg1: i32, %arg2: i32, %arg3: memref<128x128xbf16, #tpu.memory_space<vmem>>, %arg4: memref<128x16xbf16, #tpu.memory_space<vmem>>, %arg5: memref<1x128xf32, #tpu.memory_space<vmem>>, %arg6: memref<1x128xf32, #tpu.memory_space<vmem>>, %arg7: memref<128x16xbf16, #tpu.memory_space<vmem>>, %arg8: memref<128x16xf32, #tpu.memory_space<vmem>>) attributes {dimension_semantics = [#tpu.dimension_semantics<parallel>, #tpu.dimension_semantics<parallel>, #tpu.dimension_semantics<arbitrary>], iteration_bounds = array<i64: 1, 1, 1>, scalar_prefetch = 0 : i64, scratch_operands = 1 : i64, tpu.core_type = #tpu.core_type<tc>, window_params = [{transform_indices = @transform_0, window_bounds = array<i64: 128, 128>}, {transform_indices = @transform_1, window_bounds = array<i64: 128, 16>}, {transform_indices = @transform_2, window_bounds = array<i64: 1, 128>}, {transform_indices = @transform_3, window_bounds = array<i64: 1, 128>}, {transform_indices = @transform_4, window_bounds = array<i64: 128, 16>}]} {
    %c0_i32 = arith.constant 0 : i32
    %0 = arith.cmpi eq, %arg2, %c0_i32 : i32
    %1 = arith.extui %0 : i1 to i32
    %c0_i32_0 = arith.constant 0 : i32
    %2 = arith.cmpi ne, %1, %c0_i32_0 : i32
    scf.if %2 {
      %cst_15 = arith.constant 0.000000e+00 : f32
      %22 = vector.broadcast %cst_15 : f32 to vector<128x16xf32>
      %c0_16 = arith.constant 0 : index
      %c0_17 = arith.constant 0 : index
      %23 = vector.load %arg8[%c0_16, %c0_17] : memref<128x16xf32, #tpu.memory_space<vmem>>, vector<128x16xf32>
      tpu.vector_store %arg8[%c0_16, %c0_17], %22 {strides = array<i32>} : memref<128x16xf32, #tpu.memory_space<vmem>>, vector<128x16xf32>,
    } else {
    }
    %c0 = arith.constant 0 : index
    %c0_1 = arith.constant 0 : index
    %3 = vector.load %arg3[%c0, %c0_1] : memref<128x128xbf16, #tpu.memory_space<vmem>>, vector<128x128xbf16>
    %4 = arith.extf %3 : vector<128x128xbf16> to vector<128x128xf32>
    %c0_2 = arith.constant 0 : index
    %c0_3 = arith.constant 0 : index
    %5 = vector.load %arg5[%c0_2, %c0_3] : memref<1x128xf32, #tpu.memory_space<vmem>>, vector<1x128xf32>
    %6 = vector.broadcast %5 : vector<1x128xf32> to vector<128x128xf32>
    %7 = arith.mulf %4, %6 : vector<128x128xf32>
    %c0_4 = arith.constant 0 : index
    %c0_5 = arith.constant 0 : index
    %8 = vector.load %arg6[%c0_4, %c0_5] : memref<1x128xf32, #tpu.memory_space<vmem>>, vector<1x128xf32>
    %9 = vector.broadcast %8 : vector<1x128xf32> to vector<128x128xf32>
    %10 = arith.addf %7, %9 : vector<128x128xf32>
    %cst = arith.constant 0.000000e+00 : f32
    %11 = vector.broadcast %cst : f32 to vector<128x128xf32>
    %12 = arith.maximumf %10, %11 : vector<128x128xf32>
    %13 = arith.truncf %12 : vector<128x128xf32> to vector<128x128xbf16>
    %c0_6 = arith.constant 0 : index
    %c0_7 = arith.constant 0 : index
    %14 = vector.load %arg8[%c0_6, %c0_7] : memref<128x16xf32, #tpu.memory_space<vmem>>, vector<128x16xf32>
    %c0_8 = arith.constant 0 : index
    %c0_9 = arith.constant 0 : index
    %15 = vector.load %arg4[%c0_8, %c0_9] : memref<128x16xbf16, #tpu.memory_space<vmem>>, vector<128x16xbf16>
    %cst_10 = arith.constant dense<0.000000e+00> : vector<128x16xf32>
    %16 = tpu.matmul %13, %15, %cst_10 {dimension_numbers = #tpu.dot_dimension_numbers<[1], [0], [0], [1], [0, 0, 1, 1], [], []>} : vector<128x128xbf16>, vector<128x16xbf16>, vector<128x16xf32> -> vector<128x16xf32>
    %17 = arith.addf %14, %16 : vector<128x16xf32>
    %c0_11 = arith.constant 0 : index
    %c0_12 = arith.constant 0 : index
    %18 = vector.load %arg8[%c0_11, %c0_12] : memref<128x16xf32, #tpu.memory_space<vmem>>, vector<128x16xf32>
    tpu.vector_store %arg8[%c0_11, %c0_12], %17 {strides = array<i32>} : memref<128x16xf32, #tpu.memory_space<vmem>>, vector<128x16xf32>,
    %c0_i32_13 = arith.constant 0 : i32
    %19 = arith.cmpi eq, %arg2, %c0_i32_13 : i32
    %20 = arith.extui %19 : i1 to i32
    %c0_i32_14 = arith.constant 0 : i32
    %21 = arith.cmpi ne, %20, %c0_i32_14 : i32
    scf.if %21 {
      %c0_15 = arith.constant 0 : index
      %c0_16 = arith.constant 0 : index
      %22 = vector.load %arg8[%c0_15, %c0_16] : memref<128x16xf32, #tpu.memory_space<vmem>>, vector<128x16xf32>
      %23 = arith.truncf %22 : vector<128x16xf32> to vector<128x16xbf16>
      %c0_17 = arith.constant 0 : index
      %c0_18 = arith.constant 0 : index
      %24 = vector.load %arg7[%c0_17, %c0_18] : memref<128x16xbf16, #tpu.memory_space<vmem>>, vector<128x16xbf16>
      tpu.vector_store %arg7[%c0_17, %c0_18], %23 {strides = array<i32>} : memref<128x16xbf16, #tpu.memory_space<vmem>>, vector<128x16xbf16>,
    } else {
    }
    return
  }
  func.func @transform_0(%arg0: i32, %arg1: i32, %arg2: i32) -> (i32, i32) {
    %c0_i32 = arith.constant 0 : i32
    return %arg0, %arg2 : i32, i32
  }
  func.func @transform_1(%arg0: i32, %arg1: i32, %arg2: i32) -> (i32, i32) {
    %c0_i32 = arith.constant 0 : i32
    return %arg2, %arg1 : i32, i32
  }
  func.func @transform_2(%arg0: i32, %arg1: i32, %arg2: i32) -> (i32, i32) {
    %c0_i32 = arith.constant 0 : i32
    %c0_i32_0 = arith.constant 0 : i32
    return %c0_i32, %arg2 : i32, i32
  }
  func.func @transform_3(%arg0: i32, %arg1: i32, %arg2: i32) -> (i32, i32) {
    %c0_i32 = arith.constant 0 : i32
    %c0_i32_0 = arith.constant 0 : i32
    return %c0_i32, %arg2 : i32, i32
  }
  func.func @transform_4(%arg0: i32, %arg1: i32, %arg2: i32) -> (i32, i32) {
    %c0_i32 = arith.constant 0 : i32
    return %arg0, %arg1 : i32, i32
  }
}

module attributes {stable_mosaic.version = 11 : i64} {
  func.func @_mm_kernel(%arg0: i32, %arg1: i32, %arg2: i32, %arg3: memref<32x128xbf16, #tpu.memory_space<vmem>>, %arg4: memref<128x16xbf16, #tpu.memory_space<vmem>>, %arg5: memref<1x128xf32, #tpu.memory_space<vmem>>, %arg6: memref<1x128xf32, #tpu.memory_space<vmem>>, %arg7: memref<1x16xf32, #tpu.memory_space<vmem>>, %arg8: memref<1x16xf32, #tpu.memory_space<vmem>>, %arg9: memref<32x16xbf16, #tpu.memory_space<vmem>>, %arg10: memref<32x16xf32, #tpu.memory_space<vmem>>) attributes {dimension_semantics = [#tpu.dimension_semantics<parallel>, #tpu.dimension_semantics<parallel>, #tpu.dimension_semantics<arbitrary>], iteration_bounds = array<i64: 1, 1, 1>, scalar_prefetch = 0 : i64, scratch_operands = 1 : i64, tpu.core_type = #tpu.core_type<tc>, window_params = [{transform_indices = @transform_0, window_bounds = array<i64: 32, 128>}, {transform_indices = @transform_1, window_bounds = array<i64: 128, 16>}, {transform_indices = @transform_2, window_bounds = array<i64: 1, 128>}, {transform_indices = @transform_3, window_bounds = array<i64: 1, 128>}, {transform_indices = @transform_4, window_bounds = array<i64: 1, 16>}, {transform_indices = @transform_5, window_bounds = array<i64: 1, 16>}, {transform_indices = @transform_6, window_bounds = array<i64: 32, 16>}]} {
    %c0_i32 = arith.constant 0 : i32
    %0 = arith.cmpi eq, %arg2, %c0_i32 : i32
    %1 = arith.extui %0 : i1 to i32
    %c0_i32_0 = arith.constant 0 : i32
    %2 = arith.cmpi ne, %1, %c0_i32_0 : i32
    scf.if %2 {
      %cst_15 = arith.constant 0.000000e+00 : f32
      %22 = vector.broadcast %cst_15 : f32 to vector<32x16xf32>
      %c0_16 = arith.constant 0 : index
      %c0_17 = arith.constant 0 : index
      %23 = vector.load %arg10[%c0_16, %c0_17] : memref<32x16xf32, #tpu.memory_space<vmem>>, vector<32x16xf32>
      tpu.vector_store %arg10[%c0_16, %c0_17], %22 {strides = array<i32>} : memref<32x16xf32, #tpu.memory_space<vmem>>, vector<32x16xf32>,
    } else {
    }
    %c0 = arith.constant 0 : index
    %c0_1 = arith.constant 0 : index
    %3 = vector.load %arg3[%c0, %c0_1] : memref<32x128xbf16, #tpu.memory_space<vmem>>, vector<32x128xbf16>
    %4 = arith.extf %3 : vector<32x128xbf16> to vector<32x128xf32>
    %c0_2 = arith.constant 0 : index
    %c0_3 = arith.constant 0 : index
    %5 = vector.load %arg5[%c0_2, %c0_3] : memref<1x128xf32, #tpu.memory_space<vmem>>, vector<1x128xf32>
    %6 = vector.broadcast %5 : vector<1x128xf32> to vector<32x128xf32>
    %7 = arith.mulf %4, %6 : vector<32x128xf32>
    %c0_4 = arith.constant 0 : index
    %c0_5 = arith.constant 0 : index
    %8 = vector.load %arg6[%c0_4, %c0_5] : memref<1x128xf32, #tpu.memory_space<vmem>>, vector<1x128xf32>
    %9 = vector.broadcast %8 : vector<1x128xf32> to vector<32x128xf32>
    %10 = arith.addf %7, %9 : vector<32x128xf32>
    %cst = arith.constant 0.000000e+00 : f32
    %11 = vector.broadcast %cst : f32 to vector<32x128xf32>
    %12 = arith.maximumf %10, %11 : vector<32x128xf32>
    %13 = arith.truncf %12 : vector<32x128xf32> to vector<32x128xbf16>
    %c0_6 = arith.constant 0 : index
    %c0_7 = arith.constant 0 : index
    %14 = vector.load %arg10[%c0_6, %c0_7] : memref<32x16xf32, #tpu.memory_space<vmem>>, vector<32x16xf32>
    %c0_8 = arith.constant 0 : index
    %c0_9 = arith.constant 0 : index
    %15 = vector.load %arg4[%c0_8, %c0_9] : memref<128x16xbf16, #tpu.memory_space<vmem>>, vector<128x16xbf16>
    %cst_10 = arith.constant dense<0.000000e+00> : vector<32x16xf32>
    %16 = tpu.matmul %13, %15, %cst_10 {dimension_numbers = #tpu.dot_dimension_numbers<[1], [0], [0], [1], [0, 0, 1, 1], [], []>} : vector<32x128xbf16>, vector<128x16xbf16>, vector<32x16xf32> -> vector<32x16xf32>
    %17 = arith.addf %14, %16 : vector<32x16xf32>
    %c0_11 = arith.constant 0 : index
    %c0_12 = arith.constant 0 : index
    %18 = vector.load %arg10[%c0_11, %c0_12] : memref<32x16xf32, #tpu.memory_space<vmem>>, vector<32x16xf32>
    tpu.vector_store %arg10[%c0_11, %c0_12], %17 {strides = array<i32>} : memref<32x16xf32, #tpu.memory_space<vmem>>, vector<32x16xf32>,
    %c0_i32_13 = arith.constant 0 : i32
    %19 = arith.cmpi eq, %arg2, %c0_i32_13 : i32
    %20 = arith.extui %19 : i1 to i32
    %c0_i32_14 = arith.constant 0 : i32
    %21 = arith.cmpi ne, %20, %c0_i32_14 : i32
    scf.if %21 {
      %c0_15 = arith.constant 0 : index
      %c0_16 = arith.constant 0 : index
      %22 = vector.load %arg10[%c0_15, %c0_16] : memref<32x16xf32, #tpu.memory_space<vmem>>, vector<32x16xf32>
      %c0_17 = arith.constant 0 : index
      %c0_18 = arith.constant 0 : index
      %23 = vector.load %arg7[%c0_17, %c0_18] : memref<1x16xf32, #tpu.memory_space<vmem>>, vector<1x16xf32>
      %24 = vector.broadcast %23 : vector<1x16xf32> to vector<32x16xf32>
      %25 = arith.mulf %22, %24 : vector<32x16xf32>
      %c0_19 = arith.constant 0 : index
      %c0_20 = arith.constant 0 : index
      %26 = vector.load %arg8[%c0_19, %c0_20] : memref<1x16xf32, #tpu.memory_space<vmem>>, vector<1x16xf32>
      %27 = vector.broadcast %26 : vector<1x16xf32> to vector<32x16xf32>
      %28 = arith.addf %25, %27 : vector<32x16xf32>
      %cst_21 = arith.constant 0.000000e+00 : f32
      %29 = vector.broadcast %cst_21 : f32 to vector<32x16xf32>
      %30 = arith.maximumf %28, %29 : vector<32x16xf32>
      %31 = arith.truncf %30 : vector<32x16xf32> to vector<32x16xbf16>
      %c0_22 = arith.constant 0 : index
      %c0_23 = arith.constant 0 : index
      %32 = vector.load %arg9[%c0_22, %c0_23] : memref<32x16xbf16, #tpu.memory_space<vmem>>, vector<32x16xbf16>
      tpu.vector_store %arg9[%c0_22, %c0_23], %31 {strides = array<i32>} : memref<32x16xbf16, #tpu.memory_space<vmem>>, vector<32x16xbf16>,
    } else {
    }
    return
  }
  func.func @transform_0(%arg0: i32, %arg1: i32, %arg2: i32) -> (i32, i32) {
    %c0_i32 = arith.constant 0 : i32
    return %arg0, %arg2 : i32, i32
  }
  func.func @transform_1(%arg0: i32, %arg1: i32, %arg2: i32) -> (i32, i32) {
    %c0_i32 = arith.constant 0 : i32
    return %arg2, %arg1 : i32, i32
  }
  func.func @transform_2(%arg0: i32, %arg1: i32, %arg2: i32) -> (i32, i32) {
    %c0_i32 = arith.constant 0 : i32
    %c0_i32_0 = arith.constant 0 : i32
    return %c0_i32, %arg2 : i32, i32
  }
  func.func @transform_3(%arg0: i32, %arg1: i32, %arg2: i32) -> (i32, i32) {
    %c0_i32 = arith.constant 0 : i32
    %c0_i32_0 = arith.constant 0 : i32
    return %c0_i32, %arg2 : i32, i32
  }
  func.func @transform_4(%arg0: i32, %arg1: i32, %arg2: i32) -> (i32, i32) {
    %c0_i32 = arith.constant 0 : i32
    %c0_i32_0 = arith.constant 0 : i32
    return %c0_i32, %arg1 : i32, i32
  }
  func.func @transform_5(%arg0: i32, %arg1: i32, %arg2: i32) -> (i32, i32) {
    %c0_i32 = arith.constant 0 : i32
    %c0_i32_0 = arith.constant 0 : i32
    return %c0_i32, %arg1 : i32, i32
  }
  func.func @transform_6(%arg0: i32, %arg1: i32, %arg2: i32) -> (i32, i32) {
    %c0_i32 = arith.constant 0 : i32
    return %arg0, %arg1 : i32, i32
  }
}

module attributes {stable_mosaic.version = 11 : i64} {
  func.func @_mm_kernel(%arg0: i32, %arg1: i32, %arg2: i32, %arg3: memref<72x16xbf16, #tpu.memory_space<vmem>>, %arg4: memref<16x72xbf16, #tpu.memory_space<vmem>>, %arg5: memref<72x72xbf16, #tpu.memory_space<vmem>>, %arg6: memref<72x72xf32, #tpu.memory_space<vmem>>) attributes {dimension_semantics = [#tpu.dimension_semantics<parallel>, #tpu.dimension_semantics<parallel>, #tpu.dimension_semantics<arbitrary>], iteration_bounds = array<i64: 1, 1, 1>, scalar_prefetch = 0 : i64, scratch_operands = 1 : i64, tpu.core_type = #tpu.core_type<tc>, window_params = [{transform_indices = @transform_0, window_bounds = array<i64: 72, 16>}, {transform_indices = @transform_1, window_bounds = array<i64: 16, 72>}, {transform_indices = @transform_2, window_bounds = array<i64: 72, 72>}]} {
    %c0_i32 = arith.constant 0 : i32
    %0 = arith.cmpi eq, %arg2, %c0_i32 : i32
    %1 = arith.extui %0 : i1 to i32
    %c0_i32_0 = arith.constant 0 : i32
    %2 = arith.cmpi ne, %1, %c0_i32_0 : i32
    scf.if %2 {
      %cst_10 = arith.constant 0.000000e+00 : f32
      %12 = vector.broadcast %cst_10 : f32 to vector<72x72xf32>
      %c0_11 = arith.constant 0 : index
      %c0_12 = arith.constant 0 : index
      %13 = vector.load %arg6[%c0_11, %c0_12] : memref<72x72xf32, #tpu.memory_space<vmem>>, vector<72x72xf32>
      tpu.vector_store %arg6[%c0_11, %c0_12], %12 {strides = array<i32>} : memref<72x72xf32, #tpu.memory_space<vmem>>, vector<72x72xf32>,
    } else {
    }
    %c0 = arith.constant 0 : index
    %c0_1 = arith.constant 0 : index
    %3 = vector.load %arg3[%c0, %c0_1] : memref<72x16xbf16, #tpu.memory_space<vmem>>, vector<72x16xbf16>
    %c0_2 = arith.constant 0 : index
    %c0_3 = arith.constant 0 : index
    %4 = vector.load %arg6[%c0_2, %c0_3] : memref<72x72xf32, #tpu.memory_space<vmem>>, vector<72x72xf32>
    %c0_4 = arith.constant 0 : index
    %c0_5 = arith.constant 0 : index
    %5 = vector.load %arg4[%c0_4, %c0_5] : memref<16x72xbf16, #tpu.memory_space<vmem>>, vector<16x72xbf16>
    %cst = arith.constant dense<0.000000e+00> : vector<72x72xf32>
    %6 = tpu.matmul %3, %5, %cst {dimension_numbers = #tpu.dot_dimension_numbers<[1], [0], [0], [1], [0, 0, 1, 1], [], []>} : vector<72x16xbf16>, vector<16x72xbf16>, vector<72x72xf32> -> vector<72x72xf32>
    %7 = arith.addf %4, %6 : vector<72x72xf32>
    %c0_6 = arith.constant 0 : index
    %c0_7 = arith.constant 0 : index
    %8 = vector.load %arg6[%c0_6, %c0_7] : memref<72x72xf32, #tpu.memory_space<vmem>>, vector<72x72xf32>
    tpu.vector_store %arg6[%c0_6, %c0_7], %7 {strides = array<i32>} : memref<72x72xf32, #tpu.memory_space<vmem>>, vector<72x72xf32>,
    %c0_i32_8 = arith.constant 0 : i32
    %9 = arith.cmpi eq, %arg2, %c0_i32_8 : i32
    %10 = arith.extui %9 : i1 to i32
    %c0_i32_9 = arith.constant 0 : i32
    %11 = arith.cmpi ne, %10, %c0_i32_9 : i32
    scf.if %11 {
      %c0_10 = arith.constant 0 : index
      %c0_11 = arith.constant 0 : index
      %12 = vector.load %arg6[%c0_10, %c0_11] : memref<72x72xf32, #tpu.memory_space<vmem>>, vector<72x72xf32>
      %13 = arith.truncf %12 : vector<72x72xf32> to vector<72x72xbf16>
      %c0_12 = arith.constant 0 : index
      %c0_13 = arith.constant 0 : index
      %14 = vector.load %arg5[%c0_12, %c0_13] : memref<72x72xbf16, #tpu.memory_space<vmem>>, vector<72x72xbf16>
      tpu.vector_store %arg5[%c0_12, %c0_13], %13 {strides = array<i32>} : memref<72x72xbf16, #tpu.memory_space<vmem>>, vector<72x72xbf16>,
    } else {
    }
    return
  }
  func.func @transform_0(%arg0: i32, %arg1: i32, %arg2: i32) -> (i32, i32) {
    %c0_i32 = arith.constant 0 : i32
    return %arg0, %arg2 : i32, i32
  }
  func.func @transform_1(%arg0: i32, %arg1: i32, %arg2: i32) -> (i32, i32) {
    %c0_i32 = arith.constant 0 : i32
    return %arg2, %arg1 : i32, i32
  }
  func.func @transform_2(%arg0: i32, %arg1: i32, %arg2: i32) -> (i32, i32) {
    %c0_i32 = arith.constant 0 : i32
    return %arg0, %arg1 : i32, i32
  }
}

module attributes {stable_mosaic.version = 11 : i64} {
  func.func @_mm_kernel(%arg0: i32, %arg1: i32, %arg2: i32, %arg3: memref<32x128xbf16, #tpu.memory_space<vmem>>, %arg4: memref<128x16xbf16, #tpu.memory_space<vmem>>, %arg5: memref<1x128xf32, #tpu.memory_space<vmem>>, %arg6: memref<1x128xf32, #tpu.memory_space<vmem>>, %arg7: memref<32x16xbf16, #tpu.memory_space<vmem>>, %arg8: memref<32x16xf32, #tpu.memory_space<vmem>>) attributes {dimension_semantics = [#tpu.dimension_semantics<parallel>, #tpu.dimension_semantics<parallel>, #tpu.dimension_semantics<arbitrary>], iteration_bounds = array<i64: 1, 1, 1>, scalar_prefetch = 0 : i64, scratch_operands = 1 : i64, tpu.core_type = #tpu.core_type<tc>, window_params = [{transform_indices = @transform_0, window_bounds = array<i64: 32, 128>}, {transform_indices = @transform_1, window_bounds = array<i64: 128, 16>}, {transform_indices = @transform_2, window_bounds = array<i64: 1, 128>}, {transform_indices = @transform_3, window_bounds = array<i64: 1, 128>}, {transform_indices = @transform_4, window_bounds = array<i64: 32, 16>}]} {
    %c0_i32 = arith.constant 0 : i32
    %0 = arith.cmpi eq, %arg2, %c0_i32 : i32
    %1 = arith.extui %0 : i1 to i32
    %c0_i32_0 = arith.constant 0 : i32
    %2 = arith.cmpi ne, %1, %c0_i32_0 : i32
    scf.if %2 {
      %cst_15 = arith.constant 0.000000e+00 : f32
      %22 = vector.broadcast %cst_15 : f32 to vector<32x16xf32>
      %c0_16 = arith.constant 0 : index
      %c0_17 = arith.constant 0 : index
      %23 = vector.load %arg8[%c0_16, %c0_17] : memref<32x16xf32, #tpu.memory_space<vmem>>, vector<32x16xf32>
      tpu.vector_store %arg8[%c0_16, %c0_17], %22 {strides = array<i32>} : memref<32x16xf32, #tpu.memory_space<vmem>>, vector<32x16xf32>,
    } else {
    }
    %c0 = arith.constant 0 : index
    %c0_1 = arith.constant 0 : index
    %3 = vector.load %arg3[%c0, %c0_1] : memref<32x128xbf16, #tpu.memory_space<vmem>>, vector<32x128xbf16>
    %4 = arith.extf %3 : vector<32x128xbf16> to vector<32x128xf32>
    %c0_2 = arith.constant 0 : index
    %c0_3 = arith.constant 0 : index
    %5 = vector.load %arg5[%c0_2, %c0_3] : memref<1x128xf32, #tpu.memory_space<vmem>>, vector<1x128xf32>
    %6 = vector.broadcast %5 : vector<1x128xf32> to vector<32x128xf32>
    %7 = arith.mulf %4, %6 : vector<32x128xf32>
    %c0_4 = arith.constant 0 : index
    %c0_5 = arith.constant 0 : index
    %8 = vector.load %arg6[%c0_4, %c0_5] : memref<1x128xf32, #tpu.memory_space<vmem>>, vector<1x128xf32>
    %9 = vector.broadcast %8 : vector<1x128xf32> to vector<32x128xf32>
    %10 = arith.addf %7, %9 : vector<32x128xf32>
    %cst = arith.constant 0.000000e+00 : f32
    %11 = vector.broadcast %cst : f32 to vector<32x128xf32>
    %12 = arith.maximumf %10, %11 : vector<32x128xf32>
    %13 = arith.truncf %12 : vector<32x128xf32> to vector<32x128xbf16>
    %c0_6 = arith.constant 0 : index
    %c0_7 = arith.constant 0 : index
    %14 = vector.load %arg8[%c0_6, %c0_7] : memref<32x16xf32, #tpu.memory_space<vmem>>, vector<32x16xf32>
    %c0_8 = arith.constant 0 : index
    %c0_9 = arith.constant 0 : index
    %15 = vector.load %arg4[%c0_8, %c0_9] : memref<128x16xbf16, #tpu.memory_space<vmem>>, vector<128x16xbf16>
    %cst_10 = arith.constant dense<0.000000e+00> : vector<32x16xf32>
    %16 = tpu.matmul %13, %15, %cst_10 {dimension_numbers = #tpu.dot_dimension_numbers<[1], [0], [0], [1], [0, 0, 1, 1], [], []>} : vector<32x128xbf16>, vector<128x16xbf16>, vector<32x16xf32> -> vector<32x16xf32>
    %17 = arith.addf %14, %16 : vector<32x16xf32>
    %c0_11 = arith.constant 0 : index
    %c0_12 = arith.constant 0 : index
    %18 = vector.load %arg8[%c0_11, %c0_12] : memref<32x16xf32, #tpu.memory_space<vmem>>, vector<32x16xf32>
    tpu.vector_store %arg8[%c0_11, %c0_12], %17 {strides = array<i32>} : memref<32x16xf32, #tpu.memory_space<vmem>>, vector<32x16xf32>,
    %c0_i32_13 = arith.constant 0 : i32
    %19 = arith.cmpi eq, %arg2, %c0_i32_13 : i32
    %20 = arith.extui %19 : i1 to i32
    %c0_i32_14 = arith.constant 0 : i32
    %21 = arith.cmpi ne, %20, %c0_i32_14 : i32
    scf.if %21 {
      %c0_15 = arith.constant 0 : index
      %c0_16 = arith.constant 0 : index
      %22 = vector.load %arg8[%c0_15, %c0_16] : memref<32x16xf32, #tpu.memory_space<vmem>>, vector<32x16xf32>
      %23 = arith.truncf %22 : vector<32x16xf32> to vector<32x16xbf16>
      %c0_17 = arith.constant 0 : index
      %c0_18 = arith.constant 0 : index
      %24 = vector.load %arg7[%c0_17, %c0_18] : memref<32x16xbf16, #tpu.memory_space<vmem>>, vector<32x16xbf16>
      tpu.vector_store %arg7[%c0_17, %c0_18], %23 {strides = array<i32>} : memref<32x16xbf16, #tpu.memory_space<vmem>>, vector<32x16xbf16>,
    } else {
    }
    return
  }
  func.func @transform_0(%arg0: i32, %arg1: i32, %arg2: i32) -> (i32, i32) {
    %c0_i32 = arith.constant 0 : i32
    return %arg0, %arg2 : i32, i32
  }
  func.func @transform_1(%arg0: i32, %arg1: i32, %arg2: i32) -> (i32, i32) {
    %c0_i32 = arith.constant 0 : i32
    return %arg2, %arg1 : i32, i32
  }
  func.func @transform_2(%arg0: i32, %arg1: i32, %arg2: i32) -> (i32, i32) {
    %c0_i32 = arith.constant 0 : i32
    %c0_i32_0 = arith.constant 0 : i32
    return %c0_i32, %arg2 : i32, i32
  }
  func.func @transform_3(%arg0: i32, %arg1: i32, %arg2: i32) -> (i32, i32) {
    %c0_i32 = arith.constant 0 : i32
    %c0_i32_0 = arith.constant 0 : i32
    return %c0_i32, %arg2 : i32, i32
  }
  func.func @transform_4(%arg0: i32, %arg1: i32, %arg2: i32) -> (i32, i32) {
    %c0_i32 = arith.constant 0 : i32
    return %arg0, %arg1 : i32, i32
  }
}

module attributes {stable_mosaic.version = 11 : i64} {
  func.func @_mm_kernel(%arg0: i32, %arg1: i32, %arg2: i32, %arg3: memref<8x128xbf16, #tpu.memory_space<vmem>>, %arg4: memref<128x16xbf16, #tpu.memory_space<vmem>>, %arg5: memref<1x128xf32, #tpu.memory_space<vmem>>, %arg6: memref<1x128xf32, #tpu.memory_space<vmem>>, %arg7: memref<1x16xf32, #tpu.memory_space<vmem>>, %arg8: memref<1x16xf32, #tpu.memory_space<vmem>>, %arg9: memref<8x16xbf16, #tpu.memory_space<vmem>>, %arg10: memref<8x16xf32, #tpu.memory_space<vmem>>) attributes {dimension_semantics = [#tpu.dimension_semantics<parallel>, #tpu.dimension_semantics<parallel>, #tpu.dimension_semantics<arbitrary>], iteration_bounds = array<i64: 1, 1, 1>, scalar_prefetch = 0 : i64, scratch_operands = 1 : i64, tpu.core_type = #tpu.core_type<tc>, window_params = [{transform_indices = @transform_0, window_bounds = array<i64: 8, 128>}, {transform_indices = @transform_1, window_bounds = array<i64: 128, 16>}, {transform_indices = @transform_2, window_bounds = array<i64: 1, 128>}, {transform_indices = @transform_3, window_bounds = array<i64: 1, 128>}, {transform_indices = @transform_4, window_bounds = array<i64: 1, 16>}, {transform_indices = @transform_5, window_bounds = array<i64: 1, 16>}, {transform_indices = @transform_6, window_bounds = array<i64: 8, 16>}]} {
    %c0_i32 = arith.constant 0 : i32
    %0 = arith.cmpi eq, %arg2, %c0_i32 : i32
    %1 = arith.extui %0 : i1 to i32
    %c0_i32_0 = arith.constant 0 : i32
    %2 = arith.cmpi ne, %1, %c0_i32_0 : i32
    scf.if %2 {
      %cst_15 = arith.constant 0.000000e+00 : f32
      %22 = vector.broadcast %cst_15 : f32 to vector<8x16xf32>
      %c0_16 = arith.constant 0 : index
      %c0_17 = arith.constant 0 : index
      %23 = vector.load %arg10[%c0_16, %c0_17] : memref<8x16xf32, #tpu.memory_space<vmem>>, vector<8x16xf32>
      tpu.vector_store %arg10[%c0_16, %c0_17], %22 {strides = array<i32>} : memref<8x16xf32, #tpu.memory_space<vmem>>, vector<8x16xf32>,
    } else {
    }
    %c0 = arith.constant 0 : index
    %c0_1 = arith.constant 0 : index
    %3 = vector.load %arg3[%c0, %c0_1] : memref<8x128xbf16, #tpu.memory_space<vmem>>, vector<8x128xbf16>
    %4 = arith.extf %3 : vector<8x128xbf16> to vector<8x128xf32>
    %c0_2 = arith.constant 0 : index
    %c0_3 = arith.constant 0 : index
    %5 = vector.load %arg5[%c0_2, %c0_3] : memref<1x128xf32, #tpu.memory_space<vmem>>, vector<1x128xf32>
    %6 = vector.broadcast %5 : vector<1x128xf32> to vector<8x128xf32>
    %7 = arith.mulf %4, %6 : vector<8x128xf32>
    %c0_4 = arith.constant 0 : index
    %c0_5 = arith.constant 0 : index
    %8 = vector.load %arg6[%c0_4, %c0_5] : memref<1x128xf32, #tpu.memory_space<vmem>>, vector<1x128xf32>
    %9 = vector.broadcast %8 : vector<1x128xf32> to vector<8x128xf32>
    %10 = arith.addf %7, %9 : vector<8x128xf32>
    %cst = arith.constant 0.000000e+00 : f32
    %11 = vector.broadcast %cst : f32 to vector<8x128xf32>
    %12 = arith.maximumf %10, %11 : vector<8x128xf32>
    %13 = arith.truncf %12 : vector<8x128xf32> to vector<8x128xbf16>
    %c0_6 = arith.constant 0 : index
    %c0_7 = arith.constant 0 : index
    %14 = vector.load %arg10[%c0_6, %c0_7] : memref<8x16xf32, #tpu.memory_space<vmem>>, vector<8x16xf32>
    %c0_8 = arith.constant 0 : index
    %c0_9 = arith.constant 0 : index
    %15 = vector.load %arg4[%c0_8, %c0_9] : memref<128x16xbf16, #tpu.memory_space<vmem>>, vector<128x16xbf16>
    %cst_10 = arith.constant dense<0.000000e+00> : vector<8x16xf32>
    %16 = tpu.matmul %13, %15, %cst_10 {dimension_numbers = #tpu.dot_dimension_numbers<[1], [0], [0], [1], [0, 0, 1, 1], [], []>} : vector<8x128xbf16>, vector<128x16xbf16>, vector<8x16xf32> -> vector<8x16xf32>
    %17 = arith.addf %14, %16 : vector<8x16xf32>
    %c0_11 = arith.constant 0 : index
    %c0_12 = arith.constant 0 : index
    %18 = vector.load %arg10[%c0_11, %c0_12] : memref<8x16xf32, #tpu.memory_space<vmem>>, vector<8x16xf32>
    tpu.vector_store %arg10[%c0_11, %c0_12], %17 {strides = array<i32>} : memref<8x16xf32, #tpu.memory_space<vmem>>, vector<8x16xf32>,
    %c0_i32_13 = arith.constant 0 : i32
    %19 = arith.cmpi eq, %arg2, %c0_i32_13 : i32
    %20 = arith.extui %19 : i1 to i32
    %c0_i32_14 = arith.constant 0 : i32
    %21 = arith.cmpi ne, %20, %c0_i32_14 : i32
    scf.if %21 {
      %c0_15 = arith.constant 0 : index
      %c0_16 = arith.constant 0 : index
      %22 = vector.load %arg10[%c0_15, %c0_16] : memref<8x16xf32, #tpu.memory_space<vmem>>, vector<8x16xf32>
      %c0_17 = arith.constant 0 : index
      %c0_18 = arith.constant 0 : index
      %23 = vector.load %arg7[%c0_17, %c0_18] : memref<1x16xf32, #tpu.memory_space<vmem>>, vector<1x16xf32>
      %24 = vector.broadcast %23 : vector<1x16xf32> to vector<8x16xf32>
      %25 = arith.mulf %22, %24 : vector<8x16xf32>
      %c0_19 = arith.constant 0 : index
      %c0_20 = arith.constant 0 : index
      %26 = vector.load %arg8[%c0_19, %c0_20] : memref<1x16xf32, #tpu.memory_space<vmem>>, vector<1x16xf32>
      %27 = vector.broadcast %26 : vector<1x16xf32> to vector<8x16xf32>
      %28 = arith.addf %25, %27 : vector<8x16xf32>
      %cst_21 = arith.constant 0.000000e+00 : f32
      %29 = vector.broadcast %cst_21 : f32 to vector<8x16xf32>
      %30 = arith.maximumf %28, %29 : vector<8x16xf32>
      %31 = arith.truncf %30 : vector<8x16xf32> to vector<8x16xbf16>
      %c0_22 = arith.constant 0 : index
      %c0_23 = arith.constant 0 : index
      %32 = vector.load %arg9[%c0_22, %c0_23] : memref<8x16xbf16, #tpu.memory_space<vmem>>, vector<8x16xbf16>
      tpu.vector_store %arg9[%c0_22, %c0_23], %31 {strides = array<i32>} : memref<8x16xbf16, #tpu.memory_space<vmem>>, vector<8x16xbf16>,
    } else {
    }
    return
  }
  func.func @transform_0(%arg0: i32, %arg1: i32, %arg2: i32) -> (i32, i32) {
    %c0_i32 = arith.constant 0 : i32
    return %arg0, %arg2 : i32, i32
  }
  func.func @transform_1(%arg0: i32, %arg1: i32, %arg2: i32) -> (i32, i32) {
    %c0_i32 = arith.constant 0 : i32
    return %arg2, %arg1 : i32, i32
  }
  func.func @transform_2(%arg0: i32, %arg1: i32, %arg2: i32) -> (i32, i32) {
    %c0_i32 = arith.constant 0 : i32
    %c0_i32_0 = arith.constant 0 : i32
    return %c0_i32, %arg2 : i32, i32
  }
  func.func @transform_3(%arg0: i32, %arg1: i32, %arg2: i32) -> (i32, i32) {
    %c0_i32 = arith.constant 0 : i32
    %c0_i32_0 = arith.constant 0 : i32
    return %c0_i32, %arg2 : i32, i32
  }
  func.func @transform_4(%arg0: i32, %arg1: i32, %arg2: i32) -> (i32, i32) {
    %c0_i32 = arith.constant 0 : i32
    %c0_i32_0 = arith.constant 0 : i32
    return %c0_i32, %arg1 : i32, i32
  }
  func.func @transform_5(%arg0: i32, %arg1: i32, %arg2: i32) -> (i32, i32) {
    %c0_i32 = arith.constant 0 : i32
    %c0_i32_0 = arith.constant 0 : i32
    return %c0_i32, %arg1 : i32, i32
  }
  func.func @transform_6(%arg0: i32, %arg1: i32, %arg2: i32) -> (i32, i32) {
    %c0_i32 = arith.constant 0 : i32
    return %arg0, %arg1 : i32, i32
  }
}

module attributes {stable_mosaic.version = 11 : i64} {
  func.func @_mm_kernel(%arg0: i32, %arg1: i32, %arg2: i32, %arg3: memref<32x16xbf16, #tpu.memory_space<vmem>>, %arg4: memref<16x72xbf16, #tpu.memory_space<vmem>>, %arg5: memref<32x72xbf16, #tpu.memory_space<vmem>>, %arg6: memref<32x72xf32, #tpu.memory_space<vmem>>) attributes {dimension_semantics = [#tpu.dimension_semantics<parallel>, #tpu.dimension_semantics<parallel>, #tpu.dimension_semantics<arbitrary>], iteration_bounds = array<i64: 1, 1, 1>, scalar_prefetch = 0 : i64, scratch_operands = 1 : i64, tpu.core_type = #tpu.core_type<tc>, window_params = [{transform_indices = @transform_0, window_bounds = array<i64: 32, 16>}, {transform_indices = @transform_1, window_bounds = array<i64: 16, 72>}, {transform_indices = @transform_2, window_bounds = array<i64: 32, 72>}]} {
    %c0_i32 = arith.constant 0 : i32
    %0 = arith.cmpi eq, %arg2, %c0_i32 : i32
    %1 = arith.extui %0 : i1 to i32
    %c0_i32_0 = arith.constant 0 : i32
    %2 = arith.cmpi ne, %1, %c0_i32_0 : i32
    scf.if %2 {
      %cst_10 = arith.constant 0.000000e+00 : f32
      %12 = vector.broadcast %cst_10 : f32 to vector<32x72xf32>
      %c0_11 = arith.constant 0 : index
      %c0_12 = arith.constant 0 : index
      %13 = vector.load %arg6[%c0_11, %c0_12] : memref<32x72xf32, #tpu.memory_space<vmem>>, vector<32x72xf32>
      tpu.vector_store %arg6[%c0_11, %c0_12], %12 {strides = array<i32>} : memref<32x72xf32, #tpu.memory_space<vmem>>, vector<32x72xf32>,
    } else {
    }
    %c0 = arith.constant 0 : index
    %c0_1 = arith.constant 0 : index
    %3 = vector.load %arg3[%c0, %c0_1] : memref<32x16xbf16, #tpu.memory_space<vmem>>, vector<32x16xbf16>
    %c0_2 = arith.constant 0 : index
    %c0_3 = arith.constant 0 : index
    %4 = vector.load %arg6[%c0_2, %c0_3] : memref<32x72xf32, #tpu.memory_space<vmem>>, vector<32x72xf32>
    %c0_4 = arith.constant 0 : index
    %c0_5 = arith.constant 0 : index
    %5 = vector.load %arg4[%c0_4, %c0_5] : memref<16x72xbf16, #tpu.memory_space<vmem>>, vector<16x72xbf16>
    %cst = arith.constant dense<0.000000e+00> : vector<32x72xf32>
    %6 = tpu.matmul %3, %5, %cst {dimension_numbers = #tpu.dot_dimension_numbers<[1], [0], [0], [1], [0, 0, 1, 1], [], []>} : vector<32x16xbf16>, vector<16x72xbf16>, vector<32x72xf32> -> vector<32x72xf32>
    %7 = arith.addf %4, %6 : vector<32x72xf32>
    %c0_6 = arith.constant 0 : index
    %c0_7 = arith.constant 0 : index
    %8 = vector.load %arg6[%c0_6, %c0_7] : memref<32x72xf32, #tpu.memory_space<vmem>>, vector<32x72xf32>
    tpu.vector_store %arg6[%c0_6, %c0_7], %7 {strides = array<i32>} : memref<32x72xf32, #tpu.memory_space<vmem>>, vector<32x72xf32>,
    %c0_i32_8 = arith.constant 0 : i32
    %9 = arith.cmpi eq, %arg2, %c0_i32_8 : i32
    %10 = arith.extui %9 : i1 to i32
    %c0_i32_9 = arith.constant 0 : i32
    %11 = arith.cmpi ne, %10, %c0_i32_9 : i32
    scf.if %11 {
      %c0_10 = arith.constant 0 : index
      %c0_11 = arith.constant 0 : index
      %12 = vector.load %arg6[%c0_10, %c0_11] : memref<32x72xf32, #tpu.memory_space<vmem>>, vector<32x72xf32>
      %13 = arith.truncf %12 : vector<32x72xf32> to vector<32x72xbf16>
      %c0_12 = arith.constant 0 : index
      %c0_13 = arith.constant 0 : index
      %14 = vector.load %arg5[%c0_12, %c0_13] : memref<32x72xbf16, #tpu.memory_space<vmem>>, vector<32x72xbf16>
      tpu.vector_store %arg5[%c0_12, %c0_13], %13 {strides = array<i32>} : memref<32x72xbf16, #tpu.memory_space<vmem>>, vector<32x72xbf16>,
    } else {
    }
    return
  }
  func.func @transform_0(%arg0: i32, %arg1: i32, %arg2: i32) -> (i32, i32) {
    %c0_i32 = arith.constant 0 : i32
    return %arg0, %arg2 : i32, i32
  }
  func.func @transform_1(%arg0: i32, %arg1: i32, %arg2: i32) -> (i32, i32) {
    %c0_i32 = arith.constant 0 : i32
    return %arg2, %arg1 : i32, i32
  }
  func.func @transform_2(%arg0: i32, %arg1: i32, %arg2: i32) -> (i32, i32) {
    %c0_i32 = arith.constant 0 : i32
    return %arg0, %arg1 : i32, i32
  }
}

module attributes {stable_mosaic.version = 11 : i64} {
  func.func @_mm_kernel(%arg0: i32, %arg1: i32, %arg2: i32, %arg3: memref<8x32xbf16, #tpu.memory_space<vmem>>, %arg4: memref<32x10xbf16, #tpu.memory_space<vmem>>, %arg5: memref<1x10xf32, #tpu.memory_space<vmem>>, %arg6: memref<1x10xf32, #tpu.memory_space<vmem>>, %arg7: memref<8x10xf32, #tpu.memory_space<vmem>>, %arg8: memref<8x10xf32, #tpu.memory_space<vmem>>) attributes {dimension_semantics = [#tpu.dimension_semantics<parallel>, #tpu.dimension_semantics<parallel>, #tpu.dimension_semantics<arbitrary>], iteration_bounds = array<i64: 1, 1, 1>, scalar_prefetch = 0 : i64, scratch_operands = 1 : i64, tpu.core_type = #tpu.core_type<tc>, window_params = [{transform_indices = @transform_0, window_bounds = array<i64: 8, 32>}, {transform_indices = @transform_1, window_bounds = array<i64: 32, 10>}, {transform_indices = @transform_2, window_bounds = array<i64: 1, 10>}, {transform_indices = @transform_3, window_bounds = array<i64: 1, 10>}, {transform_indices = @transform_4, window_bounds = array<i64: 8, 10>}]} {
    %c0_i32 = arith.constant 0 : i32
    %0 = arith.cmpi eq, %arg2, %c0_i32 : i32
    %1 = arith.extui %0 : i1 to i32
    %c0_i32_0 = arith.constant 0 : i32
    %2 = arith.cmpi ne, %1, %c0_i32_0 : i32
    scf.if %2 {
      %cst_10 = arith.constant 0.000000e+00 : f32
      %12 = vector.broadcast %cst_10 : f32 to vector<8x10xf32>
      %c0_11 = arith.constant 0 : index
      %c0_12 = arith.constant 0 : index
      %13 = vector.load %arg8[%c0_11, %c0_12] : memref<8x10xf32, #tpu.memory_space<vmem>>, vector<8x10xf32>
      tpu.vector_store %arg8[%c0_11, %c0_12], %12 {strides = array<i32>} : memref<8x10xf32, #tpu.memory_space<vmem>>, vector<8x10xf32>,
    } else {
    }
    %c0 = arith.constant 0 : index
    %c0_1 = arith.constant 0 : index
    %3 = vector.load %arg3[%c0, %c0_1] : memref<8x32xbf16, #tpu.memory_space<vmem>>, vector<8x32xbf16>
    %c0_2 = arith.constant 0 : index
    %c0_3 = arith.constant 0 : index
    %4 = vector.load %arg8[%c0_2, %c0_3] : memref<8x10xf32, #tpu.memory_space<vmem>>, vector<8x10xf32>
    %c0_4 = arith.constant 0 : index
    %c0_5 = arith.constant 0 : index
    %5 = vector.load %arg4[%c0_4, %c0_5] : memref<32x10xbf16, #tpu.memory_space<vmem>>, vector<32x10xbf16>
    %cst = arith.constant dense<0.000000e+00> : vector<8x10xf32>
    %6 = tpu.matmul %3, %5, %cst {dimension_numbers = #tpu.dot_dimension_numbers<[1], [0], [0], [1], [0, 0, 1, 1], [], []>} : vector<8x32xbf16>, vector<32x10xbf16>, vector<8x10xf32> -> vector<8x10xf32>
    %7 = arith.addf %4, %6 : vector<8x10xf32>
    %c0_6 = arith.constant 0 : index
    %c0_7 = arith.constant 0 : index
    %8 = vector.load %arg8[%c0_6, %c0_7] : memref<8x10xf32, #tpu.memory_space<vmem>>, vector<8x10xf32>
    tpu.vector_store %arg8[%c0_6, %c0_7], %7 {strides = array<i32>} : memref<8x10xf32, #tpu.memory_space<vmem>>, vector<8x10xf32>,
    %c0_i32_8 = arith.constant 0 : i32
    %9 = arith.cmpi eq, %arg2, %c0_i32_8 : i32
    %10 = arith.extui %9 : i1 to i32
    %c0_i32_9 = arith.constant 0 : i32
    %11 = arith.cmpi ne, %10, %c0_i32_9 : i32
    scf.if %11 {
      %c0_10 = arith.constant 0 : index
      %c0_11 = arith.constant 0 : index
      %12 = vector.load %arg8[%c0_10, %c0_11] : memref<8x10xf32, #tpu.memory_space<vmem>>, vector<8x10xf32>
      %c0_12 = arith.constant 0 : index
      %c0_13 = arith.constant 0 : index
      %13 = vector.load %arg5[%c0_12, %c0_13] : memref<1x10xf32, #tpu.memory_space<vmem>>, vector<1x10xf32>
      %14 = vector.broadcast %13 : vector<1x10xf32> to vector<8x10xf32>
      %15 = arith.mulf %12, %14 : vector<8x10xf32>
      %c0_14 = arith.constant 0 : index
      %c0_15 = arith.constant 0 : index
      %16 = vector.load %arg6[%c0_14, %c0_15] : memref<1x10xf32, #tpu.memory_space<vmem>>, vector<1x10xf32>
      %17 = vector.broadcast %16 : vector<1x10xf32> to vector<8x10xf32>
      %18 = arith.addf %15, %17 : vector<8x10xf32>
      %c0_16 = arith.constant 0 : index
      %c0_17 = arith.constant 0 : index
      %19 = vector.load %arg7[%c0_16, %c0_17] : memref<8x10xf32, #tpu.memory_space<vmem>>, vector<8x10xf32>
      tpu.vector_store %arg7[%c0_16, %c0_17], %18 {strides = array<i32>} : memref<8x10xf32, #tpu.memory_space<vmem>>, vector<8x10xf32>,
    } else {
    }
    return
  }
  func.func @transform_0(%arg0: i32, %arg1: i32, %arg2: i32) -> (i32, i32) {
    %c0_i32 = arith.constant 0 : i32
    return %arg0, %arg2 : i32, i32
  }
  func.func @transform_1(%arg0: i32, %arg1: i32, %arg2: i32) -> (i32, i32) {
    %c0_i32 = arith.constant 0 : i32
    return %arg2, %arg1 : i32, i32
  }
  func.func @transform_2(%arg0: i32, %arg1: i32, %arg2: i32) -> (i32, i32) {
    %c0_i32 = arith.constant 0 : i32
    %c0_i32_0 = arith.constant 0 : i32
    return %c0_i32, %arg1 : i32, i32
  }
  func.func @transform_3(%arg0: i32, %arg1: i32, %arg2: i32) -> (i32, i32) {
    %c0_i32 = arith.constant 0 : i32
    %c0_i32_0 = arith.constant 0 : i32
    return %c0_i32, %arg1 : i32, i32
  }
  func.func @transform_4(%arg0: i32, %arg1: i32, %arg2: i32) -> (i32, i32) {
    %c0_i32 = arith.constant 0 : i32
    return %arg0, %arg1 : i32, i32
  }
}

</mosaic_0001>

<bundles_post_ra>
// kernel: densenet_forward.21
= control target key start
LH: loop header
LB: loop body
LE: loop exit
PB: predicated region body
PF: predicated region fallthrough
CT: control target
= control target key end

     0   :  { %s2467_s15 = smov 0   ;;  %s2469_s16 = smov 0   ;;  %s3304_s0 = inlined_call_operand.vmem [shape: bf16[2048,147], index: 0, kind: input, shape index: {}]   ;;  %s3305_s1 = inlined_call_operand.vmem [shape: bf16[147,16], index: 1, kind: input, shape index: {}]   ;;  %s3306_s2 = inlined_call_operand.vmem [shape: f32[1,16], index: 2, kind: input, shape index: {}]   ;;  %s3307_s3 = inlined_call_operand.vmem [shape: f32[1,16], index: 3, kind: input, shape index: {}]   ;;  %s3308_s4 = inlined_call_operand.vmem [shape: bf16[2048,16], index: 4, kind: output, shape index: {}]  }
   0x1   :  { %s2471_s17 = smov 0  }
   0x2 LB: > { %s33_s18 = sadd.s32 1, %s2434_s16  ;;  %p1970_p0 = scmp.ge.s32.totalorder %s2438_s17, 1  ;;  %s2438_s17 = sphi %s2471_s17, %s14_s17   ;;  %s2434_s16 = sphi %s2469_s16, %s3310_s16   ;;  %s2430_s15 = sphi %s2467_s15, %s3309_s15  }
   0x3   : > { %p35_p1 = scmp.ge.s32.totalorder %s33_s18, 4  ;;  %p224_p2 = scmp.lt.s32.totalorder %s2438_s17, 5 }
   0x5   : > { %s3312_s18 = smov (%p35_p1, %s33_s18), 0  ;;  %p225_p3 = pnand %p1970_p0, %p224_p2 }
   0x6   : > { %s1971_s23 = sshll.u32 (!%p225_p3), %s2430_s15, 6 }
   0x7   : > { %228 = sbr.rel (%p225_p3) target bundleno = 446 (0x1be), region = 36  ;;  %p274_p4 = scmp.lt.s32.totalorder (!%p225_p3), %s1971_s23, 255 }
   0xc   : > { %v2374_v0 = vld [vmem:[%s3305_s1 + $0x38] sm:$0xff]  ;;  %v524_v1 = vld [vmem:[%s3305_s1 + $0x48] sm:$0x3]  ;;  %vm967_vm0 = vcmask 1040384   ;;  %vm968_vm1 = vcmask 1041408   ;;  %v2373_v3 = vld [vmem:[%s3305_s1 + $0x30] sm:$0xff] }
   0xd   : > { %v850_v2 = vunpack.c.l.b16 %v524_v1  ;;  %974 = vmatpush.bf16.msra.mxu0 %v2374_v0  ;;  %2376 = vmatpush.bf16.msra.mxu2 %v2374_v0  ;;  %v2440_v4 = vmov 65535   ;;  %s3314_s23 = smov (!%p274_p4, %s1971_s23), 255  ;;  %v2372_v9 = vld [vmem:[%s3305_s1 + $0x28] sm:$0xff]  ;;  %v2375_v10 = vld [vmem:[%s3305_s1 + $0x40] sm:$0xff]  ;;  %vm870_vm2 = vcmask 154624   ;;  %v2370_v18 = vld [vmem:[%s3305_s1 + $0x18] sm:$0xff] }
   0xe   : > { %v969_v5 = vsel %vm967_vm0, 4294967295, %v2440_v4  ;;  %s2302_s28 = sshll.u32 %s3314_s23, 3  ;;  %v2371_v14 = vld [vmem:[%s3305_s1 + $0x20] sm:$0xff]  ;;  %v2369_v19 = vld [vmem:[%s3305_s1 + $0x10] sm:$0xff]  ;;  %v2368_v20 = vld [vmem:[%s3305_s1 + $0x8] sm:$0xff]  ;;  %vm313_vm3 = vcmask 130048  }
   0xf   : > { %v860_v6 = vpack.c.b16 %v850_v2, %v850_v2  ;;  %v970_v7 = vsel %vm968_vm1, %v969_v5, 0  ;;  %s2506_s7 = scalar_lea.vmem %s3304_s0, %s2302_s28  ;;  %v2367_v26 = vld [vmem:[%s3305_s1] sm:$0xff]  ;;  %s1975_s26 = sshll.u32 %s3314_s23, 2  ;;  %vm1772_vm4 = vcmask 125952  }
  0x10   : > { %v2303_v11 = vld [vmem:[%s2506_s7 + $0x4] sm:$0xf]  ;;  %v1980_v12 = vld [vmem:[%s2506_s7 + $0x8] sm:$0xf0]  ;;  %v2337_v15 = vld [vmem:[%s2506_s7 + $0x114] sm:$0xf]  ;;  %s2767_s28 = scalar_lea.vmem %s3308_s4, %s1975_s26 }
  0x11   : > { %v972_v8 = vand.u32 %v970_v7, %v860_v6  ;;  %975 = vmatpush.bf16.msra.mxu0 %v2373_v3  ;;  %2377 = vmatpush.bf16.msra.mxu2 %v2373_v3  ;;  %v1983_v13 = vor.u32 %v2303_v11, %v1980_v12  ;;  %v2116_v16 = vld [vmem:[%s2506_s7 + $0x118] sm:$0xf0]  ;;  %v2305_v21 = vld [vmem:[%s2506_s7 + $0x14] sm:$0xf]  ;;  %v2339_v23 = vld [vmem:[%s2506_s7 + $0x124] sm:$0xf] }
  0x12   : > { %v2119_v17 = vor.u32 %v2337_v15, %v2116_v16  ;;  %v1988_v22 = vld [vmem:[%s2506_s7 + $0x18] sm:$0xf0]  ;;  %v2124_v24 = vld [vmem:[%s2506_s7 + $0x128] sm:$0xf0]  ;;  %v1978_v27 = vld [vmem:[%s2506_s7] sm:$0xf] }
  0x13   : > { %1149 = vmatpush.bf16.msra.mxu1 %v972_v8  ;;  %2384 = vmatpush.bf16.msra.mxu3 %v972_v8  ;;  %v1991_v25 = vor.u32 %v2305_v21, %v1988_v22  ;;  %v2304_v28 = vld [vmem:[%s2506_s7 + $0x4] sm:$0xf0]  ;;  %v2106_v29 = vld [vmem:[%s2506_s7 + $0x100] sm:$0xf]  ;;  %v2127_v31 = vor.u32 %v2339_v23, %v2124_v24  ;;  %v2307_v34 = vld [vmem:[%s2506_s7 + $0x24] sm:$0xf] }
  0x14   : > { %v2336_v30 = vld [vmem:[%s2506_s7 + $0x104] sm:$0xf0]  ;;  %v1979_v32 = vor.u32 %v2304_v28, %v1978_v27  ;;  %v1996_v35 = vld [vmem:[%s2506_s7 + $0x28] sm:$0xf0]  ;;  %v2341_v36 = vld [vmem:[%s2506_s7 + $0x134] sm:$0xf] }
  0x15   : > { %976 = vmatpush.bf16.msra.mxu0 %v2372_v9  ;;  %2378 = vmatpush.bf16.msra.mxu2 %v2372_v9  ;;  %v2107_v33 = vor.u32 %v2336_v30, %v2106_v29  ;;  %v2132_v37 = vld [vmem:[%s2506_s7 + $0x138] sm:$0xf0]  ;;  %v1999_v38 = vor.u32 %v2307_v34, %v1996_v35  ;;  %v1986_v39 = vld [vmem:[%s2506_s7 + $0x10] sm:$0xf]  ;;  %v2306_v40 = vld [vmem:[%s2506_s7 + $0x14] sm:$0xf0] }
  0x16   : > { %v2114_v41 = vld [vmem:[%s2506_s7 + $0x110] sm:$0xf]  ;;  %v2338_v42 = vld [vmem:[%s2506_s7 + $0x114] sm:$0xf0]  ;;  %v2135_v43 = vor.u32 %v2341_v36, %v2132_v37  ;;  %v1987_v44 = vor.u32 %v2306_v40, %v1986_v39  ;;  %v2309_v46 = vld [vmem:[%s2506_s7 + $0x34] sm:$0xf] }
  0x17   : > { %1150 = vmatpush.bf16.msra.mxu1 %v2375_v10  ;;  %2385 = vmatpush.bf16.msra.mxu3 %v2375_v10  ;;  %v2115_v45 = vor.u32 %v2338_v42, %v2114_v41  ;;  %v2004_v47 = vld [vmem:[%s2506_s7 + $0x38] sm:$0xf0]  ;;  %v2343_v48 = vld [vmem:[%s2506_s7 + $0x144] sm:$0xf]  ;;  %v2140_v49 = vld [vmem:[%s2506_s7 + $0x148] sm:$0xf0] }
  0x18   : > { %v2007_v50 = vor.u32 %v2309_v46, %v2004_v47  ;;  %v1994_v51 = vld [vmem:[%s2506_s7 + $0x20] sm:$0xf]  ;;  %v2308_v52 = vld [vmem:[%s2506_s7 + $0x24] sm:$0xf0]  ;;  %v2143_v55 = vor.u32 %v2343_v48, %v2140_v49  ;;  %v2311_v58 = vld [vmem:[%s2506_s7 + $0x44] sm:$0xf] }
  0x19   : > { %977 = vmatpush.bf16.msra.mxu0 %v2371_v14  ;;  %2379 = vmatpush.bf16.msra.mxu2 %v2371_v14  ;;  %v2122_v53 = vld [vmem:[%s2506_s7 + $0x120] sm:$0xf]  ;;  %v2340_v54 = vld [vmem:[%s2506_s7 + $0x124] sm:$0xf0]  ;;  %v1995_v56 = vor.u32 %v2308_v52, %v1994_v51  ;;  %v2012_v59 = vld [vmem:[%s2506_s7 + $0x48] sm:$0xf0] }
  0x1a   : > { %2268 = vmatmul.msk.bf16.vlgmr.msra.gmra.mxu1 %vm870_vm2, %v1983_v13  ;;  %2285 = vmatmul.msk.bf16.vlgmr.msra.gmra.mxu3 %vm870_vm2, %v2119_v17  ;;  %v2123_v57 = vor.u32 %v2340_v54, %v2122_v53  ;;  %v2345_v60 = vld [vmem:[%s2506_s7 + $0x154] sm:$0xf]  ;;  %v2148_v61 = vld [vmem:[%s2506_s7 + $0x158] sm:$0xf0]  ;;  %v2015_v62 = vor.u32 %v2311_v58, %v2012_v59  ;;  %v2002_v63 = vld [vmem:[%s2506_s7 + $0x30] sm:$0xf] }
  0x1b   : > { %v2310_v0 = vld [vmem:[%s2506_s7 + $0x34] sm:$0xf0]  ;;  %v2130_v1 = vld [vmem:[%s2506_s7 + $0x130] sm:$0xf]  ;;  %v2151_v3 = vor.u32 %v2345_v60, %v2148_v61  ;;  %v2313_v6 = vld [vmem:[%s2506_s7 + $0x54] sm:$0xf] }
  0x1c   : > { %v2342_v2 = vld [vmem:[%s2506_s7 + $0x134] sm:$0xf0]  ;;  %v2003_v4 = vor.u32 %v2310_v0, %v2002_v63  ;;  %v2020_v7 = vld [vmem:[%s2506_s7 + $0x58] sm:$0xf0]  ;;  %v2347_v8 = vld [vmem:[%s2506_s7 + $0x164] sm:$0xf] }
  0x1d   : > { %978 = vmatpush.bf16.msra.mxu0 %v2370_v18  ;;  %2380 = vmatpush.bf16.msra.mxu2 %v2370_v18  ;;  %v2131_v5 = vor.u32 %v2342_v2, %v2130_v1  ;;  %v2156_v9 = vld [vmem:[%s2506_s7 + $0x168] sm:$0xf0]  ;;  %v2023_v10 = vor.u32 %v2313_v6, %v2020_v7  ;;  %v2010_v11 = vld [vmem:[%s2506_s7 + $0x40] sm:$0xf]  ;;  %v2312_v12 = vld [vmem:[%s2506_s7 + $0x44] sm:$0xf0] }
  0x1e   : > { %v2138_v13 = vld [vmem:[%s2506_s7 + $0x140] sm:$0xf]  ;;  %v2344_v14 = vld [vmem:[%s2506_s7 + $0x144] sm:$0xf0]  ;;  %v2159_v15 = vor.u32 %v2347_v8, %v2156_v9  ;;  %v2011_v16 = vor.u32 %v2312_v12, %v2010_v11  ;;  %v2315_v18 = vld [vmem:[%s2506_s7 + $0x64] sm:$0xf] }
  0x1f   : > { %v2139_v17 = vor.u32 %v2344_v14, %v2138_v13  ;;  %v2164_v21 = vld [vmem:[%s2506_s7 + $0x178] sm:$0xf0]  ;;  %v2018_v23 = vld [vmem:[%s2506_s7 + $0x50] sm:$0xf]  ;;  %v2314_v24 = vld [vmem:[%s2506_s7 + $0x54] sm:$0xf0] }
  0x20   : > { %v2019_v28 = vor.u32 %v2314_v24, %v2018_v23  ;;  %v2317_v30 = vld [vmem:[%s2506_s7 + $0x74] sm:$0xf]  ;;  %v2026_v35 = vld [vmem:[%s2506_s7 + $0x60] sm:$0xf]  ;;  %v2316_v36 = vld [vmem:[%s2506_s7 + $0x64] sm:$0xf0] }
  0x21   : > { %979 = vmatpush.bf16.msra.mxu0 %v2369_v19  ;;  %2381 = vmatpush.bf16.msra.mxu2 %v2369_v19  ;;  %v2028_v19 = vld [vmem:[%s2506_s7 + $0x68] sm:$0xf0]  ;;  %v2441_v37 = vmov 0.0   ;;  %v2348_v39 = vld [vmem:[%s2506_s7 + $0x164] sm:$0xf0]  ;;  %v2027_v41 = vor.u32 %v2316_v36, %v2026_v35 }
  0x22   : > { %v2031_v22 = vor.u32 %v2315_v18, %v2028_v19  ;;  %314 = vst.msk [vmem:[#allocation2] sm:$0xff] %vm313_vm3, %v2441_v37  ;;  %v2034_v46 = vld [vmem:[%s2506_s7 + $0x70] sm:$0xf]  ;;  %v2318_v47 = vld [vmem:[%s2506_s7 + $0x74] sm:$0xf0] }
  0x23   : > { %315 = vst.msk [vmem:[#allocation2 + $0x8] sm:$0xff] %vm313_vm3, %v2441_v37  ;;  %v2162_v49 = vld [vmem:[%s2506_s7 + $0x170] sm:$0xf]  ;;  %v2035_v51 = vor.u32 %v2318_v47, %v2034_v46  ;;  %v2321_v54 = vld [vmem:[%s2506_s7 + $0x94] sm:$0xf] }
  0x24   : > { %316 = vst.msk [vmem:[#allocation2 + $0x10] sm:$0xff] %vm313_vm3, %v2441_v37  ;;  %v2042_v60 = vld [vmem:[%s2506_s7 + $0x80] sm:$0xf]  ;;  %v2320_v61 = vld [vmem:[%s2506_s7 + $0x84] sm:$0xf0] }
  0x25   : > { %980 = vmatpush.bf16.msra.mxu0 %v2368_v20  ;;  %2382 = vmatpush.bf16.msra.mxu2 %v2368_v20  ;;  %v2349_v20 = vld [vmem:[%s2506_s7 + $0x174] sm:$0xf]  ;;  %317 = vst.msk [vmem:[#allocation2 + $0x18] sm:$0xff] %vm313_vm3, %v2441_v37  ;;  %v2170_v63 = vld [vmem:[%s2506_s7 + $0x180] sm:$0xf]  ;;  %v2043_v1 = vor.u32 %v2320_v61, %v2042_v60 }
  0x26   : > { %v2167_v27 = vor.u32 %v2349_v20, %v2164_v21  ;;  %318 = vst.msk [vmem:[#allocation2 + $0x20] sm:$0xff] %vm313_vm3, %v2441_v37  ;;  %v2352_v0 = vld [vmem:[%s2506_s7 + $0x184] sm:$0xf0]  ;;  %v2712_v9 = vld [vmem:[%s3306_s2] ss:$0 sm:$0xff] }
  0x27   : > { %319 = vst.msk [vmem:[#allocation2 + $0x28] sm:$0xff] %vm313_vm3, %v2441_v37  ;;  %v2323_v13 = vld [vmem:[%s2506_s7 + $0xa4] sm:$0xf]  ;;  %v2060_v14 = vld [vmem:[%s2506_s7 + $0xa8] sm:$0xf0] }
  0x28   : > { %320 = vst.msk [vmem:[#allocation2 + $0x30] sm:$0xff] %vm313_vm3, %v2441_v37  ;;  %v2733_v18 = vld [vmem:[%s3307_s3] ss:$0 sm:$0xff]  ;;  %v2063_v20 = vor.u32 %v2323_v13, %v2060_v14  ;;  %v2050_v21 = vld [vmem:[%s2506_s7 + $0x90] sm:$0xf] }
  0x29   : > { %981 = vmatpush.bf16.msra.mxu0 %v2367_v26  ;;  %2383 = vmatpush.bf16.msra.mxu2 %v2367_v26  ;;  %v2346_v26 = vld [vmem:[%s2506_s7 + $0x154] sm:$0xf0]  ;;  %321 = vst.msk [vmem:[#allocation2 + $0x38] sm:$0xff] %vm313_vm3, %v2441_v37  ;;  %v2068_v46 = vld [vmem:[%s2506_s7 + $0xb8] sm:$0xf0] }
  0x2a   : > { %2269 = vmatmul.msk.bf16.gmra.mxu1 %vm870_vm2, %v1991_v25  ;;  %2286 = vmatmul.msk.bf16.gmra.mxu3 %vm870_vm2, %v2127_v31  ;;  %v2146_v25 = vld [vmem:[%s2506_s7 + $0x150] sm:$0xf]  ;;  %v2036_v31 = vld [vmem:[%s2506_s7 + $0x78] sm:$0xf0]  ;;  %322 = vst.msk [vmem:[#allocation2 + $0x40] sm:$0xff] %vm313_vm3, %v2441_v37 }
  0x2b   : > { %v2147_v29 = vor.u32 %v2346_v26, %v2146_v25  ;;  %v2039_v34 = vor.u32 %v2317_v30, %v2036_v31  ;;  %323 = vst.msk [vmem:[#allocation2 + $0x48] sm:$0xff] %vm313_vm3, %v2441_v37  ;;  %v2178_v25 = vld [vmem:[%s2506_s7 + $0x190] sm:$0xf]  ;;  %v2354_v26 = vld [vmem:[%s2506_s7 + $0x194] sm:$0xf0] }
  0x2c   : > { %982 = vmatmul.bf16.vlgmr.msra.gmra.mxu0 %v1979_v32  ;;  %1062 = vmatmul.bf16.vlgmr.msra.gmra.mxu2 %v2107_v33  ;;  %v2351_v32 = vld [vmem:[%s2506_s7 + $0x184] sm:$0xf]  ;;  %v2172_v33 = vld [vmem:[%s2506_s7 + $0x188] sm:$0xf0]  ;;  %324 = vst.msk [vmem:[#allocation2 + $0x50] sm:$0xff] %vm313_vm3, %v2441_v37 }
  0x2d   : > { %v2175_v40 = vor.u32 %v2351_v32, %v2172_v33  ;;  %325 = vst.msk [vmem:[#allocation2 + $0x58] sm:$0xff] %vm313_vm3, %v2441_v37  ;;  %v2179_v32 = vor.u32 %v2354_v26, %v2178_v25  ;;  %v2186_v61 = vld [vmem:[%s2506_s7 + $0x1a0] sm:$0xf] }
  0x2e   : > { %326 = vst.msk [vmem:[#allocation2 + $0x60] sm:$0xff] %vm313_vm3, %v2441_v37  ;;  %v447_v25 = vld [vmem:[#allocation2 + $0x28] sm:$0xff] }
  0x2f   : > { %327 = vst.msk [vmem:[#allocation2 + $0x68] sm:$0xff] %vm313_vm3, %v2441_v37 }
  0x30   : > { %328 = vst.msk [vmem:[#allocation2 + $0x70] sm:$0xff] %vm313_vm3, %v2441_v37 }
  0x31   : > { %329 = vst.msk [vmem:[#allocation2 + $0x78] sm:$0xff] %vm313_vm3, %v2441_v37 }
  0x32   : > { %330 = vst.msk [vmem:[#allocation2 + $0x80] sm:$0xff] %vm313_vm3, %v2441_v37 }
  0x33   : > { %331 = vst.msk [vmem:[#allocation2 + $0x88] sm:$0xff] %vm313_vm3, %v2441_v37 }
  0x34   : > { %332 = vst.msk [vmem:[#allocation2 + $0x90] sm:$0xff] %vm313_vm3, %v2441_v37 }
  0x35   : > { %333 = vst.msk [vmem:[#allocation2 + $0x98] sm:$0xff] %vm313_vm3, %v2441_v37 }
  0x36   : > { %334 = vst.msk [vmem:[#allocation2 + $0xa0] sm:$0xff] %vm313_vm3, %v2441_v37 }
  0x37   : > { %335 = vst.msk [vmem:[#allocation2 + $0xa8] sm:$0xff] %vm313_vm3, %v2441_v37 }
  0x38   : > { %336 = vst.msk [vmem:[#allocation2 + $0xb0] sm:$0xff] %vm313_vm3, %v2441_v37 }
  0x39   : > { %337 = vst.msk [vmem:[#allocation2 + $0xb8] sm:$0xff] %vm313_vm3, %v2441_v37 }
  0x3a   : > { %2270 = vmatmul.msk.bf16.gmra.mxu1 %vm870_vm2, %v1999_v38  ;;  %2287 = vmatmul.msk.bf16.gmra.mxu3 %vm870_vm2, %v2135_v43  ;;  %v2154_v38 = vld [vmem:[%s2506_s7 + $0x160] sm:$0xf]  ;;  %v2319_v43 = vld [vmem:[%s2506_s7 + $0x84] sm:$0xf]  ;;  %338 = vst.msk [vmem:[#allocation2 + $0xc0] sm:$0xff] %vm313_vm3, %v2441_v37 }
  0x3b   : > { %v2155_v42 = vor.u32 %v2348_v39, %v2154_v38  ;;  %339 = vst.msk [vmem:[#allocation2 + $0xc8] sm:$0xff] %vm313_vm3, %v2441_v37  ;;  %v443_v38 = vld [vmem:[#allocation2 + $0x8] sm:$0xff] }
  0x3c   : > { %987 = vmatmul.bf16.gmra.mxu0 %v1987_v44  ;;  %1067 = vmatmul.bf16.gmra.mxu2 %v2115_v45  ;;  %v2044_v44 = vld [vmem:[%s2506_s7 + $0x88] sm:$0xf0]  ;;  %340 = vst.msk [vmem:[#allocation2 + $0xd0] sm:$0xff] %vm313_vm3, %v2441_v37 }
  0x3d   : > { %v2047_v45 = vor.u32 %v2319_v43, %v2044_v44  ;;  %341 = vst.msk [vmem:[#allocation2 + $0xd8] sm:$0xff] %vm313_vm3, %v2441_v37 }
  0x3e   : > { %342 = vst.msk [vmem:[#allocation2 + $0xe0] sm:$0xff] %vm313_vm3, %v2441_v37 }
  0x3f   : > { %343 = vst.msk [vmem:[#allocation2 + $0xe8] sm:$0xff] %vm313_vm3, %v2441_v37 }
  0x40   : > { %344 = vst.msk [vmem:[#allocation2 + $0xf0] sm:$0xff] %vm313_vm3, %v2441_v37 }
  0x41   : > { %345 = vst.msk [vmem:[#allocation2 + $0xf8] sm:$0xff] %vm313_vm3, %v2441_v37 }
  0x42   : > { %346 = vst.msk [vmem:[#allocation2 + $0x100] sm:$0xff] %vm313_vm3, %v2441_v37 }
  0x43   : > { %347 = vst.msk [vmem:[#allocation2 + $0x108] sm:$0xff] %vm313_vm3, %v2441_v37 }
  0x44   : > { %348 = vst.msk [vmem:[#allocation2 + $0x110] sm:$0xff] %vm313_vm3, %v2441_v37 }
  0x45   : > { %349 = vst.msk [vmem:[#allocation2 + $0x118] sm:$0xff] %vm313_vm3, %v2441_v37 }
  0x46   : > { %350 = vst.msk [vmem:[#allocation2 + $0x120] sm:$0xff] %vm313_vm3, %v2441_v37 }
  0x47   : > { %351 = vst.msk [vmem:[#allocation2 + $0x128] sm:$0xff] %vm313_vm3, %v2441_v37 }
  0x48   : > { %352 = vst.msk [vmem:[#allocation2 + $0x130] sm:$0xff] %vm313_vm3, %v2441_v37 }
  0x49   : > { %353 = vst.msk [vmem:[#allocation2 + $0x138] sm:$0xff] %vm313_vm3, %v2441_v37 }
  0x4a   : > { %2271 = vmatmul.msk.bf16.gmra.mxu1 %vm870_vm2, %v2007_v50  ;;  %2288 = vmatmul.msk.bf16.gmra.mxu3 %vm870_vm2, %v2143_v55  ;;  %v2350_v50 = vld [vmem:[%s2506_s7 + $0x174] sm:$0xf0]  ;;  %v2052_v55 = vld [vmem:[%s2506_s7 + $0x98] sm:$0xf0]  ;;  %354 = vst.msk [vmem:[#allocation2 + $0x140] sm:$0xff] %vm313_vm3, %v2441_v37 }
  0x4b   : > { %v2163_v52 = vor.u32 %v2350_v50, %v2162_v49  ;;  %v2055_v59 = vor.u32 %v2321_v54, %v2052_v55  ;;  %355 = vst.msk [vmem:[#allocation2 + $0x148] sm:$0xff] %vm313_vm3, %v2441_v37  ;;  %v476_v47 = vld [vmem:[#allocation2 + $0x110] sm:$0xff]  ;;  %v2196_v50 = vld [vmem:[%s2506_s7 + $0x1b8] sm:$0xf0] }
  0x4c   : > { %992 = vmatmul.bf16.gmra.mxu0 %v1995_v56  ;;  %1072 = vmatmul.bf16.gmra.mxu2 %v2123_v57  ;;  %v2353_v56 = vld [vmem:[%s2506_s7 + $0x194] sm:$0xf]  ;;  %v2180_v57 = vld [vmem:[%s2506_s7 + $0x198] sm:$0xf0]  ;;  %356 = vst.msk [vmem:[#allocation2 + $0x150] sm:$0xff] %vm313_vm3, %v2441_v37 }
  0x4d   : > { %v2183_v58 = vor.u32 %v2353_v56, %v2180_v57  ;;  %357 = vst.msk [vmem:[#allocation2 + $0x158] sm:$0xff] %vm313_vm3, %v2441_v37  ;;  %v2357_v49 = vld [vmem:[%s2506_s7 + $0x1b4] sm:$0xf]  ;;  %v2058_v57 = vld [vmem:[%s2506_s7 + $0xa0] sm:$0xf] }
  0x4e   : > { %358 = vst.msk [vmem:[#allocation2 + $0x160] sm:$0xff] %vm313_vm3, %v2441_v37 }
  0x4f   : > { %359 = vst.msk [vmem:[#allocation2 + $0x168] sm:$0xff] %vm313_vm3, %v2441_v37 }
  0x50   : > { %360 = vst.msk [vmem:[#allocation2 + $0x170] sm:$0xff] %vm313_vm3, %v2441_v37 }
  0x51   : > { %361 = vst.msk [vmem:[#allocation2 + $0x178] sm:$0xff] %vm313_vm3, %v2441_v37 }
  0x52   : > { %362 = vst.msk [vmem:[#allocation2 + $0x180] sm:$0xff] %vm313_vm3, %v2441_v37 }
  0x53   : > { %363 = vst.msk [vmem:[#allocation2 + $0x188] sm:$0xff] %vm313_vm3, %v2441_v37 }
  0x54   : > { %364 = vst.msk [vmem:[#allocation2 + $0x190] sm:$0xff] %vm313_vm3, %v2441_v37 }
  0x55   : > { %365 = vst.msk [vmem:[#allocation2 + $0x198] sm:$0xff] %vm313_vm3, %v2441_v37 }
  0x56   : > { %366 = vst.msk [vmem:[#allocation2 + $0x1a0] sm:$0xff] %vm313_vm3, %v2441_v37 }
  0x57   : > { %367 = vst.msk [vmem:[#allocation2 + $0x1a8] sm:$0xff] %vm313_vm3, %v2441_v37 }
  0x58   : > { %368 = vst.msk [vmem:[#allocation2 + $0x1b0] sm:$0xff] %vm313_vm3, %v2441_v37 }
  0x59   : > { %369 = vst.msk [vmem:[#allocation2 + $0x1b8] sm:$0xff] %vm313_vm3, %v2441_v37 }
  0x5a   : > { %2272 = vmatmul.msk.bf16.gmra.mxu1 %vm870_vm2, %v2015_v62  ;;  %2289 = vmatmul.msk.bf16.gmra.mxu3 %vm870_vm2, %v2151_v3  ;;  %v442_v3 = vld [vmem:[#allocation2] sm:$0xff]  ;;  %370 = vst.msk [vmem:[#allocation2 + $0x1c0] sm:$0xff] %vm313_vm3, %v2441_v37 }
  0x5b   : > { %371 = vst.msk [vmem:[#allocation2 + $0x1c8] sm:$0xff] %vm313_vm3, %v2441_v37 }
  0x5c   : > { %997 = vmatmul.bf16.gmra.mxu0 %v2003_v4  ;;  %1077 = vmatmul.bf16.gmra.mxu2 %v2131_v5  ;;  %v2171_v5 = vor.u32 %v2352_v0, %v2170_v63  ;;  %372 = vst.msk [vmem:[#allocation2 + $0x1d0] sm:$0xff] %vm313_vm3, %v2441_v37  ;;  %v477_v63 = vld [vmem:[#allocation2 + $0x118] sm:$0xff] }
  0x5d   : > { %373 = vst.msk [vmem:[#allocation2 + $0x1d8] sm:$0xff] %vm313_vm3, %v2441_v37 }
  0x5e   : > { %374 = vst.msk [vmem:[#allocation2 + $0x1e0] sm:$0xff] %vm313_vm3, %v2441_v37 }
  0x5f   : > { %375 = vst.msk [vmem:[#allocation2 + $0x1e8] sm:$0xff] %vm313_vm3, %v2441_v37 }
  0x60   : > { %376 = vst.msk [vmem:[#allocation2 + $0x1f0] sm:$0xff] %vm313_vm3, %v2441_v37 }
  0x61   : > { %377 = vst.msk [vmem:[#allocation2 + $0x1f8] sm:$0xff] %vm313_vm3, %v2441_v37  ;;  %v446_v37 = vld [vmem:[#allocation2 + $0x20] sm:$0xff] }
  0x6a   : > { %2273 = vmatmul.msk.bf16.gmra.mxu1 %vm870_vm2, %v2023_v10  ;;  %2290 = vmatmul.msk.bf16.gmra.mxu3 %vm870_vm2, %v2159_v15  ;;  %v2355_v15 = vld [vmem:[%s2506_s7 + $0x1a4] sm:$0xf] }
  0x6c   : > { %1002 = vmatmul.bf16.gmra.mxu0 %v2011_v16  ;;  %1082 = vmatmul.bf16.gmra.mxu2 %v2139_v17  ;;  %v2188_v16 = vld [vmem:[%s2506_s7 + $0x1a8] sm:$0xf0] }
  0x6d   : > { %v2191_v17 = vor.u32 %v2355_v15, %v2188_v16 }
  0x7a   : > { %2274 = vmatmul.msk.bf16.gmra.mxu1 %vm870_vm2, %v2031_v22  ;;  %2291 = vmatmul.msk.bf16.gmra.mxu3 %vm870_vm2, %v2167_v27  ;;  %v2322_v22 = vld [vmem:[%s2506_s7 + $0x94] sm:$0xf0] }
  0x7c   : > { %1007 = vmatmul.bf16.gmra.mxu0 %v2019_v28  ;;  %1087 = vmatmul.bf16.gmra.mxu2 %v2147_v29  ;;  %v2051_v29 = vor.u32 %v2322_v22, %v2050_v21 }
  0x8a   : > { %2275 = vmatmul.msk.bf16.gmra.mxu1 %vm870_vm2, %v2039_v34  ;;  %2292 = vmatmul.msk.bf16.gmra.mxu3 %vm870_vm2, %v2175_v40 }
  0x8c   : > { %1012 = vmatmul.bf16.gmra.mxu0 %v2027_v41  ;;  %1092 = vmatmul.bf16.gmra.mxu2 %v2155_v42  ;;  %v444_v42 = vld [vmem:[#allocation2 + $0x10] sm:$0xff] }
  0x97   : > { %v1152_v48 = vpop.f32.mrf.mxu1 }
  0x9a   : > { %2276 = vmatmul.msk.bf16.gmra.mxu1 %vm870_vm2, %v2047_v45  ;;  %2293 = vmatmul.msk.bf16.gmra.mxu3 %vm870_vm2, %v2183_v58  ;;  %v2325_v45 = vld [vmem:[%s2506_s7 + $0xb4] sm:$0xf]  ;;  %v2324_v58 = vld [vmem:[%s2506_s7 + $0xa4] sm:$0xf0] }
  0x9b   : > { %v2071_v56 = vor.u32 %v2325_v45, %v2068_v46  ;;  %v2066_v46 = vld [vmem:[%s2506_s7 + $0xb0] sm:$0xf] }
  0x9c   : > { %1017 = vmatmul.bf16.gmra.mxu0 %v2035_v51  ;;  %1097 = vmatmul.bf16.gmra.mxu2 %v2163_v52  ;;  %v445_v52 = vld [vmem:[#allocation2 + $0x18] sm:$0xff] }
  0x9d   : > { %v2691_v2 = vpop.f32.mrf.mxu3 }
  0x9f   : > { %v2656_v53 = vpop.f32.mrf.mxu1 }
  0xa5   : > { %v2718_v11 = vpop.f32.mrf.mxu3 }
  0xa7   : > { %v2681_v62 = vpop.f32.mrf.mxu1 }
  0xa9   : > { %v983_v4 = vpop.f32.mrf.mxu0 }
  0xaa   : > { %2277 = vmatmul.msk.bf16.gmra.mxu1 %vm870_vm2, %v2055_v59  ;;  %v1153_v6 = vadd.f32 %v1152_v48, %v983_v4  ;;  %2294 = vmatmul.msk.bf16.gmra.mxu3 %vm870_vm2, %v2191_v17  ;;  %v478_v17 = vld [vmem:[#allocation2 + $0x120] sm:$0xff] }
  0xac   : > { %v1312_v7 = vadd.f32 %v1153_v6, %v442_v3  ;;  %1022 = vmatmul.bf16.gmra.mxu0 %v2043_v1  ;;  %1102 = vmatmul.bf16.gmra.mxu2 %v2171_v5  ;;  %v2059_v1 = vor.u32 %v2324_v58, %v2058_v57  ;;  %v2358_v57 = vld [vmem:[%s2506_s7 + $0x1b4] sm:$0xf0] }
  0xad   : > { %v2757_v30 = vpop.f32.mrf.mxu3 }
  0xae   : > { %1377 = vst.msk [vmem:[#allocation2] sm:$0xff] %vm313_vm3, %v1312_v7 }
  0xaf   : > { %v2705_v8 = vpop.f32.mrf.mxu1  ;;  %v2716_v10 = vpop.f32.mrf.mxu2 }
  0xb1   : > { %v985_v12 = vpop.f32.mrf.mxu0 }
  0xb2   : > { %v1155_v36 = vadd.f32 %v2656_v53, %v985_v12  ;;  %v2199_v53 = vor.u32 %v2357_v49, %v2196_v50 }
  0xb4   : > { %v1313_v51 = vadd.f32 %v1155_v36, %v443_v38  ;;  %v2204_v36 = vld [vmem:[%s2506_s7 + $0x1c8] sm:$0xf0] }
  0xb5   : > { %v1444_v19 = vld [vmem:[#allocation2] sm:$0xff]  ;;  %v2785_v41 = vpop.f32.mrf.mxu3 }
  0xb6   : > { %v1512_v23 = vmul.f32 %v2712_v9, %v1444_v19  ;;  %1378 = vst.msk [vmem:[#allocation2 + $0x8] sm:$0xff] %vm313_vm3, %v1313_v51  ;;  %v2326_v51 = vld [vmem:[%s2506_s7 + $0xb4] sm:$0xf0] }
  0xb7   : > { %v2745_v24 = vpop.f32.mrf.mxu1  ;;  %v2755_v28 = vpop.f32.mrf.mxu2 }
  0xb8   : > { %v1580_v27 = vadd.f32 %v2733_v18, %v1512_v23 }
  0xb9   : > { %v988_v31 = vpop.f32.mrf.mxu0 }
  0xba   : > { %2278 = vmatmul.msk.bf16.gmra.mxu1 %vm870_vm2, %v2063_v20  ;;  %v1644_v33 = vmax.f32 %v1580_v27, 0.0  ;;  %v1158_v39 = vadd.f32 %v2681_v62, %v988_v31  ;;  %2295 = vmatmul.msk.bf16.gmra.mxu3 %vm870_vm2, %v2199_v53  ;;  %v2356_v62 = vld [vmem:[%s2506_s7 + $0x1a4] sm:$0xf0]  ;;  %v2327_v27 = vld [vmem:[%s2506_s7 + $0xc4] sm:$0xf] }
  0xbb   : > { %v2187_v5 = vor.u32 %v2356_v62, %v2186_v61 }
  0xbc   : > { %v1708_v34 = vpack.c.bf16 %v1644_v33, %v1644_v33  ;;  %1027 = vmatmul.bf16.gmra.mxu0 %v2051_v29  ;;  %1107 = vmatmul.bf16.gmra.mxu2 %v2179_v32  ;;  %v1314_v54 = vadd.f32 %v1158_v39, %v444_v42  ;;  %v2076_v33 = vld [vmem:[%s2506_s7 + $0xc8] sm:$0xf0] }
  0xbd   : > { %v1445_v12 = vld [vmem:[#allocation2 + $0x8] sm:$0xff]  ;;  %v2079_v50 = vor.u32 %v2327_v27, %v2076_v33  ;;  %v2329_v33 = vld [vmem:[%s2506_s7 + $0xd4] sm:$0xf] }
  0xbe   : > { %1773 = vst.msk [vmem:[%s2767_s28] sm:$0xf] %vm1772_vm4, %v1708_v34  ;;  %v1513_v13 = vmul.f32 %v2712_v9, %v1445_v12  ;;  %v2359_v34 = vld [vmem:[%s2506_s7 + $0x1c4] sm:$0xf] }
  0xbf   : > { %v2777_v35 = vpop.f32.mrf.mxu1  ;;  %v1068_v40 = vpop.f32.mrf.mxu2  ;;  %1379 = vst.msk [vmem:[#allocation2 + $0x10] sm:$0xff] %vm313_vm3, %v1314_v54  ;;  %v2207_v42 = vor.u32 %v2359_v34, %v2204_v36  ;;  %v2084_v34 = vld [vmem:[%s2506_s7 + $0xd8] sm:$0xf0] }
  0xc0   : > { %v1238_v43 = vadd.f32 %v2691_v2, %v1068_v40  ;;  %v2814_v2 = vpop.f32.mrf.mxu3  ;;  %v1581_v21 = vadd.f32 %v2733_v18, %v1513_v13 }
  0xc1   : > { %v990_v44 = vpop.f32.mrf.mxu0 }
  0xc2   : > { %v1160_v48 = vadd.f32 %v2705_v8, %v990_v44  ;;  %v1346_v55 = vadd.f32 %v1238_v43, %v476_v47  ;;  %v1645_v38 = vmax.f32 %v1581_v21, 0.0 }
  0xc4   : > { %v1315_v59 = vadd.f32 %v1160_v48, %v445_v52  ;;  %1411 = vst.msk [vmem:[#allocation2 + $0x110] sm:$0xff] %vm313_vm3, %v1346_v55  ;;  %v1709_v47 = vpack.c.bf16 %v1645_v38, %v1645_v38 }
  0xc6   : > { %1380 = vst.msk [vmem:[#allocation2 + $0x18] sm:$0xff] %vm313_vm3, %v1315_v59  ;;  %v1446_v14 = vld [vmem:[#allocation2 + $0x10] sm:$0xff] }
  0xc7   : > { %v2808_v60 = vpop.f32.mrf.mxu1  ;;  %v1070_v0 = vpop.f32.mrf.mxu2  ;;  %v1514_v15 = vmul.f32 %v2712_v9, %v1446_v14  ;;  %1774 = vst.msk [vmem:[%s2767_s28 + $0x4] sm:$0xf] %vm1772_vm4, %v1709_v47  ;;  %v2328_v47 = vld [vmem:[%s2506_s7 + $0xc4] sm:$0xf0] }
  0xc8   : > { %v1240_v3 = vadd.f32 %v2718_v11, %v1070_v0  ;;  %v2827_v20 = vpop.f32.mrf.mxu3 }
  0xc9   : > { %v993_v4 = vpop.f32.mrf.mxu0  ;;  %v1582_v29 = vadd.f32 %v2733_v18, %v1514_v15 }
  0xca   : > { %2279 = vmatmul.msk.bf16.gmra.mxu1 %vm870_vm2, %v2071_v56  ;;  %v1163_v6 = vadd.f32 %v2745_v24, %v993_v4  ;;  %v1347_v7 = vadd.f32 %v1240_v3, %v477_v63  ;;  %2296 = vmatmul.msk.bf16.gmra.mxu3 %vm870_vm2, %v2207_v42  ;;  %v2194_v56 = vld [vmem:[%s2506_s7 + $0x1b0] sm:$0xf]  ;;  %v479_v63 = vld [vmem:[#allocation2 + $0x128] sm:$0xff] }
  0xcb   : > { %v1478_v16 = vld [vmem:[#allocation2 + $0x110] sm:$0xff] }
  0xcc   : > { %v1316_v8 = vadd.f32 %v1163_v6, %v446_v37  ;;  %1032 = vmatmul.bf16.gmra.mxu0 %v2059_v1  ;;  %1412 = vst.msk [vmem:[#allocation2 + $0x118] sm:$0xff] %vm313_vm3, %v1347_v7  ;;  %1112 = vmatmul.bf16.gmra.mxu2 %v2187_v5  ;;  %v1546_v22 = vmul.f32 %v2712_v9, %v1478_v16  ;;  %v448_v5 = vld [vmem:[#allocation2 + $0x30] sm:$0xff] }
  0xcd   : > { %v1447_v23 = vld [vmem:[#allocation2 + $0x18] sm:$0xff]  ;;  %v2067_v1 = vor.u32 %v2326_v51, %v2066_v46  ;;  %v2195_v7 = vor.u32 %v2358_v57, %v2194_v56  ;;  %v2074_v46 = vld [vmem:[%s2506_s7 + $0xc0] sm:$0xf] }
  0xce   : > { %1381 = vst.msk [vmem:[#allocation2 + $0x20] sm:$0xff] %vm313_vm3, %v1316_v8  ;;  %v1515_v31 = vmul.f32 %v2712_v9, %v1447_v23  ;;  %v1614_v39 = vadd.f32 %v2733_v18, %v1546_v22  ;;  %v2075_v56 = vor.u32 %v2328_v47, %v2074_v46  ;;  %v2362_v47 = vld [vmem:[%s2506_s7 + $0x1d4] sm:$0xf0] }
  0xcf   : > { %v2823_v11 = vpop.f32.mrf.mxu1  ;;  %v1073_v19 = vpop.f32.mrf.mxu2 }
  0xd0   : > { %v1243_v24 = vadd.f32 %v2757_v30, %v1073_v19  ;;  %v1646_v30 = vmax.f32 %v1582_v29, 0.0  ;;  %v1583_v43 = vadd.f32 %v2733_v18, %v1515_v31  ;;  %v2858_v3 = vpop.f32.mrf.mxu3  ;;  %v449_v31 = vld [vmem:[#allocation2 + $0x38] sm:$0xff] }
  0xd1   : > { %v995_v26 = vpop.f32.mrf.mxu0 }
  0xd2   : > { %v1165_v32 = vadd.f32 %v2777_v35, %v995_v26  ;;  %v1348_v40 = vadd.f32 %v1243_v24, %v478_v17  ;;  %v1678_v35 = vmax.f32 %v1614_v39, 0.0  ;;  %v1710_v52 = vpack.c.bf16 %v1646_v30, %v1646_v30  ;;  %v480_v24 = vld [vmem:[#allocation2 + $0x130] sm:$0xff] }
  0xd3   : > { %v1479_v44 = vld [vmem:[#allocation2 + $0x118] sm:$0xff]  ;;  %v1647_v53 = vmax.f32 %v1583_v43, 0.0  ;;  %v2361_v39 = vld [vmem:[%s2506_s7 + $0x1d4] sm:$0xf] }
  0xd4   : > { %v1317_v45 = vadd.f32 %v1165_v32, %v447_v25  ;;  %v1547_v48 = vmul.f32 %v2712_v9, %v1479_v44  ;;  %1413 = vst.msk [vmem:[#allocation2 + $0x120] sm:$0xff] %vm313_vm3, %v1348_v40  ;;  %v1742_v58 = vpack.c.bf16 %v1678_v35, %v1678_v35  ;;  %v2212_v40 = vld [vmem:[%s2506_s7 + $0x1d8] sm:$0xf0]  ;;  %v2202_v35 = vld [vmem:[%s2506_s7 + $0x1c0] sm:$0xf] }
  0xd5   : > { %v1448_v49 = vld [vmem:[#allocation2 + $0x20] sm:$0xff]  ;;  %1775 = vst.msk [vmem:[%s2767_s28 + $0x8] sm:$0xf] %vm1772_vm4, %v1710_v52  ;;  %v1711_v61 = vpack.c.bf16 %v1647_v53, %v1647_v53  ;;  %v2215_v43 = vor.u32 %v2361_v39, %v2212_v40  ;;  %v481_v53 = vld [vmem:[#allocation2 + $0x138] sm:$0xff] }
  0xd6   : > { %v1516_v54 = vmul.f32 %v2712_v9, %v1448_v49  ;;  %1382 = vst.msk [vmem:[#allocation2 + $0x28] sm:$0xff] %vm313_vm3, %v1317_v45  ;;  %v1615_v59 = vadd.f32 %v2733_v18, %v1547_v48  ;;  %v2360_v49 = vld [vmem:[%s2506_s7 + $0x1c4] sm:$0xf0] }
  0xd7   : > { %v2848_v55 = vpop.f32.mrf.mxu1  ;;  %v1075_v0 = vpop.f32.mrf.mxu2  ;;  %1807 = vst.msk [vmem:[%s2767_s28 + $0x88] sm:$0xf] %vm1772_vm4, %v1742_v58 }
  0xd8   : > { %v1584_v62 = vadd.f32 %v2733_v18, %v1516_v54  ;;  %v1679_v37 = vmax.f32 %v1615_v59, 0.0  ;;  %v1245_v4 = vadd.f32 %v2785_v41, %v1075_v0  ;;  %1776 = vst.msk [vmem:[%s2767_s28 + $0xc] sm:$0xf] %vm1772_vm4, %v1711_v61  ;;  %v2879_v26 = vpop.f32.mrf.mxu3  ;;  %v450_v61 = vld [vmem:[#allocation2 + $0x40] sm:$0xff] }
  0xd9   : > { %v998_v6 = vpop.f32.mrf.mxu0 }
  0xda   : > { %2280 = vmatmul.msk.bf16.gmra.mxu1 %vm870_vm2, %v2079_v50  ;;  %v1648_v8 = vmax.f32 %v1584_v62, 0.0  ;;  %v1168_v12 = vadd.f32 %v2808_v60, %v998_v6  ;;  %v1743_v13 = vpack.c.bf16 %v1679_v37, %v1679_v37  ;;  %v1349_v14 = vadd.f32 %v1245_v4, %v479_v63  ;;  %2297 = vmatmul.msk.bf16.gmra.mxu3 %vm870_vm2, %v2215_v43  ;;  %v2330_v43 = vld [vmem:[%s2506_s7 + $0xd4] sm:$0xf0] }
  0xdb   : > { %v1480_v16 = vld [vmem:[#allocation2 + $0x120] sm:$0xff]  ;;  %v2203_v63 = vor.u32 %v2360_v49, %v2202_v35  ;;  %v483_v49 = vld [vmem:[#allocation2 + $0x148] sm:$0xff] }
  0xdc   : > { %v1712_v15 = vpack.c.bf16 %v1648_v8, %v1648_v8  ;;  %v1318_v17 = vadd.f32 %v1168_v12, %v448_v5  ;;  %1037 = vmatmul.bf16.gmra.mxu0 %v2067_v1  ;;  %1808 = vst.msk [vmem:[%s2767_s28 + $0x8c] sm:$0xf] %vm1772_vm4, %v1743_v13  ;;  %v1548_v41 = vmul.f32 %v2712_v9, %v1480_v16 }
  0xdd   : > { %v1449_v19 = vld [vmem:[#allocation2 + $0x28] sm:$0xff]  ;;  %1117 = vmatmul.bf16.gmra.mxu2 %v2195_v7  ;;  %1414 = vst.msk [vmem:[#allocation2 + $0x128] sm:$0xff] %vm313_vm3, %v1349_v14 }
  0xde   : > { %1777 = vst.msk [vmem:[%s2767_s28 + $0x10] sm:$0xf] %vm1772_vm4, %v1712_v15  ;;  %v1517_v21 = vmul.f32 %v2712_v9, %v1449_v19  ;;  %v1616_v60 = vadd.f32 %v2733_v18, %v1548_v41  ;;  %v482_v15 = vld [vmem:[#allocation2 + $0x140] sm:$0xff] }
  0xdf   : > { %v2873_v22 = vpop.f32.mrf.mxu1  ;;  %1383 = vst.msk [vmem:[#allocation2 + $0x30] sm:$0xff] %vm313_vm3, %v1318_v17  ;;  %v1078_v25 = vpop.f32.mrf.mxu2 }
  0xe0   : > { %v1585_v23 = vadd.f32 %v2733_v18, %v1517_v21  ;;  %v1680_v27 = vmax.f32 %v1616_v60, 0.0  ;;  %v1248_v29 = vadd.f32 %v2814_v2, %v1078_v25  ;;  %v2087_v2 = vor.u32 %v2329_v33, %v2084_v34  ;;  %v2902_v57 = vpop.f32.mrf.mxu3  ;;  %v451_v21 = vld [vmem:[#allocation2 + $0x48] sm:$0xff] }
  0xe1   : > { %v1000_v32 = vpop.f32.mrf.mxu0 }
  0xe2   : > { %v1649_v36 = vmax.f32 %v1585_v23, 0.0  ;;  %v1170_v38 = vadd.f32 %v2823_v11, %v1000_v32  ;;  %v1744_v42 = vpack.c.bf16 %v1680_v27, %v1680_v27  ;;  %v1350_v30 = vadd.f32 %v1248_v29, %v480_v24  ;;  %v2331_v23 = vld [vmem:[%s2506_s7 + $0xe4] sm:$0xf]  ;;  %v2092_v27 = vld [vmem:[%s2506_s7 + $0xe8] sm:$0xf0] }
  0xe3   : > { %v2363_v29 = vld [vmem:[%s2506_s7 + $0x1e4] sm:$0xf] }
  0xe4   : > { %v1713_v44 = vpack.c.bf16 %v1649_v36, %v1649_v36  ;;  %v1319_v45 = vadd.f32 %v1170_v38, %v449_v31  ;;  %1809 = vst.msk [vmem:[%s2767_s28 + $0x90] sm:$0xf] %vm1772_vm4, %v1744_v42  ;;  %v1481_v48 = vld [vmem:[#allocation2 + $0x128] sm:$0xff] }
  0xe5   : > { %v1549_v50 = vmul.f32 %v2712_v9, %v1481_v48  ;;  %1415 = vst.msk [vmem:[#allocation2 + $0x130] sm:$0xff] %vm313_vm3, %v1350_v30  ;;  %v2220_v31 = vld [vmem:[%s2506_s7 + $0x1e8] sm:$0xf0]  ;;  %v2082_v30 = vld [vmem:[%s2506_s7 + $0xd0] sm:$0xf] }
  0xe6   : > { %1778 = vst.msk [vmem:[%s2767_s28 + $0x14] sm:$0xf] %vm1772_vm4, %v1713_v44  ;;  %v1450_v51 = vld [vmem:[#allocation2 + $0x30] sm:$0xff]  ;;  %v2223_v34 = vor.u32 %v2363_v29, %v2220_v31 }
  0xe7   : > { %v2895_v11 = vpop.f32.mrf.mxu1  ;;  %v1518_v52 = vmul.f32 %v2712_v9, %v1450_v51  ;;  %1384 = vst.msk [vmem:[#allocation2 + $0x38] sm:$0xff] %vm313_vm3, %v1319_v45  ;;  %v1080_v54 = vpop.f32.mrf.mxu2  ;;  %v1617_v58 = vadd.f32 %v2733_v18, %v1549_v50  ;;  %v2083_v51 = vor.u32 %v2330_v43, %v2082_v30  ;;  %v485_v30 = vld [vmem:[#allocation2 + $0x158] sm:$0xff] }
  0xe8   : > { %v1250_v59 = vadd.f32 %v2827_v20, %v1080_v54  ;;  %v2919_v17 = vpop.f32.mrf.mxu3 }
  0xe9   : > { %v1003_v62 = vpop.f32.mrf.mxu0  ;;  %v1586_v0 = vadd.f32 %v2733_v18, %v1518_v52  ;;  %v1681_v37 = vmax.f32 %v1617_v58, 0.0 }
  0xea   : > { %2281 = vmatmul.msk.bf16.gmra.mxu1 %vm870_vm2, %v2087_v2  ;;  %v1173_v1 = vadd.f32 %v2848_v55, %v1003_v62  ;;  %v1351_v4 = vadd.f32 %v1250_v59, %v481_v53  ;;  %2298 = vmatmul.msk.bf16.gmra.mxu3 %vm870_vm2, %v2223_v34  ;;  %v2210_v2 = vld [vmem:[%s2506_s7 + $0x1d0] sm:$0xf]  ;;  %v2090_v34 = vld [vmem:[%s2506_s7 + $0xe0] sm:$0xf] }
  0xeb   : > { %v1650_v5 = vmax.f32 %v1586_v0, 0.0  ;;  %v1745_v7 = vpack.c.bf16 %v1681_v37, %v1681_v37  ;;  %v2211_v59 = vor.u32 %v2362_v47, %v2210_v2 }
  0xec   : > { %v1320_v6 = vadd.f32 %v1173_v1, %v450_v61  ;;  %1042 = vmatmul.bf16.gmra.mxu0 %v2075_v56  ;;  %1416 = vst.msk [vmem:[#allocation2 + $0x138] sm:$0xff] %vm313_vm3, %v1351_v4  ;;  %v1482_v8 = vld [vmem:[#allocation2 + $0x130] sm:$0xff] }
  0xed   : > { %1122 = vmatmul.bf16.gmra.mxu2 %v2203_v63  ;;  %v1714_v20 = vpack.c.bf16 %v1650_v5, %v1650_v5  ;;  %1810 = vst.msk [vmem:[%s2767_s28 + $0x94] sm:$0xf] %vm1772_vm4, %v1745_v7  ;;  %v1550_v55 = vmul.f32 %v2712_v9, %v1482_v8  ;;  %v452_v56 = vld [vmem:[#allocation2 + $0x50] sm:$0xff] }
  0xee   : > { %1385 = vst.msk [vmem:[#allocation2 + $0x40] sm:$0xff] %vm313_vm3, %v1320_v6  ;;  %v1451_v13 = vld [vmem:[#allocation2 + $0x38] sm:$0xff]  ;;  %v484_v8 = vld [vmem:[#allocation2 + $0x150] sm:$0xff] }
  0xef   : > { %v2911_v12 = vpop.f32.mrf.mxu1  ;;  %1779 = vst.msk [vmem:[%s2767_s28 + $0x18] sm:$0xf] %vm1772_vm4, %v1714_v20  ;;  %v1519_v14 = vmul.f32 %v2712_v9, %v1451_v13  ;;  %v1083_v16 = vpop.f32.mrf.mxu2  ;;  %v1618_v41 = vadd.f32 %v2733_v18, %v1550_v55 }
  0xf0   : > { %v1253_v19 = vadd.f32 %v2858_v3, %v1083_v16  ;;  %v2946_v52 = vpop.f32.mrf.mxu3  ;;  %v453_v16 = vld [vmem:[#allocation2 + $0x58] sm:$0xff] }
  0xf1   : > { %v1005_v60 = vpop.f32.mrf.mxu0  ;;  %v1587_v24 = vadd.f32 %v2733_v18, %v1519_v14  ;;  %v1682_v32 = vmax.f32 %v1618_v41, 0.0 }
  0xf2   : > { %v1175_v25 = vadd.f32 %v2873_v22, %v1005_v60  ;;  %v1352_v33 = vadd.f32 %v1253_v19, %v482_v15  ;;  %v2095_v22 = vor.u32 %v2331_v23, %v2092_v27  ;;  %v2333_v19 = vld [vmem:[%s2506_s7 + $0xf4] sm:$0xf] }
  0xf3   : > { %v1651_v36 = vmax.f32 %v1587_v24, 0.0  ;;  %v1483_v38 = vld [vmem:[#allocation2 + $0x138] sm:$0xff]  ;;  %v1746_v39 = vpack.c.bf16 %v1682_v32, %v1682_v32  ;;  %v2365_v24 = vld [vmem:[%s2506_s7 + $0x1f4] sm:$0xf] }
  0xf4   : > { %v1321_v3 = vadd.f32 %v1175_v25, %v451_v21  ;;  %v1551_v40 = vmul.f32 %v2712_v9, %v1483_v38  ;;  %1417 = vst.msk [vmem:[#allocation2 + $0x140] sm:$0xff] %vm313_vm3, %v1352_v33  ;;  %v2100_v21 = vld [vmem:[%s2506_s7 + $0xf8] sm:$0xf0]  ;;  %v2218_v38 = vld [vmem:[%s2506_s7 + $0x1e0] sm:$0xf] }
  0xf5   : > { %v1452_v42 = vld [vmem:[#allocation2 + $0x40] sm:$0xff]  ;;  %v1715_v44 = vpack.c.bf16 %v1651_v36, %v1651_v36  ;;  %1811 = vst.msk [vmem:[%s2767_s28 + $0x98] sm:$0xf] %vm1772_vm4, %v1746_v39  ;;  %v2228_v25 = vld [vmem:[%s2506_s7 + $0x1f8] sm:$0xf0] }
  0xf6   : > { %v1520_v45 = vmul.f32 %v2712_v9, %v1452_v42  ;;  %1386 = vst.msk [vmem:[#allocation2 + $0x48] sm:$0xff] %vm313_vm3, %v1321_v3  ;;  %v1619_v35 = vadd.f32 %v2733_v18, %v1551_v40  ;;  %v2231_v31 = vor.u32 %v2365_v24, %v2228_v25  ;;  %v2332_v36 = vld [vmem:[%s2506_s7 + $0xe4] sm:$0xf0]  ;;  %v2098_v25 = vld [vmem:[%s2506_s7 + $0xf0] sm:$0xf] }
  0xf7   : > { %v2936_v46 = vpop.f32.mrf.mxu1  ;;  %1780 = vst.msk [vmem:[%s2767_s28 + $0x1c] sm:$0xf] %vm1772_vm4, %v1715_v44  ;;  %v1085_v50 = vpop.f32.mrf.mxu2  ;;  %v2364_v39 = vld [vmem:[%s2506_s7 + $0x1e4] sm:$0xf0]  ;;  %v2091_v44 = vor.u32 %v2332_v36, %v2090_v34 }
  0xf8   : > { %v1588_v48 = vadd.f32 %v2733_v18, %v1520_v45  ;;  %v1683_v53 = vmax.f32 %v1619_v35, 0.0  ;;  %v1255_v54 = vadd.f32 %v2879_v26, %v1085_v50  ;;  %v2963_v13 = vpop.f32.mrf.mxu3  ;;  %v454_v35 = vld [vmem:[#allocation2 + $0x60] sm:$0xff]  ;;  %v487_v36 = vld [vmem:[#allocation2 + $0x168] sm:$0xff] }
  0xf9   : > { %v1008_v58 = vpop.f32.mrf.mxu0 }
  0xfa   : > { %2282 = vmatmul.msk.bf16.gmra.mxu1 %vm870_vm2, %v2095_v22  ;;  %v1652_v61 = vmax.f32 %v1588_v48, 0.0  ;;  %v1178_v62 = vadd.f32 %v2895_v11, %v1008_v58  ;;  %v1747_v63 = vpack.c.bf16 %v1683_v53, %v1683_v53  ;;  %v1353_v0 = vadd.f32 %v1255_v54, %v483_v49  ;;  %2299 = vmatmul.msk.bf16.gmra.mxu3 %vm870_vm2, %v2231_v31 }
  0xfb   : > { %v1484_v37 = vld [vmem:[#allocation2 + $0x140] sm:$0xff]  ;;  %v2219_v49 = vor.u32 %v2364_v39, %v2218_v38 }
  0xfc   : > { %v1716_v1 = vpack.c.bf16 %v1652_v61, %v1652_v61  ;;  %v1322_v4 = vadd.f32 %v1178_v62, %v452_v56  ;;  %1047 = vmatmul.bf16.gmra.mxu0 %v2083_v51  ;;  %1812 = vst.msk [vmem:[%s2767_s28 + $0x9c] sm:$0xf] %vm1772_vm4, %v1747_v63  ;;  %v1552_v5 = vmul.f32 %v2712_v9, %v1484_v37 }
  0xfd   : > { %v1453_v26 = vld [vmem:[#allocation2 + $0x48] sm:$0xff]  ;;  %1127 = vmatmul.bf16.gmra.mxu2 %v2211_v59  ;;  %1418 = vst.msk [vmem:[#allocation2 + $0x148] sm:$0xff] %vm313_vm3, %v1353_v0 }
  0xfe   : > { %1781 = vst.msk [vmem:[%s2767_s28 + $0x20] sm:$0xf] %vm1772_vm4, %v1716_v1  ;;  %v1521_v6 = vmul.f32 %v2712_v9, %v1453_v26  ;;  %v1620_v11 = vadd.f32 %v2733_v18, %v1552_v5  ;;  %v486_v1 = vld [vmem:[#allocation2 + $0x160] sm:$0xff] }
  0xff   : > { %v2957_v7 = vpop.f32.mrf.mxu1  ;;  %1387 = vst.msk [vmem:[#allocation2 + $0x50] sm:$0xff] %vm313_vm3, %v1322_v4  ;;  %v1088_v55 = vpop.f32.mrf.mxu2 }
 0x100   : > { %v1589_v20 = vadd.f32 %v2733_v18, %v1521_v6  ;;  %v1684_v14 = vmax.f32 %v1620_v11, 0.0  ;;  %v1258_v15 = vadd.f32 %v2902_v57, %v1088_v55  ;;  %v2103_v57 = vor.u32 %v2333_v19, %v2100_v21  ;;  %v2986_v45 = vpop.f32.mrf.mxu3  ;;  %v455_v6 = vld [vmem:[#allocation2 + $0x68] sm:$0xff]  ;;  %v2335_v55 = vld [vmem:[%s2506_s7 + $0x104] sm:$0xf] }
 0x101   : > { %v1010_v41 = vpop.f32.mrf.mxu0 }
 0x102   : > { %v1653_v60 = vmax.f32 %v1589_v20, 0.0  ;;  %v1180_v23 = vadd.f32 %v2911_v12, %v1010_v41  ;;  %v1748_v27 = vpack.c.bf16 %v1684_v14, %v1684_v14  ;;  %v1354_v29 = vadd.f32 %v1258_v15, %v484_v8  ;;  %v2108_v14 = vld [vmem:[%s2506_s7 + $0x108] sm:$0xf0] }
 0x103   : > { %v2111_v24 = vor.u32 %v2335_v55, %v2108_v14 }
 0x104   : > { %v1717_v32 = vpack.c.bf16 %v1653_v60, %v1653_v60  ;;  %v1323_v33 = vadd.f32 %v1180_v23, %v453_v16  ;;  %1813 = vst.msk [vmem:[%s2767_s28 + $0xa0] sm:$0xf] %vm1772_vm4, %v1748_v27  ;;  %v1485_v3 = vld [vmem:[#allocation2 + $0x148] sm:$0xff] }
 0x105   : > { %v1553_v40 = vmul.f32 %v2712_v9, %v1485_v3  ;;  %1419 = vst.msk [vmem:[#allocation2 + $0x150] sm:$0xff] %vm313_vm3, %v1354_v29 }
 0x106   : > { %1782 = vst.msk [vmem:[%s2767_s28 + $0x24] sm:$0xf] %vm1772_vm4, %v1717_v32  ;;  %v1454_v42 = vld [vmem:[#allocation2 + $0x50] sm:$0xff] }
 0x107   : > { %v2979_v12 = vpop.f32.mrf.mxu1  ;;  %v1522_v22 = vmul.f32 %v2712_v9, %v1454_v42  ;;  %1388 = vst.msk [vmem:[#allocation2 + $0x58] sm:$0xff] %vm313_vm3, %v1323_v33  ;;  %v1090_v43 = vpop.f32.mrf.mxu2  ;;  %v1621_v2 = vadd.f32 %v2733_v18, %v1553_v40  ;;  %v2226_v32 = vld [vmem:[%s2506_s7 + $0x1f0] sm:$0xf]  ;;  %v2366_v33 = vld [vmem:[%s2506_s7 + $0x1f4] sm:$0xf0] }
 0x108   : > { %v1260_v47 = vadd.f32 %v2919_v17, %v1090_v43  ;;  %v3003_v4 = vpop.f32.mrf.mxu3  ;;  %v2227_v43 = vor.u32 %v2366_v33, %v2226_v32 }
 0x109   : > { %v1013_v48 = vpop.f32.mrf.mxu0  ;;  %v1590_v50 = vadd.f32 %v2733_v18, %v1522_v22  ;;  %v1685_v53 = vmax.f32 %v1621_v2, 0.0  ;;  %v456_v22 = vld [vmem:[#allocation2 + $0x70] sm:$0xff] }
 0x10a   : > { %2283 = vmatmul.msk.bf16.gmra.mxu1 %vm870_vm2, %v2103_v57  ;;  %v1183_v51 = vadd.f32 %v2936_v46, %v1013_v48  ;;  %v1355_v54 = vadd.f32 %v1260_v47, %v485_v30 }
 0x10b   : > { %v1654_v56 = vmax.f32 %v1590_v50, 0.0  ;;  %v1749_v59 = vpack.c.bf16 %v1685_v53, %v1685_v53 }
 0x10c   : > { %v1324_v58 = vadd.f32 %v1183_v51, %v454_v35  ;;  %1052 = vmatmul.bf16.gmra.mxu0 %v2091_v44  ;;  %1420 = vst.msk [vmem:[#allocation2 + $0x158] sm:$0xff] %vm313_vm3, %v1355_v54  ;;  %v1486_v61 = vld [vmem:[#allocation2 + $0x150] sm:$0xff] }
 0x10d   : > { %1132 = vmatmul.bf16.gmra.mxu2 %v2219_v49  ;;  %v1718_v17 = vpack.c.bf16 %v1654_v56, %v1654_v56  ;;  %1814 = vst.msk [vmem:[%s2767_s28 + $0xa4] sm:$0xf] %vm1772_vm4, %v1749_v59  ;;  %v1554_v46 = vmul.f32 %v2712_v9, %v1486_v61 }
 0x10e   : > { %1389 = vst.msk [vmem:[#allocation2 + $0x60] sm:$0xff] %vm313_vm3, %v1324_v58  ;;  %v1455_v63 = vld [vmem:[#allocation2 + $0x58] sm:$0xff]  ;;  %v488_v58 = vld [vmem:[#allocation2 + $0x170] sm:$0xff] }
 0x10f   : > { %v2995_v62 = vpop.f32.mrf.mxu1  ;;  %1783 = vst.msk [vmem:[%s2767_s28 + $0x28] sm:$0xf] %vm1772_vm4, %v1718_v17  ;;  %v1523_v0 = vmul.f32 %v2712_v9, %v1455_v63  ;;  %v1093_v37 = vpop.f32.mrf.mxu2  ;;  %v1622_v5 = vadd.f32 %v2733_v18, %v1554_v46  ;;  %v457_v63 = vld [vmem:[#allocation2 + $0x78] sm:$0xff] }
 0x110   : > { %v1263_v26 = vadd.f32 %v2946_v52, %v1093_v37  ;;  %v3027_v39 = vpop.f32.mrf.mxu3 }
 0x111   : > { %v1015_v11 = vpop.f32.mrf.mxu0  ;;  %v1591_v20 = vadd.f32 %v2733_v18, %v1523_v0  ;;  %v1686_v15 = vmax.f32 %v1622_v5, 0.0 }
 0x112   : > { %v1185_v8 = vadd.f32 %v2957_v7, %v1015_v11  ;;  %v1356_v16 = vadd.f32 %v1263_v26, %v486_v1  ;;  %v2334_v7 = vld [vmem:[%s2506_s7 + $0xf4] sm:$0xf0] }
 0x113   : > { %v1655_v41 = vmax.f32 %v1591_v20, 0.0  ;;  %v1487_v19 = vld [vmem:[#allocation2 + $0x158] sm:$0xff]  ;;  %v1750_v52 = vpack.c.bf16 %v1686_v15, %v1686_v15  ;;  %v2099_v3 = vor.u32 %v2334_v7, %v2098_v25 }
 0x114   : > { %v1325_v21 = vadd.f32 %v1185_v8, %v455_v6  ;;  %v1555_v60 = vmul.f32 %v2712_v9, %v1487_v19  ;;  %1421 = vst.msk [vmem:[#allocation2 + $0x160] sm:$0xff] %vm313_vm3, %v1356_v16 }
 0x115   : > { %v1456_v23 = vld [vmem:[#allocation2 + $0x60] sm:$0xff]  ;;  %v1719_v27 = vpack.c.bf16 %v1655_v41, %v1655_v41  ;;  %1815 = vst.msk [vmem:[%s2767_s28 + $0xa8] sm:$0xf] %vm1772_vm4, %v1750_v52 }
 0x116   : > { %v1524_v29 = vmul.f32 %v2712_v9, %v1456_v23  ;;  %1390 = vst.msk [vmem:[#allocation2 + $0x68] sm:$0xff] %vm313_vm3, %v1325_v21  ;;  %v1623_v34 = vadd.f32 %v2733_v18, %v1555_v60  ;;  %v458_v21 = vld [vmem:[#allocation2 + $0x80] sm:$0xff] }
 0x117   : > { %v3017_v31 = vpop.f32.mrf.mxu1  ;;  %1784 = vst.msk [vmem:[%s2767_s28 + $0x2c] sm:$0xf] %vm1772_vm4, %v1719_v27  ;;  %v1095_v38 = vpop.f32.mrf.mxu2 }
 0x118   : > { %v1592_v57 = vadd.f32 %v2733_v18, %v1524_v29  ;;  %v1687_v40 = vmax.f32 %v1623_v34, 0.0  ;;  %v1265_v42 = vadd.f32 %v2963_v13, %v1095_v38  ;;  %v3042_v17 = vpop.f32.mrf.mxu3 }
 0x119   : > { %v1018_v30 = vpop.f32.mrf.mxu0 }
 0x11a   : > { %2284 = vmatmul.msk.bf16.gmra.mxu1 %vm870_vm2, %v2111_v24  ;;  %v1656_v44 = vmax.f32 %v1592_v57, 0.0  ;;  %v1188_v2 = vadd.f32 %v2979_v12, %v1018_v30  ;;  %v1751_v47 = vpack.c.bf16 %v1687_v40, %v1687_v40  ;;  %v1357_v35 = vadd.f32 %v1265_v42, %v487_v36  ;;  %v490_v36 = vld [vmem:[#allocation2 + $0x180] sm:$0xff] }
 0x11b   : > { %v1488_v49 = vld [vmem:[#allocation2 + $0x160] sm:$0xff] }
 0x11c   : > { %v1720_v48 = vpack.c.bf16 %v1656_v44, %v1656_v44  ;;  %v1326_v50 = vadd.f32 %v1188_v2, %v456_v22  ;;  %1057 = vmatmul.bf16.gmra.mxu0 %v2099_v3  ;;  %1816 = vst.msk [vmem:[%s2767_s28 + $0xac] sm:$0xf] %vm1772_vm4, %v1751_v47  ;;  %v1556_v51 = vmul.f32 %v2712_v9, %v1488_v49  ;;  %v459_v22 = vld [vmem:[#allocation2 + $0x88] sm:$0xff] }
 0x11d   : > { %v1457_v13 = vld [vmem:[#allocation2 + $0x68] sm:$0xff]  ;;  %1137 = vmatmul.bf16.gmra.mxu2 %v2227_v43  ;;  %1422 = vst.msk [vmem:[#allocation2 + $0x168] sm:$0xff] %vm313_vm3, %v1357_v35 }
 0x11e   : > { %1785 = vst.msk [vmem:[%s2767_s28 + $0x30] sm:$0xf] %vm1772_vm4, %v1720_v48  ;;  %v1525_v53 = vmul.f32 %v2712_v9, %v1457_v13  ;;  %v1624_v56 = vadd.f32 %v2733_v18, %v1556_v51 }
 0x11f   : > { %v1194_v54 = vpop.f32.mrf.mxu1  ;;  %1391 = vst.msk [vmem:[#allocation2 + $0x70] sm:$0xff] %vm313_vm3, %v1326_v50  ;;  %v1098_v59 = vpop.f32.mrf.mxu2 }
 0x120   : > { %v1593_v12 = vadd.f32 %v2733_v18, %v1525_v53  ;;  %v1688_v61 = vmax.f32 %v1624_v56, 0.0  ;;  %v1268_v46 = vadd.f32 %v2986_v45, %v1098_v59  ;;  %v3056_v16 = vpop.f32.mrf.mxu3 }
 0x121   : > { %v1020_v0 = vpop.f32.mrf.mxu0 }
 0x122   : > { %v1657_v1 = vmax.f32 %v1593_v12, 0.0  ;;  %v1190_v37 = vadd.f32 %v2995_v62, %v1020_v0  ;;  %v1752_v5 = vpack.c.bf16 %v1688_v61, %v1688_v61  ;;  %v1358_v26 = vadd.f32 %v1268_v46, %v488_v58  ;;  %v489_v62 = vld [vmem:[#allocation2 + $0x178] sm:$0xff]  ;;  %v491_v58 = vld [vmem:[#allocation2 + $0x188] sm:$0xff] }
 0x124   : > { %v1721_v6 = vpack.c.bf16 %v1657_v1, %v1657_v1  ;;  %v1327_v11 = vadd.f32 %v1190_v37, %v457_v63  ;;  %1817 = vst.msk [vmem:[%s2767_s28 + $0xb0] sm:$0xf] %vm1772_vm4, %v1752_v5  ;;  %v1489_v20 = vld [vmem:[#allocation2 + $0x168] sm:$0xff]  ;;  %v460_v63 = vld [vmem:[#allocation2 + $0x90] sm:$0xff] }
 0x125   : > { %v1557_v55 = vmul.f32 %v2712_v9, %v1489_v20  ;;  %1423 = vst.msk [vmem:[#allocation2 + $0x170] sm:$0xff] %vm313_vm3, %v1358_v26 }
 0x126   : > { %1786 = vst.msk [vmem:[%s2767_s28 + $0x34] sm:$0xf] %vm1772_vm4, %v1721_v6  ;;  %v1458_v14 = vld [vmem:[#allocation2 + $0x70] sm:$0xff] }
 0x127   : > { %v3050_v8 = vpop.f32.mrf.mxu1  ;;  %v1526_v45 = vmul.f32 %v2712_v9, %v1458_v14  ;;  %1392 = vst.msk [vmem:[#allocation2 + $0x78] sm:$0xff] %vm313_vm3, %v1327_v11  ;;  %v1100_v15 = vpop.f32.mrf.mxu2  ;;  %v1625_v41 = vadd.f32 %v2733_v18, %v1557_v55 }
 0x128   : > { %v1270_v19 = vadd.f32 %v3003_v4, %v1100_v15  ;;  %v3072_v3 = vpop.f32.mrf.mxu3 }
 0x129   : > { %v1023_v52 = vpop.f32.mrf.mxu0  ;;  %v1594_v60 = vadd.f32 %v2733_v18, %v1526_v45  ;;  %v1689_v24 = vmax.f32 %v1625_v41, 0.0  ;;  %v3105_v45 = vld [vmem:[%s3307_s3] ss:$0 sm:$0xff]  ;;  %v492_v41 = vld [vmem:[#allocation2 + $0x190] sm:$0xff] }
 0x12a   : > { %v1193_v23 = vadd.f32 %v3017_v31, %v1023_v52  ;;  %v1359_v25 = vadd.f32 %v1270_v19, %v489_v62 }
 0x12b   : > { %v1658_v7 = vmax.f32 %v1594_v60, 0.0  ;;  %v1753_v29 = vpack.c.bf16 %v1689_v24, %v1689_v24  ;;  %v461_v60 = vld [vmem:[#allocation2 + $0x98] sm:$0xff] }
 0x12c   : > { %v1328_v27 = vadd.f32 %v1193_v23, %v458_v21  ;;  %1424 = vst.msk [vmem:[#allocation2 + $0x178] sm:$0xff] %vm313_vm3, %v1359_v25  ;;  %v1490_v33 = vld [vmem:[#allocation2 + $0x170] sm:$0xff] }
 0x12d   : > { %v1722_v32 = vpack.c.bf16 %v1658_v7, %v1658_v7  ;;  %1818 = vst.msk [vmem:[%s2767_s28 + $0xb4] sm:$0xf] %vm1772_vm4, %v1753_v29  ;;  %v1558_v4 = vmul.f32 %v2712_v9, %v1490_v33 }
 0x12e   : > { %1393 = vst.msk [vmem:[#allocation2 + $0x80] sm:$0xff] %vm313_vm3, %v1328_v27  ;;  %v1459_v57 = vld [vmem:[#allocation2 + $0x78] sm:$0xff] }
 0x12f   : > { %v3064_v34 = vpop.f32.mrf.mxu1  ;;  %1787 = vst.msk [vmem:[%s2767_s28 + $0x38] sm:$0xf] %vm1772_vm4, %v1722_v32  ;;  %v1527_v31 = vmul.f32 %v2712_v9, %v1459_v57  ;;  %v1103_v38 = vpop.f32.mrf.mxu2  ;;  %v1626_v40 = vadd.f32 %v2733_v18, %v1558_v4 }
 0x130   : > { %v1273_v42 = vadd.f32 %v3027_v39, %v1103_v38  ;;  %v3089_v37 = vpop.f32.mrf.mxu3 }
 0x131   : > { %v1025_v30 = vpop.f32.mrf.mxu0  ;;  %v1595_v43 = vadd.f32 %v2733_v18, %v1527_v31  ;;  %v1690_v2 = vmax.f32 %v1626_v40, 0.0 }
 0x132   : > { %v1195_v44 = vadd.f32 %v1194_v54, %v1025_v30  ;;  %v1360_v47 = vadd.f32 %v1273_v42, %v490_v36  ;;  %v493_v36 = vld [vmem:[#allocation2 + $0x198] sm:$0xff] }
 0x133   : > { %v1659_v35 = vmax.f32 %v1595_v43, 0.0  ;;  %v1491_v48 = vld [vmem:[#allocation2 + $0x178] sm:$0xff]  ;;  %v1754_v50 = vpack.c.bf16 %v1690_v2, %v1690_v2 }
 0x134   : > { %v1329_v49 = vadd.f32 %v1195_v44, %v459_v22  ;;  %v1559_v51 = vmul.f32 %v2712_v9, %v1491_v48  ;;  %1425 = vst.msk [vmem:[#allocation2 + $0x180] sm:$0xff] %vm313_vm3, %v1360_v47  ;;  %v462_v22 = vld [vmem:[#allocation2 + $0xa0] sm:$0xff] }
 0x135   : > { %v1460_v13 = vld [vmem:[#allocation2 + $0x80] sm:$0xff]  ;;  %v1723_v53 = vpack.c.bf16 %v1659_v35, %v1659_v35  ;;  %1819 = vst.msk [vmem:[%s2767_s28 + $0xb8] sm:$0xf] %vm1772_vm4, %v1754_v50 }
 0x136   : > { %v1528_v39 = vmul.f32 %v2712_v9, %v1460_v13  ;;  %1394 = vst.msk [vmem:[#allocation2 + $0x88] sm:$0xff] %vm313_vm3, %v1329_v49  ;;  %v1627_v54 = vadd.f32 %v2733_v18, %v1559_v51 }
 0x137   : > { %v1202_v56 = vpop.f32.mrf.mxu1  ;;  %1788 = vst.msk [vmem:[%s2767_s28 + $0x3c] sm:$0xf] %vm1772_vm4, %v1723_v53  ;;  %v1105_v59 = vpop.f32.mrf.mxu2 }
 0x138   : > { %v1596_v12 = vadd.f32 %v2733_v18, %v1528_v39  ;;  %v1691_v61 = vmax.f32 %v1627_v54, 0.0  ;;  %v1275_v46 = vadd.f32 %v3042_v17, %v1105_v59  ;;  %v3096_v18 = vld [vmem:[%s3306_s2] ss:$0 sm:$0xff]  ;;  %v3113_v33 = vpop.f32.mrf.mxu3 }
 0x139   : > { %v1028_v9 = vpop.f32.mrf.mxu0  ;;  %v494_v54 = vld [vmem:[#allocation2 + $0x1a0] sm:$0xff] }
 0x13a   : > { %v1660_v0 = vmax.f32 %v1596_v12, 0.0  ;;  %v1198_v1 = vadd.f32 %v3050_v8, %v1028_v9  ;;  %v1755_v5 = vpack.c.bf16 %v1691_v61, %v1691_v61  ;;  %v1361_v26 = vadd.f32 %v1275_v46, %v491_v58  ;;  %v463_v61 = vld [vmem:[#allocation2 + $0xa8] sm:$0xff] }
 0x13b   : > { %v1492_v11 = vld [vmem:[#allocation2 + $0x180] sm:$0xff] }
 0x13c   : > { %v1724_v6 = vpack.c.bf16 %v1660_v0, %v1660_v0  ;;  %v1330_v20 = vadd.f32 %v1198_v1, %v460_v63  ;;  %1820 = vst.msk [vmem:[%s2767_s28 + $0xbc] sm:$0xf] %vm1772_vm4, %v1755_v5  ;;  %v1560_v17 = vmul.f32 %v3096_v18, %v1492_v11 }
 0x13d   : > { %v1461_v55 = vld [vmem:[#allocation2 + $0x88] sm:$0xff]  ;;  %1426 = vst.msk [vmem:[#allocation2 + $0x188] sm:$0xff] %vm313_vm3, %v1361_v26 }
 0x13e   : > { %1789 = vst.msk [vmem:[%s2767_s28 + $0x40] sm:$0xf] %vm1772_vm4, %v1724_v6  ;;  %v1529_v8 = vmul.f32 %v3096_v18, %v1461_v55  ;;  %v1628_v62 = vadd.f32 %v3105_v45, %v1560_v17 }
 0x13f   : > { %v1204_v14 = vpop.f32.mrf.mxu1  ;;  %1395 = vst.msk [vmem:[#allocation2 + $0x90] sm:$0xff] %vm313_vm3, %v1330_v20  ;;  %v1108_v19 = vpop.f32.mrf.mxu2 }
 0x140   : > { %v1597_v15 = vadd.f32 %v3105_v45, %v1529_v8  ;;  %v1692_v21 = vmax.f32 %v1628_v62, 0.0  ;;  %v1278_v52 = vadd.f32 %v3056_v16, %v1108_v19 }
 0x141   : > { %v1030_v23 = vpop.f32.mrf.mxu0 }
 0x142   : > { %v1661_v24 = vmax.f32 %v1597_v15, 0.0  ;;  %v1200_v25 = vadd.f32 %v3064_v34, %v1030_v23  ;;  %v1756_v7 = vpack.c.bf16 %v1692_v21, %v1692_v21  ;;  %v1362_v27 = vadd.f32 %v1278_v52, %v492_v41  ;;  %v495_v15 = vld [vmem:[#allocation2 + $0x1a8] sm:$0xff] }
 0x144   : > { %v1725_v29 = vpack.c.bf16 %v1661_v24, %v1661_v24  ;;  %v1331_v32 = vadd.f32 %v1200_v25, %v461_v60  ;;  %1821 = vst.msk [vmem:[%s2767_s28 + $0xc0] sm:$0xf] %vm1772_vm4, %v1756_v7  ;;  %v1493_v4 = vld [vmem:[#allocation2 + $0x188] sm:$0xff]  ;;  %v464_v60 = vld [vmem:[#allocation2 + $0xb0] sm:$0xff] }
 0x145   : > { %v1561_v16 = vmul.f32 %v3096_v18, %v1493_v4  ;;  %1427 = vst.msk [vmem:[#allocation2 + $0x190] sm:$0xff] %vm313_vm3, %v1362_v27 }
 0x146   : > { %1790 = vst.msk [vmem:[%s2767_s28 + $0x44] sm:$0xf] %vm1772_vm4, %v1725_v29  ;;  %v1462_v31 = vld [vmem:[#allocation2 + $0x90] sm:$0xff] }
 0x147   : > { %v3119_v57 = vpop.f32.mrf.mxu1  ;;  %v1530_v34 = vmul.f32 %v3096_v18, %v1462_v31  ;;  %1396 = vst.msk [vmem:[#allocation2 + $0x98] sm:$0xff] %vm313_vm3, %v1331_v32  ;;  %v1110_v38 = vpop.f32.mrf.mxu2  ;;  %v1629_v40 = vadd.f32 %v3105_v45, %v1561_v16 }
 0x148   : > { %v1280_v42 = vadd.f32 %v3072_v3, %v1110_v38  ;;  %v1287_v3 = vpop.f32.mrf.mxu3  ;;  %v496_v38 = vld [vmem:[#allocation2 + $0x1b0] sm:$0xff] }
 0x149   : > { %v1033_v30 = vpop.f32.mrf.mxu0  ;;  %v1598_v43 = vadd.f32 %v3105_v45, %v1530_v34  ;;  %v1693_v2 = vmax.f32 %v1629_v40, 0.0 }
 0x14a   : > { %v1203_v44 = vadd.f32 %v1202_v56, %v1033_v30  ;;  %v1363_v47 = vadd.f32 %v1280_v42, %v493_v36  ;;  %v465_v30 = vld [vmem:[#allocation2 + $0xb8] sm:$0xff] }
 0x14b   : > { %v1662_v35 = vmax.f32 %v1598_v43, 0.0  ;;  %v1757_v49 = vpack.c.bf16 %v1693_v2, %v1693_v2 }
 0x14c   : > { %v1332_v48 = vadd.f32 %v1203_v44, %v462_v22  ;;  %1428 = vst.msk [vmem:[#allocation2 + $0x198] sm:$0xff] %vm313_vm3, %v1363_v47  ;;  %v1494_v51 = vld [vmem:[#allocation2 + $0x190] sm:$0xff] }
 0x14d   : > { %v1726_v50 = vpack.c.bf16 %v1662_v35, %v1662_v35  ;;  %1822 = vst.msk [vmem:[%s2767_s28 + $0xc4] sm:$0xf] %vm1772_vm4, %v1757_v49  ;;  %v1562_v53 = vmul.f32 %v3096_v18, %v1494_v51 }
 0x14e   : > { %1397 = vst.msk [vmem:[#allocation2 + $0xa0] sm:$0xff] %vm313_vm3, %v1332_v48  ;;  %v1463_v39 = vld [vmem:[#allocation2 + $0x98] sm:$0xff] }
 0x14f   : > { %v3130_v13 = vpop.f32.mrf.mxu1  ;;  %1791 = vst.msk [vmem:[%s2767_s28 + $0x48] sm:$0xf] %vm1772_vm4, %v1726_v50  ;;  %v1531_v56 = vmul.f32 %v3096_v18, %v1463_v39  ;;  %v1113_v12 = vpop.f32.mrf.mxu2  ;;  %v1630_v58 = vadd.f32 %v3105_v45, %v1562_v53 }
 0x150   : > { %v1283_v59 = vadd.f32 %v3089_v37, %v1113_v12  ;;  %v1289_v19 = vpop.f32.mrf.mxu3 }
 0x151   : > { %v1035_v46 = vpop.f32.mrf.mxu0  ;;  %v1599_v63 = vadd.f32 %v3105_v45, %v1531_v56  ;;  %v1694_v0 = vmax.f32 %v1630_v58, 0.0 }
 0x152   : > { %v1205_v9 = vadd.f32 %v1204_v14, %v1035_v46  ;;  %v1364_v1 = vadd.f32 %v1283_v59, %v494_v54  ;;  %v466_v59 = vld [vmem:[#allocation2 + $0xc0] sm:$0xff] }
 0x153   : > { %v1663_v5 = vmax.f32 %v1599_v63, 0.0  ;;  %v1495_v26 = vld [vmem:[#allocation2 + $0x198] sm:$0xff]  ;;  %v1758_v11 = vpack.c.bf16 %v1694_v0, %v1694_v0 }
 0x154   : > { %v1333_v6 = vadd.f32 %v1205_v9, %v463_v61  ;;  %v1563_v20 = vmul.f32 %v3096_v18, %v1495_v26  ;;  %1429 = vst.msk [vmem:[#allocation2 + $0x1a0] sm:$0xff] %vm313_vm3, %v1364_v1 }
 0x155   : > { %v1464_v17 = vld [vmem:[#allocation2 + $0xa0] sm:$0xff]  ;;  %v1727_v55 = vpack.c.bf16 %v1663_v5, %v1663_v5  ;;  %1823 = vst.msk [vmem:[%s2767_s28 + $0xc8] sm:$0xf] %vm1772_vm4, %v1758_v11 }
 0x156   : > { %v1532_v37 = vmul.f32 %v3096_v18, %v1464_v17  ;;  %1398 = vst.msk [vmem:[#allocation2 + $0xa8] sm:$0xff] %vm313_vm3, %v1333_v6  ;;  %v1631_v14 = vadd.f32 %v3105_v45, %v1563_v20 }
 0x157   : > { %v1212_v8 = vpop.f32.mrf.mxu1  ;;  %1792 = vst.msk [vmem:[%s2767_s28 + $0x4c] sm:$0xf] %vm1772_vm4, %v1727_v55  ;;  %v1115_v41 = vpop.f32.mrf.mxu2 }
 0x158   : > { %v1600_v62 = vadd.f32 %v3105_v45, %v1532_v37  ;;  %v1695_v21 = vmax.f32 %v1631_v14, 0.0  ;;  %v1285_v52 = vadd.f32 %v3113_v33, %v1115_v41  ;;  %v1292_v47 = vpop.f32.mrf.mxu3  ;;  %v498_v14 = vld [vmem:[#allocation2 + $0x1c0] sm:$0xff] }
 0x159   : > { %v1038_v23 = vpop.f32.mrf.mxu0 }
 0x15a   : > { %v1664_v24 = vmax.f32 %v1600_v62, 0.0  ;;  %v1208_v25 = vadd.f32 %v3119_v57, %v1038_v23  ;;  %v1759_v7 = vpack.c.bf16 %v1695_v21, %v1695_v21  ;;  %v1365_v27 = vadd.f32 %v1285_v52, %v495_v15 }
 0x15b   : > { %v1496_v32 = vld [vmem:[#allocation2 + $0x1a0] sm:$0xff] }
 0x15c   : > { %v1728_v29 = vpack.c.bf16 %v1664_v24, %v1664_v24  ;;  %v1334_v4 = vadd.f32 %v1208_v25, %v464_v60  ;;  %1824 = vst.msk [vmem:[%s2767_s28 + $0xcc] sm:$0xf] %vm1772_vm4, %v1759_v7  ;;  %v1564_v16 = vmul.f32 %v3096_v18, %v1496_v32 }
 0x15d   : > { %v1465_v31 = vld [vmem:[#allocation2 + $0xa8] sm:$0xff]  ;;  %1430 = vst.msk [vmem:[#allocation2 + $0x1a8] sm:$0xff] %vm313_vm3, %v1365_v27 }
 0x15e   : > { %1793 = vst.msk [vmem:[%s2767_s28 + $0x50] sm:$0xf] %vm1772_vm4, %v1728_v29  ;;  %v1533_v34 = vmul.f32 %v3096_v18, %v1465_v31  ;;  %v1632_v36 = vadd.f32 %v3105_v45, %v1564_v16 }
 0x15f   : > { %v1214_v33 = vpop.f32.mrf.mxu1  ;;  %1399 = vst.msk [vmem:[#allocation2 + $0xb0] sm:$0xff] %vm313_vm3, %v1334_v4 }
 0x160   : > { %v1601_v57 = vadd.f32 %v3105_v45, %v1533_v34  ;;  %v1118_v40 = vpop.f32.mrf.mxu2  ;;  %v1696_v42 = vmax.f32 %v1632_v36, 0.0  ;;  %v1294_v26 = vpop.f32.mrf.mxu3 }
 0x161   : > { %v1288_v22 = vadd.f32 %v1287_v3, %v1118_v40  ;;  %v1040_v43 = vpop.f32.mrf.mxu0 }
 0x162   : > { %v1665_v44 = vmax.f32 %v1601_v57, 0.0  ;;  %v1210_v2 = vadd.f32 %v3130_v13, %v1040_v43  ;;  %v1760_v35 = vpack.c.bf16 %v1696_v42, %v1696_v42  ;;  %v497_v13 = vld [vmem:[#allocation2 + $0x1b8] sm:$0xff] }
 0x163   : > { %v1366_v48 = vadd.f32 %v1288_v22, %v496_v38  ;;  %v499_v38 = vld [vmem:[#allocation2 + $0x1c8] sm:$0xff] }
 0x164   : > { %v1729_v49 = vpack.c.bf16 %v1665_v44, %v1665_v44  ;;  %v1335_v50 = vadd.f32 %v1210_v2, %v465_v30  ;;  %1825 = vst.msk [vmem:[%s2767_s28 + $0xd0] sm:$0xf] %vm1772_vm4, %v1760_v35  ;;  %v1497_v51 = vld [vmem:[#allocation2 + $0x1a8] sm:$0xff]  ;;  %v468_v30 = vld [vmem:[#allocation2 + $0xd0] sm:$0xff] }
 0x165   : > { %v1565_v39 = vmul.f32 %v3096_v18, %v1497_v51  ;;  %1431 = vst.msk [vmem:[#allocation2 + $0x1b0] sm:$0xff] %vm313_vm3, %v1366_v48 }
 0x166   : > { %1794 = vst.msk [vmem:[%s2767_s28 + $0x54] sm:$0xf] %vm1772_vm4, %v1729_v49  ;;  %v1466_v3 = vld [vmem:[#allocation2 + $0xb0] sm:$0xff] }
 0x167   : > { %v3168_v53 = vpop.f32.mrf.mxu1  ;;  %v1534_v56 = vmul.f32 %v3096_v18, %v1466_v3  ;;  %1400 = vst.msk [vmem:[#allocation2 + $0xb8] sm:$0xff] %vm313_vm3, %v1335_v50  ;;  %v1633_v12 = vadd.f32 %v3105_v45, %v1565_v39 }
 0x168   : > { %v1120_v54 = vpop.f32.mrf.mxu2  ;;  %v1297_v36 = vpop.f32.mrf.mxu3 }
 0x169   : > { %v1290_v58 = vadd.f32 %v1289_v19, %v1120_v54  ;;  %v1043_v61 = vpop.f32.mrf.mxu0  ;;  %v1602_v46 = vadd.f32 %v3105_v45, %v1534_v56  ;;  %v1697_v9 = vmax.f32 %v1633_v12, 0.0  ;;  %v467_v19 = vld [vmem:[#allocation2 + $0xc8] sm:$0xff]  ;;  %v500_v54 = vld [vmem:[#allocation2 + $0x1d0] sm:$0xff] }
 0x16a   : > { %v1213_v63 = vadd.f32 %v1212_v8, %v1043_v61 }
 0x16b   : > { %v1367_v0 = vadd.f32 %v1290_v58, %v497_v13  ;;  %v1666_v1 = vmax.f32 %v1602_v46, 0.0  ;;  %v1761_v6 = vpack.c.bf16 %v1697_v9, %v1697_v9  ;;  %v469_v46 = vld [vmem:[#allocation2 + $0xd8] sm:$0xff] }
 0x16c   : > { %v1336_v5 = vadd.f32 %v1213_v63, %v466_v59  ;;  %v1498_v20 = vld [vmem:[#allocation2 + $0x1b0] sm:$0xff] }
 0x16d   : > { %1432 = vst.msk [vmem:[#allocation2 + $0x1b8] sm:$0xff] %vm313_vm3, %v1367_v0  ;;  %v1730_v11 = vpack.c.bf16 %v1666_v1, %v1666_v1  ;;  %v1566_v55 = vmul.f32 %v3096_v18, %v1498_v20 }
 0x16e   : > { %1401 = vst.msk [vmem:[#allocation2 + $0xc0] sm:$0xff] %vm313_vm3, %v1336_v5  ;;  %v1467_v37 = vld [vmem:[#allocation2 + $0xb8] sm:$0xff] }
 0x16f   : > { %v3178_v17 = vpop.f32.mrf.mxu1  ;;  %1826 = vst.msk [vmem:[%s2767_s28 + $0xd4] sm:$0xf] %vm1772_vm4, %v1761_v6  ;;  %v1535_v8 = vmul.f32 %v3096_v18, %v1467_v37  ;;  %v1634_v15 = vadd.f32 %v3105_v45, %v1566_v55 }
 0x170   : > { %1795 = vst.msk [vmem:[%s2767_s28 + $0x58] sm:$0xf] %vm1772_vm4, %v1730_v11  ;;  %v1123_v62 = vpop.f32.mrf.mxu2  ;;  %v1299_v58 = vpop.f32.mrf.mxu3 }
 0x171   : > { %v1293_v41 = vadd.f32 %v1292_v47, %v1123_v62  ;;  %v1045_v21 = vpop.f32.mrf.mxu0  ;;  %v1603_v52 = vadd.f32 %v3105_v45, %v1535_v8  ;;  %v1698_v23 = vmax.f32 %v1634_v15, 0.0 }
 0x172   : > { %v1215_v60 = vadd.f32 %v1214_v33, %v1045_v21 }
 0x173   : > { %v1368_v24 = vadd.f32 %v1293_v41, %v498_v14  ;;  %v1667_v25 = vmax.f32 %v1603_v52, 0.0  ;;  %v1762_v29 = vpack.c.bf16 %v1698_v23, %v1698_v23  ;;  %v470_v41 = vld [vmem:[#allocation2 + $0xe0] sm:$0xff] }
 0x174   : > { %v1499_v7 = vld [vmem:[#allocation2 + $0x1b8] sm:$0xff]  ;;  %v1337_v27 = vadd.f32 %v1215_v60, %v467_v19 }
 0x175   : > { %v1567_v32 = vmul.f32 %v3096_v18, %v1499_v7  ;;  %v1468_v4 = vld [vmem:[#allocation2 + $0xc0] sm:$0xff]  ;;  %1433 = vst.msk [vmem:[#allocation2 + $0x1c0] sm:$0xff] %vm313_vm3, %v1368_v24  ;;  %v1731_v16 = vpack.c.bf16 %v1667_v25, %v1667_v25 }
 0x176   : > { %v1536_v31 = vmul.f32 %v3096_v18, %v1468_v4  ;;  %1402 = vst.msk [vmem:[#allocation2 + $0xc8] sm:$0xff] %vm313_vm3, %v1337_v27 }
 0x177   : > { %v1222_v34 = vpop.f32.mrf.mxu1  ;;  %1827 = vst.msk [vmem:[%s2767_s28 + $0xd8] sm:$0xf] %vm1772_vm4, %v1762_v29  ;;  %v1635_v33 = vadd.f32 %v3105_v45, %v1567_v32 }
 0x178   : > { %1796 = vst.msk [vmem:[%s2767_s28 + $0x5c] sm:$0xf] %vm1772_vm4, %v1731_v16  ;;  %v1604_v57 = vadd.f32 %v3105_v45, %v1536_v31  ;;  %v1125_v40 = vpop.f32.mrf.mxu2  ;;  %v1302_v52 = vpop.f32.mrf.mxu3 }
 0x179   : > { %v1699_v42 = vmax.f32 %v1635_v33, 0.0  ;;  %v1295_v22 = vadd.f32 %v1294_v26, %v1125_v40  ;;  %v1048_v43 = vpop.f32.mrf.mxu0  ;;  %v471_v40 = vld [vmem:[#allocation2 + $0xe8] sm:$0xff] }
 0x17a   : > { %v1668_v44 = vmax.f32 %v1604_v57, 0.0  ;;  %v1218_v2 = vadd.f32 %v3168_v53, %v1048_v43 }
 0x17b   : > { %v1763_v47 = vpack.c.bf16 %v1699_v42, %v1699_v42  ;;  %v1369_v35 = vadd.f32 %v1295_v22, %v499_v38 }
 0x17c   : > { %v1732_v48 = vpack.c.bf16 %v1668_v44, %v1668_v44  ;;  %v1500_v49 = vld [vmem:[#allocation2 + $0x1c0] sm:$0xff]  ;;  %v1338_v50 = vadd.f32 %v1218_v2, %v468_v30 }
 0x17d   : > { %1828 = vst.msk [vmem:[%s2767_s28 + $0xdc] sm:$0xf] %vm1772_vm4, %v1763_v47  ;;  %v1568_v51 = vmul.f32 %v3096_v18, %v1500_v49  ;;  %v1469_v39 = vld [vmem:[#allocation2 + $0xc8] sm:$0xff] }
 0x17e   : > { %1797 = vst.msk [vmem:[%s2767_s28 + $0x60] sm:$0xf] %vm1772_vm4, %v1732_v48  ;;  %v1537_v3 = vmul.f32 %v3096_v18, %v1469_v39 }
 0x17f   : > { %v1224_v56 = vpop.f32.mrf.mxu1  ;;  %v1636_v13 = vadd.f32 %v3105_v45, %v1568_v51  ;;  %1434 = vst.msk [vmem:[#allocation2 + $0x1c8] sm:$0xff] %vm313_vm3, %v1369_v35 }
 0x180   : > { %v1605_v53 = vadd.f32 %v3105_v45, %v1537_v3  ;;  %1403 = vst.msk [vmem:[#allocation2 + $0xd0] sm:$0xff] %vm313_vm3, %v1338_v50  ;;  %v1128_v12 = vpop.f32.mrf.mxu2  ;;  %v1304_v35 = vpop.f32.mrf.mxu3 }
 0x181   : > { %v1700_v59 = vmax.f32 %v1636_v13, 0.0  ;;  %v1298_v61 = vadd.f32 %v1297_v36, %v1128_v12  ;;  %v1050_v63 = vpop.f32.mrf.mxu0  ;;  %v502_v36 = vld [vmem:[#allocation2 + $0x1e0] sm:$0xff] }
 0x182   : > { %v1669_v9 = vmax.f32 %v1605_v53, 0.0  ;;  %v1220_v0 = vadd.f32 %v3178_v17, %v1050_v63  ;;  %v501_v17 = vld [vmem:[#allocation2 + $0x1d8] sm:$0xff] }
 0x183   : > { %v1764_v1 = vpack.c.bf16 %v1700_v59, %v1700_v59  ;;  %v1370_v5 = vadd.f32 %v1298_v61, %v500_v54 }
 0x184   : > { %v1733_v26 = vpack.c.bf16 %v1669_v9, %v1669_v9  ;;  %v1339_v6 = vadd.f32 %v1220_v0, %v469_v46  ;;  %v472_v9 = vld [vmem:[#allocation2 + $0xf0] sm:$0xff] }
 0x185   : > { %1829 = vst.msk [vmem:[%s2767_s28 + $0xe0] sm:$0xf] %vm1772_vm4, %v1764_v1 }
 0x186   : > { %1798 = vst.msk [vmem:[%s2767_s28 + $0x64] sm:$0xf] %vm1772_vm4, %v1733_v26  ;;  %v1501_v11 = vld [vmem:[#allocation2 + $0x1c8] sm:$0xff] }
 0x187   : > { %v3214_v20 = vpop.f32.mrf.mxu1  ;;  %v1569_v55 = vmul.f32 %v3096_v18, %v1501_v11  ;;  %v1470_v37 = vld [vmem:[#allocation2 + $0xd0] sm:$0xff]  ;;  %1435 = vst.msk [vmem:[#allocation2 + $0x1d0] sm:$0xff] %vm313_vm3, %v1370_v5 }
 0x188   : > { %v1538_v8 = vmul.f32 %v3096_v18, %v1470_v37  ;;  %1404 = vst.msk [vmem:[#allocation2 + $0xd8] sm:$0xff] %vm313_vm3, %v1339_v6  ;;  %v1130_v14 = vpop.f32.mrf.mxu2 }
 0x189   : > { %v1637_v62 = vadd.f32 %v3105_v45, %v1569_v55  ;;  %v1300_v15 = vadd.f32 %v1299_v58, %v1130_v14  ;;  %v1053_v19 = vpop.f32.mrf.mxu0  ;;  %v503_v58 = vld [vmem:[#allocation2 + $0x1e8] sm:$0xff]  ;;  %v1307_v14 = vpop.f32.mrf.mxu3 }
 0x18a   : > { %v1606_v21 = vadd.f32 %v3105_v45, %v1538_v8  ;;  %v1223_v60 = vadd.f32 %v1222_v34, %v1053_v19 }
 0x18b   : > { %v1701_v23 = vmax.f32 %v1637_v62, 0.0  ;;  %v1371_v24 = vadd.f32 %v1300_v15, %v501_v17  ;;  %v475_v62 = vld [vmem:[#allocation2 + $0x108] sm:$0xff] }
 0x18c   : > { %v1670_v25 = vmax.f32 %v1606_v21, 0.0  ;;  %v1340_v7 = vadd.f32 %v1223_v60, %v470_v41  ;;  %v504_v21 = vld [vmem:[#allocation2 + $0x1f0] sm:$0xff] }
 0x18d   : > { %v1765_v27 = vpack.c.bf16 %v1701_v23, %v1701_v23  ;;  %1436 = vst.msk [vmem:[#allocation2 + $0x1d8] sm:$0xff] %vm313_vm3, %v1371_v24 }
 0x18e   : > { %v1734_v29 = vpack.c.bf16 %v1670_v25, %v1670_v25  ;;  %v1502_v32 = vld [vmem:[#allocation2 + $0x1d0] sm:$0xff]  ;;  %1405 = vst.msk [vmem:[#allocation2 + $0xe0] sm:$0xff] %vm313_vm3, %v1340_v7  ;;  %v473_v25 = vld [vmem:[#allocation2 + $0xf8] sm:$0xff] }
 0x18f   : > { %v3224_v4 = vpop.f32.mrf.mxu1  ;;  %1830 = vst.msk [vmem:[%s2767_s28 + $0xe4] sm:$0xf] %vm1772_vm4, %v1765_v27  ;;  %v1570_v16 = vmul.f32 %v3096_v18, %v1502_v32  ;;  %v1471_v31 = vld [vmem:[#allocation2 + $0xd8] sm:$0xff] }
 0x190   : > { %1799 = vst.msk [vmem:[%s2767_s28 + $0x68] sm:$0xf] %vm1772_vm4, %v1734_v29  ;;  %v1539_v34 = vmul.f32 %v3096_v18, %v1471_v31  ;;  %v1133_v33 = vpop.f32.mrf.mxu2 }
 0x191   : > { %v1638_v57 = vadd.f32 %v3105_v45, %v1570_v16  ;;  %v1303_v38 = vadd.f32 %v1302_v52, %v1133_v33  ;;  %v1055_v42 = vpop.f32.mrf.mxu0 }
 0x192   : > { %v1607_v22 = vadd.f32 %v3105_v45, %v1539_v34  ;;  %v1225_v30 = vadd.f32 %v1224_v56, %v1055_v42  ;;  %v474_v56 = vld [vmem:[#allocation2 + $0x100] sm:$0xff] }
 0x193   : > { %v1702_v43 = vmax.f32 %v1638_v57, 0.0  ;;  %v1372_v44 = vadd.f32 %v1303_v38, %v502_v36 }
 0x194   : > { %v1671_v2 = vmax.f32 %v1607_v22, 0.0  ;;  %v1503_v47 = vld [vmem:[#allocation2 + $0x1d8] sm:$0xff]  ;;  %v1341_v48 = vadd.f32 %v1225_v30, %v471_v40  ;;  %v1309_v22 = vpop.f32.mrf.mxu3 }
 0x195   : > { %v1766_v49 = vpack.c.bf16 %v1702_v43, %v1702_v43  ;;  %v1571_v50 = vmul.f32 %v3096_v18, %v1503_v47  ;;  %v1472_v51 = vld [vmem:[#allocation2 + $0xe0] sm:$0xff]  ;;  %1437 = vst.msk [vmem:[#allocation2 + $0x1e0] sm:$0xff] %vm313_vm3, %v1372_v44  ;;  %v505_v30 = vld [vmem:[#allocation2 + $0x1f8] sm:$0xff] }
 0x196   : > { %v1735_v39 = vpack.c.bf16 %v1671_v2, %v1671_v2  ;;  %v1540_v3 = vmul.f32 %v3096_v18, %v1472_v51  ;;  %1406 = vst.msk [vmem:[#allocation2 + $0xe8] sm:$0xff] %vm313_vm3, %v1341_v48 }
 0x197   : > { %v1232_v13 = vpop.f32.mrf.mxu1  ;;  %1831 = vst.msk [vmem:[%s2767_s28 + $0xe8] sm:$0xf] %vm1772_vm4, %v1766_v49  ;;  %v1639_v53 = vadd.f32 %v3105_v45, %v1571_v50 }
 0x198   : > { %v1233_v54 = vadd.f32 %v1232_v13, %v2716_v10  ;;  %1800 = vst.msk [vmem:[%s2767_s28 + $0x6c] sm:$0xf] %vm1772_vm4, %v1735_v39  ;;  %v1608_v12 = vadd.f32 %v3105_v45, %v1540_v3  ;;  %v1135_v59 = vpop.f32.mrf.mxu2 }
 0x199   : > { %v1703_v61 = vmax.f32 %v1639_v53, 0.0  ;;  %v1305_v63 = vadd.f32 %v1304_v35, %v1135_v59  ;;  %v1058_v0 = vpop.f32.mrf.mxu0 }
 0x19a   : > { %v1344_v46 = vadd.f32 %v1233_v54, %v474_v56  ;;  %v1672_v1 = vmax.f32 %v1608_v12, 0.0  ;;  %v1228_v5 = vadd.f32 %v3214_v20, %v1058_v0 }
 0x19b   : > { %v1767_v26 = vpack.c.bf16 %v1703_v61, %v1703_v61  ;;  %v1373_v10 = vadd.f32 %v1305_v63, %v503_v58 }
 0x19c   : > { %1409 = vst.msk [vmem:[#allocation2 + $0x100] sm:$0xff] %vm313_vm3, %v1344_v46  ;;  %v1736_v6 = vpack.c.bf16 %v1672_v1, %v1672_v1  ;;  %v1504_v11 = vld [vmem:[#allocation2 + $0x1e0] sm:$0xff]  ;;  %v1342_v55 = vadd.f32 %v1228_v5, %v472_v9 }
 0x19d   : > { %1832 = vst.msk [vmem:[%s2767_s28 + $0xec] sm:$0xf] %vm1772_vm4, %v1767_v26  ;;  %v1572_v37 = vmul.f32 %v3096_v18, %v1504_v11  ;;  %v1473_v8 = vld [vmem:[#allocation2 + $0xe8] sm:$0xff] }
 0x19e   : > { %1801 = vst.msk [vmem:[%s2767_s28 + $0x70] sm:$0xf] %vm1772_vm4, %v1736_v6  ;;  %v1541_v17 = vmul.f32 %v3096_v18, %v1473_v8 }
 0x19f   : > { %v1234_v15 = vpop.f32.mrf.mxu1  ;;  %v1640_v20 = vadd.f32 %v3105_v45, %v1572_v37  ;;  %1438 = vst.msk [vmem:[#allocation2 + $0x1e8] sm:$0xff] %vm313_vm3, %v1373_v10 }
 0x1a0   : > { %v1235_v41 = vadd.f32 %v1234_v15, %v2755_v28  ;;  %v1609_v19 = vadd.f32 %v3105_v45, %v1541_v17  ;;  %1407 = vst.msk [vmem:[#allocation2 + $0xf0] sm:$0xff] %vm313_vm3, %v1342_v55  ;;  %v1138_v52 = vpop.f32.mrf.mxu2 }
 0x1a1   : > { %v1704_v60 = vmax.f32 %v1640_v20, 0.0  ;;  %v1308_v24 = vadd.f32 %v1307_v14, %v1138_v52  ;;  %v1060_v7 = vpop.f32.mrf.mxu0 }
 0x1a2   : > { %v1345_v23 = vadd.f32 %v1235_v41, %v475_v62  ;;  %v1673_v27 = vmax.f32 %v1609_v19, 0.0  ;;  %v1230_v32 = vadd.f32 %v3224_v4, %v1060_v7 }
 0x1a3   : > { %v1476_v29 = vld [vmem:[#allocation2 + $0x100] sm:$0xff]  ;;  %v1768_v16 = vpack.c.bf16 %v1704_v60, %v1704_v60  ;;  %v1374_v31 = vadd.f32 %v1308_v24, %v504_v21 }
 0x1a4   : > { %v1544_v28 = vmul.f32 %v3096_v18, %v1476_v29  ;;  %1410 = vst.msk [vmem:[#allocation2 + $0x108] sm:$0xff] %vm313_vm3, %v1345_v23  ;;  %v1737_v34 = vpack.c.bf16 %v1673_v27, %v1673_v27  ;;  %v1343_v36 = vadd.f32 %v1230_v32, %v473_v25 }
 0x1a5   : > { %1833 = vst.msk [vmem:[%s2767_s28 + $0xf0] sm:$0xf] %vm1772_vm4, %v1768_v16 }
 0x1a6   : > { %v1612_v33 = vadd.f32 %v3105_v45, %v1544_v28  ;;  %1802 = vst.msk [vmem:[%s2767_s28 + $0x74] sm:$0xf] %vm1772_vm4, %v1737_v34  ;;  %v1505_v57 = vld [vmem:[#allocation2 + $0x1e8] sm:$0xff] }
 0x1a7   : > { %v1573_v40 = vmul.f32 %v3096_v18, %v1505_v57  ;;  %v1474_v4 = vld [vmem:[#allocation2 + $0xf0] sm:$0xff]  ;;  %1439 = vst.msk [vmem:[#allocation2 + $0x1f0] sm:$0xff] %vm313_vm3, %v1374_v31 }
 0x1a8   : > { %v1676_v38 = vmax.f32 %v1612_v33, 0.0  ;;  %v1542_v42 = vmul.f32 %v3096_v18, %v1474_v4  ;;  %1408 = vst.msk [vmem:[#allocation2 + $0xf8] sm:$0xff] %vm313_vm3, %v1343_v36  ;;  %v1140_v43 = vpop.f32.mrf.mxu2 }
 0x1a9   : > { %v1641_v2 = vadd.f32 %v3105_v45, %v1573_v40  ;;  %v1310_v47 = vadd.f32 %v1309_v22, %v1140_v43 }
 0x1aa   : > { %v1740_v44 = vpack.c.bf16 %v1676_v38, %v1676_v38  ;;  %v1610_v35 = vadd.f32 %v3105_v45, %v1542_v42 }
 0x1ab   : > { %v1477_v48 = vld [vmem:[#allocation2 + $0x108] sm:$0xff]  ;;  %v1705_v49 = vmax.f32 %v1641_v2, 0.0  ;;  %v1375_v51 = vadd.f32 %v1310_v47, %v505_v30 }
 0x1ac   : > { %1805 = vst.msk [vmem:[%s2767_s28 + $0x80] sm:$0xf] %vm1772_vm4, %v1740_v44  ;;  %v1545_v50 = vmul.f32 %v3096_v18, %v1477_v48  ;;  %v1674_v39 = vmax.f32 %v1610_v35, 0.0 }
 0x1ad   : > { %v1769_v3 = vpack.c.bf16 %v1705_v49, %v1705_v49  ;;  %1440 = vst.msk [vmem:[#allocation2 + $0x1f8] sm:$0xff] %vm313_vm3, %v1375_v51 }
 0x1ae   : > { %v1613_v56 = vadd.f32 %v3105_v45, %v1545_v50  ;;  %v1738_v13 = vpack.c.bf16 %v1674_v39, %v1674_v39  ;;  %v1506_v53 = vld [vmem:[#allocation2 + $0x1f0] sm:$0xff] }
 0x1af   : > { %1834 = vst.msk [vmem:[%s2767_s28 + $0xf4] sm:$0xf] %vm1772_vm4, %v1769_v3  ;;  %v1574_v12 = vmul.f32 %v3096_v18, %v1506_v53  ;;  %v1475_v58 = vld [vmem:[#allocation2 + $0xf8] sm:$0xff] }
 0x1b0   : > { %v1677_v54 = vmax.f32 %v1613_v56, 0.0  ;;  %1803 = vst.msk [vmem:[%s2767_s28 + $0x78] sm:$0xf] %vm1772_vm4, %v1738_v13  ;;  %v1543_v59 = vmul.f32 %v3096_v18, %v1475_v58 }
 0x1b1   : > { %v1642_v46 = vadd.f32 %v3105_v45, %v1574_v12 }
 0x1b2   : > { %v1741_v61 = vpack.c.bf16 %v1677_v54, %v1677_v54  ;;  %v1611_v63 = vadd.f32 %v3105_v45, %v1543_v59 }
 0x1b3   : > { %v1706_v9 = vmax.f32 %v1642_v46, 0.0 }
 0x1b4   : > { %1806 = vst.msk [vmem:[%s2767_s28 + $0x84] sm:$0xf] %vm1772_vm4, %v1741_v61  ;;  %v1675_v0 = vmax.f32 %v1611_v63, 0.0  ;;  %v1507_v1 = vld [vmem:[#allocation2 + $0x1f8] sm:$0xff] }
 0x1b5   : > { %v1770_v5 = vpack.c.bf16 %v1706_v9, %v1706_v9  ;;  %v1575_v26 = vmul.f32 %v3096_v18, %v1507_v1 }
 0x1b6   : > { %v1739_v10 = vpack.c.bf16 %v1675_v0, %v1675_v0 }
 0x1b7   : > { %1835 = vst.msk [vmem:[%s2767_s28 + $0xf8] sm:$0xf] %vm1772_vm4, %v1770_v5  ;;  %v1643_v6 = vadd.f32 %v3105_v45, %v1575_v26 }
 0x1b8   : > { %1804 = vst.msk [vmem:[%s2767_s28 + $0x7c] sm:$0xf] %vm1772_vm4, %v1739_v10 }
 0x1b9   : > { %v1707_v11 = vmax.f32 %v1643_v6, 0.0 }
 0x1bb   : > { %v1771_v55 = vpack.c.bf16 %v1707_v11, %v1707_v11 }
 0x1bd   : > { %1836 = vst.msk [vmem:[%s2767_s28 + $0xfc] sm:$0xf] %vm1772_vm4, %v1771_v55 }
 0x1be PF: > { %s14_s17 = sadd.s32 1, %s2438_s17   ;;  %s3309_s15 = smov %s2434_s16 }
 0x1bf   : > { %p11_p5 = scmp.ge.s32.totalorder %s14_s17, 6   ;;  %s3310_s16 = smov %s3312_s18 }
 0x1c1   :  { %13 = sbr.rel (!%p11_p5) target bundleno = 2 (0x2), region = 83 }

// kernel: densenet_forward.22
= control target key start
LH: loop header
LB: loop body
LE: loop exit
PB: predicated region body
PF: predicated region fallthrough
CT: control target
= control target key end

     0   :  { %s1452_s21 = smov 0   ;;  %s1454_s22 = smov 0   ;;  %s1844_s0 = inlined_call_operand.vmem [shape: bf16[512,128], index: 0, kind: input, shape index: {}]   ;;  %s1845_s1 = inlined_call_operand.vmem [shape: bf16[128,16], index: 1, kind: input, shape index: {}]   ;;  %s1846_s2 = inlined_call_operand.vmem [shape: f32[1,128], index: 2, kind: input, shape index: {}]   ;;  %s1847_s3 = inlined_call_operand.vmem [shape: f32[1,128], index: 3, kind: input, shape index: {}]   ;;  %s1848_s4 = inlined_call_operand.vmem [shape: f32[1,16], index: 4, kind: input, shape index: {}]   ;;  %s1849_s5 = inlined_call_operand.vmem [shape: f32[1,16], index: 5, kind: input, shape index: {}]   ;;  %s1850_s6 = inlined_call_operand.vmem [shape: bf16[512,16], index: 6, kind: output, shape index: {}]  }
   0x1   :  { %s1456_s23 = smov 0  }
   0x2 LB: > { %s35_s24 = sadd.s32 1, %s1410_s22  ;;  %p1213_p0 = scmp.ge.s32.totalorder %s1414_s23, 1  ;;  %s1414_s23 = sphi %s1456_s23, %s16_s23   ;;  %s1410_s22 = sphi %s1454_s22, %s1852_s22   ;;  %s1406_s21 = sphi %s1452_s21, %s1851_s21  }
   0x3   : > { %p37_p1 = scmp.ge.s32.totalorder %s35_s24, 2  ;;  %p287_p2 = scmp.lt.s32.totalorder %s1414_s23, 3 }
   0x5   : > { %s1854_s24 = smov (%p37_p1, %s35_s24), 0  ;;  %p288_p3 = pnand %p1213_p0, %p287_p2 }
   0x6   : > { %s1214_s27 = sshll.u32 (!%p288_p3), %s1406_s21, 5 }
   0x7   : > { %291 = sbr.rel (%p288_p3) target bundleno = 254 (0xfe), region = 44  ;;  %p344_p4 = scmp.lt.s32.totalorder (!%p288_p3), %s1214_s27, 63 }
   0xc   : > { %v1259_v0 = vld [vmem:[%s1845_s1 + $0x38] sm:$0xff]  ;;  %v1258_v1 = vld [vmem:[%s1845_s1 + $0x30] sm:$0xff]  ;;  %s1856_s27 = smov (!%p344_p4, %s1214_s27), 63  ;;  %v1257_v2 = vld [vmem:[%s1845_s1 + $0x28] sm:$0xff]  ;;  %vm386_vm0 = vcmask 130048   ;;  %vm1024_vm1 = vcmask 125952  }
   0xd   : > { %699 = vmatpush.bf16.msra.mxu0 %v1259_v0  ;;  %1339 = vmatpush.bf16.msra.mxu1 %v1259_v0  ;;  %s1215_s30 = sshll.u32 %s1856_s27, 2  ;;  %v1256_v5 = vld [vmem:[%s1845_s1 + $0x20] sm:$0xff]  ;;  %v1255_v15 = vld [vmem:[%s1845_s1 + $0x18] sm:$0xff]  ;;  %v1254_v25 = vld [vmem:[%s1845_s1 + $0x10] sm:$0xff] }
   0xe   : > { %1340 = vmatpush.bf16.msra.mxu2 %v1259_v0  ;;  %1341 = vmatpush.bf16.msra.mxu3 %v1259_v0  ;;  %s1487_s11 = scalar_lea.vmem %s1844_s0, %s1215_s30  ;;  %v1499_v10 = vld [vmem:[%s1846_s2] ss:$0 sm:$0xff]  ;;  %v1253_v34 = vld [vmem:[%s1845_s1 + $0x8] sm:$0xff]  ;;  %s1683_s13 = scalar_lea.vmem %s1850_s6, %s1215_s30 }
   0xf   : > { %v1261_v3 = vld [vmem:[%s1487_s11] sm:$0xff]   ;;  %v1324_v43 = vld [vmem:[%s1487_s11 + $0x8] sm:$0xff]  }
  0x10   : > { %v1327_v4 = vld [vmem:[%s1487_s11 + $0x20] sm:$0xff]   ;;  %v1262_v8 = vunpack.c.l.bf16 %v1261_v3  ;;  %v1263_v9 = vunpack.c.h.bf16 %v1261_v3  ;;  %v1328_v47 = vld [vmem:[%s1487_s11 + $0x28] sm:$0xff]   ;;  %v1266_v52 = vunpack.c.l.bf16 %v1324_v43  ;;  %v1267_v53 = vunpack.c.h.bf16 %v1324_v43 }
  0x11   : > { %700 = vmatpush.bf16.msra.mxu0 %v1258_v1  ;;  %1342 = vmatpush.bf16.msra.mxu1 %v1258_v1  ;;  %v1331_v6 = vld [vmem:[%s1487_s11 + $0x40] sm:$0xff]   ;;  %v1278_v11 = vunpack.c.l.bf16 %v1327_v4  ;;  %v1279_v12 = vunpack.c.h.bf16 %v1327_v4  ;;  %v1332_v48 = vld [vmem:[%s1487_s11 + $0x48] sm:$0xff]   ;;  %v1282_v55 = vunpack.c.l.bf16 %v1328_v47  ;;  %v1283_v56 = vunpack.c.h.bf16 %v1328_v47 }
  0x12   : > { %1343 = vmatpush.bf16.msra.mxu2 %v1258_v1  ;;  %1344 = vmatpush.bf16.msra.mxu3 %v1258_v1  ;;  %v1335_v7 = vld [vmem:[%s1487_s11 + $0x60] sm:$0xff]   ;;  %v1294_v13 = vunpack.c.l.bf16 %v1331_v6  ;;  %v1295_v14 = vunpack.c.h.bf16 %v1331_v6  ;;  %v487_v18 = vmul.f32 %v1499_v10, %v1262_v8  ;;  %v488_v19 = vmul.f32 %v1499_v10, %v1263_v9  ;;  %v1336_v49 = vld [vmem:[%s1487_s11 + $0x68] sm:$0xff]  }
  0x13   : > { %v1310_v16 = vunpack.c.l.bf16 %v1335_v7  ;;  %v1311_v17 = vunpack.c.h.bf16 %v1335_v7  ;;  %v1509_v20 = vld [vmem:[%s1847_s3] ss:$0 sm:$0xff]  ;;  %v495_v21 = vmul.f32 %v1499_v10, %v1278_v11  ;;  %v496_v22 = vmul.f32 %v1499_v10, %v1279_v12 }
  0x14   : > { %v503_v23 = vmul.f32 %v1499_v10, %v1294_v13  ;;  %v504_v24 = vmul.f32 %v1499_v10, %v1295_v14  ;;  %v523_v28 = vadd.f32 %v1509_v20, %v487_v18  ;;  %v524_v29 = vadd.f32 %v1509_v20, %v488_v19  ;;  %v1252_v44 = vld [vmem:[%s1845_s1] sm:$0xff]  ;;  %v1325_v19 = vld [vmem:[%s1487_s11 + $0x10] sm:$0xff]  }
  0x15   : > { %701 = vmatpush.bf16.msra.mxu0 %v1257_v2  ;;  %1345 = vmatpush.bf16.msra.mxu1 %v1257_v2  ;;  %v511_v26 = vmul.f32 %v1499_v10, %v1310_v16  ;;  %v512_v27 = vmul.f32 %v1499_v10, %v1311_v17  ;;  %v531_v30 = vadd.f32 %v1509_v20, %v495_v21  ;;  %v1298_v57 = vunpack.c.l.bf16 %v1332_v48  ;;  %v1329_v21 = vld [vmem:[%s1487_s11 + $0x30] sm:$0xff]  }
  0x16   : > { %1346 = vmatpush.bf16.msra.mxu2 %v1257_v2  ;;  %1347 = vmatpush.bf16.msra.mxu3 %v1257_v2  ;;  %v532_v31 = vadd.f32 %v1509_v20, %v496_v22  ;;  %v539_v32 = vadd.f32 %v1509_v20, %v503_v23  ;;  %v540_v33 = vadd.f32 %v1509_v20, %v504_v24  ;;  %v555_v37 = vmax.f32 %v523_v28, 0.0 }
  0x17   : > { %v547_v35 = vadd.f32 %v1509_v20, %v511_v26  ;;  %v548_v36 = vadd.f32 %v1509_v20, %v512_v27  ;;  %v556_v38 = vmax.f32 %v524_v29, 0.0  ;;  %v563_v39 = vmax.f32 %v531_v30, 0.0  ;;  %v1333_v26 = vld [vmem:[%s1487_s11 + $0x50] sm:$0xff]  }
  0x18   : > { %v564_v40 = vmax.f32 %v532_v31, 0.0  ;;  %v571_v41 = vmax.f32 %v539_v32, 0.0  ;;  %v572_v42 = vmax.f32 %v540_v33, 0.0  ;;  %v1299_v59 = vunpack.c.h.bf16 %v1332_v48  ;;  %v1337_v27 = vld [vmem:[%s1487_s11 + $0x70] sm:$0xff]  }
  0x19   : > { %702 = vmatpush.bf16.msra.mxu0 %v1256_v5  ;;  %1348 = vmatpush.bf16.msra.mxu1 %v1256_v5  ;;  %v579_v45 = vmax.f32 %v547_v35, 0.0  ;;  %v580_v46 = vmax.f32 %v548_v36, 0.0  ;;  %v587_v50 = vpack.c.bf16 %v556_v38, %v555_v37  ;;  %v1314_v60 = vunpack.c.l.bf16 %v1336_v49 }
  0x1a   : > { %1349 = vmatpush.bf16.msra.mxu2 %v1256_v5  ;;  %1350 = vmatpush.bf16.msra.mxu3 %v1256_v5  ;;  %v591_v51 = vpack.c.bf16 %v564_v40, %v563_v39  ;;  %v595_v54 = vpack.c.bf16 %v572_v42, %v571_v41  ;;  %v1315_v61 = vunpack.c.h.bf16 %v1336_v49  ;;  %v489_v62 = vmul.f32 %v1499_v10, %v1266_v52 }
  0x1b   : > { %v599_v58 = vpack.c.bf16 %v580_v46, %v579_v45  ;;  %v490_v63 = vmul.f32 %v1499_v10, %v1267_v53  ;;  %v497_v0 = vmul.f32 %v1499_v10, %v1282_v55  ;;  %v498_v1 = vmul.f32 %v1499_v10, %v1283_v56 }
  0x1c   : > { %v505_v2 = vmul.f32 %v1499_v10, %v1298_v57  ;;  %v506_v3 = vmul.f32 %v1499_v10, %v1299_v59  ;;  %v513_v4 = vmul.f32 %v1499_v10, %v1314_v60  ;;  %v514_v5 = vmul.f32 %v1499_v10, %v1315_v61 }
  0x1d   : > { %703 = vmatpush.bf16.msra.mxu0 %v1255_v15  ;;  %1351 = vmatpush.bf16.msra.mxu1 %v1255_v15  ;;  %v525_v6 = vadd.f32 %v1509_v20, %v489_v62  ;;  %v526_v7 = vadd.f32 %v1509_v20, %v490_v63  ;;  %v533_v8 = vadd.f32 %v1509_v20, %v497_v0  ;;  %v1270_v28 = vunpack.c.l.bf16 %v1325_v19  ;;  %v1326_v63 = vld [vmem:[%s1487_s11 + $0x18] sm:$0xff]  }
  0x1e   : > { %1352 = vmatpush.bf16.msra.mxu2 %v1255_v15  ;;  %1353 = vmatpush.bf16.msra.mxu3 %v1255_v15  ;;  %v534_v9 = vadd.f32 %v1509_v20, %v498_v1  ;;  %v541_v11 = vadd.f32 %v1509_v20, %v505_v2  ;;  %v542_v12 = vadd.f32 %v1509_v20, %v506_v3  ;;  %v1271_v29 = vunpack.c.h.bf16 %v1325_v19  ;;  %v1330_v2 = vld [vmem:[%s1487_s11 + $0x38] sm:$0xff]  }
  0x1f   : > { %v549_v13 = vadd.f32 %v1509_v20, %v513_v4  ;;  %v550_v14 = vadd.f32 %v1509_v20, %v514_v5  ;;  %v557_v15 = vmax.f32 %v525_v6, 0.0  ;;  %v558_v16 = vmax.f32 %v526_v7, 0.0  ;;  %v1334_v3 = vld [vmem:[%s1487_s11 + $0x58] sm:$0xff]  }
  0x20   : > { %v565_v17 = vmax.f32 %v533_v8, 0.0  ;;  %v566_v18 = vmax.f32 %v534_v9, 0.0  ;;  %v573_v22 = vmax.f32 %v541_v11, 0.0  ;;  %v574_v23 = vmax.f32 %v542_v12, 0.0  ;;  %v1338_v4 = vld [vmem:[%s1487_s11 + $0x78] sm:$0xff]  }
  0x21   : > { %704 = vmatpush.bf16.msra.mxu0 %v1254_v25  ;;  %1354 = vmatpush.bf16.msra.mxu1 %v1254_v25  ;;  %v581_v24 = vmax.f32 %v549_v13, 0.0  ;;  %v1286_v30 = vunpack.c.l.bf16 %v1329_v21  ;;  %v1287_v31 = vunpack.c.h.bf16 %v1329_v21  ;;  %v588_v32 = vpack.c.bf16 %v558_v16, %v557_v15 }
  0x22   : > { %1355 = vmatpush.bf16.msra.mxu2 %v1254_v25  ;;  %1356 = vmatpush.bf16.msra.mxu3 %v1254_v25  ;;  %v582_v25 = vmax.f32 %v550_v14, 0.0  ;;  %v592_v33 = vpack.c.bf16 %v566_v18, %v565_v17  ;;  %v1303_v35 = vunpack.c.h.bf16 %v1333_v26  ;;  %v596_v36 = vpack.c.bf16 %v574_v23, %v573_v22 }
  0x23   : > { %v1318_v38 = vunpack.c.l.bf16 %v1337_v27  ;;  %v1319_v39 = vunpack.c.h.bf16 %v1337_v27  ;;  %v491_v40 = vmul.f32 %v1499_v10, %v1270_v28  ;;  %v492_v41 = vmul.f32 %v1499_v10, %v1271_v29 }
  0x24   : > { %v600_v37 = vpack.c.bf16 %v582_v25, %v581_v24  ;;  %v499_v42 = vmul.f32 %v1499_v10, %v1286_v30  ;;  %v500_v43 = vmul.f32 %v1499_v10, %v1287_v31  ;;  %v508_v45 = vmul.f32 %v1499_v10, %v1303_v35 }
  0x25   : > { %705 = vmatpush.bf16.msra.mxu0 %v1253_v34  ;;  %1357 = vmatpush.bf16.msra.mxu1 %v1253_v34  ;;  %v515_v46 = vmul.f32 %v1499_v10, %v1318_v38  ;;  %v516_v47 = vmul.f32 %v1499_v10, %v1319_v39  ;;  %v1416_v48 = vmov 0.0   ;;  %v527_v49 = vadd.f32 %v1509_v20, %v491_v40 }
  0x26   : > { %1358 = vmatpush.bf16.msra.mxu2 %v1253_v34  ;;  %1359 = vmatpush.bf16.msra.mxu3 %v1253_v34  ;;  %v1302_v34 = vunpack.c.l.bf16 %v1333_v26  ;;  %387 = vst.msk [vmem:[#allocation2] sm:$0xff] %vm386_vm0, %v1416_v48  ;;  %v536_v52 = vadd.f32 %v1509_v20, %v500_v43  ;;  %v1274_v7 = vunpack.c.l.bf16 %v1326_v63  ;;  %v1275_v8 = vunpack.c.h.bf16 %v1326_v63 }
  0x27   : > { %388 = vst.msk [vmem:[#allocation2 + $0x8] sm:$0xff] %vm386_vm0, %v1416_v48  ;;  %v551_v55 = vadd.f32 %v1509_v20, %v515_v46  ;;  %v552_v56 = vadd.f32 %v1509_v20, %v516_v47  ;;  %v559_v57 = vmax.f32 %v527_v49, 0.0  ;;  %v1290_v11 = vunpack.c.l.bf16 %v1330_v2 }
  0x28   : > { %389 = vst.msk [vmem:[#allocation2 + $0x10] sm:$0xff] %vm386_vm0, %v1416_v48  ;;  %v568_v60 = vmax.f32 %v536_v52, 0.0  ;;  %v1291_v12 = vunpack.c.h.bf16 %v1330_v2  ;;  %v1306_v13 = vunpack.c.l.bf16 %v1334_v3  ;;  %v1307_v15 = vunpack.c.h.bf16 %v1334_v3 }
  0x29   : > { %706 = vmatpush.bf16.msra.mxu0 %v1252_v44  ;;  %1360 = vmatpush.bf16.msra.mxu1 %v1252_v44  ;;  %390 = vst.msk [vmem:[#allocation2 + $0x18] sm:$0xff] %vm386_vm0, %v1416_v48  ;;  %v583_v0 = vmax.f32 %v551_v55, 0.0  ;;  %v584_v1 = vmax.f32 %v552_v56, 0.0  ;;  %v1322_v16 = vunpack.c.l.bf16 %v1338_v4  ;;  %v1323_v17 = vunpack.c.h.bf16 %v1338_v4  ;;  %v1663_v56 = vld [vmem:[%s1848_s4] ss:$0 sm:$0xff] }
  0x2a   : > { %1361 = vmatpush.bf16.msra.mxu2 %v1252_v44  ;;  %1362 = vmatpush.bf16.msra.mxu3 %v1252_v44  ;;  %v507_v44 = vmul.f32 %v1499_v10, %v1302_v34  ;;  %391 = vst.msk [vmem:[#allocation2 + $0x20] sm:$0xff] %vm386_vm0, %v1416_v48  ;;  %v493_v18 = vmul.f32 %v1499_v10, %v1274_v7 }
  0x2b   : > { %392 = vst.msk [vmem:[#allocation2 + $0x28] sm:$0xff] %vm386_vm0, %v1416_v48  ;;  %v601_v14 = vpack.c.bf16 %v584_v1, %v583_v0  ;;  %v494_v19 = vmul.f32 %v1499_v10, %v1275_v8  ;;  %v501_v21 = vmul.f32 %v1499_v10, %v1290_v11  ;;  %v502_v22 = vmul.f32 %v1499_v10, %v1291_v12 }
  0x2c   : > { %707 = vmatmul.bf16.vlgmr.msra.gmra.mxu0 %v587_v50  ;;  %727 = vmatmul.bf16.vlgmr.msra.gmra.mxu1 %v591_v51  ;;  %v528_v50 = vadd.f32 %v1509_v20, %v492_v41  ;;  %v535_v51 = vadd.f32 %v1509_v20, %v499_v42  ;;  %v543_v53 = vadd.f32 %v1509_v20, %v507_v44 }
  0x2d   : > { %747 = vmatmul.bf16.vlgmr.msra.gmra.mxu2 %v595_v54  ;;  %767 = vmatmul.bf16.vlgmr.msra.gmra.mxu3 %v599_v58  ;;  %v544_v54 = vadd.f32 %v1509_v20, %v508_v45  ;;  %393 = vst.msk [vmem:[#allocation2 + $0x30] sm:$0xff] %vm386_vm0, %v1416_v48  ;;  %v509_v23 = vmul.f32 %v1499_v10, %v1306_v13  ;;  %v603_v45 = vld [vmem:[#allocation2] sm:$0xff] }
  0x2e   : > { %v560_v58 = vmax.f32 %v528_v50, 0.0  ;;  %v567_v59 = vmax.f32 %v535_v51, 0.0  ;;  %v575_v61 = vmax.f32 %v543_v53, 0.0  ;;  %394 = vst.msk [vmem:[#allocation2 + $0x38] sm:$0xff] %vm386_vm0, %v1416_v48  ;;  %v510_v24 = vmul.f32 %v1499_v10, %v1307_v15 }
  0x2f   : > { %v576_v62 = vmax.f32 %v544_v54, 0.0  ;;  %395 = vst.msk [vmem:[#allocation2 + $0x40] sm:$0xff] %vm386_vm0, %v1416_v48  ;;  %v517_v25 = vmul.f32 %v1499_v10, %v1322_v16  ;;  %v518_v26 = vmul.f32 %v1499_v10, %v1323_v17  ;;  %v529_v27 = vadd.f32 %v1509_v20, %v493_v18  ;;  %v604_v54 = vld [vmem:[#allocation2 + $0x8] sm:$0xff]  ;;  %v605_v13 = vld [vmem:[#allocation2 + $0x10] sm:$0xff] }
  0x30   : > { %v589_v5 = vpack.c.bf16 %v560_v58, %v559_v57  ;;  %v593_v6 = vpack.c.bf16 %v568_v60, %v567_v59  ;;  %396 = vst.msk [vmem:[#allocation2 + $0x48] sm:$0xff] %vm386_vm0, %v1416_v48  ;;  %v530_v28 = vadd.f32 %v1509_v20, %v494_v19  ;;  %v537_v29 = vadd.f32 %v1509_v20, %v501_v21 }
  0x31   : > { %v597_v9 = vpack.c.bf16 %v576_v62, %v575_v61  ;;  %397 = vst.msk [vmem:[#allocation2 + $0x50] sm:$0xff] %vm386_vm0, %v1416_v48  ;;  %v538_v30 = vadd.f32 %v1509_v20, %v502_v22  ;;  %v545_v10 = vadd.f32 %v1509_v20, %v509_v23  ;;  %v546_v31 = vadd.f32 %v1509_v20, %v510_v24  ;;  %v1668_v62 = vld [vmem:[%s1849_s5] ss:$0 sm:$0xff] }
  0x32   : > { %398 = vst.msk [vmem:[#allocation2 + $0x58] sm:$0xff] %vm386_vm0, %v1416_v48  ;;  %v561_v34 = vmax.f32 %v529_v27, 0.0  ;;  %v562_v35 = vmax.f32 %v530_v28, 0.0 }
  0x33   : > { %399 = vst.msk [vmem:[#allocation2 + $0x60] sm:$0xff] %vm386_vm0, %v1416_v48  ;;  %v577_v38 = vmax.f32 %v545_v10, 0.0  ;;  %v578_v39 = vmax.f32 %v546_v31, 0.0 }
  0x34   : > { %400 = vst.msk [vmem:[#allocation2 + $0x68] sm:$0xff] %vm386_vm0, %v1416_v48  ;;  %v590_v41 = vpack.c.bf16 %v562_v35, %v561_v34 }
  0x35   : > { %401 = vst.msk [vmem:[#allocation2 + $0x70] sm:$0xff] %vm386_vm0, %v1416_v48  ;;  %v598_v43 = vpack.c.bf16 %v578_v39, %v577_v38 }
  0x36   : > { %402 = vst.msk [vmem:[#allocation2 + $0x78] sm:$0xff] %vm386_vm0, %v1416_v48  ;;  %v611_v46 = vld [vmem:[#allocation2 + $0x40] sm:$0xff] }
  0x37   : > { %403 = vst.msk [vmem:[#allocation2 + $0x80] sm:$0xff] %vm386_vm0, %v1416_v48  ;;  %v612_v55 = vld [vmem:[#allocation2 + $0x48] sm:$0xff] }
  0x38   : > { %404 = vst.msk [vmem:[#allocation2 + $0x88] sm:$0xff] %vm386_vm0, %v1416_v48  ;;  %v613_v17 = vld [vmem:[#allocation2 + $0x50] sm:$0xff] }
  0x39   : > { %405 = vst.msk [vmem:[#allocation2 + $0x90] sm:$0xff] %vm386_vm0, %v1416_v48 }
  0x3a   : > { %406 = vst.msk [vmem:[#allocation2 + $0x98] sm:$0xff] %vm386_vm0, %v1416_v48 }
  0x3b   : > { %407 = vst.msk [vmem:[#allocation2 + $0xa0] sm:$0xff] %vm386_vm0, %v1416_v48 }
  0x3c   : > { %712 = vmatmul.bf16.gmra.mxu0 %v588_v32  ;;  %732 = vmatmul.bf16.gmra.mxu1 %v592_v33  ;;  %v553_v32 = vadd.f32 %v1509_v20, %v517_v25  ;;  %v554_v33 = vadd.f32 %v1509_v20, %v518_v26  ;;  %408 = vst.msk [vmem:[#allocation2 + $0xa8] sm:$0xff] %vm386_vm0, %v1416_v48 }
  0x3d   : > { %752 = vmatmul.bf16.gmra.mxu2 %v596_v36  ;;  %772 = vmatmul.bf16.gmra.mxu3 %v600_v37  ;;  %v569_v36 = vmax.f32 %v537_v29, 0.0  ;;  %v570_v37 = vmax.f32 %v538_v30, 0.0  ;;  %409 = vst.msk [vmem:[#allocation2 + $0xb0] sm:$0xff] %vm386_vm0, %v1416_v48 }
  0x3e   : > { %v585_v40 = vmax.f32 %v553_v32, 0.0  ;;  %v586_v20 = vmax.f32 %v554_v33, 0.0  ;;  %410 = vst.msk [vmem:[#allocation2 + $0xb8] sm:$0xff] %vm386_vm0, %v1416_v48  ;;  %v619_v52 = vld [vmem:[#allocation2 + $0x80] sm:$0xff] }
  0x3f   : > { %411 = vst.msk [vmem:[#allocation2 + $0xc0] sm:$0xff] %vm386_vm0, %v1416_v48  ;;  %v594_v42 = vpack.c.bf16 %v570_v37, %v569_v36 }
  0x40   : > { %412 = vst.msk [vmem:[#allocation2 + $0xc8] sm:$0xff] %vm386_vm0, %v1416_v48  ;;  %v602_v44 = vpack.c.bf16 %v586_v20, %v585_v40  ;;  %v621_v38 = vld [vmem:[#allocation2 + $0x90] sm:$0xff] }
  0x41   : > { %413 = vst.msk [vmem:[#allocation2 + $0xd0] sm:$0xff] %vm386_vm0, %v1416_v48 }
  0x42   : > { %414 = vst.msk [vmem:[#allocation2 + $0xd8] sm:$0xff] %vm386_vm0, %v1416_v48 }
  0x43   : > { %415 = vst.msk [vmem:[#allocation2 + $0xe0] sm:$0xff] %vm386_vm0, %v1416_v48 }
  0x44   : > { %416 = vst.msk [vmem:[#allocation2 + $0xe8] sm:$0xff] %vm386_vm0, %v1416_v48 }
  0x45   : > { %417 = vst.msk [vmem:[#allocation2 + $0xf0] sm:$0xff] %vm386_vm0, %v1416_v48 }
  0x46   : > { %418 = vst.msk [vmem:[#allocation2 + $0xf8] sm:$0xff] %vm386_vm0, %v1416_v48  ;;  %v627_v53 = vld [vmem:[#allocation2 + $0xc0] sm:$0xff] }
  0x47   : > { %v628_v8 = vld [vmem:[#allocation2 + $0xc8] sm:$0xff] }
  0x4c   : > { %717 = vmatmul.bf16.gmra.mxu0 %v589_v5  ;;  %737 = vmatmul.bf16.gmra.mxu1 %v593_v6  ;;  %v620_v6 = vld [vmem:[#allocation2 + $0x88] sm:$0xff] }
  0x4d   : > { %757 = vmatmul.bf16.gmra.mxu2 %v597_v9  ;;  %777 = vmatmul.bf16.gmra.mxu3 %v601_v14 }
  0x5c   : > { %722 = vmatmul.bf16.gmra.mxu0 %v590_v41  ;;  %742 = vmatmul.bf16.gmra.mxu1 %v594_v42  ;;  %v629_v42 = vld [vmem:[#allocation2 + $0xd0] sm:$0xff] }
  0x5d   : > { %762 = vmatmul.bf16.gmra.mxu2 %v598_v43  ;;  %782 = vmatmul.bf16.gmra.mxu3 %v602_v44 }
  0xa9   : > { %v708_v47 = vpop.f32.mrf.mxu0  ;;  %v728_v49 = vpop.f32.mrf.mxu1 }
  0xaa   : > { %v788_v50 = vadd.f32 %v708_v47, %v603_v45  ;;  %v796_v51 = vadd.f32 %v728_v49, %v611_v46  ;;  %v606_v49 = vld [vmem:[#allocation2 + $0x18] sm:$0xff] }
  0xac   : > { %821 = vst.msk [vmem:[#allocation2] sm:$0xff] %vm386_vm0, %v788_v50 }
  0xad   : > { %829 = vst.msk [vmem:[#allocation2 + $0x40] sm:$0xff] %vm386_vm0, %v796_v51 }
  0xb0   : > { %v748_v48 = vpop.f32.mrf.mxu2  ;;  %v768_v57 = vpop.f32.mrf.mxu3 }
  0xb1   : > { %v804_v58 = vadd.f32 %v748_v48, %v619_v52  ;;  %v812_v59 = vadd.f32 %v768_v57, %v627_v53  ;;  %v710_v60 = vpop.f32.mrf.mxu0  ;;  %v730_v61 = vpop.f32.mrf.mxu1  ;;  %v614_v53 = vld [vmem:[#allocation2 + $0x58] sm:$0xff] }
  0xb2   : > { %v789_v63 = vadd.f32 %v710_v60, %v604_v54  ;;  %v797_v0 = vadd.f32 %v730_v61, %v612_v55 }
  0xb3   : > { %v856_v1 = vld [vmem:[#allocation2] sm:$0xff]  ;;  %837 = vst.msk [vmem:[#allocation2 + $0x80] sm:$0xff] %vm386_vm0, %v804_v58 }
  0xb4   : > { %v892_v2 = vmul.f32 %v1663_v56, %v856_v1  ;;  %v864_v3 = vld [vmem:[#allocation2 + $0x40] sm:$0xff]  ;;  %845 = vst.msk [vmem:[#allocation2 + $0xc0] sm:$0xff] %vm386_vm0, %v812_v59 }
  0xb5   : > { %v900_v4 = vmul.f32 %v1663_v56, %v864_v3  ;;  %822 = vst.msk [vmem:[#allocation2 + $0x8] sm:$0xff] %vm386_vm0, %v789_v63  ;;  %v622_v63 = vld [vmem:[#allocation2 + $0x98] sm:$0xff] }
  0xb6   : > { %v928_v5 = vadd.f32 %v1668_v62, %v892_v2  ;;  %830 = vst.msk [vmem:[#allocation2 + $0x48] sm:$0xff] %vm386_vm0, %v797_v0  ;;  %v630_v0 = vld [vmem:[#allocation2 + $0xd8] sm:$0xff] }
  0xb7   : > { %v936_v7 = vadd.f32 %v1668_v62, %v900_v4 }
  0xb8   : > { %v960_v9 = vmax.f32 %v928_v5, 0.0  ;;  %v750_v11 = vpop.f32.mrf.mxu2  ;;  %v770_v12 = vpop.f32.mrf.mxu3 }
  0xb9   : > { %v968_v14 = vmax.f32 %v936_v7, 0.0  ;;  %v805_v15 = vadd.f32 %v750_v11, %v620_v6  ;;  %v713_v16 = vpop.f32.mrf.mxu0  ;;  %v733_v18 = vpop.f32.mrf.mxu1  ;;  %v813_v22 = vadd.f32 %v770_v12, %v628_v8 }
  0xba   : > { %v992_v19 = vpack.c.bf16 %v960_v9, %v960_v9  ;;  %v872_v21 = vld [vmem:[#allocation2 + $0x80] sm:$0xff]  ;;  %v790_v26 = vadd.f32 %v713_v16, %v605_v13  ;;  %v798_v29 = vadd.f32 %v733_v18, %v613_v17 }
  0xbb   : > { %v1000_v23 = vpack.c.bf16 %v968_v14, %v968_v14  ;;  %v908_v24 = vmul.f32 %v1663_v56, %v872_v21  ;;  %v880_v25 = vld [vmem:[#allocation2 + $0xc0] sm:$0xff]  ;;  %838 = vst.msk [vmem:[#allocation2 + $0x88] sm:$0xff] %vm386_vm0, %v805_v15 }
  0xbc   : > { %1025 = vst.msk [vmem:[%s1683_s13] sm:$0xf] %vm1024_vm1, %v992_v19  ;;  %v916_v27 = vmul.f32 %v1663_v56, %v880_v25  ;;  %v857_v28 = vld [vmem:[#allocation2 + $0x8] sm:$0xff]  ;;  %v607_v17 = vld [vmem:[#allocation2 + $0x20] sm:$0xff] }
  0xbd   : > { %1033 = vst.msk [vmem:[%s1683_s13 + $0x20] sm:$0xf] %vm1024_vm1, %v1000_v23  ;;  %v944_v30 = vadd.f32 %v1668_v62, %v908_v24  ;;  %v893_v10 = vmul.f32 %v1663_v56, %v857_v28  ;;  %v865_v31 = vld [vmem:[#allocation2 + $0x48] sm:$0xff]  ;;  %v615_v19 = vld [vmem:[#allocation2 + $0x60] sm:$0xff] }
  0xbe   : > { %v952_v32 = vadd.f32 %v1668_v62, %v916_v27  ;;  %v901_v33 = vmul.f32 %v1663_v56, %v865_v31  ;;  %846 = vst.msk [vmem:[#allocation2 + $0xc8] sm:$0xff] %vm386_vm0, %v813_v22  ;;  %v623_v28 = vld [vmem:[#allocation2 + $0xa0] sm:$0xff]  ;;  %v608_v31 = vld [vmem:[#allocation2 + $0x28] sm:$0xff] }
  0xbf   : > { %v976_v34 = vmax.f32 %v944_v30, 0.0  ;;  %v929_v35 = vadd.f32 %v1668_v62, %v893_v10  ;;  %823 = vst.msk [vmem:[#allocation2 + $0x10] sm:$0xff] %vm386_vm0, %v790_v26 }
  0xc0   : > { %v984_v36 = vmax.f32 %v952_v32, 0.0  ;;  %v937_v37 = vadd.f32 %v1668_v62, %v901_v33  ;;  %831 = vst.msk [vmem:[#allocation2 + $0x50] sm:$0xff] %vm386_vm0, %v798_v29  ;;  %v753_v39 = vpop.f32.mrf.mxu2  ;;  %v773_v40 = vpop.f32.mrf.mxu3  ;;  %v631_v29 = vld [vmem:[#allocation2 + $0xe0] sm:$0xff]  ;;  %v616_v32 = vld [vmem:[#allocation2 + $0x68] sm:$0xff] }
  0xc1   : > { %v1008_v20 = vpack.c.bf16 %v976_v34, %v976_v34  ;;  %v961_v41 = vmax.f32 %v929_v35, 0.0  ;;  %v715_v43 = vpop.f32.mrf.mxu0  ;;  %v735_v44 = vpop.f32.mrf.mxu1  ;;  %v806_v52 = vadd.f32 %v753_v39, %v621_v38  ;;  %v814_v55 = vadd.f32 %v773_v40, %v629_v42 }
  0xc2   : > { %v1016_v45 = vpack.c.bf16 %v984_v36, %v984_v36  ;;  %v969_v46 = vmax.f32 %v937_v37, 0.0  ;;  %v873_v47 = vld [vmem:[#allocation2 + $0x88] sm:$0xff]  ;;  %v791_v58 = vadd.f32 %v715_v43, %v606_v49  ;;  %v799_v61 = vadd.f32 %v735_v44, %v614_v53 }
  0xc3   : > { %1041 = vst.msk [vmem:[%s1683_s13 + $0x40] sm:$0xf] %vm1024_vm1, %v1008_v20  ;;  %v993_v50 = vpack.c.bf16 %v961_v41, %v961_v41  ;;  %v909_v51 = vmul.f32 %v1663_v56, %v873_v47 }
  0xc4   : > { %1049 = vst.msk [vmem:[%s1683_s13 + $0x60] sm:$0xf] %vm1024_vm1, %v1016_v45  ;;  %v1001_v54 = vpack.c.bf16 %v969_v46, %v969_v46 }
  0xc5   : > { %1026 = vst.msk [vmem:[%s1683_s13 + $0x4] sm:$0xf] %vm1024_vm1, %v993_v50  ;;  %v945_v48 = vadd.f32 %v1668_v62, %v909_v51  ;;  %v881_v57 = vld [vmem:[#allocation2 + $0xc8] sm:$0xff] }
  0xc6   : > { %1034 = vst.msk [vmem:[%s1683_s13 + $0x24] sm:$0xf] %vm1024_vm1, %v1001_v54  ;;  %v917_v59 = vmul.f32 %v1663_v56, %v881_v57  ;;  %v858_v60 = vld [vmem:[#allocation2 + $0x10] sm:$0xff] }
  0xc7   : > { %v977_v1 = vmax.f32 %v945_v48, 0.0  ;;  %v894_v2 = vmul.f32 %v1663_v56, %v858_v60  ;;  %v866_v3 = vld [vmem:[#allocation2 + $0x50] sm:$0xff]  ;;  %839 = vst.msk [vmem:[#allocation2 + $0x90] sm:$0xff] %vm386_vm0, %v806_v52 }
  0xc8   : > { %v953_v4 = vadd.f32 %v1668_v62, %v917_v59  ;;  %v902_v5 = vmul.f32 %v1663_v56, %v866_v3  ;;  %847 = vst.msk [vmem:[#allocation2 + $0xd0] sm:$0xff] %vm386_vm0, %v814_v55  ;;  %v755_v6 = vpop.f32.mrf.mxu2  ;;  %v775_v7 = vpop.f32.mrf.mxu3 }
  0xc9   : > { %v1009_v8 = vpack.c.bf16 %v977_v1, %v977_v1  ;;  %v930_v9 = vadd.f32 %v1668_v62, %v894_v2  ;;  %824 = vst.msk [vmem:[#allocation2 + $0x18] sm:$0xff] %vm386_vm0, %v791_v58  ;;  %v807_v11 = vadd.f32 %v755_v6, %v622_v63  ;;  %v815_v12 = vadd.f32 %v775_v7, %v630_v0  ;;  %v718_v13 = vpop.f32.mrf.mxu0  ;;  %v738_v14 = vpop.f32.mrf.mxu1  ;;  %v632_v1 = vld [vmem:[#allocation2 + $0xe8] sm:$0xff]  ;;  %v609_v7 = vld [vmem:[#allocation2 + $0x30] sm:$0xff] }
  0xca   : > { %v985_v15 = vmax.f32 %v953_v4, 0.0  ;;  %v938_v16 = vadd.f32 %v1668_v62, %v902_v5  ;;  %832 = vst.msk [vmem:[#allocation2 + $0x58] sm:$0xff] %vm386_vm0, %v799_v61  ;;  %v792_v24 = vadd.f32 %v718_v13, %v607_v17  ;;  %v800_v27 = vadd.f32 %v738_v14, %v615_v19  ;;  %v624_v61 = vld [vmem:[#allocation2 + $0xa8] sm:$0xff]  ;;  %v617_v14 = vld [vmem:[#allocation2 + $0x70] sm:$0xff] }
  0xcb   : > { %1042 = vst.msk [vmem:[%s1683_s13 + $0x44] sm:$0xf] %vm1024_vm1, %v1009_v8  ;;  %v962_v18 = vmax.f32 %v930_v9, 0.0 }
  0xcc   : > { %v1017_v21 = vpack.c.bf16 %v985_v15, %v985_v15  ;;  %v970_v22 = vmax.f32 %v938_v16, 0.0  ;;  %840 = vst.msk [vmem:[#allocation2 + $0x98] sm:$0xff] %vm386_vm0, %v807_v11 }
  0xcd   : > { %v994_v23 = vpack.c.bf16 %v962_v18, %v962_v18  ;;  %848 = vst.msk [vmem:[#allocation2 + $0xd8] sm:$0xff] %vm386_vm0, %v815_v12 }
  0xce   : > { %1050 = vst.msk [vmem:[%s1683_s13 + $0x64] sm:$0xf] %vm1024_vm1, %v1017_v21  ;;  %v1002_v25 = vpack.c.bf16 %v970_v22, %v970_v22  ;;  %v874_v26 = vld [vmem:[#allocation2 + $0x90] sm:$0xff] }
  0xcf   : > { %1027 = vst.msk [vmem:[%s1683_s13 + $0x8] sm:$0xf] %vm1024_vm1, %v994_v23  ;;  %v910_v30 = vmul.f32 %v1663_v56, %v874_v26  ;;  %v882_v10 = vld [vmem:[#allocation2 + $0xd0] sm:$0xff] }
  0xd0   : > { %1035 = vst.msk [vmem:[%s1683_s13 + $0x28] sm:$0xf] %vm1024_vm1, %v1002_v25  ;;  %v918_v33 = vmul.f32 %v1663_v56, %v882_v10  ;;  %v859_v34 = vld [vmem:[#allocation2 + $0x18] sm:$0xff]  ;;  %v758_v35 = vpop.f32.mrf.mxu2  ;;  %v778_v36 = vpop.f32.mrf.mxu3 }
  0xd1   : > { %v946_v37 = vadd.f32 %v1668_v62, %v910_v30  ;;  %v895_v38 = vmul.f32 %v1663_v56, %v859_v34  ;;  %v867_v39 = vld [vmem:[#allocation2 + $0x58] sm:$0xff]  ;;  %825 = vst.msk [vmem:[#allocation2 + $0x20] sm:$0xff] %vm386_vm0, %v792_v24  ;;  %v808_v40 = vadd.f32 %v758_v35, %v623_v28  ;;  %v816_v20 = vadd.f32 %v778_v36, %v631_v29  ;;  %v720_v41 = vpop.f32.mrf.mxu0  ;;  %v740_v42 = vpop.f32.mrf.mxu1 }
  0xd2   : > { %v954_v43 = vadd.f32 %v1668_v62, %v918_v33  ;;  %v903_v44 = vmul.f32 %v1663_v56, %v867_v39  ;;  %833 = vst.msk [vmem:[#allocation2 + $0x60] sm:$0xff] %vm386_vm0, %v800_v27  ;;  %v793_v45 = vadd.f32 %v720_v41, %v608_v31  ;;  %v801_v46 = vadd.f32 %v740_v42, %v616_v32  ;;  %v625_v41 = vld [vmem:[#allocation2 + $0xb0] sm:$0xff] }
  0xd3   : > { %v978_v47 = vmax.f32 %v946_v37, 0.0  ;;  %v931_v49 = vadd.f32 %v1668_v62, %v895_v38  ;;  %v875_v50 = vld [vmem:[#allocation2 + $0x98] sm:$0xff]  ;;  %841 = vst.msk [vmem:[#allocation2 + $0xa0] sm:$0xff] %vm386_vm0, %v808_v40 }
  0xd4   : > { %v986_v51 = vmax.f32 %v954_v43, 0.0  ;;  %v939_v52 = vadd.f32 %v1668_v62, %v903_v44  ;;  %v911_v53 = vmul.f32 %v1663_v56, %v875_v50  ;;  %v883_v54 = vld [vmem:[#allocation2 + $0xd8] sm:$0xff]  ;;  %849 = vst.msk [vmem:[#allocation2 + $0xe0] sm:$0xff] %vm386_vm0, %v816_v20 }
  0xd5   : > { %v1010_v55 = vpack.c.bf16 %v978_v47, %v978_v47  ;;  %v963_v48 = vmax.f32 %v931_v49, 0.0  ;;  %v919_v57 = vmul.f32 %v1663_v56, %v883_v54  ;;  %826 = vst.msk [vmem:[#allocation2 + $0x28] sm:$0xff] %vm386_vm0, %v793_v45 }
  0xd6   : > { %v1018_v58 = vpack.c.bf16 %v986_v51, %v986_v51  ;;  %v971_v59 = vmax.f32 %v939_v52, 0.0  ;;  %v947_v60 = vadd.f32 %v1668_v62, %v911_v53  ;;  %834 = vst.msk [vmem:[#allocation2 + $0x68] sm:$0xff] %vm386_vm0, %v801_v46  ;;  %v633_v46 = vld [vmem:[#allocation2 + $0xf0] sm:$0xff]  ;;  %v610_v51 = vld [vmem:[#allocation2 + $0x38] sm:$0xff] }
  0xd7   : > { %1043 = vst.msk [vmem:[%s1683_s13 + $0x48] sm:$0xf] %vm1024_vm1, %v1010_v55  ;;  %v995_v63 = vpack.c.bf16 %v963_v48, %v963_v48  ;;  %v955_v0 = vadd.f32 %v1668_v62, %v919_v57  ;;  %v618_v48 = vld [vmem:[#allocation2 + $0x78] sm:$0xff] }
  0xd8   : > { %1051 = vst.msk [vmem:[%s1683_s13 + $0x68] sm:$0xf] %vm1024_vm1, %v1018_v58  ;;  %v1003_v2 = vpack.c.bf16 %v971_v59, %v971_v59  ;;  %v979_v3 = vmax.f32 %v947_v60, 0.0  ;;  %v860_v4 = vld [vmem:[#allocation2 + $0x20] sm:$0xff]  ;;  %v760_v5 = vpop.f32.mrf.mxu2  ;;  %v780_v6 = vpop.f32.mrf.mxu3 }
  0xd9   : > { %1028 = vst.msk [vmem:[%s1683_s13 + $0xc] sm:$0xf] %vm1024_vm1, %v995_v63  ;;  %v987_v8 = vmax.f32 %v955_v0, 0.0  ;;  %v896_v9 = vmul.f32 %v1663_v56, %v860_v4  ;;  %v868_v11 = vld [vmem:[#allocation2 + $0x60] sm:$0xff]  ;;  %v809_v12 = vadd.f32 %v760_v5, %v624_v61  ;;  %v723_v13 = vpop.f32.mrf.mxu0  ;;  %v743_v15 = vpop.f32.mrf.mxu1  ;;  %v817_v19 = vadd.f32 %v780_v6, %v632_v1  ;;  %v634_v4 = vld [vmem:[#allocation2 + $0xf8] sm:$0xff] }
  0xda   : > { %1036 = vst.msk [vmem:[%s1683_s13 + $0x2c] sm:$0xf] %vm1024_vm1, %v1003_v2  ;;  %v1011_v16 = vpack.c.bf16 %v979_v3, %v979_v3  ;;  %v904_v17 = vmul.f32 %v1663_v56, %v868_v11  ;;  %v876_v18 = vld [vmem:[#allocation2 + $0xa0] sm:$0xff]  ;;  %v794_v25 = vadd.f32 %v723_v13, %v609_v7  ;;  %v802_v29 = vadd.f32 %v743_v15, %v617_v14  ;;  %v626_v3 = vld [vmem:[#allocation2 + $0xb8] sm:$0xff] }
  0xdb   : > { %v1019_v21 = vpack.c.bf16 %v987_v8, %v987_v8  ;;  %v932_v22 = vadd.f32 %v1668_v62, %v896_v9  ;;  %v912_v23 = vmul.f32 %v1663_v56, %v876_v18  ;;  %v884_v24 = vld [vmem:[#allocation2 + $0xe0] sm:$0xff]  ;;  %842 = vst.msk [vmem:[#allocation2 + $0xa8] sm:$0xff] %vm386_vm0, %v809_v12 }
  0xdc   : > { %1044 = vst.msk [vmem:[%s1683_s13 + $0x4c] sm:$0xf] %vm1024_vm1, %v1011_v16  ;;  %v940_v26 = vadd.f32 %v1668_v62, %v904_v17  ;;  %v920_v27 = vmul.f32 %v1663_v56, %v884_v24  ;;  %v861_v28 = vld [vmem:[#allocation2 + $0x28] sm:$0xff] }
  0xdd   : > { %1052 = vst.msk [vmem:[%s1683_s13 + $0x6c] sm:$0xf] %vm1024_vm1, %v1019_v21  ;;  %v964_v30 = vmax.f32 %v932_v22, 0.0  ;;  %v948_v10 = vadd.f32 %v1668_v62, %v912_v23  ;;  %v897_v31 = vmul.f32 %v1663_v56, %v861_v28  ;;  %v869_v32 = vld [vmem:[#allocation2 + $0x68] sm:$0xff] }
  0xde   : > { %v972_v33 = vmax.f32 %v940_v26, 0.0  ;;  %v956_v34 = vadd.f32 %v1668_v62, %v920_v27  ;;  %v905_v35 = vmul.f32 %v1663_v56, %v869_v32  ;;  %850 = vst.msk [vmem:[#allocation2 + $0xe8] sm:$0xff] %vm386_vm0, %v817_v19 }
  0xdf   : > { %v996_v36 = vpack.c.bf16 %v964_v30, %v964_v30  ;;  %v980_v37 = vmax.f32 %v948_v10, 0.0  ;;  %v933_v38 = vadd.f32 %v1668_v62, %v897_v31  ;;  %827 = vst.msk [vmem:[#allocation2 + $0x30] sm:$0xff] %vm386_vm0, %v794_v25 }
  0xe0   : > { %v1004_v39 = vpack.c.bf16 %v972_v33, %v972_v33  ;;  %v988_v40 = vmax.f32 %v956_v34, 0.0  ;;  %v941_v20 = vadd.f32 %v1668_v62, %v905_v35  ;;  %835 = vst.msk [vmem:[#allocation2 + $0x70] sm:$0xff] %vm386_vm0, %v802_v29  ;;  %v763_v42 = vpop.f32.mrf.mxu2  ;;  %v783_v43 = vpop.f32.mrf.mxu3 }
  0xe1   : > { %1029 = vst.msk [vmem:[%s1683_s13 + $0x10] sm:$0xf] %vm1024_vm1, %v996_v36  ;;  %v1012_v44 = vpack.c.bf16 %v980_v37, %v980_v37  ;;  %v965_v45 = vmax.f32 %v933_v38, 0.0  ;;  %v725_v52 = vpop.f32.mrf.mxu0  ;;  %v810_v55 = vadd.f32 %v763_v42, %v625_v41  ;;  %v745_v57 = vpop.f32.mrf.mxu1  ;;  %v818_v59 = vadd.f32 %v783_v43, %v633_v46 }
  0xe2   : > { %1037 = vst.msk [vmem:[%s1683_s13 + $0x30] sm:$0xf] %vm1024_vm1, %v1004_v39  ;;  %v1020_v47 = vpack.c.bf16 %v988_v40, %v988_v40  ;;  %v973_v49 = vmax.f32 %v941_v20, 0.0  ;;  %v877_v50 = vld [vmem:[#allocation2 + $0xa8] sm:$0xff]  ;;  %v795_v63 = vadd.f32 %v725_v52, %v610_v51  ;;  %v803_v2 = vadd.f32 %v745_v57, %v618_v48 }
  0xe3   : > { %1045 = vst.msk [vmem:[%s1683_s13 + $0x50] sm:$0xf] %vm1024_vm1, %v1012_v44  ;;  %v997_v53 = vpack.c.bf16 %v965_v45, %v965_v45  ;;  %v913_v54 = vmul.f32 %v1663_v56, %v877_v50 }
  0xe4   : > { %1053 = vst.msk [vmem:[%s1683_s13 + $0x70] sm:$0xf] %vm1024_vm1, %v1020_v47  ;;  %v1005_v58 = vpack.c.bf16 %v973_v49, %v973_v49 }
  0xe5   : > { %1030 = vst.msk [vmem:[%s1683_s13 + $0x14] sm:$0xf] %vm1024_vm1, %v997_v53  ;;  %v949_v60 = vadd.f32 %v1668_v62, %v913_v54  ;;  %v885_v61 = vld [vmem:[#allocation2 + $0xe8] sm:$0xff] }
  0xe6   : > { %1038 = vst.msk [vmem:[%s1683_s13 + $0x34] sm:$0xf] %vm1024_vm1, %v1005_v58  ;;  %v921_v0 = vmul.f32 %v1663_v56, %v885_v61  ;;  %v862_v1 = vld [vmem:[#allocation2 + $0x30] sm:$0xff] }
  0xe7   : > { %v981_v5 = vmax.f32 %v949_v60, 0.0  ;;  %v898_v6 = vmul.f32 %v1663_v56, %v862_v1  ;;  %v870_v7 = vld [vmem:[#allocation2 + $0x70] sm:$0xff]  ;;  %843 = vst.msk [vmem:[#allocation2 + $0xb0] sm:$0xff] %vm386_vm0, %v810_v55 }
  0xe8   : > { %v957_v8 = vadd.f32 %v1668_v62, %v921_v0  ;;  %v906_v9 = vmul.f32 %v1663_v56, %v870_v7  ;;  %851 = vst.msk [vmem:[#allocation2 + $0xf0] sm:$0xff] %vm386_vm0, %v818_v59  ;;  %v765_v11 = vpop.f32.mrf.mxu2  ;;  %v785_v12 = vpop.f32.mrf.mxu3 }
  0xe9   : > { %v1013_v13 = vpack.c.bf16 %v981_v5, %v981_v5  ;;  %v934_v14 = vadd.f32 %v1668_v62, %v898_v6  ;;  %828 = vst.msk [vmem:[#allocation2 + $0x38] sm:$0xff] %vm386_vm0, %v795_v63  ;;  %v811_v15 = vadd.f32 %v765_v11, %v626_v3  ;;  %v819_v16 = vadd.f32 %v785_v12, %v634_v4 }
  0xea   : > { %v989_v17 = vmax.f32 %v957_v8, 0.0  ;;  %v942_v18 = vadd.f32 %v1668_v62, %v906_v9  ;;  %836 = vst.msk [vmem:[#allocation2 + $0x78] sm:$0xff] %vm386_vm0, %v803_v2 }
  0xeb   : > { %1046 = vst.msk [vmem:[%s1683_s13 + $0x54] sm:$0xf] %vm1024_vm1, %v1013_v13  ;;  %v966_v19 = vmax.f32 %v934_v14, 0.0 }
  0xec   : > { %v1021_v21 = vpack.c.bf16 %v989_v17, %v989_v17  ;;  %v974_v22 = vmax.f32 %v942_v18, 0.0  ;;  %844 = vst.msk [vmem:[#allocation2 + $0xb8] sm:$0xff] %vm386_vm0, %v811_v15 }
  0xed   : > { %v998_v23 = vpack.c.bf16 %v966_v19, %v966_v19  ;;  %852 = vst.msk [vmem:[#allocation2 + $0xf8] sm:$0xff] %vm386_vm0, %v819_v16 }
  0xee   : > { %1054 = vst.msk [vmem:[%s1683_s13 + $0x74] sm:$0xf] %vm1024_vm1, %v1021_v21  ;;  %v1006_v24 = vpack.c.bf16 %v974_v22, %v974_v22  ;;  %v878_v25 = vld [vmem:[#allocation2 + $0xb0] sm:$0xff] }
  0xef   : > { %1031 = vst.msk [vmem:[%s1683_s13 + $0x18] sm:$0xf] %vm1024_vm1, %v998_v23  ;;  %v914_v26 = vmul.f32 %v1663_v56, %v878_v25  ;;  %v886_v27 = vld [vmem:[#allocation2 + $0xf0] sm:$0xff] }
  0xf0   : > { %1039 = vst.msk [vmem:[%s1683_s13 + $0x38] sm:$0xf] %vm1024_vm1, %v1006_v24  ;;  %v922_v28 = vmul.f32 %v1663_v56, %v886_v27  ;;  %v863_v29 = vld [vmem:[#allocation2 + $0x38] sm:$0xff] }
  0xf1   : > { %v950_v30 = vadd.f32 %v1668_v62, %v914_v26  ;;  %v899_v10 = vmul.f32 %v1663_v56, %v863_v29  ;;  %v871_v31 = vld [vmem:[#allocation2 + $0x78] sm:$0xff] }
  0xf2   : > { %v958_v32 = vadd.f32 %v1668_v62, %v922_v28  ;;  %v907_v33 = vmul.f32 %v1663_v56, %v871_v31 }
  0xf3   : > { %v982_v34 = vmax.f32 %v950_v30, 0.0  ;;  %v935_v35 = vadd.f32 %v1668_v62, %v899_v10  ;;  %v879_v36 = vld [vmem:[#allocation2 + $0xb8] sm:$0xff] }
  0xf4   : > { %v990_v37 = vmax.f32 %v958_v32, 0.0  ;;  %v943_v38 = vadd.f32 %v1668_v62, %v907_v33  ;;  %v915_v39 = vmul.f32 %v1663_v56, %v879_v36  ;;  %v887_v40 = vld [vmem:[#allocation2 + $0xf8] sm:$0xff] }
  0xf5   : > { %v1014_v20 = vpack.c.bf16 %v982_v34, %v982_v34  ;;  %v967_v41 = vmax.f32 %v935_v35, 0.0  ;;  %v923_v42 = vmul.f32 %v1663_v56, %v887_v40 }
  0xf6   : > { %v1022_v43 = vpack.c.bf16 %v990_v37, %v990_v37  ;;  %v975_v44 = vmax.f32 %v943_v38, 0.0  ;;  %v951_v45 = vadd.f32 %v1668_v62, %v915_v39 }
  0xf7   : > { %1047 = vst.msk [vmem:[%s1683_s13 + $0x58] sm:$0xf] %vm1024_vm1, %v1014_v20  ;;  %v999_v46 = vpack.c.bf16 %v967_v41, %v967_v41  ;;  %v959_v47 = vadd.f32 %v1668_v62, %v923_v42 }
  0xf8   : > { %1055 = vst.msk [vmem:[%s1683_s13 + $0x78] sm:$0xf] %vm1024_vm1, %v1022_v43  ;;  %v1007_v49 = vpack.c.bf16 %v975_v44, %v975_v44  ;;  %v983_v50 = vmax.f32 %v951_v45, 0.0 }
  0xf9   : > { %1032 = vst.msk [vmem:[%s1683_s13 + $0x1c] sm:$0xf] %vm1024_vm1, %v999_v46  ;;  %v991_v51 = vmax.f32 %v959_v47, 0.0 }
  0xfa   : > { %1040 = vst.msk [vmem:[%s1683_s13 + $0x3c] sm:$0xf] %vm1024_vm1, %v1007_v49  ;;  %v1015_v56 = vpack.c.bf16 %v983_v50, %v983_v50 }
  0xfb   : > { %v1023_v52 = vpack.c.bf16 %v991_v51, %v991_v51 }
  0xfc   : > { %1048 = vst.msk [vmem:[%s1683_s13 + $0x5c] sm:$0xf] %vm1024_vm1, %v1015_v56 }
  0xfd   : > { %1056 = vst.msk [vmem:[%s1683_s13 + $0x7c] sm:$0xf] %vm1024_vm1, %v1023_v52 }
  0xfe PF: > { %s16_s23 = sadd.s32 1, %s1414_s23   ;;  %s1851_s21 = smov %s1410_s22 }
  0xff   : > { %p13_p5 = scmp.ge.s32.totalorder %s16_s23, 4   ;;  %s1852_s22 = smov %s1854_s24 }
 0x101   :  { %15 = sbr.rel (!%p13_p5) target bundleno = 2 (0x2), region = 97 }

// kernel: densenet_forward.23
= control target key start
LH: loop header
LB: loop body
LE: loop exit
PB: predicated region body
PF: predicated region fallthrough
CT: control target
= control target key end

     0   :  { %s903_s9 = smov 0   ;;  %s905_s10 = smov 0   ;;  %s1086_s0 = inlined_call_operand.vmem [shape: bf16[648,16], index: 0, kind: input, shape index: {}]   ;;  %s1087_s1 = inlined_call_operand.vmem [shape: bf16[16,72], index: 1, kind: input, shape index: {}]   ;;  %s1088_s2 = inlined_call_operand.vmem [shape: bf16[648,72], index: 2, kind: output, shape index: {}]  }
   0x1   :  { %s907_s11 = smov 0  }
   0x2 LB: > { %s31_s12 = sadd.s32 1, %s881_s10  ;;  %p746_p0 = scmp.ge.s32.totalorder %s885_s11, 1  ;;  %s885_s11 = sphi %s907_s11, %s12_s11   ;;  %s881_s10 = sphi %s905_s10, %s1090_s10   ;;  %s877_s9 = sphi %s903_s9, %s1089_s9  }
   0x3   : > { %p33_p1 = scmp.ge.s32.totalorder %s31_s12, 3  ;;  %p155_p2 = scmp.lt.s32.totalorder %s885_s11, 4 }
   0x5   : > { %s1092_s12 = smov (%p33_p1, %s31_s12), 0  ;;  %p156_p3 = pnand %p746_p0, %p155_p2 }
   0x6   : > { %s191_s15 = smul.u32 (!%p156_p3), 27, %s877_s9 }
   0x7   : > { %159 = sbr.rel (%p156_p3) target bundleno = 219 (0xdb), region = 28 }
   0x8   : > { %p192_p4 = scmp.lt.s32.totalorder (!%p156_p3), %s191_s15, 80 }
   0xc   : > { %v834_v0 = vld [vmem:[%s1087_s1] sm:$0xff]  ;;  %s1094_s15 = smov (!%p192_p4, %s191_s15), 80  ;;  %vm381_vm0 = vcmask 130048   ;;  %vm223_vm1 = vcmask 588800   ;;  %v887_v11 = vmov 0.0   ;;  %vm614_vm2 = vcmask 584704  }
   0xd   : > { %431 = vmatpush.bf16.msra.mxu0 %v834_v0  ;;  %835 = vmatpush.bf16.msra.mxu1 %v834_v0  ;;  %s747_s16 = sshll.u32 %s1094_s15, 2  ;;  %224 = vst.msk [vmem:[#allocation2] sm:$0xff] %vm223_vm1, %v887_v11 }
   0xe   : > { %836 = vmatpush.bf16.msra.mxu2 %v834_v0  ;;  %837 = vmatpush.bf16.msra.mxu3 %v834_v0  ;;  %s932_s19 = scalar_lea.vmem %s1086_s0, %s747_s16  ;;  %225 = vst.msk [vmem:[#allocation2 + $0x8] sm:$0xff] %vm223_vm1, %v887_v11  ;;  %s996_s22 = scalar_lea.vmem %s1088_s2, %s747_s16 }
   0xf   : > { %v821_v1 = vld [vmem:[%s932_s19] sm:$0xff]  ;;  %v822_v5 = vld [vmem:[%s932_s19 + $0x8] sm:$0xff]  ;;  %226 = vst.msk [vmem:[#allocation2 + $0x10] sm:$0xff] %vm223_vm1, %v887_v11  ;;  %v823_v12 = vld [vmem:[%s932_s19 + $0x10] sm:$0xff] }
  0x10   : > { %v825_v2 = vld [vmem:[%s932_s19 + $0x20] sm:$0xff]  ;;  %805 = vmatmul.msk.bf16.vlgmr.msra.gmra.mxu0 %vm381_vm0, %v821_v1  ;;  %v826_v6 = vld [vmem:[%s932_s19 + $0x28] sm:$0xff]  ;;  %227 = vst.msk [vmem:[#allocation2 + $0x18] sm:$0xff] %vm223_vm1, %v887_v11  ;;  %v827_v13 = vld [vmem:[%s932_s19 + $0x30] sm:$0xff] }
  0x11   : > { %v829_v3 = vld [vmem:[%s932_s19 + $0x40] sm:$0xff]  ;;  %809 = vmatmul.msk.bf16.vlgmr.msra.gmra.mxu1 %vm381_vm0, %v825_v2  ;;  %v277_v7 = vld [vmem:[%s932_s19 + $0x68] sm:$0xf]  ;;  %228 = vst.msk [vmem:[#allocation2 + $0x20] sm:$0xff] %vm223_vm1, %v887_v11  ;;  %v831_v14 = vld [vmem:[%s932_s19 + $0x50] sm:$0xff] }
  0x12   : > { %813 = vmatmul.msk.bf16.vlgmr.msra.gmra.mxu2 %vm381_vm0, %v829_v3  ;;  %v833_v4 = vld [vmem:[%s932_s19 + $0x60] sm:$0xff]  ;;  %v830_v8 = vld [vmem:[%s932_s19 + $0x48] sm:$0xff]  ;;  %v360_v9 = vunpack.c.l.b16 %v277_v7  ;;  %229 = vst.msk [vmem:[#allocation2 + $0x28] sm:$0xff] %vm223_vm1, %v887_v11  ;;  %v824_v15 = vld [vmem:[%s932_s19 + $0x18] sm:$0xff] }
  0x13   : > { %817 = vmatmul.msk.bf16.vlgmr.msra.gmra.mxu3 %vm381_vm0, %v833_v4  ;;  %230 = vst.msk [vmem:[#allocation2 + $0x30] sm:$0xff] %vm223_vm1, %v887_v11  ;;  %v828_v16 = vld [vmem:[%s932_s19 + $0x38] sm:$0xff] }
  0x14   : > { %v374_v10 = vpack.c.b16 %v360_v9, %v360_v9  ;;  %231 = vst.msk [vmem:[#allocation2 + $0x38] sm:$0xff] %vm223_vm1, %v887_v11  ;;  %v832_v17 = vld [vmem:[%s932_s19 + $0x58] sm:$0xff]  ;;  %v278_v18 = vld [vmem:[#allocation2] sm:$0xff] }
  0x15   : > { %232 = vst.msk [vmem:[#allocation2 + $0x40] sm:$0xff] %vm223_vm1, %v887_v11  ;;  %v279_v25 = vld [vmem:[#allocation2 + $0x8] sm:$0xff] }
  0x16   : > { %233 = vst.msk [vmem:[#allocation2 + $0x48] sm:$0xff] %vm223_vm1, %v887_v11  ;;  %v280_v39 = vld [vmem:[#allocation2 + $0x10] sm:$0xff] }
  0x17   : > { %234 = vst.msk [vmem:[#allocation2 + $0x50] sm:$0xff] %vm223_vm1, %v887_v11  ;;  %v281_v59 = vld [vmem:[#allocation2 + $0x18] sm:$0xff] }
  0x18   : > { %235 = vst.msk [vmem:[#allocation2 + $0x58] sm:$0xff] %vm223_vm1, %v887_v11 }
  0x19   : > { %236 = vst.msk [vmem:[#allocation2 + $0x60] sm:$0xff] %vm223_vm1, %v887_v11 }
  0x1a   : > { %237 = vst.msk [vmem:[#allocation2 + $0x68] sm:$0xff] %vm223_vm1, %v887_v11 }
  0x1b   : > { %238 = vst.msk [vmem:[#allocation2 + $0x70] sm:$0xff] %vm223_vm1, %v887_v11 }
  0x1c   : > { %239 = vst.msk [vmem:[#allocation2 + $0x78] sm:$0xff] %vm223_vm1, %v887_v11  ;;  %v286_v19 = vld [vmem:[#allocation2 + $0x40] sm:$0xff] }
  0x1d   : > { %240 = vst.msk [vmem:[#allocation2 + $0x80] sm:$0xff] %vm223_vm1, %v887_v11  ;;  %v287_v26 = vld [vmem:[#allocation2 + $0x48] sm:$0xff] }
  0x1e   : > { %241 = vst.msk [vmem:[#allocation2 + $0x88] sm:$0xff] %vm223_vm1, %v887_v11  ;;  %v288_v43 = vld [vmem:[#allocation2 + $0x50] sm:$0xff] }
  0x1f   : > { %242 = vst.msk [vmem:[#allocation2 + $0x90] sm:$0xff] %vm223_vm1, %v887_v11  ;;  %v289_v61 = vld [vmem:[#allocation2 + $0x58] sm:$0xff] }
  0x20   : > { %806 = vmatmul.msk.bf16.gmra.mxu0 %vm381_vm0, %v822_v5  ;;  %243 = vst.msk [vmem:[#allocation2 + $0x98] sm:$0xff] %vm223_vm1, %v887_v11 }
  0x21   : > { %810 = vmatmul.msk.bf16.gmra.mxu1 %vm381_vm0, %v826_v6  ;;  %244 = vst.msk [vmem:[#allocation2 + $0xa0] sm:$0xff] %vm223_vm1, %v887_v11 }
  0x22   : > { %814 = vmatmul.msk.bf16.gmra.mxu2 %vm381_vm0, %v830_v8  ;;  %245 = vst.msk [vmem:[#allocation2 + $0xa8] sm:$0xff] %vm223_vm1, %v887_v11 }
  0x23   : > { %818 = vmatmul.msk.bf16.gmra.mxu3 %vm381_vm0, %v374_v10  ;;  %246 = vst.msk [vmem:[#allocation2 + $0xb0] sm:$0xff] %vm223_vm1, %v887_v11  ;;  %v282_v10 = vld [vmem:[#allocation2 + $0x20] sm:$0xff] }
  0x24   : > { %247 = vst.msk [vmem:[#allocation2 + $0xb8] sm:$0xff] %vm223_vm1, %v887_v11  ;;  %v294_v24 = vld [vmem:[#allocation2 + $0x80] sm:$0xff] }
  0x25   : > { %248 = vst.msk [vmem:[#allocation2 + $0xc0] sm:$0xff] %vm223_vm1, %v887_v11  ;;  %v295_v38 = vld [vmem:[#allocation2 + $0x88] sm:$0xff] }
  0x26   : > { %249 = vst.msk [vmem:[#allocation2 + $0xc8] sm:$0xff] %vm223_vm1, %v887_v11  ;;  %v296_v57 = vld [vmem:[#allocation2 + $0x90] sm:$0xff] }
  0x27   : > { %250 = vst.msk [vmem:[#allocation2 + $0xd0] sm:$0xff] %vm223_vm1, %v887_v11  ;;  %v297_v8 = vld [vmem:[#allocation2 + $0x98] sm:$0xff] }
  0x2c   : > { %v302_v47 = vld [vmem:[#allocation2 + $0xc0] sm:$0xff] }
  0x2d   : > { %v303_v51 = vld [vmem:[#allocation2 + $0xc8] sm:$0xff] }
  0x30   : > { %807 = vmatmul.msk.bf16.gmra.mxu0 %vm381_vm0, %v823_v12 }
  0x31   : > { %811 = vmatmul.msk.bf16.gmra.mxu1 %vm381_vm0, %v827_v13  ;;  %v290_v13 = vld [vmem:[#allocation2 + $0x60] sm:$0xff] }
  0x32   : > { %815 = vmatmul.msk.bf16.gmra.mxu2 %vm381_vm0, %v831_v14 }
  0x40   : > { %808 = vmatmul.msk.bf16.gmra.mxu0 %vm381_vm0, %v824_v15 }
  0x41   : > { %812 = vmatmul.msk.bf16.gmra.mxu1 %vm381_vm0, %v828_v16 }
  0x42   : > { %816 = vmatmul.msk.bf16.gmra.mxu2 %vm381_vm0, %v832_v17 }
  0x8d   : > { %v433_v20 = vpop.f32.mrf.mxu0 }
  0x8e   : > { %v453_v21 = vpop.f32.mrf.mxu1  ;;  %v502_v22 = vadd.f32 %v433_v20, %v278_v18 }
  0x8f   : > { %v510_v23 = vadd.f32 %v453_v21, %v286_v19 }
  0x90   : > { %530 = vst.msk [vmem:[#allocation2] sm:$0xff] %vm223_vm1, %v502_v22 }
  0x91   : > { %538 = vst.msk [vmem:[#allocation2 + $0x40] sm:$0xff] %vm223_vm1, %v510_v23 }
  0x95   : > { %v473_v27 = vpop.f32.mrf.mxu2  ;;  %v435_v29 = vpop.f32.mrf.mxu0 }
  0x96   : > { %v518_v28 = vadd.f32 %v473_v27, %v294_v24  ;;  %v455_v30 = vpop.f32.mrf.mxu1  ;;  %v503_v31 = vadd.f32 %v435_v29, %v279_v25  ;;  %v493_v33 = vpop.f32.mrf.mxu3 }
  0x97   : > { %v511_v32 = vadd.f32 %v455_v30, %v287_v26  ;;  %v560_v34 = vld [vmem:[#allocation2] sm:$0xff]  ;;  %v526_v56 = vadd.f32 %v493_v33, %v302_v47  ;;  %v291_v33 = vld [vmem:[#allocation2 + $0x68] sm:$0xff] }
  0x98   : > { %546 = vst.msk [vmem:[#allocation2 + $0x80] sm:$0xff] %vm223_vm1, %v518_v28  ;;  %v587_v35 = vpack.c.bf16 %v560_v34, %v560_v34  ;;  %v568_v36 = vld [vmem:[#allocation2 + $0x40] sm:$0xff] }
  0x99   : > { %531 = vst.msk [vmem:[#allocation2 + $0x8] sm:$0xff] %vm223_vm1, %v503_v31  ;;  %v595_v37 = vpack.c.bf16 %v568_v36, %v568_v36  ;;  %v298_v28 = vld [vmem:[#allocation2 + $0xa0] sm:$0xff]  ;;  %v283_v31 = vld [vmem:[#allocation2 + $0x28] sm:$0xff] }
  0x9a   : > { %539 = vst.msk [vmem:[#allocation2 + $0x48] sm:$0xff] %vm223_vm1, %v511_v32 }
  0x9b   : > { %615 = vst.msk [vmem:[%s996_s22] sm:$0xf] %vm614_vm2, %v587_v35 }
  0x9c   : > { %623 = vst.msk [vmem:[%s996_s22 + $0x20] sm:$0xf] %vm614_vm2, %v595_v37  ;;  %v304_v37 = vld [vmem:[#allocation2 + $0xd0] sm:$0xff] }
  0x9d   : > { %v475_v40 = vpop.f32.mrf.mxu2  ;;  %v438_v42 = vpop.f32.mrf.mxu0  ;;  %554 = vst.msk [vmem:[#allocation2 + $0xc0] sm:$0xff] %vm223_vm1, %v526_v56 }
  0x9e   : > { %v519_v41 = vadd.f32 %v475_v40, %v295_v38  ;;  %v458_v44 = vpop.f32.mrf.mxu1  ;;  %v504_v46 = vadd.f32 %v438_v42, %v280_v39  ;;  %v495_v48 = vpop.f32.mrf.mxu3 }
  0x9f   : > { %v576_v45 = vld [vmem:[#allocation2 + $0x80] sm:$0xff]  ;;  %v512_v54 = vadd.f32 %v458_v44, %v288_v43  ;;  %v527_v58 = vadd.f32 %v495_v48, %v303_v51  ;;  %v284_v48 = vld [vmem:[#allocation2 + $0x30] sm:$0xff] }
  0xa0   : > { %v603_v49 = vpack.c.bf16 %v576_v45, %v576_v45  ;;  %v561_v50 = vld [vmem:[#allocation2 + $0x8] sm:$0xff]  ;;  %547 = vst.msk [vmem:[#allocation2 + $0x88] sm:$0xff] %vm223_vm1, %v519_v41 }
  0xa1   : > { %v588_v52 = vpack.c.bf16 %v561_v50, %v561_v50  ;;  %v569_v53 = vld [vmem:[#allocation2 + $0x48] sm:$0xff]  ;;  %532 = vst.msk [vmem:[#allocation2 + $0x10] sm:$0xff] %vm223_vm1, %v504_v46  ;;  %v292_v50 = vld [vmem:[#allocation2 + $0x70] sm:$0xff] }
  0xa2   : > { %631 = vst.msk [vmem:[%s996_s22 + $0x40] sm:$0xf] %vm614_vm2, %v603_v49  ;;  %v596_v55 = vpack.c.bf16 %v569_v53, %v569_v53  ;;  %v299_v46 = vld [vmem:[#allocation2 + $0xa8] sm:$0xff] }
  0xa3   : > { %616 = vst.msk [vmem:[%s996_s22 + $0x4] sm:$0xf] %vm614_vm2, %v588_v52 }
  0xa4   : > { %624 = vst.msk [vmem:[%s996_s22 + $0x24] sm:$0xf] %vm614_vm2, %v596_v55  ;;  %v584_v17 = vld [vmem:[#allocation2 + $0xc0] sm:$0xff] }
  0xa5   : > { %540 = vst.msk [vmem:[#allocation2 + $0x50] sm:$0xff] %vm223_vm1, %v512_v54  ;;  %v478_v60 = vpop.f32.mrf.mxu2  ;;  %v440_v63 = vpop.f32.mrf.mxu0  ;;  %v611_v26 = vpack.c.bf16 %v584_v17, %v584_v17 }
  0xa6   : > { %v520_v62 = vadd.f32 %v478_v60, %v296_v57  ;;  %v460_v0 = vpop.f32.mrf.mxu1  ;;  %v505_v2 = vadd.f32 %v440_v63, %v281_v59  ;;  %555 = vst.msk [vmem:[#allocation2 + $0xc8] sm:$0xff] %vm223_vm1, %v527_v58  ;;  %v498_v3 = vpop.f32.mrf.mxu3 }
  0xa7   : > { %v577_v1 = vld [vmem:[#allocation2 + $0x88] sm:$0xff]  ;;  %v513_v6 = vadd.f32 %v460_v0, %v289_v61  ;;  %639 = vst.msk [vmem:[%s996_s22 + $0x60] sm:$0xf] %vm614_vm2, %v611_v26  ;;  %v528_v44 = vadd.f32 %v498_v3, %v304_v37  ;;  %v300_v61 = vld [vmem:[#allocation2 + $0xb0] sm:$0xff]  ;;  %v285_v0 = vld [vmem:[#allocation2 + $0x38] sm:$0xff] }
  0xa8   : > { %v604_v4 = vpack.c.bf16 %v577_v1, %v577_v1  ;;  %v562_v5 = vld [vmem:[#allocation2 + $0x10] sm:$0xff]  ;;  %548 = vst.msk [vmem:[#allocation2 + $0x90] sm:$0xff] %vm223_vm1, %v520_v62  ;;  %v293_v3 = vld [vmem:[#allocation2 + $0x78] sm:$0xff] }
  0xa9   : > { %v589_v7 = vpack.c.bf16 %v562_v5, %v562_v5  ;;  %533 = vst.msk [vmem:[#allocation2 + $0x18] sm:$0xff] %vm223_vm1, %v505_v2 }
  0xaa   : > { %632 = vst.msk [vmem:[%s996_s22 + $0x44] sm:$0xf] %vm614_vm2, %v604_v4 }
  0xab   : > { %617 = vst.msk [vmem:[%s996_s22 + $0x8] sm:$0xf] %vm614_vm2, %v589_v7 }
  0xac   : > { %v570_v9 = vld [vmem:[#allocation2 + $0x50] sm:$0xff]  ;;  %541 = vst.msk [vmem:[#allocation2 + $0x58] sm:$0xff] %vm223_vm1, %v513_v6 }
  0xad   : > { %v597_v11 = vpack.c.bf16 %v570_v9, %v570_v9  ;;  %v480_v12 = vpop.f32.mrf.mxu2  ;;  %v443_v15 = vpop.f32.mrf.mxu0  ;;  %v585_v24 = vld [vmem:[#allocation2 + $0xc8] sm:$0xff]  ;;  %556 = vst.msk [vmem:[#allocation2 + $0xd0] sm:$0xff] %vm223_vm1, %v528_v44 }
  0xae   : > { %v521_v14 = vadd.f32 %v480_v12, %v297_v8  ;;  %v463_v16 = vpop.f32.mrf.mxu1  ;;  %v506_v19 = vadd.f32 %v443_v15, %v282_v10  ;;  %v500_v20 = vpop.f32.mrf.mxu3  ;;  %v612_v29 = vpack.c.bf16 %v585_v24, %v585_v24 }
  0xaf   : > { %625 = vst.msk [vmem:[%s996_s22 + $0x28] sm:$0xf] %vm614_vm2, %v597_v11  ;;  %v578_v18 = vld [vmem:[#allocation2 + $0x90] sm:$0xff]  ;;  %v514_v23 = vadd.f32 %v463_v16, %v290_v13 }
  0xb0   : > { %v605_v21 = vpack.c.bf16 %v578_v18, %v578_v18  ;;  %v563_v22 = vld [vmem:[#allocation2 + $0x18] sm:$0xff]  ;;  %549 = vst.msk [vmem:[#allocation2 + $0x98] sm:$0xff] %vm223_vm1, %v521_v14 }
  0xb1   : > { %v590_v25 = vpack.c.bf16 %v563_v22, %v563_v22  ;;  %534 = vst.msk [vmem:[#allocation2 + $0x20] sm:$0xff] %vm223_vm1, %v506_v19  ;;  %v301_v14 = vld [vmem:[#allocation2 + $0xb8] sm:$0xff] }
  0xb2   : > { %633 = vst.msk [vmem:[%s996_s22 + $0x48] sm:$0xf] %vm614_vm2, %v605_v21 }
  0xb3   : > { %618 = vst.msk [vmem:[%s996_s22 + $0xc] sm:$0xf] %vm614_vm2, %v590_v25  ;;  %v571_v27 = vld [vmem:[#allocation2 + $0x58] sm:$0xff] }
  0xb4   : > { %v598_v30 = vpack.c.bf16 %v571_v27, %v571_v27  ;;  %542 = vst.msk [vmem:[#allocation2 + $0x60] sm:$0xff] %vm223_vm1, %v514_v23  ;;  %v586_v63 = vld [vmem:[#allocation2 + $0xd0] sm:$0xff] }
  0xb5   : > { %v483_v32 = vpop.f32.mrf.mxu2  ;;  %v445_v35 = vpop.f32.mrf.mxu0  ;;  %640 = vst.msk [vmem:[%s996_s22 + $0x64] sm:$0xf] %vm614_vm2, %v612_v29  ;;  %v613_v2 = vpack.c.bf16 %v586_v63, %v586_v63 }
  0xb6   : > { %626 = vst.msk [vmem:[%s996_s22 + $0x2c] sm:$0xf] %vm614_vm2, %v598_v30  ;;  %v522_v34 = vadd.f32 %v483_v32, %v298_v28  ;;  %v465_v36 = vpop.f32.mrf.mxu1  ;;  %v507_v39 = vadd.f32 %v445_v35, %v283_v31 }
  0xb7   : > { %v579_v38 = vld [vmem:[#allocation2 + $0x98] sm:$0xff]  ;;  %v515_v42 = vadd.f32 %v465_v36, %v291_v33  ;;  %641 = vst.msk [vmem:[%s996_s22 + $0x68] sm:$0xf] %vm614_vm2, %v613_v2 }
  0xb8   : > { %v606_v40 = vpack.c.bf16 %v579_v38, %v579_v38  ;;  %v564_v41 = vld [vmem:[#allocation2 + $0x20] sm:$0xff]  ;;  %550 = vst.msk [vmem:[#allocation2 + $0xa0] sm:$0xff] %vm223_vm1, %v522_v34 }
  0xb9   : > { %v591_v43 = vpack.c.bf16 %v564_v41, %v564_v41  ;;  %535 = vst.msk [vmem:[#allocation2 + $0x28] sm:$0xff] %vm223_vm1, %v507_v39 }
  0xba   : > { %634 = vst.msk [vmem:[%s996_s22 + $0x4c] sm:$0xf] %vm614_vm2, %v606_v40 }
  0xbb   : > { %619 = vst.msk [vmem:[%s996_s22 + $0x10] sm:$0xf] %vm614_vm2, %v591_v43  ;;  %v572_v45 = vld [vmem:[#allocation2 + $0x60] sm:$0xff] }
  0xbc   : > { %v599_v47 = vpack.c.bf16 %v572_v45, %v572_v45  ;;  %543 = vst.msk [vmem:[#allocation2 + $0x68] sm:$0xff] %vm223_vm1, %v515_v42 }
  0xbd   : > { %v485_v49 = vpop.f32.mrf.mxu2  ;;  %v448_v52 = vpop.f32.mrf.mxu0 }
  0xbe   : > { %627 = vst.msk [vmem:[%s996_s22 + $0x30] sm:$0xf] %vm614_vm2, %v599_v47  ;;  %v523_v51 = vadd.f32 %v485_v49, %v299_v46  ;;  %v468_v53 = vpop.f32.mrf.mxu1  ;;  %v508_v55 = vadd.f32 %v448_v52, %v284_v48 }
  0xbf   : > { %v580_v54 = vld [vmem:[#allocation2 + $0xa0] sm:$0xff]  ;;  %v516_v58 = vadd.f32 %v468_v53, %v292_v50 }
  0xc0   : > { %v607_v56 = vpack.c.bf16 %v580_v54, %v580_v54  ;;  %v565_v57 = vld [vmem:[#allocation2 + $0x28] sm:$0xff]  ;;  %551 = vst.msk [vmem:[#allocation2 + $0xa8] sm:$0xff] %vm223_vm1, %v523_v51 }
  0xc1   : > { %v592_v59 = vpack.c.bf16 %v565_v57, %v565_v57  ;;  %536 = vst.msk [vmem:[#allocation2 + $0x30] sm:$0xff] %vm223_vm1, %v508_v55 }
  0xc2   : > { %635 = vst.msk [vmem:[%s996_s22 + $0x50] sm:$0xf] %vm614_vm2, %v607_v56 }
  0xc3   : > { %620 = vst.msk [vmem:[%s996_s22 + $0x14] sm:$0xf] %vm614_vm2, %v592_v59  ;;  %v573_v60 = vld [vmem:[#allocation2 + $0x68] sm:$0xff] }
  0xc4   : > { %v600_v62 = vpack.c.bf16 %v573_v60, %v573_v60  ;;  %544 = vst.msk [vmem:[#allocation2 + $0x70] sm:$0xff] %vm223_vm1, %v516_v58 }
  0xc5   : > { %v488_v1 = vpop.f32.mrf.mxu2  ;;  %v450_v5 = vpop.f32.mrf.mxu0 }
  0xc6   : > { %628 = vst.msk [vmem:[%s996_s22 + $0x34] sm:$0xf] %vm614_vm2, %v600_v62  ;;  %v524_v4 = vadd.f32 %v488_v1, %v300_v61  ;;  %v470_v6 = vpop.f32.mrf.mxu1  ;;  %v509_v8 = vadd.f32 %v450_v5, %v285_v0 }
  0xc7   : > { %v581_v7 = vld [vmem:[#allocation2 + $0xa8] sm:$0xff]  ;;  %v517_v11 = vadd.f32 %v470_v6, %v293_v3 }
  0xc8   : > { %v608_v9 = vpack.c.bf16 %v581_v7, %v581_v7  ;;  %v566_v10 = vld [vmem:[#allocation2 + $0x30] sm:$0xff]  ;;  %552 = vst.msk [vmem:[#allocation2 + $0xb0] sm:$0xff] %vm223_vm1, %v524_v4 }
  0xc9   : > { %v593_v12 = vpack.c.bf16 %v566_v10, %v566_v10  ;;  %537 = vst.msk [vmem:[#allocation2 + $0x38] sm:$0xff] %vm223_vm1, %v509_v8 }
  0xca   : > { %636 = vst.msk [vmem:[%s996_s22 + $0x54] sm:$0xf] %vm614_vm2, %v608_v9 }
  0xcb   : > { %621 = vst.msk [vmem:[%s996_s22 + $0x18] sm:$0xf] %vm614_vm2, %v593_v12  ;;  %v574_v13 = vld [vmem:[#allocation2 + $0x70] sm:$0xff] }
  0xcc   : > { %v601_v15 = vpack.c.bf16 %v574_v13, %v574_v13  ;;  %545 = vst.msk [vmem:[#allocation2 + $0x78] sm:$0xff] %vm223_vm1, %v517_v11 }
  0xcd   : > { %v490_v16 = vpop.f32.mrf.mxu2 }
  0xce   : > { %629 = vst.msk [vmem:[%s996_s22 + $0x38] sm:$0xf] %vm614_vm2, %v601_v15  ;;  %v525_v17 = vadd.f32 %v490_v16, %v301_v14 }
  0xcf   : > { %v582_v18 = vld [vmem:[#allocation2 + $0xb0] sm:$0xff] }
  0xd0   : > { %v609_v19 = vpack.c.bf16 %v582_v18, %v582_v18  ;;  %v567_v20 = vld [vmem:[#allocation2 + $0x38] sm:$0xff]  ;;  %553 = vst.msk [vmem:[#allocation2 + $0xb8] sm:$0xff] %vm223_vm1, %v525_v17 }
  0xd1   : > { %v594_v21 = vpack.c.bf16 %v567_v20, %v567_v20 }
  0xd2   : > { %637 = vst.msk [vmem:[%s996_s22 + $0x58] sm:$0xf] %vm614_vm2, %v609_v19 }
  0xd3   : > { %622 = vst.msk [vmem:[%s996_s22 + $0x1c] sm:$0xf] %vm614_vm2, %v594_v21  ;;  %v575_v22 = vld [vmem:[#allocation2 + $0x78] sm:$0xff] }
  0xd4   : > { %v602_v23 = vpack.c.bf16 %v575_v22, %v575_v22 }
  0xd6   : > { %630 = vst.msk [vmem:[%s996_s22 + $0x3c] sm:$0xf] %vm614_vm2, %v602_v23 }
  0xd7   : > { %v583_v24 = vld [vmem:[#allocation2 + $0xb8] sm:$0xff] }
  0xd8   : > { %v610_v25 = vpack.c.bf16 %v583_v24, %v583_v24 }
  0xda   : > { %638 = vst.msk [vmem:[%s996_s22 + $0x5c] sm:$0xf] %vm614_vm2, %v610_v25 }
  0xdb PF: > { %s12_s11 = sadd.s32 1, %s885_s11   ;;  %s1089_s9 = smov %s881_s10 }
  0xdc   : > { %p9_p5 = scmp.ge.s32.totalorder %s12_s11, 5   ;;  %s1090_s10 = smov %s1092_s12 }
  0xde   :  { %11 = sbr.rel (!%p9_p5) target bundleno = 2 (0x2), region = 69 }

// kernel: densenet_forward.26
= control target key start
LH: loop header
LB: loop body
LE: loop exit
PB: predicated region body
PF: predicated region fallthrough
CT: control target
= control target key end

     0   :  { %s1228_s15 = smov 0   ;;  %s1230_s16 = smov 0   ;;  %s1546_s0 = inlined_call_operand.vmem [shape: bf16[512,128], index: 0, kind: input, shape index: {}]   ;;  %s1547_s1 = inlined_call_operand.vmem [shape: bf16[128,16], index: 1, kind: input, shape index: {}]   ;;  %s1548_s2 = inlined_call_operand.vmem [shape: f32[1,128], index: 2, kind: input, shape index: {}]   ;;  %s1549_s3 = inlined_call_operand.vmem [shape: f32[1,128], index: 3, kind: input, shape index: {}]   ;;  %s1550_s4 = inlined_call_operand.vmem [shape: bf16[512,16], index: 4, kind: output, shape index: {}]  }
   0x1   :  { %s1232_s17 = smov 0  }
   0x2 LB: > { %s33_s18 = sadd.s32 1, %s1196_s16  ;;  %p1001_p0 = scmp.ge.s32.totalorder %s1200_s17, 1  ;;  %s1200_s17 = sphi %s1232_s17, %s14_s17   ;;  %s1196_s16 = sphi %s1230_s16, %s1552_s16   ;;  %s1192_s15 = sphi %s1228_s15, %s1551_s15  }
   0x3   : > { %p35_p1 = scmp.ge.s32.totalorder %s33_s18, 2  ;;  %p221_p2 = scmp.lt.s32.totalorder %s1200_s17, 3 }
   0x5   : > { %s1554_s18 = smov (%p35_p1, %s33_s18), 0  ;;  %p222_p3 = pnand %p1001_p0, %p221_p2 }
   0x6   : > { %s1002_s21 = sshll.u32 (!%p222_p3), %s1192_s15, 5 }
   0x7   : > { %225 = sbr.rel (%p222_p3) target bundleno = 247 (0xf7), region = 36  ;;  %p268_p4 = scmp.lt.s32.totalorder (!%p222_p3), %s1002_s21, 63 }
   0xc   : > { %v1047_v0 = vld [vmem:[%s1547_s1 + $0x38] sm:$0xff]  ;;  %v1046_v1 = vld [vmem:[%s1547_s1 + $0x30] sm:$0xff]  ;;  %s1556_s21 = smov (!%p268_p4, %s1002_s21), 63  ;;  %v1045_v2 = vld [vmem:[%s1547_s1 + $0x28] sm:$0xff]  ;;  %vm304_vm0 = vcmask 130048   ;;  %vm838_vm1 = vcmask 125952  }
   0xd   : > { %617 = vmatpush.bf16.msra.mxu0 %v1047_v0  ;;  %1127 = vmatpush.bf16.msra.mxu1 %v1047_v0  ;;  %s1003_s24 = sshll.u32 %s1556_s21, 2  ;;  %v1044_v5 = vld [vmem:[%s1547_s1 + $0x20] sm:$0xff]  ;;  %v1043_v15 = vld [vmem:[%s1547_s1 + $0x18] sm:$0xff]  ;;  %v1042_v25 = vld [vmem:[%s1547_s1 + $0x10] sm:$0xff] }
   0xe   : > { %1128 = vmatpush.bf16.msra.mxu2 %v1047_v0  ;;  %1129 = vmatpush.bf16.msra.mxu3 %v1047_v0  ;;  %s1263_s29 = scalar_lea.vmem %s1546_s0, %s1003_s24  ;;  %v1275_v10 = vld [vmem:[%s1548_s2] ss:$0 sm:$0xff]  ;;  %v1041_v34 = vld [vmem:[%s1547_s1 + $0x8] sm:$0xff]  ;;  %s1441_s25 = scalar_lea.vmem %s1550_s4, %s1003_s24 }
   0xf   : > { %v1049_v3 = vld [vmem:[%s1263_s29] sm:$0xff]   ;;  %v1112_v43 = vld [vmem:[%s1263_s29 + $0x8] sm:$0xff]  }
  0x10   : > { %v1115_v4 = vld [vmem:[%s1263_s29 + $0x20] sm:$0xff]   ;;  %v1050_v8 = vunpack.c.l.bf16 %v1049_v3  ;;  %v1051_v9 = vunpack.c.h.bf16 %v1049_v3  ;;  %v1116_v47 = vld [vmem:[%s1263_s29 + $0x28] sm:$0xff]   ;;  %v1054_v52 = vunpack.c.l.bf16 %v1112_v43  ;;  %v1055_v53 = vunpack.c.h.bf16 %v1112_v43 }
  0x11   : > { %618 = vmatpush.bf16.msra.mxu0 %v1046_v1  ;;  %1130 = vmatpush.bf16.msra.mxu1 %v1046_v1  ;;  %v1119_v6 = vld [vmem:[%s1263_s29 + $0x40] sm:$0xff]   ;;  %v1066_v11 = vunpack.c.l.bf16 %v1115_v4  ;;  %v1067_v12 = vunpack.c.h.bf16 %v1115_v4  ;;  %v1120_v48 = vld [vmem:[%s1263_s29 + $0x48] sm:$0xff]   ;;  %v1070_v55 = vunpack.c.l.bf16 %v1116_v47  ;;  %v1071_v56 = vunpack.c.h.bf16 %v1116_v47 }
  0x12   : > { %1131 = vmatpush.bf16.msra.mxu2 %v1046_v1  ;;  %1132 = vmatpush.bf16.msra.mxu3 %v1046_v1  ;;  %v1123_v7 = vld [vmem:[%s1263_s29 + $0x60] sm:$0xff]   ;;  %v1082_v13 = vunpack.c.l.bf16 %v1119_v6  ;;  %v1083_v14 = vunpack.c.h.bf16 %v1119_v6  ;;  %v405_v18 = vmul.f32 %v1275_v10, %v1050_v8  ;;  %v406_v19 = vmul.f32 %v1275_v10, %v1051_v9  ;;  %v1124_v49 = vld [vmem:[%s1263_s29 + $0x68] sm:$0xff]  }
  0x13   : > { %v1098_v16 = vunpack.c.l.bf16 %v1123_v7  ;;  %v1099_v17 = vunpack.c.h.bf16 %v1123_v7  ;;  %v1285_v20 = vld [vmem:[%s1549_s3] ss:$0 sm:$0xff]  ;;  %v413_v21 = vmul.f32 %v1275_v10, %v1066_v11  ;;  %v414_v22 = vmul.f32 %v1275_v10, %v1067_v12 }
  0x14   : > { %v421_v23 = vmul.f32 %v1275_v10, %v1082_v13  ;;  %v422_v24 = vmul.f32 %v1275_v10, %v1083_v14  ;;  %v441_v28 = vadd.f32 %v1285_v20, %v405_v18  ;;  %v442_v29 = vadd.f32 %v1285_v20, %v406_v19  ;;  %v1040_v44 = vld [vmem:[%s1547_s1] sm:$0xff]  ;;  %v1113_v19 = vld [vmem:[%s1263_s29 + $0x10] sm:$0xff]  }
  0x15   : > { %619 = vmatpush.bf16.msra.mxu0 %v1045_v2  ;;  %1133 = vmatpush.bf16.msra.mxu1 %v1045_v2  ;;  %v429_v26 = vmul.f32 %v1275_v10, %v1098_v16  ;;  %v430_v27 = vmul.f32 %v1275_v10, %v1099_v17  ;;  %v449_v30 = vadd.f32 %v1285_v20, %v413_v21  ;;  %v1086_v57 = vunpack.c.l.bf16 %v1120_v48  ;;  %v1117_v21 = vld [vmem:[%s1263_s29 + $0x30] sm:$0xff]  }
  0x16   : > { %1134 = vmatpush.bf16.msra.mxu2 %v1045_v2  ;;  %1135 = vmatpush.bf16.msra.mxu3 %v1045_v2  ;;  %v450_v31 = vadd.f32 %v1285_v20, %v414_v22  ;;  %v457_v32 = vadd.f32 %v1285_v20, %v421_v23  ;;  %v458_v33 = vadd.f32 %v1285_v20, %v422_v24  ;;  %v473_v37 = vmax.f32 %v441_v28, 0.0 }
  0x17   : > { %v465_v35 = vadd.f32 %v1285_v20, %v429_v26  ;;  %v466_v36 = vadd.f32 %v1285_v20, %v430_v27  ;;  %v474_v38 = vmax.f32 %v442_v29, 0.0  ;;  %v481_v39 = vmax.f32 %v449_v30, 0.0  ;;  %v1121_v26 = vld [vmem:[%s1263_s29 + $0x50] sm:$0xff]  }
  0x18   : > { %v482_v40 = vmax.f32 %v450_v31, 0.0  ;;  %v489_v41 = vmax.f32 %v457_v32, 0.0  ;;  %v490_v42 = vmax.f32 %v458_v33, 0.0  ;;  %v1087_v59 = vunpack.c.h.bf16 %v1120_v48  ;;  %v1125_v27 = vld [vmem:[%s1263_s29 + $0x70] sm:$0xff]  }
  0x19   : > { %620 = vmatpush.bf16.msra.mxu0 %v1044_v5  ;;  %1136 = vmatpush.bf16.msra.mxu1 %v1044_v5  ;;  %v497_v45 = vmax.f32 %v465_v35, 0.0  ;;  %v498_v46 = vmax.f32 %v466_v36, 0.0  ;;  %v505_v50 = vpack.c.bf16 %v474_v38, %v473_v37  ;;  %v1102_v60 = vunpack.c.l.bf16 %v1124_v49 }
  0x1a   : > { %1137 = vmatpush.bf16.msra.mxu2 %v1044_v5  ;;  %1138 = vmatpush.bf16.msra.mxu3 %v1044_v5  ;;  %v509_v51 = vpack.c.bf16 %v482_v40, %v481_v39  ;;  %v513_v54 = vpack.c.bf16 %v490_v42, %v489_v41  ;;  %v1103_v61 = vunpack.c.h.bf16 %v1124_v49  ;;  %v407_v62 = vmul.f32 %v1275_v10, %v1054_v52 }
  0x1b   : > { %v517_v58 = vpack.c.bf16 %v498_v46, %v497_v45  ;;  %v408_v63 = vmul.f32 %v1275_v10, %v1055_v53  ;;  %v415_v0 = vmul.f32 %v1275_v10, %v1070_v55  ;;  %v416_v1 = vmul.f32 %v1275_v10, %v1071_v56 }
  0x1c   : > { %v423_v2 = vmul.f32 %v1275_v10, %v1086_v57  ;;  %v424_v3 = vmul.f32 %v1275_v10, %v1087_v59  ;;  %v431_v4 = vmul.f32 %v1275_v10, %v1102_v60  ;;  %v432_v5 = vmul.f32 %v1275_v10, %v1103_v61 }
  0x1d   : > { %621 = vmatpush.bf16.msra.mxu0 %v1043_v15  ;;  %1139 = vmatpush.bf16.msra.mxu1 %v1043_v15  ;;  %v443_v6 = vadd.f32 %v1285_v20, %v407_v62  ;;  %v444_v7 = vadd.f32 %v1285_v20, %v408_v63  ;;  %v451_v8 = vadd.f32 %v1285_v20, %v415_v0  ;;  %v1058_v28 = vunpack.c.l.bf16 %v1113_v19  ;;  %v1114_v63 = vld [vmem:[%s1263_s29 + $0x18] sm:$0xff]  }
  0x1e   : > { %1140 = vmatpush.bf16.msra.mxu2 %v1043_v15  ;;  %1141 = vmatpush.bf16.msra.mxu3 %v1043_v15  ;;  %v452_v9 = vadd.f32 %v1285_v20, %v416_v1  ;;  %v459_v11 = vadd.f32 %v1285_v20, %v423_v2  ;;  %v460_v12 = vadd.f32 %v1285_v20, %v424_v3  ;;  %v1059_v29 = vunpack.c.h.bf16 %v1113_v19  ;;  %v1118_v2 = vld [vmem:[%s1263_s29 + $0x38] sm:$0xff]  }
  0x1f   : > { %v467_v13 = vadd.f32 %v1285_v20, %v431_v4  ;;  %v468_v14 = vadd.f32 %v1285_v20, %v432_v5  ;;  %v475_v15 = vmax.f32 %v443_v6, 0.0  ;;  %v476_v16 = vmax.f32 %v444_v7, 0.0  ;;  %v1122_v3 = vld [vmem:[%s1263_s29 + $0x58] sm:$0xff]  }
  0x20   : > { %v483_v17 = vmax.f32 %v451_v8, 0.0  ;;  %v484_v18 = vmax.f32 %v452_v9, 0.0  ;;  %v491_v22 = vmax.f32 %v459_v11, 0.0  ;;  %v492_v23 = vmax.f32 %v460_v12, 0.0  ;;  %v1126_v4 = vld [vmem:[%s1263_s29 + $0x78] sm:$0xff]  }
  0x21   : > { %622 = vmatpush.bf16.msra.mxu0 %v1042_v25  ;;  %1142 = vmatpush.bf16.msra.mxu1 %v1042_v25  ;;  %v499_v24 = vmax.f32 %v467_v13, 0.0  ;;  %v1074_v30 = vunpack.c.l.bf16 %v1117_v21  ;;  %v1075_v31 = vunpack.c.h.bf16 %v1117_v21  ;;  %v506_v32 = vpack.c.bf16 %v476_v16, %v475_v15 }
  0x22   : > { %1143 = vmatpush.bf16.msra.mxu2 %v1042_v25  ;;  %1144 = vmatpush.bf16.msra.mxu3 %v1042_v25  ;;  %v500_v25 = vmax.f32 %v468_v14, 0.0  ;;  %v510_v33 = vpack.c.bf16 %v484_v18, %v483_v17  ;;  %v1091_v35 = vunpack.c.h.bf16 %v1121_v26  ;;  %v514_v36 = vpack.c.bf16 %v492_v23, %v491_v22 }
  0x23   : > { %v1106_v38 = vunpack.c.l.bf16 %v1125_v27  ;;  %v1107_v39 = vunpack.c.h.bf16 %v1125_v27  ;;  %v409_v40 = vmul.f32 %v1275_v10, %v1058_v28  ;;  %v410_v41 = vmul.f32 %v1275_v10, %v1059_v29 }
  0x24   : > { %v518_v37 = vpack.c.bf16 %v500_v25, %v499_v24  ;;  %v417_v42 = vmul.f32 %v1275_v10, %v1074_v30  ;;  %v418_v43 = vmul.f32 %v1275_v10, %v1075_v31  ;;  %v426_v45 = vmul.f32 %v1275_v10, %v1091_v35 }
  0x25   : > { %623 = vmatpush.bf16.msra.mxu0 %v1041_v34  ;;  %1145 = vmatpush.bf16.msra.mxu1 %v1041_v34  ;;  %v433_v46 = vmul.f32 %v1275_v10, %v1106_v38  ;;  %v434_v47 = vmul.f32 %v1275_v10, %v1107_v39  ;;  %v1202_v48 = vmov 0.0   ;;  %v445_v49 = vadd.f32 %v1285_v20, %v409_v40 }
  0x26   : > { %1146 = vmatpush.bf16.msra.mxu2 %v1041_v34  ;;  %1147 = vmatpush.bf16.msra.mxu3 %v1041_v34  ;;  %v1090_v34 = vunpack.c.l.bf16 %v1121_v26  ;;  %305 = vst.msk [vmem:[#allocation2] sm:$0xff] %vm304_vm0, %v1202_v48  ;;  %v454_v52 = vadd.f32 %v1285_v20, %v418_v43  ;;  %v1062_v7 = vunpack.c.l.bf16 %v1114_v63  ;;  %v1063_v8 = vunpack.c.h.bf16 %v1114_v63 }
  0x27   : > { %306 = vst.msk [vmem:[#allocation2 + $0x8] sm:$0xff] %vm304_vm0, %v1202_v48  ;;  %v469_v55 = vadd.f32 %v1285_v20, %v433_v46  ;;  %v470_v56 = vadd.f32 %v1285_v20, %v434_v47  ;;  %v477_v57 = vmax.f32 %v445_v49, 0.0  ;;  %v1078_v11 = vunpack.c.l.bf16 %v1118_v2 }
  0x28   : > { %307 = vst.msk [vmem:[#allocation2 + $0x10] sm:$0xff] %vm304_vm0, %v1202_v48  ;;  %v486_v60 = vmax.f32 %v454_v52, 0.0  ;;  %v1079_v12 = vunpack.c.h.bf16 %v1118_v2  ;;  %v1094_v13 = vunpack.c.l.bf16 %v1122_v3  ;;  %v1095_v15 = vunpack.c.h.bf16 %v1122_v3 }
  0x29   : > { %624 = vmatpush.bf16.msra.mxu0 %v1040_v44  ;;  %1148 = vmatpush.bf16.msra.mxu1 %v1040_v44  ;;  %308 = vst.msk [vmem:[#allocation2 + $0x18] sm:$0xff] %vm304_vm0, %v1202_v48  ;;  %v501_v0 = vmax.f32 %v469_v55, 0.0  ;;  %v502_v1 = vmax.f32 %v470_v56, 0.0  ;;  %v1110_v16 = vunpack.c.l.bf16 %v1126_v4  ;;  %v1111_v17 = vunpack.c.h.bf16 %v1126_v4 }
  0x2a   : > { %1149 = vmatpush.bf16.msra.mxu2 %v1040_v44  ;;  %1150 = vmatpush.bf16.msra.mxu3 %v1040_v44  ;;  %v425_v44 = vmul.f32 %v1275_v10, %v1090_v34  ;;  %309 = vst.msk [vmem:[#allocation2 + $0x20] sm:$0xff] %vm304_vm0, %v1202_v48  ;;  %v411_v18 = vmul.f32 %v1275_v10, %v1062_v7 }
  0x2b   : > { %310 = vst.msk [vmem:[#allocation2 + $0x28] sm:$0xff] %vm304_vm0, %v1202_v48  ;;  %v519_v14 = vpack.c.bf16 %v502_v1, %v501_v0  ;;  %v412_v19 = vmul.f32 %v1275_v10, %v1063_v8  ;;  %v419_v21 = vmul.f32 %v1275_v10, %v1078_v11  ;;  %v420_v22 = vmul.f32 %v1275_v10, %v1079_v12 }
  0x2c   : > { %625 = vmatmul.bf16.vlgmr.msra.gmra.mxu0 %v505_v50  ;;  %645 = vmatmul.bf16.vlgmr.msra.gmra.mxu1 %v509_v51  ;;  %v446_v50 = vadd.f32 %v1285_v20, %v410_v41  ;;  %v453_v51 = vadd.f32 %v1285_v20, %v417_v42  ;;  %v461_v53 = vadd.f32 %v1285_v20, %v425_v44 }
  0x2d   : > { %665 = vmatmul.bf16.vlgmr.msra.gmra.mxu2 %v513_v54  ;;  %685 = vmatmul.bf16.vlgmr.msra.gmra.mxu3 %v517_v58  ;;  %v462_v54 = vadd.f32 %v1285_v20, %v426_v45  ;;  %311 = vst.msk [vmem:[#allocation2 + $0x30] sm:$0xff] %vm304_vm0, %v1202_v48  ;;  %v427_v23 = vmul.f32 %v1275_v10, %v1094_v13  ;;  %v521_v45 = vld [vmem:[#allocation2] sm:$0xff] }
  0x2e   : > { %v478_v58 = vmax.f32 %v446_v50, 0.0  ;;  %v485_v59 = vmax.f32 %v453_v51, 0.0  ;;  %v493_v61 = vmax.f32 %v461_v53, 0.0  ;;  %312 = vst.msk [vmem:[#allocation2 + $0x38] sm:$0xff] %vm304_vm0, %v1202_v48  ;;  %v428_v24 = vmul.f32 %v1275_v10, %v1095_v15 }
  0x2f   : > { %v494_v62 = vmax.f32 %v462_v54, 0.0  ;;  %313 = vst.msk [vmem:[#allocation2 + $0x40] sm:$0xff] %vm304_vm0, %v1202_v48  ;;  %v435_v25 = vmul.f32 %v1275_v10, %v1110_v16  ;;  %v436_v26 = vmul.f32 %v1275_v10, %v1111_v17  ;;  %v447_v27 = vadd.f32 %v1285_v20, %v411_v18  ;;  %v522_v54 = vld [vmem:[#allocation2 + $0x8] sm:$0xff] }
  0x30   : > { %v507_v5 = vpack.c.bf16 %v478_v58, %v477_v57  ;;  %v511_v6 = vpack.c.bf16 %v486_v60, %v485_v59  ;;  %314 = vst.msk [vmem:[#allocation2 + $0x48] sm:$0xff] %vm304_vm0, %v1202_v48  ;;  %v448_v28 = vadd.f32 %v1285_v20, %v412_v19  ;;  %v455_v29 = vadd.f32 %v1285_v20, %v419_v21 }
  0x31   : > { %v515_v9 = vpack.c.bf16 %v494_v62, %v493_v61  ;;  %315 = vst.msk [vmem:[#allocation2 + $0x50] sm:$0xff] %vm304_vm0, %v1202_v48  ;;  %v456_v30 = vadd.f32 %v1285_v20, %v420_v22  ;;  %v463_v10 = vadd.f32 %v1285_v20, %v427_v23  ;;  %v464_v31 = vadd.f32 %v1285_v20, %v428_v24 }
  0x32   : > { %316 = vst.msk [vmem:[#allocation2 + $0x58] sm:$0xff] %vm304_vm0, %v1202_v48  ;;  %v479_v34 = vmax.f32 %v447_v27, 0.0  ;;  %v480_v35 = vmax.f32 %v448_v28, 0.0 }
  0x33   : > { %317 = vst.msk [vmem:[#allocation2 + $0x60] sm:$0xff] %vm304_vm0, %v1202_v48  ;;  %v495_v38 = vmax.f32 %v463_v10, 0.0  ;;  %v496_v39 = vmax.f32 %v464_v31, 0.0 }
  0x34   : > { %318 = vst.msk [vmem:[#allocation2 + $0x68] sm:$0xff] %vm304_vm0, %v1202_v48  ;;  %v508_v41 = vpack.c.bf16 %v480_v35, %v479_v34 }
  0x35   : > { %319 = vst.msk [vmem:[#allocation2 + $0x70] sm:$0xff] %vm304_vm0, %v1202_v48  ;;  %v516_v43 = vpack.c.bf16 %v496_v39, %v495_v38 }
  0x36   : > { %320 = vst.msk [vmem:[#allocation2 + $0x78] sm:$0xff] %vm304_vm0, %v1202_v48  ;;  %v529_v46 = vld [vmem:[#allocation2 + $0x40] sm:$0xff] }
  0x37   : > { %321 = vst.msk [vmem:[#allocation2 + $0x80] sm:$0xff] %vm304_vm0, %v1202_v48 }
  0x38   : > { %322 = vst.msk [vmem:[#allocation2 + $0x88] sm:$0xff] %vm304_vm0, %v1202_v48 }
  0x39   : > { %323 = vst.msk [vmem:[#allocation2 + $0x90] sm:$0xff] %vm304_vm0, %v1202_v48 }
  0x3a   : > { %324 = vst.msk [vmem:[#allocation2 + $0x98] sm:$0xff] %vm304_vm0, %v1202_v48 }
  0x3b   : > { %325 = vst.msk [vmem:[#allocation2 + $0xa0] sm:$0xff] %vm304_vm0, %v1202_v48 }
  0x3c   : > { %630 = vmatmul.bf16.gmra.mxu0 %v506_v32  ;;  %650 = vmatmul.bf16.gmra.mxu1 %v510_v33  ;;  %v471_v32 = vadd.f32 %v1285_v20, %v435_v25  ;;  %v472_v33 = vadd.f32 %v1285_v20, %v436_v26  ;;  %326 = vst.msk [vmem:[#allocation2 + $0xa8] sm:$0xff] %vm304_vm0, %v1202_v48 }
  0x3d   : > { %670 = vmatmul.bf16.gmra.mxu2 %v514_v36  ;;  %690 = vmatmul.bf16.gmra.mxu3 %v518_v37  ;;  %v487_v36 = vmax.f32 %v455_v29, 0.0  ;;  %v488_v37 = vmax.f32 %v456_v30, 0.0  ;;  %327 = vst.msk [vmem:[#allocation2 + $0xb0] sm:$0xff] %vm304_vm0, %v1202_v48  ;;  %v524_v29 = vld [vmem:[#allocation2 + $0x18] sm:$0xff] }
  0x3e   : > { %v503_v40 = vmax.f32 %v471_v32, 0.0  ;;  %v504_v20 = vmax.f32 %v472_v33, 0.0  ;;  %328 = vst.msk [vmem:[#allocation2 + $0xb8] sm:$0xff] %vm304_vm0, %v1202_v48  ;;  %v537_v52 = vld [vmem:[#allocation2 + $0x80] sm:$0xff]  ;;  %v532_v32 = vld [vmem:[#allocation2 + $0x58] sm:$0xff] }
  0x3f   : > { %329 = vst.msk [vmem:[#allocation2 + $0xc0] sm:$0xff] %vm304_vm0, %v1202_v48  ;;  %v512_v42 = vpack.c.bf16 %v488_v37, %v487_v36  ;;  %v538_v3 = vld [vmem:[#allocation2 + $0x88] sm:$0xff] }
  0x40   : > { %330 = vst.msk [vmem:[#allocation2 + $0xc8] sm:$0xff] %vm304_vm0, %v1202_v48  ;;  %v520_v44 = vpack.c.bf16 %v504_v20, %v503_v40  ;;  %v539_v23 = vld [vmem:[#allocation2 + $0x90] sm:$0xff] }
  0x41   : > { %331 = vst.msk [vmem:[#allocation2 + $0xd0] sm:$0xff] %vm304_vm0, %v1202_v48  ;;  %v540_v40 = vld [vmem:[#allocation2 + $0x98] sm:$0xff] }
  0x42   : > { %332 = vst.msk [vmem:[#allocation2 + $0xd8] sm:$0xff] %vm304_vm0, %v1202_v48 }
  0x43   : > { %333 = vst.msk [vmem:[#allocation2 + $0xe0] sm:$0xff] %vm304_vm0, %v1202_v48 }
  0x44   : > { %334 = vst.msk [vmem:[#allocation2 + $0xe8] sm:$0xff] %vm304_vm0, %v1202_v48 }
  0x45   : > { %335 = vst.msk [vmem:[#allocation2 + $0xf0] sm:$0xff] %vm304_vm0, %v1202_v48 }
  0x46   : > { %336 = vst.msk [vmem:[#allocation2 + $0xf8] sm:$0xff] %vm304_vm0, %v1202_v48  ;;  %v545_v53 = vld [vmem:[#allocation2 + $0xc0] sm:$0xff]  ;;  %v530_v48 = vld [vmem:[#allocation2 + $0x48] sm:$0xff] }
  0x47   : > { %v546_v4 = vld [vmem:[#allocation2 + $0xc8] sm:$0xff] }
  0x48   : > { %v547_v24 = vld [vmem:[#allocation2 + $0xd0] sm:$0xff] }
  0x4c   : > { %635 = vmatmul.bf16.gmra.mxu0 %v507_v5  ;;  %655 = vmatmul.bf16.gmra.mxu1 %v511_v6 }
  0x4d   : > { %675 = vmatmul.bf16.gmra.mxu2 %v515_v9  ;;  %695 = vmatmul.bf16.gmra.mxu3 %v519_v14  ;;  %v523_v9 = vld [vmem:[#allocation2 + $0x10] sm:$0xff] }
  0x4e   : > { %v531_v14 = vld [vmem:[#allocation2 + $0x50] sm:$0xff] }
  0x5c   : > { %640 = vmatmul.bf16.gmra.mxu0 %v508_v41  ;;  %660 = vmatmul.bf16.gmra.mxu1 %v512_v42 }
  0x5d   : > { %680 = vmatmul.bf16.gmra.mxu2 %v516_v43  ;;  %700 = vmatmul.bf16.gmra.mxu3 %v520_v44  ;;  %v548_v44 = vld [vmem:[#allocation2 + $0xd8] sm:$0xff] }
  0xa9   : > { %v626_v47 = vpop.f32.mrf.mxu0  ;;  %v646_v49 = vpop.f32.mrf.mxu1 }
  0xaa   : > { %v706_v50 = vadd.f32 %v626_v47, %v521_v45  ;;  %v714_v51 = vadd.f32 %v646_v49, %v529_v46  ;;  %v525_v49 = vld [vmem:[#allocation2 + $0x20] sm:$0xff] }
  0xac   : > { %739 = vst.msk [vmem:[#allocation2] sm:$0xff] %vm304_vm0, %v706_v50 }
  0xad   : > { %747 = vst.msk [vmem:[#allocation2 + $0x40] sm:$0xff] %vm304_vm0, %v714_v51 }
  0xb0   : > { %v666_v55 = vpop.f32.mrf.mxu2  ;;  %v686_v56 = vpop.f32.mrf.mxu3 }
  0xb1   : > { %v722_v57 = vadd.f32 %v666_v55, %v537_v52  ;;  %v730_v58 = vadd.f32 %v686_v56, %v545_v53  ;;  %v628_v59 = vpop.f32.mrf.mxu0  ;;  %v648_v60 = vpop.f32.mrf.mxu1 }
  0xb2   : > { %v707_v61 = vadd.f32 %v628_v59, %v522_v54  ;;  %v715_v1 = vadd.f32 %v648_v60, %v530_v48  ;;  %v541_v48 = vld [vmem:[#allocation2 + $0xa0] sm:$0xff] }
  0xb3   : > { %v774_v62 = vld [vmem:[#allocation2] sm:$0xff]  ;;  %755 = vst.msk [vmem:[#allocation2 + $0x80] sm:$0xff] %vm304_vm0, %v722_v57 }
  0xb4   : > { %v806_v63 = vpack.c.bf16 %v774_v62, %v774_v62  ;;  %v782_v0 = vld [vmem:[#allocation2 + $0x40] sm:$0xff]  ;;  %763 = vst.msk [vmem:[#allocation2 + $0xc0] sm:$0xff] %vm304_vm0, %v730_v58 }
  0xb5   : > { %v814_v2 = vpack.c.bf16 %v782_v0, %v782_v0  ;;  %740 = vst.msk [vmem:[#allocation2 + $0x8] sm:$0xff] %vm304_vm0, %v707_v61  ;;  %v533_v58 = vld [vmem:[#allocation2 + $0x60] sm:$0xff] }
  0xb6   : > { %839 = vst.msk [vmem:[%s1441_s25] sm:$0xf] %vm838_vm1, %v806_v63  ;;  %v549_v60 = vld [vmem:[#allocation2 + $0xe0] sm:$0xff] }
  0xb7   : > { %847 = vst.msk [vmem:[%s1441_s25 + $0x20] sm:$0xf] %vm838_vm1, %v814_v2 }
  0xb8   : > { %748 = vst.msk [vmem:[#allocation2 + $0x48] sm:$0xff] %vm304_vm0, %v715_v1  ;;  %v668_v5 = vpop.f32.mrf.mxu2  ;;  %v688_v6 = vpop.f32.mrf.mxu3 }
  0xb9   : > { %v723_v7 = vadd.f32 %v668_v5, %v538_v3  ;;  %v731_v8 = vadd.f32 %v688_v6, %v546_v4  ;;  %v631_v11 = vpop.f32.mrf.mxu0  ;;  %v651_v12 = vpop.f32.mrf.mxu1  ;;  %v526_v3 = vld [vmem:[#allocation2 + $0x28] sm:$0xff] }
  0xba   : > { %v790_v13 = vld [vmem:[#allocation2 + $0x80] sm:$0xff]  ;;  %v708_v19 = vadd.f32 %v631_v11, %v523_v9  ;;  %v716_v22 = vadd.f32 %v651_v12, %v531_v14 }
  0xbb   : > { %v822_v15 = vpack.c.bf16 %v790_v13, %v790_v13  ;;  %v798_v16 = vld [vmem:[#allocation2 + $0xc0] sm:$0xff]  ;;  %756 = vst.msk [vmem:[#allocation2 + $0x88] sm:$0xff] %vm304_vm0, %v723_v7  ;;  %v534_v7 = vld [vmem:[#allocation2 + $0x68] sm:$0xff] }
  0xbc   : > { %v830_v17 = vpack.c.bf16 %v798_v16, %v798_v16  ;;  %v775_v18 = vld [vmem:[#allocation2 + $0x8] sm:$0xff]  ;;  %764 = vst.msk [vmem:[#allocation2 + $0xc8] sm:$0xff] %vm304_vm0, %v731_v8 }
  0xbd   : > { %855 = vst.msk [vmem:[%s1441_s25 + $0x40] sm:$0xf] %vm838_vm1, %v822_v15  ;;  %v807_v21 = vpack.c.bf16 %v775_v18, %v775_v18  ;;  %v542_v15 = vld [vmem:[#allocation2 + $0xa8] sm:$0xff] }
  0xbe   : > { %863 = vst.msk [vmem:[%s1441_s25 + $0x60] sm:$0xf] %vm838_vm1, %v830_v17  ;;  %v550_v16 = vld [vmem:[#allocation2 + $0xe8] sm:$0xff] }
  0xbf   : > { %840 = vst.msk [vmem:[%s1441_s25 + $0x4] sm:$0xf] %vm838_vm1, %v807_v21  ;;  %v783_v25 = vld [vmem:[#allocation2 + $0x48] sm:$0xff] }
  0xc0   : > { %v815_v26 = vpack.c.bf16 %v783_v25, %v783_v25  ;;  %741 = vst.msk [vmem:[#allocation2 + $0x10] sm:$0xff] %vm304_vm0, %v708_v19  ;;  %v671_v27 = vpop.f32.mrf.mxu2  ;;  %v691_v28 = vpop.f32.mrf.mxu3  ;;  %v527_v25 = vld [vmem:[#allocation2 + $0x30] sm:$0xff] }
  0xc1   : > { %749 = vst.msk [vmem:[#allocation2 + $0x50] sm:$0xff] %vm304_vm0, %v716_v22  ;;  %v724_v30 = vadd.f32 %v671_v27, %v539_v23  ;;  %v732_v10 = vadd.f32 %v691_v28, %v547_v24  ;;  %v633_v31 = vpop.f32.mrf.mxu0  ;;  %v653_v33 = vpop.f32.mrf.mxu1 }
  0xc2   : > { %848 = vst.msk [vmem:[%s1441_s25 + $0x24] sm:$0xf] %vm838_vm1, %v815_v26  ;;  %v791_v34 = vld [vmem:[#allocation2 + $0x88] sm:$0xff]  ;;  %v709_v37 = vadd.f32 %v633_v31, %v524_v29  ;;  %v717_v39 = vadd.f32 %v653_v33, %v532_v32  ;;  %v535_v33 = vld [vmem:[#allocation2 + $0x70] sm:$0xff] }
  0xc3   : > { %v823_v35 = vpack.c.bf16 %v791_v34, %v791_v34  ;;  %v799_v36 = vld [vmem:[#allocation2 + $0xc8] sm:$0xff]  ;;  %757 = vst.msk [vmem:[#allocation2 + $0x90] sm:$0xff] %vm304_vm0, %v724_v30 }
  0xc4   : > { %v831_v38 = vpack.c.bf16 %v799_v36, %v799_v36  ;;  %765 = vst.msk [vmem:[#allocation2 + $0xd0] sm:$0xff] %vm304_vm0, %v732_v10  ;;  %v543_v36 = vld [vmem:[#allocation2 + $0xb0] sm:$0xff] }
  0xc5   : > { %856 = vst.msk [vmem:[%s1441_s25 + $0x44] sm:$0xf] %vm838_vm1, %v823_v35 }
  0xc6   : > { %864 = vst.msk [vmem:[%s1441_s25 + $0x64] sm:$0xf] %vm838_vm1, %v831_v38 }
  0xc7   : > { %v776_v20 = vld [vmem:[#allocation2 + $0x10] sm:$0xff]  ;;  %742 = vst.msk [vmem:[#allocation2 + $0x18] sm:$0xff] %vm304_vm0, %v709_v37 }
  0xc8   : > { %v808_v41 = vpack.c.bf16 %v776_v20, %v776_v20  ;;  %v784_v42 = vld [vmem:[#allocation2 + $0x50] sm:$0xff]  ;;  %750 = vst.msk [vmem:[#allocation2 + $0x58] sm:$0xff] %vm304_vm0, %v717_v39  ;;  %v673_v43 = vpop.f32.mrf.mxu2  ;;  %v693_v45 = vpop.f32.mrf.mxu3 }
  0xc9   : > { %v816_v46 = vpack.c.bf16 %v784_v42, %v784_v42  ;;  %v725_v47 = vadd.f32 %v673_v43, %v540_v40  ;;  %v636_v50 = vpop.f32.mrf.mxu0  ;;  %v656_v51 = vpop.f32.mrf.mxu1  ;;  %v733_v55 = vadd.f32 %v693_v45, %v548_v44  ;;  %v528_v44 = vld [vmem:[#allocation2 + $0x38] sm:$0xff] }
  0xca   : > { %841 = vst.msk [vmem:[%s1441_s25 + $0x8] sm:$0xf] %vm838_vm1, %v808_v41  ;;  %v792_v52 = vld [vmem:[#allocation2 + $0x90] sm:$0xff]  ;;  %v710_v57 = vadd.f32 %v636_v50, %v525_v49  ;;  %v718_v63 = vadd.f32 %v656_v51, %v533_v58 }
  0xcb   : > { %849 = vst.msk [vmem:[%s1441_s25 + $0x28] sm:$0xf] %vm838_vm1, %v816_v46  ;;  %v824_v53 = vpack.c.bf16 %v792_v52, %v792_v52  ;;  %v800_v54 = vld [vmem:[#allocation2 + $0xd0] sm:$0xff] }
  0xcc   : > { %v832_v56 = vpack.c.bf16 %v800_v54, %v800_v54  ;;  %758 = vst.msk [vmem:[#allocation2 + $0x98] sm:$0xff] %vm304_vm0, %v725_v47  ;;  %v551_v41 = vld [vmem:[#allocation2 + $0xf0] sm:$0xff]  ;;  %v536_v47 = vld [vmem:[#allocation2 + $0x78] sm:$0xff] }
  0xcd   : > { %857 = vst.msk [vmem:[%s1441_s25 + $0x48] sm:$0xf] %vm838_vm1, %v824_v53 }
  0xce   : > { %865 = vst.msk [vmem:[%s1441_s25 + $0x68] sm:$0xf] %vm838_vm1, %v832_v56  ;;  %v777_v59 = vld [vmem:[#allocation2 + $0x18] sm:$0xff] }
  0xcf   : > { %v809_v61 = vpack.c.bf16 %v777_v59, %v777_v59  ;;  %v785_v62 = vld [vmem:[#allocation2 + $0x58] sm:$0xff]  ;;  %766 = vst.msk [vmem:[#allocation2 + $0xd8] sm:$0xff] %vm304_vm0, %v733_v55 }
  0xd0   : > { %v817_v0 = vpack.c.bf16 %v785_v62, %v785_v62  ;;  %743 = vst.msk [vmem:[#allocation2 + $0x20] sm:$0xff] %vm304_vm0, %v710_v57  ;;  %v676_v1 = vpop.f32.mrf.mxu2  ;;  %v696_v2 = vpop.f32.mrf.mxu3  ;;  %v544_v56 = vld [vmem:[#allocation2 + $0xb8] sm:$0xff] }
  0xd1   : > { %842 = vst.msk [vmem:[%s1441_s25 + $0xc] sm:$0xf] %vm838_vm1, %v809_v61  ;;  %v726_v4 = vadd.f32 %v676_v1, %v541_v48  ;;  %v734_v5 = vadd.f32 %v696_v2, %v549_v60  ;;  %v638_v6 = vpop.f32.mrf.mxu0  ;;  %v658_v8 = vpop.f32.mrf.mxu1  ;;  %v552_v57 = vld [vmem:[#allocation2 + $0xf8] sm:$0xff] }
  0xd2   : > { %850 = vst.msk [vmem:[%s1441_s25 + $0x2c] sm:$0xf] %vm838_vm1, %v817_v0  ;;  %v711_v11 = vadd.f32 %v638_v6, %v526_v3  ;;  %v719_v13 = vadd.f32 %v658_v8, %v534_v7 }
  0xd3   : > { %v793_v9 = vld [vmem:[#allocation2 + $0x98] sm:$0xff]  ;;  %751 = vst.msk [vmem:[#allocation2 + $0x60] sm:$0xff] %vm304_vm0, %v718_v63 }
  0xd4   : > { %v825_v12 = vpack.c.bf16 %v793_v9, %v793_v9  ;;  %759 = vst.msk [vmem:[#allocation2 + $0xa0] sm:$0xff] %vm304_vm0, %v726_v4 }
  0xd5   : > { %767 = vst.msk [vmem:[#allocation2 + $0xe0] sm:$0xff] %vm304_vm0, %v734_v5 }
  0xd6   : > { %858 = vst.msk [vmem:[%s1441_s25 + $0x4c] sm:$0xf] %vm838_vm1, %v825_v12  ;;  %v801_v14 = vld [vmem:[#allocation2 + $0xd8] sm:$0xff] }
  0xd7   : > { %v833_v17 = vpack.c.bf16 %v801_v14, %v801_v14  ;;  %v778_v18 = vld [vmem:[#allocation2 + $0x20] sm:$0xff]  ;;  %744 = vst.msk [vmem:[#allocation2 + $0x28] sm:$0xff] %vm304_vm0, %v711_v11 }
  0xd8   : > { %v810_v19 = vpack.c.bf16 %v778_v18, %v778_v18  ;;  %752 = vst.msk [vmem:[#allocation2 + $0x68] sm:$0xff] %vm304_vm0, %v719_v13  ;;  %v678_v21 = vpop.f32.mrf.mxu2  ;;  %v698_v22 = vpop.f32.mrf.mxu3 }
  0xd9   : > { %866 = vst.msk [vmem:[%s1441_s25 + $0x6c] sm:$0xf] %vm838_vm1, %v833_v17  ;;  %v727_v23 = vadd.f32 %v678_v21, %v542_v15  ;;  %v735_v24 = vadd.f32 %v698_v22, %v550_v16  ;;  %v641_v26 = vpop.f32.mrf.mxu0  ;;  %v661_v27 = vpop.f32.mrf.mxu1 }
  0xda   : > { %843 = vst.msk [vmem:[%s1441_s25 + $0x10] sm:$0xf] %vm838_vm1, %v810_v19  ;;  %v786_v28 = vld [vmem:[#allocation2 + $0x60] sm:$0xff]  ;;  %v712_v32 = vadd.f32 %v641_v26, %v527_v25  ;;  %v720_v39 = vadd.f32 %v661_v27, %v535_v33 }
  0xdb   : > { %v818_v29 = vpack.c.bf16 %v786_v28, %v786_v28  ;;  %v794_v30 = vld [vmem:[#allocation2 + $0xa0] sm:$0xff]  ;;  %760 = vst.msk [vmem:[#allocation2 + $0xa8] sm:$0xff] %vm304_vm0, %v727_v23 }
  0xdc   : > { %v826_v10 = vpack.c.bf16 %v794_v30, %v794_v30  ;;  %v802_v31 = vld [vmem:[#allocation2 + $0xe0] sm:$0xff]  ;;  %768 = vst.msk [vmem:[#allocation2 + $0xe8] sm:$0xff] %vm304_vm0, %v735_v24 }
  0xdd   : > { %851 = vst.msk [vmem:[%s1441_s25 + $0x30] sm:$0xf] %vm838_vm1, %v818_v29  ;;  %v834_v34 = vpack.c.bf16 %v802_v31, %v802_v31 }
  0xde   : > { %859 = vst.msk [vmem:[%s1441_s25 + $0x50] sm:$0xf] %vm838_vm1, %v826_v10  ;;  %v779_v35 = vld [vmem:[#allocation2 + $0x28] sm:$0xff] }
  0xdf   : > { %867 = vst.msk [vmem:[%s1441_s25 + $0x70] sm:$0xf] %vm838_vm1, %v834_v34  ;;  %v811_v37 = vpack.c.bf16 %v779_v35, %v779_v35  ;;  %v787_v38 = vld [vmem:[#allocation2 + $0x68] sm:$0xff] }
  0xe0   : > { %v819_v40 = vpack.c.bf16 %v787_v38, %v787_v38  ;;  %745 = vst.msk [vmem:[#allocation2 + $0x30] sm:$0xff] %vm304_vm0, %v712_v32  ;;  %v681_v20 = vpop.f32.mrf.mxu2  ;;  %v701_v42 = vpop.f32.mrf.mxu3 }
  0xe1   : > { %844 = vst.msk [vmem:[%s1441_s25 + $0x14] sm:$0xf] %vm838_vm1, %v811_v37  ;;  %v728_v43 = vadd.f32 %v681_v20, %v543_v36  ;;  %v643_v45 = vpop.f32.mrf.mxu0  ;;  %v663_v49 = vpop.f32.mrf.mxu1  ;;  %v736_v52 = vadd.f32 %v701_v42, %v551_v41 }
  0xe2   : > { %852 = vst.msk [vmem:[%s1441_s25 + $0x34] sm:$0xf] %vm838_vm1, %v819_v40  ;;  %v795_v46 = vld [vmem:[#allocation2 + $0xa8] sm:$0xff]  ;;  %v713_v54 = vadd.f32 %v643_v45, %v528_v44  ;;  %v721_v55 = vadd.f32 %v663_v49, %v536_v47 }
  0xe3   : > { %v827_v50 = vpack.c.bf16 %v795_v46, %v795_v46  ;;  %v803_v51 = vld [vmem:[#allocation2 + $0xe8] sm:$0xff]  ;;  %753 = vst.msk [vmem:[#allocation2 + $0x70] sm:$0xff] %vm304_vm0, %v720_v39 }
  0xe4   : > { %v835_v53 = vpack.c.bf16 %v803_v51, %v803_v51  ;;  %761 = vst.msk [vmem:[#allocation2 + $0xb0] sm:$0xff] %vm304_vm0, %v728_v43 }
  0xe5   : > { %860 = vst.msk [vmem:[%s1441_s25 + $0x54] sm:$0xf] %vm838_vm1, %v827_v50 }
  0xe6   : > { %868 = vst.msk [vmem:[%s1441_s25 + $0x74] sm:$0xf] %vm838_vm1, %v835_v53 }
  0xe7   : > { %v780_v58 = vld [vmem:[#allocation2 + $0x30] sm:$0xff]  ;;  %769 = vst.msk [vmem:[#allocation2 + $0xf0] sm:$0xff] %vm304_vm0, %v736_v52 }
  0xe8   : > { %v812_v59 = vpack.c.bf16 %v780_v58, %v780_v58  ;;  %746 = vst.msk [vmem:[#allocation2 + $0x38] sm:$0xff] %vm304_vm0, %v713_v54  ;;  %v683_v48 = vpop.f32.mrf.mxu2  ;;  %v703_v60 = vpop.f32.mrf.mxu3 }
  0xe9   : > { %754 = vst.msk [vmem:[#allocation2 + $0x78] sm:$0xff] %vm304_vm0, %v721_v55  ;;  %v729_v61 = vadd.f32 %v683_v48, %v544_v56  ;;  %v737_v62 = vadd.f32 %v703_v60, %v552_v57 }
  0xea   : > { %845 = vst.msk [vmem:[%s1441_s25 + $0x18] sm:$0xf] %vm838_vm1, %v812_v59  ;;  %v788_v63 = vld [vmem:[#allocation2 + $0x70] sm:$0xff] }
  0xeb   : > { %v820_v0 = vpack.c.bf16 %v788_v63, %v788_v63  ;;  %v796_v1 = vld [vmem:[#allocation2 + $0xb0] sm:$0xff]  ;;  %762 = vst.msk [vmem:[#allocation2 + $0xb8] sm:$0xff] %vm304_vm0, %v729_v61 }
  0xec   : > { %v828_v2 = vpack.c.bf16 %v796_v1, %v796_v1  ;;  %770 = vst.msk [vmem:[#allocation2 + $0xf8] sm:$0xff] %vm304_vm0, %v737_v62 }
  0xed   : > { %853 = vst.msk [vmem:[%s1441_s25 + $0x38] sm:$0xf] %vm838_vm1, %v820_v0 }
  0xee   : > { %861 = vst.msk [vmem:[%s1441_s25 + $0x58] sm:$0xf] %vm838_vm1, %v828_v2  ;;  %v804_v3 = vld [vmem:[#allocation2 + $0xf0] sm:$0xff] }
  0xef   : > { %v836_v4 = vpack.c.bf16 %v804_v3, %v804_v3  ;;  %v781_v5 = vld [vmem:[#allocation2 + $0x38] sm:$0xff] }
  0xf0   : > { %v813_v6 = vpack.c.bf16 %v781_v5, %v781_v5  ;;  %v789_v7 = vld [vmem:[#allocation2 + $0x78] sm:$0xff] }
  0xf1   : > { %869 = vst.msk [vmem:[%s1441_s25 + $0x78] sm:$0xf] %vm838_vm1, %v836_v4  ;;  %v821_v8 = vpack.c.bf16 %v789_v7, %v789_v7 }
  0xf2   : > { %846 = vst.msk [vmem:[%s1441_s25 + $0x1c] sm:$0xf] %vm838_vm1, %v813_v6  ;;  %v797_v9 = vld [vmem:[#allocation2 + $0xb8] sm:$0xff] }
  0xf3   : > { %854 = vst.msk [vmem:[%s1441_s25 + $0x3c] sm:$0xf] %vm838_vm1, %v821_v8  ;;  %v829_v11 = vpack.c.bf16 %v797_v9, %v797_v9  ;;  %v805_v12 = vld [vmem:[#allocation2 + $0xf8] sm:$0xff] }
  0xf4   : > { %v837_v13 = vpack.c.bf16 %v805_v12, %v805_v12 }
  0xf5   : > { %862 = vst.msk [vmem:[%s1441_s25 + $0x5c] sm:$0xf] %vm838_vm1, %v829_v11 }
  0xf6   : > { %870 = vst.msk [vmem:[%s1441_s25 + $0x7c] sm:$0xf] %vm838_vm1, %v837_v13 }
  0xf7 PF: > { %s14_s17 = sadd.s32 1, %s1200_s17   ;;  %s1551_s15 = smov %s1196_s16 }
  0xf8   : > { %p11_p5 = scmp.ge.s32.totalorder %s14_s17, 4   ;;  %s1552_s16 = smov %s1554_s18 }
  0xfa   :  { %13 = sbr.rel (!%p11_p5) target bundleno = 2 (0x2), region = 83 }

// kernel: densenet_forward.27
= control target key start
LH: loop header
LB: loop body
LE: loop exit
PB: predicated region body
PF: predicated region fallthrough
CT: control target
= control target key end

     0   :  { %vm27_vm0 = vcmask 130048   ;;  %v522_v34 = vmov 0.0   ;;  %vm393_vm1 = vcmask 125952   ;;  %s802_s1 = inlined_call_operand.vmem [shape: bf16[128,16], index: 1, kind: input, shape index: {}]   ;;  %s803_s2 = inlined_call_operand.vmem [shape: f32[1,128], index: 2, kind: input, shape index: {}]   ;;  %s804_s3 = inlined_call_operand.vmem [shape: f32[1,128], index: 3, kind: input, shape index: {}]   ;;  %s805_s4 = inlined_call_operand.vmem [shape: f32[1,16], index: 4, kind: input, shape index: {}]   ;;  %s806_s5 = inlined_call_operand.vmem [shape: f32[1,16], index: 5, kind: input, shape index: {}]   ;;  %s807_s0 = inlined_call_operand.vmem [shape: bf16[128,128], index: 0, kind: input, shape index: {}]   ;;  %s808_s6 = inlined_call_operand.vmem [shape: bf16[128,16], index: 6, kind: output, shape index: {}]  }
   0x1   :  { %v453_v0 = vld [vmem:[%s802_s1 + $0x38] sm:$0xff]  ;;  %v452_v1 = vld [vmem:[%s802_s1 + $0x30] sm:$0xff]  ;;  %v451_v2 = vld [vmem:[%s802_s1 + $0x28] sm:$0xff]  ;;  %28 = vst.msk [vmem:[#allocation2] sm:$0xff] %vm27_vm0, %v522_v34 }
   0x2   :  { %220 = vmatpush.bf16.msra.mxu0 %v453_v0  ;;  %493 = vmatpush.bf16.msra.mxu1 %v453_v0  ;;  %v455_v3 = vld [vmem:[%s807_s0] sm:$0xff]   ;;  %v487_v5 = vld [vmem:[%s807_s0 + $0x10] sm:$0xff]   ;;  %v449_v15 = vld [vmem:[%s802_s1 + $0x18] sm:$0xff]  ;;  %29 = vst.msk [vmem:[#allocation2 + $0x8] sm:$0xff] %vm27_vm0, %v522_v34 }
   0x3   :  { %494 = vmatpush.bf16.msra.mxu2 %v453_v0  ;;  %495 = vmatpush.bf16.msra.mxu3 %v453_v0  ;;  %v450_v4 = vld [vmem:[%s802_s1 + $0x20] sm:$0xff]  ;;  %v491_v7 = vld [vmem:[%s807_s0 + $0x30] sm:$0xff]   ;;  %v456_v8 = vunpack.c.l.bf16 %v455_v3  ;;  %v457_v9 = vunpack.c.h.bf16 %v455_v3  ;;  %v464_v11 = vunpack.c.l.bf16 %v487_v5  ;;  %v465_v12 = vunpack.c.h.bf16 %v487_v5  ;;  %v447_v35 = vld [vmem:[%s802_s1 + $0x8] sm:$0xff]  ;;  %30 = vst.msk [vmem:[#allocation2 + $0x10] sm:$0xff] %vm27_vm0, %v522_v34 }
   0x4   :  { %v489_v6 = vld [vmem:[%s807_s0 + $0x20] sm:$0xff]   ;;  %v480_v16 = vunpack.c.l.bf16 %v491_v7  ;;  %v481_v17 = vunpack.c.h.bf16 %v491_v7  ;;  %v448_v25 = vld [vmem:[%s802_s1 + $0x10] sm:$0xff]  ;;  %v486_v40 = vld [vmem:[%s807_s0 + $0x8] sm:$0xff]   ;;  %31 = vst.msk [vmem:[#allocation2 + $0x18] sm:$0xff] %vm27_vm0, %v522_v34 }
   0x5   :  { %v585_v10 = vld [vmem:[%s803_s2] ss:$0 sm:$0xff]  ;;  %v472_v13 = vunpack.c.l.bf16 %v489_v6  ;;  %v473_v14 = vunpack.c.h.bf16 %v489_v6  ;;  %v488_v45 = vld [vmem:[%s807_s0 + $0x18] sm:$0xff]   ;;  %32 = vst.msk [vmem:[#allocation2 + $0x20] sm:$0xff] %vm27_vm0, %v522_v34  ;;  %v490_v49 = vld [vmem:[%s807_s0 + $0x28] sm:$0xff]   ;;  %v460_v52 = vunpack.c.l.bf16 %v486_v40  ;;  %v461_v53 = vunpack.c.h.bf16 %v486_v40 }
   0x6   :  { %221 = vmatpush.bf16.msra.mxu0 %v452_v1  ;;  %496 = vmatpush.bf16.msra.mxu1 %v452_v1  ;;  %v80_v18 = vmul.f32 %v585_v10, %v456_v8  ;;  %v81_v19 = vmul.f32 %v585_v10, %v457_v9  ;;  %v595_v20 = vld [vmem:[%s804_s3] ss:$0 sm:$0xff]  ;;  %v84_v21 = vmul.f32 %v585_v10, %v464_v11  ;;  %v492_v50 = vld [vmem:[%s807_s0 + $0x38] sm:$0xff]   ;;  %v468_v54 = vunpack.c.l.bf16 %v488_v45 }
   0x7   :  { %497 = vmatpush.bf16.msra.mxu2 %v452_v1  ;;  %498 = vmatpush.bf16.msra.mxu3 %v452_v1  ;;  %v85_v22 = vmul.f32 %v585_v10, %v465_v12  ;;  %v88_v23 = vmul.f32 %v585_v10, %v472_v13  ;;  %v89_v24 = vmul.f32 %v585_v10, %v473_v14  ;;  %v446_v46 = vld [vmem:[%s802_s1] sm:$0xff]  ;;  %v469_v57 = vunpack.c.h.bf16 %v488_v45 }
   0x8   :  { %v92_v26 = vmul.f32 %v585_v10, %v480_v16  ;;  %v93_v27 = vmul.f32 %v585_v10, %v481_v17  ;;  %v100_v28 = vadd.f32 %v595_v20, %v80_v18  ;;  %v101_v29 = vadd.f32 %v595_v20, %v81_v19  ;;  %33 = vst.msk [vmem:[#allocation2 + $0x28] sm:$0xff] %vm27_vm0, %v522_v34 }
   0x9   :  { %v104_v30 = vadd.f32 %v595_v20, %v84_v21  ;;  %v105_v31 = vadd.f32 %v595_v20, %v85_v22  ;;  %v108_v32 = vadd.f32 %v595_v20, %v88_v23  ;;  %v109_v33 = vadd.f32 %v595_v20, %v89_v24  ;;  %34 = vst.msk [vmem:[#allocation2 + $0x30] sm:$0xff] %vm27_vm0, %v522_v34 }
   0xa   :  { %222 = vmatpush.bf16.msra.mxu0 %v451_v2  ;;  %499 = vmatpush.bf16.msra.mxu1 %v451_v2  ;;  %v112_v36 = vadd.f32 %v595_v20, %v92_v26  ;;  %v113_v37 = vadd.f32 %v595_v20, %v93_v27  ;;  %v116_v38 = vmax.f32 %v100_v28, 0.0  ;;  %v117_v39 = vmax.f32 %v101_v29, 0.0  ;;  %35 = vst.msk [vmem:[#allocation2 + $0x38] sm:$0xff] %vm27_vm0, %v522_v34  ;;  %v140_v28 = vld [vmem:[#allocation2] sm:$0xff] }
   0xb   :  { %500 = vmatpush.bf16.msra.mxu2 %v451_v2  ;;  %501 = vmatpush.bf16.msra.mxu3 %v451_v2  ;;  %v120_v41 = vmax.f32 %v104_v30, 0.0  ;;  %v121_v42 = vmax.f32 %v105_v31, 0.0  ;;  %v124_v43 = vmax.f32 %v108_v32, 0.0  ;;  %v125_v44 = vmax.f32 %v109_v33, 0.0  ;;  %36 = vst.msk [vmem:[#allocation2 + $0x40] sm:$0xff] %vm27_vm0, %v522_v34 }
   0xc   :  { %v128_v47 = vmax.f32 %v112_v36, 0.0  ;;  %v129_v48 = vmax.f32 %v113_v37, 0.0  ;;  %v132_v51 = vpack.c.bf16 %v117_v39, %v116_v38  ;;  %v476_v58 = vunpack.c.l.bf16 %v490_v49  ;;  %37 = vst.msk [vmem:[#allocation2 + $0x48] sm:$0xff] %vm27_vm0, %v522_v34  ;;  %v144_v29 = vld [vmem:[#allocation2 + $0x20] sm:$0xff] }
   0xd   :  { %v134_v55 = vpack.c.bf16 %v121_v42, %v120_v41  ;;  %v136_v56 = vpack.c.bf16 %v125_v44, %v124_v43  ;;  %v477_v60 = vunpack.c.h.bf16 %v490_v49  ;;  %v484_v61 = vunpack.c.l.bf16 %v492_v50  ;;  %38 = vst.msk [vmem:[#allocation2 + $0x50] sm:$0xff] %vm27_vm0, %v522_v34  ;;  %v685_v37 = vld [vmem:[%s805_s4] ss:$0 sm:$0xff] }
   0xe   :  { %223 = vmatpush.bf16.msra.mxu0 %v450_v4  ;;  %502 = vmatpush.bf16.msra.mxu1 %v450_v4  ;;  %v138_v59 = vpack.c.bf16 %v129_v48, %v128_v47  ;;  %v485_v62 = vunpack.c.h.bf16 %v492_v50  ;;  %v82_v63 = vmul.f32 %v585_v10, %v460_v52  ;;  %v83_v0 = vmul.f32 %v585_v10, %v461_v53  ;;  %v690_v44 = vld [vmem:[%s806_s5] ss:$0 sm:$0xff] }
   0xf   :  { %503 = vmatpush.bf16.msra.mxu2 %v450_v4  ;;  %504 = vmatpush.bf16.msra.mxu3 %v450_v4  ;;  %39 = vst.msk [vmem:[#allocation2 + $0x58] sm:$0xff] %vm27_vm0, %v522_v34  ;;  %v86_v1 = vmul.f32 %v585_v10, %v468_v54  ;;  %v87_v2 = vmul.f32 %v585_v10, %v469_v57  ;;  %v145_v36 = vld [vmem:[#allocation2 + $0x28] sm:$0xff] }
  0x10   :  { %v90_v3 = vmul.f32 %v585_v10, %v476_v58  ;;  %40 = vst.msk [vmem:[#allocation2 + $0x60] sm:$0xff] %vm27_vm0, %v522_v34  ;;  %v91_v4 = vmul.f32 %v585_v10, %v477_v60  ;;  %v94_v5 = vmul.f32 %v585_v10, %v484_v61  ;;  %v95_v6 = vmul.f32 %v585_v10, %v485_v62  ;;  %v142_v58 = vld [vmem:[#allocation2 + $0x10] sm:$0xff] }
  0x11   :  { %41 = vst.msk [vmem:[#allocation2 + $0x68] sm:$0xff] %vm27_vm0, %v522_v34  ;;  %v102_v7 = vadd.f32 %v595_v20, %v82_v63  ;;  %v103_v8 = vadd.f32 %v595_v20, %v83_v0  ;;  %v106_v9 = vadd.f32 %v595_v20, %v86_v1  ;;  %v107_v11 = vadd.f32 %v595_v20, %v87_v2  ;;  %v146_v62 = vld [vmem:[#allocation2 + $0x30] sm:$0xff] }
  0x12   :  { %224 = vmatpush.bf16.msra.mxu0 %v449_v15  ;;  %505 = vmatpush.bf16.msra.mxu1 %v449_v15  ;;  %42 = vst.msk [vmem:[#allocation2 + $0x70] sm:$0xff] %vm27_vm0, %v522_v34  ;;  %v110_v12 = vadd.f32 %v595_v20, %v90_v3  ;;  %v111_v10 = vadd.f32 %v595_v20, %v91_v4  ;;  %v148_v33 = vld [vmem:[#allocation2 + $0x40] sm:$0xff] }
  0x13   :  { %506 = vmatpush.bf16.msra.mxu2 %v449_v15  ;;  %507 = vmatpush.bf16.msra.mxu3 %v449_v15  ;;  %43 = vst.msk [vmem:[#allocation2 + $0x78] sm:$0xff] %vm27_vm0, %v522_v34  ;;  %v114_v13 = vadd.f32 %v595_v20, %v94_v5  ;;  %v115_v14 = vadd.f32 %v595_v20, %v95_v6  ;;  %v118_v15 = vmax.f32 %v102_v7, 0.0  ;;  %v119_v16 = vmax.f32 %v103_v8, 0.0  ;;  %v149_v52 = vld [vmem:[#allocation2 + $0x48] sm:$0xff] }
  0x14   :  { %v122_v17 = vmax.f32 %v106_v9, 0.0  ;;  %v123_v18 = vmax.f32 %v107_v11, 0.0  ;;  %v126_v19 = vmax.f32 %v110_v12, 0.0  ;;  %v127_v21 = vmax.f32 %v111_v10, 0.0 }
  0x15   :  { %v130_v22 = vmax.f32 %v114_v13, 0.0  ;;  %v131_v23 = vmax.f32 %v115_v14, 0.0  ;;  %v133_v24 = vpack.c.bf16 %v119_v16, %v118_v15 }
  0x16   :  { %225 = vmatpush.bf16.msra.mxu0 %v448_v25  ;;  %508 = vmatpush.bf16.msra.mxu1 %v448_v25  ;;  %v137_v26 = vpack.c.bf16 %v127_v21, %v126_v19  ;;  %v150_v19 = vld [vmem:[#allocation2 + $0x50] sm:$0xff] }
  0x17   :  { %509 = vmatpush.bf16.msra.mxu2 %v448_v25  ;;  %510 = vmatpush.bf16.msra.mxu3 %v448_v25  ;;  %v135_v25 = vpack.c.bf16 %v123_v18, %v122_v17  ;;  %v139_v27 = vpack.c.bf16 %v131_v23, %v130_v22  ;;  %v152_v34 = vld [vmem:[#allocation2 + $0x60] sm:$0xff] }
  0x18   :  { %v153_v54 = vld [vmem:[#allocation2 + $0x68] sm:$0xff] }
  0x1a   :  { %226 = vmatpush.bf16.msra.mxu0 %v447_v35  ;;  %511 = vmatpush.bf16.msra.mxu1 %v447_v35 }
  0x1b   :  { %512 = vmatpush.bf16.msra.mxu2 %v447_v35  ;;  %513 = vmatpush.bf16.msra.mxu3 %v447_v35  ;;  %v141_v35 = vld [vmem:[#allocation2 + $0x8] sm:$0xff] }
  0x1e   :  { %227 = vmatpush.bf16.msra.mxu0 %v446_v46  ;;  %514 = vmatpush.bf16.msra.mxu1 %v446_v46 }
  0x1f   :  { %515 = vmatpush.bf16.msra.mxu2 %v446_v46  ;;  %516 = vmatpush.bf16.msra.mxu3 %v446_v46 }
  0x21   :  { %228 = vmatmul.bf16.vlgmr.msra.gmra.mxu0 %v132_v51  ;;  %238 = vmatmul.bf16.vlgmr.msra.gmra.mxu1 %v134_v55 }
  0x22   :  { %248 = vmatmul.bf16.vlgmr.msra.gmra.mxu2 %v136_v56  ;;  %258 = vmatmul.bf16.vlgmr.msra.gmra.mxu3 %v138_v59 }
  0x31   :  { %233 = vmatmul.bf16.gmra.mxu0 %v133_v24  ;;  %243 = vmatmul.bf16.gmra.mxu1 %v135_v25  ;;  %v154_v25 = vld [vmem:[#allocation2 + $0x70] sm:$0xff] }
  0x32   :  { %253 = vmatmul.bf16.gmra.mxu2 %v137_v26  ;;  %263 = vmatmul.bf16.gmra.mxu3 %v139_v27 }
  0x9e   :  { %v229_v30 = vpop.f32.mrf.mxu0  ;;  %v239_v20 = vpop.f32.mrf.mxu1 }
  0x9f   :  { %v269_v31 = vadd.f32 %v229_v30, %v140_v28  ;;  %v273_v32 = vadd.f32 %v239_v20, %v144_v29  ;;  %v143_v29 = vld [vmem:[#allocation2 + $0x18] sm:$0xff] }
  0xa1   :  { %286 = vst.msk [vmem:[#allocation2] sm:$0xff] %vm27_vm0, %v269_v31 }
  0xa2   :  { %290 = vst.msk [vmem:[#allocation2 + $0x20] sm:$0xff] %vm27_vm0, %v273_v32 }
  0xa5   :  { %v249_v38 = vpop.f32.mrf.mxu2  ;;  %v259_v39 = vpop.f32.mrf.mxu3 }
  0xa6   :  { %v277_v40 = vadd.f32 %v249_v38, %v148_v33  ;;  %v281_v41 = vadd.f32 %v259_v39, %v152_v34  ;;  %v231_v42 = vpop.f32.mrf.mxu0  ;;  %v241_v43 = vpop.f32.mrf.mxu1  ;;  %v147_v33 = vld [vmem:[#allocation2 + $0x38] sm:$0xff] }
  0xa7   :  { %v270_v45 = vadd.f32 %v231_v42, %v141_v35  ;;  %v274_v46 = vadd.f32 %v241_v43, %v145_v36 }
  0xa8   :  { %v305_v47 = vld [vmem:[#allocation2] sm:$0xff]  ;;  %294 = vst.msk [vmem:[#allocation2 + $0x40] sm:$0xff] %vm27_vm0, %v277_v40 }
  0xa9   :  { %v325_v48 = vmul.f32 %v685_v37, %v305_v47  ;;  %v309_v49 = vld [vmem:[#allocation2 + $0x20] sm:$0xff]  ;;  %298 = vst.msk [vmem:[#allocation2 + $0x60] sm:$0xff] %vm27_vm0, %v281_v41 }
  0xaa   :  { %v329_v50 = vmul.f32 %v685_v37, %v309_v49  ;;  %287 = vst.msk [vmem:[#allocation2 + $0x8] sm:$0xff] %vm27_vm0, %v270_v45  ;;  %v151_v45 = vld [vmem:[#allocation2 + $0x58] sm:$0xff] }
  0xab   :  { %v345_v51 = vadd.f32 %v690_v44, %v325_v48  ;;  %291 = vst.msk [vmem:[#allocation2 + $0x28] sm:$0xff] %vm27_vm0, %v274_v46  ;;  %v155_v46 = vld [vmem:[#allocation2 + $0x78] sm:$0xff] }
  0xac   :  { %v349_v53 = vadd.f32 %v690_v44, %v329_v50 }
  0xad   :  { %v361_v55 = vmax.f32 %v345_v51, 0.0  ;;  %v251_v56 = vpop.f32.mrf.mxu2  ;;  %v261_v57 = vpop.f32.mrf.mxu3 }
  0xae   :  { %v365_v59 = vmax.f32 %v349_v53, 0.0  ;;  %v278_v60 = vadd.f32 %v251_v56, %v149_v52  ;;  %v234_v61 = vpop.f32.mrf.mxu0  ;;  %v244_v63 = vpop.f32.mrf.mxu1  ;;  %v282_v2 = vadd.f32 %v261_v57, %v153_v54 }
  0xaf   :  { %v377_v0 = vpack.c.bf16 %v361_v55, %v361_v55  ;;  %v313_v1 = vld [vmem:[#allocation2 + $0x40] sm:$0xff]  ;;  %v271_v6 = vadd.f32 %v234_v61, %v142_v58  ;;  %v275_v9 = vadd.f32 %v244_v63, %v146_v62 }
  0xb0   :  { %v381_v3 = vpack.c.bf16 %v365_v59, %v365_v59  ;;  %v333_v4 = vmul.f32 %v685_v37, %v313_v1  ;;  %v317_v5 = vld [vmem:[#allocation2 + $0x60] sm:$0xff]  ;;  %295 = vst.msk [vmem:[#allocation2 + $0x48] sm:$0xff] %vm27_vm0, %v278_v60 }
  0xb1   :  { %394 = vst.msk [vmem:[%s808_s6] sm:$0xf] %vm393_vm1, %v377_v0  ;;  %v337_v7 = vmul.f32 %v685_v37, %v317_v5  ;;  %v306_v8 = vld [vmem:[#allocation2 + $0x8] sm:$0xff] }
  0xb2   :  { %398 = vst.msk [vmem:[%s808_s6 + $0x10] sm:$0xf] %vm393_vm1, %v381_v3  ;;  %v353_v11 = vadd.f32 %v690_v44, %v333_v4  ;;  %v326_v12 = vmul.f32 %v685_v37, %v306_v8  ;;  %v310_v10 = vld [vmem:[#allocation2 + $0x28] sm:$0xff] }
  0xb3   :  { %v357_v13 = vadd.f32 %v690_v44, %v337_v7  ;;  %v330_v14 = vmul.f32 %v685_v37, %v310_v10  ;;  %299 = vst.msk [vmem:[#allocation2 + $0x68] sm:$0xff] %vm27_vm0, %v282_v2 }
  0xb4   :  { %v369_v15 = vmax.f32 %v353_v11, 0.0  ;;  %v346_v16 = vadd.f32 %v690_v44, %v326_v12  ;;  %288 = vst.msk [vmem:[#allocation2 + $0x10] sm:$0xff] %vm27_vm0, %v271_v6 }
  0xb5   :  { %v373_v17 = vmax.f32 %v357_v13, 0.0  ;;  %v350_v18 = vadd.f32 %v690_v44, %v330_v14  ;;  %292 = vst.msk [vmem:[#allocation2 + $0x30] sm:$0xff] %vm27_vm0, %v275_v9  ;;  %v254_v21 = vpop.f32.mrf.mxu2  ;;  %v264_v22 = vpop.f32.mrf.mxu3 }
  0xb6   :  { %v385_v23 = vpack.c.bf16 %v369_v15, %v369_v15  ;;  %v362_v24 = vmax.f32 %v346_v16, 0.0  ;;  %v236_v30 = vpop.f32.mrf.mxu0  ;;  %v279_v32 = vadd.f32 %v254_v21, %v150_v19  ;;  %v246_v34 = vpop.f32.mrf.mxu1  ;;  %v283_v36 = vadd.f32 %v264_v22, %v154_v25 }
  0xb7   :  { %v389_v26 = vpack.c.bf16 %v373_v17, %v373_v17  ;;  %v366_v27 = vmax.f32 %v350_v18, 0.0  ;;  %v314_v28 = vld [vmem:[#allocation2 + $0x48] sm:$0xff]  ;;  %v272_v40 = vadd.f32 %v236_v30, %v143_v29  ;;  %v276_v43 = vadd.f32 %v246_v34, %v147_v33 }
  0xb8   :  { %402 = vst.msk [vmem:[%s808_s6 + $0x20] sm:$0xf] %vm393_vm1, %v385_v23  ;;  %v378_v20 = vpack.c.bf16 %v362_v24, %v362_v24  ;;  %v334_v31 = vmul.f32 %v685_v37, %v314_v28 }
  0xb9   :  { %406 = vst.msk [vmem:[%s808_s6 + $0x30] sm:$0xf] %vm393_vm1, %v389_v26  ;;  %v382_v35 = vpack.c.bf16 %v366_v27, %v366_v27 }
  0xba   :  { %395 = vst.msk [vmem:[%s808_s6 + $0x4] sm:$0xf] %vm393_vm1, %v378_v20  ;;  %v354_v38 = vadd.f32 %v690_v44, %v334_v31  ;;  %v318_v39 = vld [vmem:[#allocation2 + $0x68] sm:$0xff] }
  0xbb   :  { %399 = vst.msk [vmem:[%s808_s6 + $0x14] sm:$0xf] %vm393_vm1, %v382_v35  ;;  %v338_v41 = vmul.f32 %v685_v37, %v318_v39  ;;  %v307_v42 = vld [vmem:[#allocation2 + $0x10] sm:$0xff] }
  0xbc   :  { %v370_v47 = vmax.f32 %v354_v38, 0.0  ;;  %v327_v48 = vmul.f32 %v685_v37, %v307_v42  ;;  %v311_v49 = vld [vmem:[#allocation2 + $0x30] sm:$0xff]  ;;  %296 = vst.msk [vmem:[#allocation2 + $0x50] sm:$0xff] %vm27_vm0, %v279_v32 }
  0xbd   :  { %v358_v50 = vadd.f32 %v690_v44, %v338_v41  ;;  %v331_v51 = vmul.f32 %v685_v37, %v311_v49  ;;  %300 = vst.msk [vmem:[#allocation2 + $0x70] sm:$0xff] %vm27_vm0, %v283_v36  ;;  %v256_v52 = vpop.f32.mrf.mxu2  ;;  %v266_v53 = vpop.f32.mrf.mxu3 }
  0xbe   :  { %v386_v54 = vpack.c.bf16 %v370_v47, %v370_v47  ;;  %v347_v55 = vadd.f32 %v690_v44, %v327_v48  ;;  %289 = vst.msk [vmem:[#allocation2 + $0x18] sm:$0xff] %vm27_vm0, %v272_v40  ;;  %v280_v56 = vadd.f32 %v256_v52, %v151_v45  ;;  %v284_v57 = vadd.f32 %v266_v53, %v155_v46 }
  0xbf   :  { %v374_v58 = vmax.f32 %v358_v50, 0.0  ;;  %v351_v59 = vadd.f32 %v690_v44, %v331_v51  ;;  %293 = vst.msk [vmem:[#allocation2 + $0x38] sm:$0xff] %vm27_vm0, %v276_v43 }
  0xc0   :  { %403 = vst.msk [vmem:[%s808_s6 + $0x24] sm:$0xf] %vm393_vm1, %v386_v54  ;;  %v363_v60 = vmax.f32 %v347_v55, 0.0 }
  0xc1   :  { %v390_v61 = vpack.c.bf16 %v374_v58, %v374_v58  ;;  %v367_v62 = vmax.f32 %v351_v59, 0.0  ;;  %297 = vst.msk [vmem:[#allocation2 + $0x58] sm:$0xff] %vm27_vm0, %v280_v56 }
  0xc2   :  { %v379_v63 = vpack.c.bf16 %v363_v60, %v363_v60  ;;  %301 = vst.msk [vmem:[#allocation2 + $0x78] sm:$0xff] %vm27_vm0, %v284_v57 }
  0xc3   :  { %407 = vst.msk [vmem:[%s808_s6 + $0x34] sm:$0xf] %vm393_vm1, %v390_v61  ;;  %v383_v0 = vpack.c.bf16 %v367_v62, %v367_v62  ;;  %v315_v1 = vld [vmem:[#allocation2 + $0x50] sm:$0xff] }
  0xc4   :  { %396 = vst.msk [vmem:[%s808_s6 + $0x8] sm:$0xf] %vm393_vm1, %v379_v63  ;;  %v335_v2 = vmul.f32 %v685_v37, %v315_v1  ;;  %v319_v3 = vld [vmem:[#allocation2 + $0x70] sm:$0xff] }
  0xc5   :  { %400 = vst.msk [vmem:[%s808_s6 + $0x18] sm:$0xf] %vm393_vm1, %v383_v0  ;;  %v339_v4 = vmul.f32 %v685_v37, %v319_v3  ;;  %v308_v5 = vld [vmem:[#allocation2 + $0x18] sm:$0xff] }
  0xc6   :  { %v355_v6 = vadd.f32 %v690_v44, %v335_v2  ;;  %v328_v7 = vmul.f32 %v685_v37, %v308_v5  ;;  %v312_v8 = vld [vmem:[#allocation2 + $0x38] sm:$0xff] }
  0xc7   :  { %v359_v9 = vadd.f32 %v690_v44, %v339_v4  ;;  %v332_v11 = vmul.f32 %v685_v37, %v312_v8 }
  0xc8   :  { %v371_v12 = vmax.f32 %v355_v6, 0.0  ;;  %v348_v10 = vadd.f32 %v690_v44, %v328_v7  ;;  %v316_v13 = vld [vmem:[#allocation2 + $0x58] sm:$0xff] }
  0xc9   :  { %v375_v14 = vmax.f32 %v359_v9, 0.0  ;;  %v352_v15 = vadd.f32 %v690_v44, %v332_v11  ;;  %v336_v16 = vmul.f32 %v685_v37, %v316_v13  ;;  %v320_v17 = vld [vmem:[#allocation2 + $0x78] sm:$0xff] }
  0xca   :  { %v387_v18 = vpack.c.bf16 %v371_v12, %v371_v12  ;;  %v364_v19 = vmax.f32 %v348_v10, 0.0  ;;  %v340_v21 = vmul.f32 %v685_v37, %v320_v17 }
  0xcb   :  { %v391_v22 = vpack.c.bf16 %v375_v14, %v375_v14  ;;  %v368_v23 = vmax.f32 %v352_v15, 0.0  ;;  %v356_v24 = vadd.f32 %v690_v44, %v336_v16 }
  0xcc   :  { %404 = vst.msk [vmem:[%s808_s6 + $0x28] sm:$0xf] %vm393_vm1, %v387_v18  ;;  %v380_v25 = vpack.c.bf16 %v364_v19, %v364_v19  ;;  %v360_v26 = vadd.f32 %v690_v44, %v340_v21 }
  0xcd   :  { %408 = vst.msk [vmem:[%s808_s6 + $0x38] sm:$0xf] %vm393_vm1, %v391_v22  ;;  %v384_v27 = vpack.c.bf16 %v368_v23, %v368_v23  ;;  %v372_v28 = vmax.f32 %v356_v24, 0.0 }
  0xce   :  { %397 = vst.msk [vmem:[%s808_s6 + $0xc] sm:$0xf] %vm393_vm1, %v380_v25  ;;  %v376_v37 = vmax.f32 %v360_v26, 0.0 }
  0xcf   :  { %401 = vst.msk [vmem:[%s808_s6 + $0x1c] sm:$0xf] %vm393_vm1, %v384_v27  ;;  %v388_v29 = vpack.c.bf16 %v372_v28, %v372_v28 }
  0xd0   :  { %v392_v44 = vpack.c.bf16 %v376_v37, %v376_v37 }
  0xd1   :  { %405 = vst.msk [vmem:[%s808_s6 + $0x2c] sm:$0xf] %vm393_vm1, %v388_v29 }
  0xd2   :  { %409 = vst.msk [vmem:[%s808_s6 + $0x3c] sm:$0xf] %vm393_vm1, %v392_v44 }

// kernel: densenet_forward.28
= control target key start
LH: loop header
LB: loop body
LE: loop exit
PB: predicated region body
PF: predicated region fallthrough
CT: control target
= control target key end

     0   :  { %vm163_vm0 = vcmask 130048   ;;  %vm16_vm1 = vcmask 588800   ;;  %v492_v8 = vmov 0.0   ;;  %vm380_vm2 = vcmask 584704   ;;  %s713_s1 = inlined_call_operand.vmem [shape: bf16[16,72], index: 1, kind: input, shape index: {}]   ;;  %s714_s0 = inlined_call_operand.vmem [shape: bf16[200,16], index: 0, kind: input, shape index: {}]   ;;  %s715_s2 = inlined_call_operand.vmem [shape: bf16[200,72], index: 2, kind: output, shape index: {}]  }
   0x1   :  { %v487_v0 = vld [vmem:[%s713_s1] sm:$0xff]  ;;  %v484_v3 = vld [vmem:[%s714_s0 + $0x48] sm:$0xff]  ;;  %v485_v7 = vld [vmem:[%s714_s0 + $0x50] sm:$0xff]  ;;  %17 = vst.msk [vmem:[#allocation2] sm:$0xff] %vm16_vm1, %v492_v8 }
   0x2   :  { %v475_v1 = vld [vmem:[%s714_s0] sm:$0xff]  ;;  %210 = vmatpush.bf16.msra.mxu0 %v487_v0  ;;  %488 = vmatpush.bf16.msra.mxu1 %v487_v0  ;;  %v476_v5 = vld [vmem:[%s714_s0 + $0x8] sm:$0xff]  ;;  %18 = vst.msk [vmem:[#allocation2 + $0x8] sm:$0xff] %vm16_vm1, %v492_v8  ;;  %v477_v9 = vld [vmem:[%s714_s0 + $0x10] sm:$0xff] }
   0x3   :  { %v479_v2 = vld [vmem:[%s714_s0 + $0x20] sm:$0xff]  ;;  %490 = vmatpush.bf16.msra.mxu3 %v487_v0  ;;  %489 = vmatpush.bf16.msra.mxu2 %v487_v0  ;;  %v480_v6 = vld [vmem:[%s714_s0 + $0x28] sm:$0xff]  ;;  %19 = vst.msk [vmem:[#allocation2 + $0x10] sm:$0xff] %vm16_vm1, %v492_v8  ;;  %v481_v10 = vld [vmem:[%s714_s0 + $0x30] sm:$0xff] }
   0x4   :  { %v483_v4 = vld [vmem:[%s714_s0 + $0x40] sm:$0xff]  ;;  %20 = vst.msk [vmem:[#allocation2 + $0x18] sm:$0xff] %vm16_vm1, %v492_v8  ;;  %v486_v11 = vld [vmem:[%s714_s0 + $0x58] sm:$0xff] }
   0x5   :  { %462 = vmatmul.msk.bf16.vlgmr.msra.gmra.mxu0 %vm163_vm0, %v475_v1  ;;  %466 = vmatmul.msk.bf16.vlgmr.msra.gmra.mxu1 %vm163_vm0, %v479_v2  ;;  %21 = vst.msk [vmem:[#allocation2 + $0x20] sm:$0xff] %vm16_vm1, %v492_v8  ;;  %v66_v12 = vld [vmem:[%s714_s0 + $0x60] sm:$0xf]  ;;  %v478_v14 = vld [vmem:[%s714_s0 + $0x18] sm:$0xff] }
   0x6   :  { %471 = vmatmul.msk.bf16.vlgmr.msra.gmra.mxu3 %vm163_vm0, %v484_v3  ;;  %470 = vmatmul.msk.bf16.vlgmr.msra.gmra.mxu2 %vm163_vm0, %v483_v4  ;;  %22 = vst.msk [vmem:[#allocation2 + $0x28] sm:$0xff] %vm16_vm1, %v492_v8  ;;  %v143_v13 = vunpack.c.l.b16 %v66_v12  ;;  %v482_v15 = vld [vmem:[%s714_s0 + $0x38] sm:$0xff] }
   0x7   :  { %23 = vst.msk [vmem:[#allocation2 + $0x30] sm:$0xff] %vm16_vm1, %v492_v8 }
   0x8   :  { %24 = vst.msk [vmem:[#allocation2 + $0x38] sm:$0xff] %vm16_vm1, %v492_v8  ;;  %v156_v16 = vpack.c.b16 %v143_v13, %v143_v13  ;;  %v67_v17 = vld [vmem:[#allocation2] sm:$0xff] }
   0x9   :  { %25 = vst.msk [vmem:[#allocation2 + $0x40] sm:$0xff] %vm16_vm1, %v492_v8  ;;  %v68_v24 = vld [vmem:[#allocation2 + $0x8] sm:$0xff] }
   0xa   :  { %26 = vst.msk [vmem:[#allocation2 + $0x48] sm:$0xff] %vm16_vm1, %v492_v8  ;;  %v69_v38 = vld [vmem:[#allocation2 + $0x10] sm:$0xff] }
   0xb   :  { %27 = vst.msk [vmem:[#allocation2 + $0x50] sm:$0xff] %vm16_vm1, %v492_v8  ;;  %v70_v57 = vld [vmem:[#allocation2 + $0x18] sm:$0xff] }
   0xc   :  { %28 = vst.msk [vmem:[#allocation2 + $0x58] sm:$0xff] %vm16_vm1, %v492_v8 }
   0xd   :  { %29 = vst.msk [vmem:[#allocation2 + $0x60] sm:$0xff] %vm16_vm1, %v492_v8 }
   0xe   :  { %30 = vst.msk [vmem:[#allocation2 + $0x68] sm:$0xff] %vm16_vm1, %v492_v8 }
   0xf   :  { %31 = vst.msk [vmem:[#allocation2 + $0x70] sm:$0xff] %vm16_vm1, %v492_v8 }
  0x10   :  { %32 = vst.msk [vmem:[#allocation2 + $0x78] sm:$0xff] %vm16_vm1, %v492_v8  ;;  %v75_v18 = vld [vmem:[#allocation2 + $0x40] sm:$0xff] }
  0x11   :  { %33 = vst.msk [vmem:[#allocation2 + $0x80] sm:$0xff] %vm16_vm1, %v492_v8  ;;  %v76_v25 = vld [vmem:[#allocation2 + $0x48] sm:$0xff] }
  0x12   :  { %34 = vst.msk [vmem:[#allocation2 + $0x88] sm:$0xff] %vm16_vm1, %v492_v8  ;;  %v77_v42 = vld [vmem:[#allocation2 + $0x50] sm:$0xff] }
  0x13   :  { %35 = vst.msk [vmem:[#allocation2 + $0x90] sm:$0xff] %vm16_vm1, %v492_v8  ;;  %v78_v60 = vld [vmem:[#allocation2 + $0x58] sm:$0xff] }
  0x14   :  { %36 = vst.msk [vmem:[#allocation2 + $0x98] sm:$0xff] %vm16_vm1, %v492_v8 }
  0x15   :  { %463 = vmatmul.msk.bf16.gmra.mxu0 %vm163_vm0, %v476_v5  ;;  %467 = vmatmul.msk.bf16.gmra.mxu1 %vm163_vm0, %v480_v6  ;;  %37 = vst.msk [vmem:[#allocation2 + $0xa0] sm:$0xff] %vm16_vm1, %v492_v8 }
  0x16   :  { %472 = vmatmul.msk.bf16.gmra.mxu3 %vm163_vm0, %v485_v7  ;;  %38 = vst.msk [vmem:[#allocation2 + $0xa8] sm:$0xff] %vm16_vm1, %v492_v8 }
  0x17   :  { %39 = vst.msk [vmem:[#allocation2 + $0xb0] sm:$0xff] %vm16_vm1, %v492_v8 }
  0x18   :  { %40 = vst.msk [vmem:[#allocation2 + $0xb8] sm:$0xff] %vm16_vm1, %v492_v8  ;;  %v83_v52 = vld [vmem:[#allocation2 + $0x80] sm:$0xff] }
  0x19   :  { %41 = vst.msk [vmem:[#allocation2 + $0xc0] sm:$0xff] %vm16_vm1, %v492_v8  ;;  %v84_v56 = vld [vmem:[#allocation2 + $0x88] sm:$0xff]  ;;  %v71_v8 = vld [vmem:[#allocation2 + $0x20] sm:$0xff] }
  0x1a   :  { %v85_v23 = vld [vmem:[#allocation2 + $0x90] sm:$0xff] }
  0x1b   :  { %v86_v37 = vld [vmem:[#allocation2 + $0x98] sm:$0xff] }
  0x1c   :  { %v87_v54 = vld [vmem:[#allocation2 + $0xa0] sm:$0xff] }
  0x1d   :  { %v88_v6 = vld [vmem:[#allocation2 + $0xa8] sm:$0xff] }
  0x25   :  { %464 = vmatmul.msk.bf16.gmra.mxu0 %vm163_vm0, %v477_v9  ;;  %468 = vmatmul.msk.bf16.gmra.mxu1 %vm163_vm0, %v481_v10 }
  0x26   :  { %473 = vmatmul.msk.bf16.gmra.mxu3 %vm163_vm0, %v486_v11  ;;  %v79_v11 = vld [vmem:[#allocation2 + $0x60] sm:$0xff] }
  0x35   :  { %465 = vmatmul.msk.bf16.gmra.mxu0 %vm163_vm0, %v478_v14  ;;  %469 = vmatmul.msk.bf16.gmra.mxu1 %vm163_vm0, %v482_v15 }
  0x36   :  { %474 = vmatmul.msk.bf16.gmra.mxu3 %vm163_vm0, %v156_v16 }
  0x82   :  { %v212_v19 = vpop.f32.mrf.mxu0  ;;  %v232_v20 = vpop.f32.mrf.mxu1 }
  0x83   :  { %v276_v21 = vadd.f32 %v212_v19, %v67_v17  ;;  %v284_v22 = vadd.f32 %v232_v20, %v75_v18 }
  0x85   :  { %302 = vst.msk [vmem:[#allocation2] sm:$0xff] %vm16_vm1, %v276_v21 }
  0x86   :  { %310 = vst.msk [vmem:[#allocation2 + $0x40] sm:$0xff] %vm16_vm1, %v284_v22 }
  0x89   :  { %v257_v26 = vpop.f32.mrf.mxu3  ;;  %v252_v36 = vpop.f32.mrf.mxu2 }
  0x8a   :  { %v294_v27 = vadd.f32 %v257_v26, %v85_v23  ;;  %v214_v28 = vpop.f32.mrf.mxu0  ;;  %v234_v29 = vpop.f32.mrf.mxu1  ;;  %v292_v55 = vadd.f32 %v252_v36, %v83_v52 }
  0x8b   :  { %v277_v30 = vadd.f32 %v214_v28, %v68_v24  ;;  %v285_v31 = vadd.f32 %v234_v29, %v76_v25  ;;  %v89_v25 = vld [vmem:[#allocation2 + $0xb0] sm:$0xff]  ;;  %v72_v28 = vld [vmem:[#allocation2 + $0x28] sm:$0xff] }
  0x8c   :  { %v330_v32 = vld [vmem:[#allocation2] sm:$0xff]  ;;  %320 = vst.msk [vmem:[#allocation2 + $0x90] sm:$0xff] %vm16_vm1, %v294_v27 }
  0x8d   :  { %v355_v33 = vpack.c.bf16 %v330_v32, %v330_v32  ;;  %v338_v34 = vld [vmem:[#allocation2 + $0x40] sm:$0xff]  ;;  %303 = vst.msk [vmem:[#allocation2 + $0x8] sm:$0xff] %vm16_vm1, %v277_v30  ;;  %v80_v30 = vld [vmem:[#allocation2 + $0x68] sm:$0xff] }
  0x8e   :  { %v363_v35 = vpack.c.bf16 %v338_v34, %v338_v34  ;;  %311 = vst.msk [vmem:[#allocation2 + $0x48] sm:$0xff] %vm16_vm1, %v285_v31 }
  0x8f   :  { %381 = vst.msk [vmem:[%s715_s2] sm:$0xf] %vm380_vm2, %v355_v33 }
  0x90   :  { %389 = vst.msk [vmem:[%s715_s2 + $0x20] sm:$0xf] %vm380_vm2, %v363_v35 }
  0x91   :  { %v259_v39 = vpop.f32.mrf.mxu3  ;;  %v254_v53 = vpop.f32.mrf.mxu2  ;;  %318 = vst.msk [vmem:[#allocation2 + $0x80] sm:$0xff] %vm16_vm1, %v292_v55 }
  0x92   :  { %v295_v40 = vadd.f32 %v259_v39, %v86_v37  ;;  %v217_v41 = vpop.f32.mrf.mxu0  ;;  %v237_v43 = vpop.f32.mrf.mxu1  ;;  %v293_v58 = vadd.f32 %v254_v53, %v84_v56  ;;  %v91_v56 = vld [vmem:[#allocation2 + $0xc0] sm:$0xff] }
  0x93   :  { %v348_v44 = vld [vmem:[#allocation2 + $0x90] sm:$0xff]  ;;  %v278_v45 = vadd.f32 %v217_v41, %v69_v38  ;;  %v286_v50 = vadd.f32 %v237_v43, %v77_v42  ;;  %v90_v41 = vld [vmem:[#allocation2 + $0xb8] sm:$0xff] }
  0x94   :  { %v373_v46 = vpack.c.bf16 %v348_v44, %v348_v44  ;;  %v331_v47 = vld [vmem:[#allocation2 + $0x8] sm:$0xff]  ;;  %321 = vst.msk [vmem:[#allocation2 + $0x98] sm:$0xff] %vm16_vm1, %v295_v40  ;;  %v73_v43 = vld [vmem:[#allocation2 + $0x30] sm:$0xff] }
  0x95   :  { %v356_v48 = vpack.c.bf16 %v331_v47, %v331_v47  ;;  %v339_v49 = vld [vmem:[#allocation2 + $0x48] sm:$0xff]  ;;  %304 = vst.msk [vmem:[#allocation2 + $0x10] sm:$0xff] %vm16_vm1, %v278_v45  ;;  %v81_v45 = vld [vmem:[#allocation2 + $0x70] sm:$0xff] }
  0x96   :  { %399 = vst.msk [vmem:[%s715_s2 + $0x48] sm:$0xf] %vm380_vm2, %v373_v46  ;;  %v364_v51 = vpack.c.bf16 %v339_v49, %v339_v49 }
  0x97   :  { %382 = vst.msk [vmem:[%s715_s2 + $0x4] sm:$0xf] %vm380_vm2, %v356_v48 }
  0x98   :  { %390 = vst.msk [vmem:[%s715_s2 + $0x24] sm:$0xf] %vm380_vm2, %v364_v51  ;;  %v346_v15 = vld [vmem:[#allocation2 + $0x80] sm:$0xff] }
  0x99   :  { %312 = vst.msk [vmem:[#allocation2 + $0x50] sm:$0xff] %vm16_vm1, %v286_v50  ;;  %v262_v59 = vpop.f32.mrf.mxu3  ;;  %v371_v23 = vpack.c.bf16 %v346_v15, %v346_v15 }
  0x9a   :  { %v296_v61 = vadd.f32 %v262_v59, %v87_v54  ;;  %v219_v62 = vpop.f32.mrf.mxu0  ;;  %v239_v63 = vpop.f32.mrf.mxu1  ;;  %319 = vst.msk [vmem:[#allocation2 + $0x88] sm:$0xff] %vm16_vm1, %v293_v58  ;;  %v74_v58 = vld [vmem:[#allocation2 + $0x38] sm:$0xff] }
  0x9b   :  { %v349_v0 = vld [vmem:[#allocation2 + $0x98] sm:$0xff]  ;;  %v279_v1 = vadd.f32 %v219_v62, %v70_v57  ;;  %v287_v4 = vadd.f32 %v239_v63, %v78_v60  ;;  %397 = vst.msk [vmem:[%s715_s2 + $0x40] sm:$0xf] %vm380_vm2, %v371_v23 }
  0x9c   :  { %v374_v2 = vpack.c.bf16 %v349_v0, %v349_v0  ;;  %v332_v3 = vld [vmem:[#allocation2 + $0x10] sm:$0xff]  ;;  %322 = vst.msk [vmem:[#allocation2 + $0xa0] sm:$0xff] %vm16_vm1, %v296_v61  ;;  %v82_v60 = vld [vmem:[#allocation2 + $0x78] sm:$0xff] }
  0x9d   :  { %v357_v5 = vpack.c.bf16 %v332_v3, %v332_v3  ;;  %305 = vst.msk [vmem:[#allocation2 + $0x18] sm:$0xff] %vm16_vm1, %v279_v1 }
  0x9e   :  { %400 = vst.msk [vmem:[%s715_s2 + $0x4c] sm:$0xf] %vm380_vm2, %v374_v2 }
  0x9f   :  { %383 = vst.msk [vmem:[%s715_s2 + $0x8] sm:$0xf] %vm380_vm2, %v357_v5 }
  0xa0   :  { %v340_v7 = vld [vmem:[#allocation2 + $0x50] sm:$0xff]  ;;  %313 = vst.msk [vmem:[#allocation2 + $0x58] sm:$0xff] %vm16_vm1, %v287_v4 }
  0xa1   :  { %v365_v9 = vpack.c.bf16 %v340_v7, %v340_v7  ;;  %v264_v10 = vpop.f32.mrf.mxu3  ;;  %v347_v21 = vld [vmem:[#allocation2 + $0x88] sm:$0xff] }
  0xa2   :  { %v297_v12 = vadd.f32 %v264_v10, %v88_v6  ;;  %v222_v13 = vpop.f32.mrf.mxu0  ;;  %v242_v14 = vpop.f32.mrf.mxu1  ;;  %v372_v26 = vpack.c.bf16 %v347_v21, %v347_v21 }
  0xa3   :  { %391 = vst.msk [vmem:[%s715_s2 + $0x28] sm:$0xf] %vm380_vm2, %v365_v9  ;;  %v350_v16 = vld [vmem:[#allocation2 + $0xa0] sm:$0xff]  ;;  %v280_v17 = vadd.f32 %v222_v13, %v71_v8  ;;  %v288_v20 = vadd.f32 %v242_v14, %v79_v11 }
  0xa4   :  { %v375_v18 = vpack.c.bf16 %v350_v16, %v350_v16  ;;  %v333_v19 = vld [vmem:[#allocation2 + $0x18] sm:$0xff]  ;;  %323 = vst.msk [vmem:[#allocation2 + $0xa8] sm:$0xff] %vm16_vm1, %v297_v12 }
  0xa5   :  { %v358_v22 = vpack.c.bf16 %v333_v19, %v333_v19  ;;  %306 = vst.msk [vmem:[#allocation2 + $0x20] sm:$0xff] %vm16_vm1, %v280_v17 }
  0xa6   :  { %401 = vst.msk [vmem:[%s715_s2 + $0x50] sm:$0xf] %vm380_vm2, %v375_v18 }
  0xa7   :  { %384 = vst.msk [vmem:[%s715_s2 + $0xc] sm:$0xf] %vm380_vm2, %v358_v22  ;;  %v341_v24 = vld [vmem:[#allocation2 + $0x58] sm:$0xff] }
  0xa8   :  { %v366_v27 = vpack.c.bf16 %v341_v24, %v341_v24  ;;  %314 = vst.msk [vmem:[#allocation2 + $0x60] sm:$0xff] %vm16_vm1, %v288_v20 }
  0xa9   :  { %v267_v29 = vpop.f32.mrf.mxu3  ;;  %398 = vst.msk [vmem:[%s715_s2 + $0x44] sm:$0xf] %vm380_vm2, %v372_v26 }
  0xaa   :  { %392 = vst.msk [vmem:[%s715_s2 + $0x2c] sm:$0xf] %vm380_vm2, %v366_v27  ;;  %v298_v31 = vadd.f32 %v267_v29, %v89_v25  ;;  %v224_v32 = vpop.f32.mrf.mxu0  ;;  %v244_v33 = vpop.f32.mrf.mxu1 }
  0xab   :  { %v351_v34 = vld [vmem:[#allocation2 + $0xa8] sm:$0xff]  ;;  %v281_v35 = vadd.f32 %v224_v32, %v72_v28  ;;  %v289_v38 = vadd.f32 %v244_v33, %v80_v30 }
  0xac   :  { %v376_v36 = vpack.c.bf16 %v351_v34, %v351_v34  ;;  %v334_v37 = vld [vmem:[#allocation2 + $0x20] sm:$0xff]  ;;  %324 = vst.msk [vmem:[#allocation2 + $0xb0] sm:$0xff] %vm16_vm1, %v298_v31 }
  0xad   :  { %v359_v39 = vpack.c.bf16 %v334_v37, %v334_v37  ;;  %307 = vst.msk [vmem:[#allocation2 + $0x28] sm:$0xff] %vm16_vm1, %v281_v35 }
  0xae   :  { %402 = vst.msk [vmem:[%s715_s2 + $0x54] sm:$0xf] %vm380_vm2, %v376_v36 }
  0xaf   :  { %385 = vst.msk [vmem:[%s715_s2 + $0x10] sm:$0xf] %vm380_vm2, %v359_v39  ;;  %v342_v40 = vld [vmem:[#allocation2 + $0x60] sm:$0xff] }
  0xb0   :  { %v367_v42 = vpack.c.bf16 %v342_v40, %v342_v40  ;;  %315 = vst.msk [vmem:[#allocation2 + $0x68] sm:$0xff] %vm16_vm1, %v289_v38 }
  0xb1   :  { %v269_v44 = vpop.f32.mrf.mxu3 }
  0xb2   :  { %393 = vst.msk [vmem:[%s715_s2 + $0x30] sm:$0xf] %vm380_vm2, %v367_v42  ;;  %v299_v46 = vadd.f32 %v269_v44, %v90_v41  ;;  %v227_v47 = vpop.f32.mrf.mxu0  ;;  %v247_v48 = vpop.f32.mrf.mxu1 }
  0xb3   :  { %v352_v49 = vld [vmem:[#allocation2 + $0xb0] sm:$0xff]  ;;  %v282_v50 = vadd.f32 %v227_v47, %v73_v43  ;;  %v290_v53 = vadd.f32 %v247_v48, %v81_v45 }
  0xb4   :  { %v377_v51 = vpack.c.bf16 %v352_v49, %v352_v49  ;;  %v335_v52 = vld [vmem:[#allocation2 + $0x28] sm:$0xff]  ;;  %325 = vst.msk [vmem:[#allocation2 + $0xb8] sm:$0xff] %vm16_vm1, %v299_v46 }
  0xb5   :  { %v360_v54 = vpack.c.bf16 %v335_v52, %v335_v52  ;;  %308 = vst.msk [vmem:[#allocation2 + $0x30] sm:$0xff] %vm16_vm1, %v282_v50 }
  0xb6   :  { %403 = vst.msk [vmem:[%s715_s2 + $0x58] sm:$0xf] %vm380_vm2, %v377_v51 }
  0xb7   :  { %386 = vst.msk [vmem:[%s715_s2 + $0x14] sm:$0xf] %vm380_vm2, %v360_v54  ;;  %v343_v55 = vld [vmem:[#allocation2 + $0x68] sm:$0xff] }
  0xb8   :  { %v368_v57 = vpack.c.bf16 %v343_v55, %v343_v55  ;;  %316 = vst.msk [vmem:[#allocation2 + $0x70] sm:$0xff] %vm16_vm1, %v290_v53 }
  0xb9   :  { %v272_v59 = vpop.f32.mrf.mxu3 }
  0xba   :  { %394 = vst.msk [vmem:[%s715_s2 + $0x34] sm:$0xf] %vm380_vm2, %v368_v57  ;;  %v300_v61 = vadd.f32 %v272_v59, %v91_v56  ;;  %v229_v62 = vpop.f32.mrf.mxu0  ;;  %v249_v63 = vpop.f32.mrf.mxu1 }
  0xbb   :  { %v353_v0 = vld [vmem:[#allocation2 + $0xb8] sm:$0xff]  ;;  %v283_v1 = vadd.f32 %v229_v62, %v74_v58  ;;  %v291_v4 = vadd.f32 %v249_v63, %v82_v60 }
  0xbc   :  { %v378_v2 = vpack.c.bf16 %v353_v0, %v353_v0  ;;  %v336_v3 = vld [vmem:[#allocation2 + $0x30] sm:$0xff]  ;;  %326 = vst.msk [vmem:[#allocation2 + $0xc0] sm:$0xff] %vm16_vm1, %v300_v61 }
  0xbd   :  { %v361_v5 = vpack.c.bf16 %v336_v3, %v336_v3  ;;  %309 = vst.msk [vmem:[#allocation2 + $0x38] sm:$0xff] %vm16_vm1, %v283_v1 }
  0xbe   :  { %404 = vst.msk [vmem:[%s715_s2 + $0x5c] sm:$0xf] %vm380_vm2, %v378_v2 }
  0xbf   :  { %387 = vst.msk [vmem:[%s715_s2 + $0x18] sm:$0xf] %vm380_vm2, %v361_v5  ;;  %v344_v6 = vld [vmem:[#allocation2 + $0x70] sm:$0xff] }
  0xc0   :  { %v369_v7 = vpack.c.bf16 %v344_v6, %v344_v6  ;;  %317 = vst.msk [vmem:[#allocation2 + $0x78] sm:$0xff] %vm16_vm1, %v291_v4 }
  0xc1   :  { %v274_v8 = vpop.f32.mrf.mxu3 }
  0xc2   :  { %395 = vst.msk [vmem:[%s715_s2 + $0x38] sm:$0xf] %vm380_vm2, %v369_v7 }
  0xc3   :  { %v354_v9 = vld [vmem:[#allocation2 + $0xc0] sm:$0xff] }
  0xc4   :  { %v379_v10 = vpack.c.bf16 %v354_v9, %v354_v9  ;;  %v337_v11 = vld [vmem:[#allocation2 + $0x38] sm:$0xff] }
  0xc5   :  { %v362_v12 = vpack.c.bf16 %v337_v11, %v337_v11 }
  0xc6   :  { %405 = vst.msk [vmem:[%s715_s2 + $0x60] sm:$0xf] %vm380_vm2, %v379_v10 }
  0xc7   :  { %388 = vst.msk [vmem:[%s715_s2 + $0x1c] sm:$0xf] %vm380_vm2, %v362_v12  ;;  %v345_v13 = vld [vmem:[#allocation2 + $0x78] sm:$0xff] }
  0xc8   :  { %v370_v14 = vpack.c.bf16 %v345_v13, %v345_v13 }
  0xca   :  { %396 = vst.msk [vmem:[%s715_s2 + $0x3c] sm:$0xf] %vm380_vm2, %v370_v14 }

// kernel: densenet_forward.31
= control target key start
LH: loop header
LB: loop body
LE: loop exit
PB: predicated region body
PF: predicated region fallthrough
CT: control target
= control target key end

     0   :  { %vm21_vm0 = vcmask 130048   ;;  %v458_v34 = vmov 0.0   ;;  %vm331_vm1 = vcmask 125952   ;;  %s686_s1 = inlined_call_operand.vmem [shape: bf16[128,16], index: 1, kind: input, shape index: {}]   ;;  %s687_s2 = inlined_call_operand.vmem [shape: f32[1,128], index: 2, kind: input, shape index: {}]   ;;  %s688_s3 = inlined_call_operand.vmem [shape: f32[1,128], index: 3, kind: input, shape index: {}]   ;;  %s689_s0 = inlined_call_operand.vmem [shape: bf16[128,128], index: 0, kind: input, shape index: {}]   ;;  %s690_s4 = inlined_call_operand.vmem [shape: bf16[128,16], index: 4, kind: output, shape index: {}]  }
   0x1   :  { %v391_v0 = vld [vmem:[%s686_s1 + $0x38] sm:$0xff]  ;;  %v390_v1 = vld [vmem:[%s686_s1 + $0x30] sm:$0xff]  ;;  %v389_v2 = vld [vmem:[%s686_s1 + $0x28] sm:$0xff]  ;;  %22 = vst.msk [vmem:[#allocation2] sm:$0xff] %vm21_vm0, %v458_v34 }
   0x2   :  { %214 = vmatpush.bf16.msra.mxu0 %v391_v0  ;;  %431 = vmatpush.bf16.msra.mxu1 %v391_v0  ;;  %v393_v3 = vld [vmem:[%s689_s0] sm:$0xff]   ;;  %v425_v5 = vld [vmem:[%s689_s0 + $0x10] sm:$0xff]   ;;  %v387_v15 = vld [vmem:[%s686_s1 + $0x18] sm:$0xff]  ;;  %23 = vst.msk [vmem:[#allocation2 + $0x8] sm:$0xff] %vm21_vm0, %v458_v34 }
   0x3   :  { %432 = vmatpush.bf16.msra.mxu2 %v391_v0  ;;  %433 = vmatpush.bf16.msra.mxu3 %v391_v0  ;;  %v388_v4 = vld [vmem:[%s686_s1 + $0x20] sm:$0xff]  ;;  %v429_v7 = vld [vmem:[%s689_s0 + $0x30] sm:$0xff]   ;;  %v394_v8 = vunpack.c.l.bf16 %v393_v3  ;;  %v395_v9 = vunpack.c.h.bf16 %v393_v3  ;;  %v402_v11 = vunpack.c.l.bf16 %v425_v5  ;;  %v403_v12 = vunpack.c.h.bf16 %v425_v5  ;;  %v385_v35 = vld [vmem:[%s686_s1 + $0x8] sm:$0xff]  ;;  %24 = vst.msk [vmem:[#allocation2 + $0x10] sm:$0xff] %vm21_vm0, %v458_v34 }
   0x4   :  { %v427_v6 = vld [vmem:[%s689_s0 + $0x20] sm:$0xff]   ;;  %v418_v16 = vunpack.c.l.bf16 %v429_v7  ;;  %v419_v17 = vunpack.c.h.bf16 %v429_v7  ;;  %v386_v25 = vld [vmem:[%s686_s1 + $0x10] sm:$0xff]  ;;  %v424_v40 = vld [vmem:[%s689_s0 + $0x8] sm:$0xff]   ;;  %25 = vst.msk [vmem:[#allocation2 + $0x18] sm:$0xff] %vm21_vm0, %v458_v34 }
   0x5   :  { %v511_v10 = vld [vmem:[%s687_s2] ss:$0 sm:$0xff]  ;;  %v410_v13 = vunpack.c.l.bf16 %v427_v6  ;;  %v411_v14 = vunpack.c.h.bf16 %v427_v6  ;;  %v426_v45 = vld [vmem:[%s689_s0 + $0x18] sm:$0xff]   ;;  %26 = vst.msk [vmem:[#allocation2 + $0x20] sm:$0xff] %vm21_vm0, %v458_v34  ;;  %v428_v49 = vld [vmem:[%s689_s0 + $0x28] sm:$0xff]   ;;  %v398_v52 = vunpack.c.l.bf16 %v424_v40  ;;  %v399_v53 = vunpack.c.h.bf16 %v424_v40 }
   0x6   :  { %215 = vmatpush.bf16.msra.mxu0 %v390_v1  ;;  %434 = vmatpush.bf16.msra.mxu1 %v390_v1  ;;  %v74_v18 = vmul.f32 %v511_v10, %v394_v8  ;;  %v75_v19 = vmul.f32 %v511_v10, %v395_v9  ;;  %v521_v20 = vld [vmem:[%s688_s3] ss:$0 sm:$0xff]  ;;  %v78_v21 = vmul.f32 %v511_v10, %v402_v11  ;;  %v430_v50 = vld [vmem:[%s689_s0 + $0x38] sm:$0xff]   ;;  %v406_v54 = vunpack.c.l.bf16 %v426_v45 }
   0x7   :  { %435 = vmatpush.bf16.msra.mxu2 %v390_v1  ;;  %436 = vmatpush.bf16.msra.mxu3 %v390_v1  ;;  %v79_v22 = vmul.f32 %v511_v10, %v403_v12  ;;  %v82_v23 = vmul.f32 %v511_v10, %v410_v13  ;;  %v83_v24 = vmul.f32 %v511_v10, %v411_v14  ;;  %v384_v46 = vld [vmem:[%s686_s1] sm:$0xff]  ;;  %v407_v57 = vunpack.c.h.bf16 %v426_v45 }
   0x8   :  { %v86_v26 = vmul.f32 %v511_v10, %v418_v16  ;;  %v87_v27 = vmul.f32 %v511_v10, %v419_v17  ;;  %v94_v28 = vadd.f32 %v521_v20, %v74_v18  ;;  %v95_v29 = vadd.f32 %v521_v20, %v75_v19  ;;  %27 = vst.msk [vmem:[#allocation2 + $0x28] sm:$0xff] %vm21_vm0, %v458_v34 }
   0x9   :  { %v98_v30 = vadd.f32 %v521_v20, %v78_v21  ;;  %v99_v31 = vadd.f32 %v521_v20, %v79_v22  ;;  %v102_v32 = vadd.f32 %v521_v20, %v82_v23  ;;  %v103_v33 = vadd.f32 %v521_v20, %v83_v24  ;;  %28 = vst.msk [vmem:[#allocation2 + $0x30] sm:$0xff] %vm21_vm0, %v458_v34 }
   0xa   :  { %216 = vmatpush.bf16.msra.mxu0 %v389_v2  ;;  %437 = vmatpush.bf16.msra.mxu1 %v389_v2  ;;  %v106_v36 = vadd.f32 %v521_v20, %v86_v26  ;;  %v107_v37 = vadd.f32 %v521_v20, %v87_v27  ;;  %v110_v38 = vmax.f32 %v94_v28, 0.0  ;;  %v111_v39 = vmax.f32 %v95_v29, 0.0  ;;  %29 = vst.msk [vmem:[#allocation2 + $0x38] sm:$0xff] %vm21_vm0, %v458_v34  ;;  %v134_v28 = vld [vmem:[#allocation2] sm:$0xff] }
   0xb   :  { %438 = vmatpush.bf16.msra.mxu2 %v389_v2  ;;  %439 = vmatpush.bf16.msra.mxu3 %v389_v2  ;;  %v114_v41 = vmax.f32 %v98_v30, 0.0  ;;  %v115_v42 = vmax.f32 %v99_v31, 0.0  ;;  %v118_v43 = vmax.f32 %v102_v32, 0.0  ;;  %v119_v44 = vmax.f32 %v103_v33, 0.0  ;;  %30 = vst.msk [vmem:[#allocation2 + $0x40] sm:$0xff] %vm21_vm0, %v458_v34 }
   0xc   :  { %v122_v47 = vmax.f32 %v106_v36, 0.0  ;;  %v123_v48 = vmax.f32 %v107_v37, 0.0  ;;  %v126_v51 = vpack.c.bf16 %v111_v39, %v110_v38  ;;  %v414_v58 = vunpack.c.l.bf16 %v428_v49  ;;  %31 = vst.msk [vmem:[#allocation2 + $0x48] sm:$0xff] %vm21_vm0, %v458_v34  ;;  %v138_v29 = vld [vmem:[#allocation2 + $0x20] sm:$0xff] }
   0xd   :  { %v128_v55 = vpack.c.bf16 %v115_v42, %v114_v41  ;;  %v130_v56 = vpack.c.bf16 %v119_v44, %v118_v43  ;;  %v415_v60 = vunpack.c.h.bf16 %v428_v49  ;;  %v422_v61 = vunpack.c.l.bf16 %v430_v50  ;;  %32 = vst.msk [vmem:[#allocation2 + $0x50] sm:$0xff] %vm21_vm0, %v458_v34 }
   0xe   :  { %217 = vmatpush.bf16.msra.mxu0 %v388_v4  ;;  %440 = vmatpush.bf16.msra.mxu1 %v388_v4  ;;  %v132_v59 = vpack.c.bf16 %v123_v48, %v122_v47  ;;  %v423_v62 = vunpack.c.h.bf16 %v430_v50  ;;  %v76_v63 = vmul.f32 %v511_v10, %v398_v52  ;;  %v77_v0 = vmul.f32 %v511_v10, %v399_v53 }
   0xf   :  { %441 = vmatpush.bf16.msra.mxu2 %v388_v4  ;;  %442 = vmatpush.bf16.msra.mxu3 %v388_v4  ;;  %33 = vst.msk [vmem:[#allocation2 + $0x58] sm:$0xff] %vm21_vm0, %v458_v34  ;;  %v80_v1 = vmul.f32 %v511_v10, %v406_v54  ;;  %v81_v2 = vmul.f32 %v511_v10, %v407_v57  ;;  %v139_v41 = vld [vmem:[#allocation2 + $0x28] sm:$0xff] }
  0x10   :  { %v84_v3 = vmul.f32 %v511_v10, %v414_v58  ;;  %34 = vst.msk [vmem:[#allocation2 + $0x60] sm:$0xff] %vm21_vm0, %v458_v34  ;;  %v85_v4 = vmul.f32 %v511_v10, %v415_v60  ;;  %v88_v5 = vmul.f32 %v511_v10, %v422_v61  ;;  %v89_v6 = vmul.f32 %v511_v10, %v423_v62 }
  0x11   :  { %35 = vst.msk [vmem:[#allocation2 + $0x68] sm:$0xff] %vm21_vm0, %v458_v34  ;;  %v96_v7 = vadd.f32 %v521_v20, %v76_v63  ;;  %v97_v8 = vadd.f32 %v521_v20, %v77_v0  ;;  %v100_v9 = vadd.f32 %v521_v20, %v80_v1  ;;  %v101_v11 = vadd.f32 %v521_v20, %v81_v2 }
  0x12   :  { %218 = vmatpush.bf16.msra.mxu0 %v387_v15  ;;  %443 = vmatpush.bf16.msra.mxu1 %v387_v15  ;;  %36 = vst.msk [vmem:[#allocation2 + $0x70] sm:$0xff] %vm21_vm0, %v458_v34  ;;  %v104_v12 = vadd.f32 %v521_v20, %v84_v3  ;;  %v105_v10 = vadd.f32 %v521_v20, %v85_v4  ;;  %v142_v33 = vld [vmem:[#allocation2 + $0x40] sm:$0xff] }
  0x13   :  { %444 = vmatpush.bf16.msra.mxu2 %v387_v15  ;;  %445 = vmatpush.bf16.msra.mxu3 %v387_v15  ;;  %37 = vst.msk [vmem:[#allocation2 + $0x78] sm:$0xff] %vm21_vm0, %v458_v34  ;;  %v108_v13 = vadd.f32 %v521_v20, %v88_v5  ;;  %v109_v14 = vadd.f32 %v521_v20, %v89_v6  ;;  %v112_v15 = vmax.f32 %v96_v7, 0.0  ;;  %v113_v16 = vmax.f32 %v97_v8, 0.0  ;;  %v143_v49 = vld [vmem:[#allocation2 + $0x48] sm:$0xff] }
  0x14   :  { %v116_v17 = vmax.f32 %v100_v9, 0.0  ;;  %v117_v18 = vmax.f32 %v101_v11, 0.0  ;;  %v120_v19 = vmax.f32 %v104_v12, 0.0  ;;  %v121_v21 = vmax.f32 %v105_v10, 0.0  ;;  %v144_v3 = vld [vmem:[#allocation2 + $0x50] sm:$0xff]  ;;  %v137_v9 = vld [vmem:[#allocation2 + $0x18] sm:$0xff] }
  0x15   :  { %v124_v22 = vmax.f32 %v108_v13, 0.0  ;;  %v125_v23 = vmax.f32 %v109_v14, 0.0  ;;  %v127_v24 = vpack.c.bf16 %v113_v16, %v112_v15  ;;  %v141_v13 = vld [vmem:[#allocation2 + $0x38] sm:$0xff] }
  0x16   :  { %219 = vmatpush.bf16.msra.mxu0 %v386_v25  ;;  %446 = vmatpush.bf16.msra.mxu1 %v386_v25  ;;  %v131_v26 = vpack.c.bf16 %v121_v21, %v120_v19 }
  0x17   :  { %447 = vmatpush.bf16.msra.mxu2 %v386_v25  ;;  %448 = vmatpush.bf16.msra.mxu3 %v386_v25  ;;  %v129_v25 = vpack.c.bf16 %v117_v18, %v116_v17  ;;  %v133_v27 = vpack.c.bf16 %v125_v23, %v124_v22  ;;  %v146_v34 = vld [vmem:[#allocation2 + $0x60] sm:$0xff]  ;;  %v145_v22 = vld [vmem:[#allocation2 + $0x58] sm:$0xff] }
  0x18   :  { %v147_v50 = vld [vmem:[#allocation2 + $0x68] sm:$0xff] }
  0x19   :  { %v148_v4 = vld [vmem:[#allocation2 + $0x70] sm:$0xff] }
  0x1a   :  { %220 = vmatpush.bf16.msra.mxu0 %v385_v35  ;;  %449 = vmatpush.bf16.msra.mxu1 %v385_v35 }
  0x1b   :  { %450 = vmatpush.bf16.msra.mxu2 %v385_v35  ;;  %451 = vmatpush.bf16.msra.mxu3 %v385_v35  ;;  %v135_v35 = vld [vmem:[#allocation2 + $0x8] sm:$0xff] }
  0x1e   :  { %221 = vmatpush.bf16.msra.mxu0 %v384_v46  ;;  %452 = vmatpush.bf16.msra.mxu1 %v384_v46 }
  0x1f   :  { %453 = vmatpush.bf16.msra.mxu2 %v384_v46  ;;  %454 = vmatpush.bf16.msra.mxu3 %v384_v46 }
  0x21   :  { %222 = vmatmul.bf16.vlgmr.msra.gmra.mxu0 %v126_v51  ;;  %232 = vmatmul.bf16.vlgmr.msra.gmra.mxu1 %v128_v55  ;;  %v136_v55 = vld [vmem:[#allocation2 + $0x10] sm:$0xff] }
  0x22   :  { %242 = vmatmul.bf16.vlgmr.msra.gmra.mxu2 %v130_v56  ;;  %252 = vmatmul.bf16.vlgmr.msra.gmra.mxu3 %v132_v59  ;;  %v140_v59 = vld [vmem:[#allocation2 + $0x30] sm:$0xff] }
  0x31   :  { %227 = vmatmul.bf16.gmra.mxu0 %v127_v24  ;;  %237 = vmatmul.bf16.gmra.mxu1 %v129_v25 }
  0x32   :  { %247 = vmatmul.bf16.gmra.mxu2 %v131_v26  ;;  %257 = vmatmul.bf16.gmra.mxu3 %v133_v27  ;;  %v149_v27 = vld [vmem:[#allocation2 + $0x78] sm:$0xff] }
  0x9e   :  { %v223_v30 = vpop.f32.mrf.mxu0  ;;  %v233_v20 = vpop.f32.mrf.mxu1 }
  0x9f   :  { %v263_v31 = vadd.f32 %v223_v30, %v134_v28  ;;  %v267_v32 = vadd.f32 %v233_v20, %v138_v29 }
  0xa1   :  { %280 = vst.msk [vmem:[#allocation2] sm:$0xff] %vm21_vm0, %v263_v31 }
  0xa2   :  { %284 = vst.msk [vmem:[#allocation2 + $0x20] sm:$0xff] %vm21_vm0, %v267_v32 }
  0xa5   :  { %v243_v36 = vpop.f32.mrf.mxu2  ;;  %v253_v37 = vpop.f32.mrf.mxu3 }
  0xa6   :  { %v271_v38 = vadd.f32 %v243_v36, %v142_v33  ;;  %v275_v39 = vadd.f32 %v253_v37, %v146_v34  ;;  %v225_v40 = vpop.f32.mrf.mxu0  ;;  %v235_v42 = vpop.f32.mrf.mxu1 }
  0xa7   :  { %v264_v43 = vadd.f32 %v225_v40, %v135_v35  ;;  %v268_v47 = vadd.f32 %v235_v42, %v139_v41 }
  0xa8   :  { %v299_v44 = vld [vmem:[#allocation2] sm:$0xff]  ;;  %288 = vst.msk [vmem:[#allocation2 + $0x40] sm:$0xff] %vm21_vm0, %v271_v38 }
  0xa9   :  { %v315_v45 = vpack.c.bf16 %v299_v44, %v299_v44  ;;  %v303_v46 = vld [vmem:[#allocation2 + $0x20] sm:$0xff]  ;;  %292 = vst.msk [vmem:[#allocation2 + $0x60] sm:$0xff] %vm21_vm0, %v275_v39 }
  0xaa   :  { %v319_v48 = vpack.c.bf16 %v303_v46, %v303_v46  ;;  %281 = vst.msk [vmem:[#allocation2 + $0x8] sm:$0xff] %vm21_vm0, %v264_v43 }
  0xab   :  { %332 = vst.msk [vmem:[%s690_s4] sm:$0xf] %vm331_vm1, %v315_v45 }
  0xac   :  { %336 = vst.msk [vmem:[%s690_s4 + $0x10] sm:$0xf] %vm331_vm1, %v319_v48 }
  0xad   :  { %285 = vst.msk [vmem:[#allocation2 + $0x28] sm:$0xff] %vm21_vm0, %v268_v47  ;;  %v245_v51 = vpop.f32.mrf.mxu2  ;;  %v255_v52 = vpop.f32.mrf.mxu3 }
  0xae   :  { %v272_v53 = vadd.f32 %v245_v51, %v143_v49  ;;  %v276_v54 = vadd.f32 %v255_v52, %v147_v50  ;;  %v228_v56 = vpop.f32.mrf.mxu0  ;;  %v238_v57 = vpop.f32.mrf.mxu1 }
  0xaf   :  { %v307_v58 = vld [vmem:[#allocation2 + $0x40] sm:$0xff]  ;;  %v265_v0 = vadd.f32 %v228_v56, %v136_v55  ;;  %v269_v2 = vadd.f32 %v238_v57, %v140_v59 }
  0xb0   :  { %v323_v60 = vpack.c.bf16 %v307_v58, %v307_v58  ;;  %v311_v61 = vld [vmem:[#allocation2 + $0x60] sm:$0xff]  ;;  %289 = vst.msk [vmem:[#allocation2 + $0x48] sm:$0xff] %vm21_vm0, %v272_v53 }
  0xb1   :  { %v327_v62 = vpack.c.bf16 %v311_v61, %v311_v61  ;;  %v300_v63 = vld [vmem:[#allocation2 + $0x8] sm:$0xff]  ;;  %293 = vst.msk [vmem:[#allocation2 + $0x68] sm:$0xff] %vm21_vm0, %v276_v54 }
  0xb2   :  { %340 = vst.msk [vmem:[%s690_s4 + $0x20] sm:$0xf] %vm331_vm1, %v323_v60  ;;  %v316_v1 = vpack.c.bf16 %v300_v63, %v300_v63 }
  0xb3   :  { %344 = vst.msk [vmem:[%s690_s4 + $0x30] sm:$0xf] %vm331_vm1, %v327_v62 }
  0xb4   :  { %333 = vst.msk [vmem:[%s690_s4 + $0x4] sm:$0xf] %vm331_vm1, %v316_v1  ;;  %v304_v5 = vld [vmem:[#allocation2 + $0x28] sm:$0xff] }
  0xb5   :  { %v320_v6 = vpack.c.bf16 %v304_v5, %v304_v5  ;;  %282 = vst.msk [vmem:[#allocation2 + $0x10] sm:$0xff] %vm21_vm0, %v265_v0  ;;  %v248_v7 = vpop.f32.mrf.mxu2  ;;  %v258_v8 = vpop.f32.mrf.mxu3 }
  0xb6   :  { %286 = vst.msk [vmem:[#allocation2 + $0x30] sm:$0xff] %vm21_vm0, %v269_v2  ;;  %v273_v11 = vadd.f32 %v248_v7, %v144_v3  ;;  %v277_v12 = vadd.f32 %v258_v8, %v148_v4  ;;  %v230_v10 = vpop.f32.mrf.mxu0  ;;  %v240_v14 = vpop.f32.mrf.mxu1 }
  0xb7   :  { %337 = vst.msk [vmem:[%s690_s4 + $0x14] sm:$0xf] %vm331_vm1, %v320_v6  ;;  %v308_v15 = vld [vmem:[#allocation2 + $0x48] sm:$0xff]  ;;  %v266_v18 = vadd.f32 %v230_v10, %v137_v9  ;;  %v270_v21 = vadd.f32 %v240_v14, %v141_v13 }
  0xb8   :  { %v324_v16 = vpack.c.bf16 %v308_v15, %v308_v15  ;;  %v312_v17 = vld [vmem:[#allocation2 + $0x68] sm:$0xff]  ;;  %290 = vst.msk [vmem:[#allocation2 + $0x50] sm:$0xff] %vm21_vm0, %v273_v11 }
  0xb9   :  { %v328_v19 = vpack.c.bf16 %v312_v17, %v312_v17  ;;  %294 = vst.msk [vmem:[#allocation2 + $0x70] sm:$0xff] %vm21_vm0, %v277_v12 }
  0xba   :  { %341 = vst.msk [vmem:[%s690_s4 + $0x24] sm:$0xf] %vm331_vm1, %v324_v16 }
  0xbb   :  { %345 = vst.msk [vmem:[%s690_s4 + $0x34] sm:$0xf] %vm331_vm1, %v328_v19 }
  0xbc   :  { %v301_v23 = vld [vmem:[#allocation2 + $0x10] sm:$0xff]  ;;  %283 = vst.msk [vmem:[#allocation2 + $0x18] sm:$0xff] %vm21_vm0, %v266_v18 }
  0xbd   :  { %v317_v24 = vpack.c.bf16 %v301_v23, %v301_v23  ;;  %v305_v25 = vld [vmem:[#allocation2 + $0x30] sm:$0xff]  ;;  %287 = vst.msk [vmem:[#allocation2 + $0x38] sm:$0xff] %vm21_vm0, %v270_v21  ;;  %v250_v26 = vpop.f32.mrf.mxu2  ;;  %v260_v28 = vpop.f32.mrf.mxu3 }
  0xbe   :  { %v321_v29 = vpack.c.bf16 %v305_v25, %v305_v25  ;;  %v274_v30 = vadd.f32 %v250_v26, %v145_v22  ;;  %v278_v33 = vadd.f32 %v260_v28, %v149_v27 }
  0xbf   :  { %334 = vst.msk [vmem:[%s690_s4 + $0x8] sm:$0xf] %vm331_vm1, %v317_v24  ;;  %v309_v20 = vld [vmem:[#allocation2 + $0x50] sm:$0xff] }
  0xc0   :  { %338 = vst.msk [vmem:[%s690_s4 + $0x18] sm:$0xf] %vm331_vm1, %v321_v29  ;;  %v325_v31 = vpack.c.bf16 %v309_v20, %v309_v20  ;;  %v313_v32 = vld [vmem:[#allocation2 + $0x70] sm:$0xff] }
  0xc1   :  { %v329_v34 = vpack.c.bf16 %v313_v32, %v313_v32  ;;  %291 = vst.msk [vmem:[#allocation2 + $0x58] sm:$0xff] %vm21_vm0, %v274_v30 }
  0xc2   :  { %342 = vst.msk [vmem:[%s690_s4 + $0x28] sm:$0xf] %vm331_vm1, %v325_v31 }
  0xc3   :  { %346 = vst.msk [vmem:[%s690_s4 + $0x38] sm:$0xf] %vm331_vm1, %v329_v34  ;;  %v302_v35 = vld [vmem:[#allocation2 + $0x18] sm:$0xff] }
  0xc4   :  { %v318_v36 = vpack.c.bf16 %v302_v35, %v302_v35  ;;  %v306_v37 = vld [vmem:[#allocation2 + $0x38] sm:$0xff]  ;;  %295 = vst.msk [vmem:[#allocation2 + $0x78] sm:$0xff] %vm21_vm0, %v278_v33 }
  0xc5   :  { %v322_v38 = vpack.c.bf16 %v306_v37, %v306_v37 }
  0xc6   :  { %335 = vst.msk [vmem:[%s690_s4 + $0xc] sm:$0xf] %vm331_vm1, %v318_v36 }
  0xc7   :  { %339 = vst.msk [vmem:[%s690_s4 + $0x1c] sm:$0xf] %vm331_vm1, %v322_v38 }
  0xc8   :  { %v310_v39 = vld [vmem:[#allocation2 + $0x58] sm:$0xff] }
  0xc9   :  { %v326_v40 = vpack.c.bf16 %v310_v39, %v310_v39 }
  0xcb   :  { %343 = vst.msk [vmem:[%s690_s4 + $0x2c] sm:$0xf] %vm331_vm1, %v326_v40  ;;  %v314_v41 = vld [vmem:[#allocation2 + $0x78] sm:$0xff] }
  0xcc   :  { %v330_v42 = vpack.c.bf16 %v314_v41, %v314_v41 }
  0xce   :  { %347 = vst.msk [vmem:[%s690_s4 + $0x3c] sm:$0xf] %vm331_vm1, %v330_v42 }

// kernel: densenet_forward.32
= control target key start
LH: loop header
LB: loop body
LE: loop exit
PB: predicated region body
PF: predicated region fallthrough
CT: control target
= control target key end

     0   :  { %vm27_vm0 = vcmask 130048   ;;  %v260_v2 = vmov 0.0   ;;  %vm189_vm1 = vcmask 125952   ;;  %s362_s1 = inlined_call_operand.vmem [shape: bf16[128,16], index: 1, kind: input, shape index: {}]   ;;  %s363_s2 = inlined_call_operand.vmem [shape: f32[1,128], index: 2, kind: input, shape index: {}]   ;;  %s364_s3 = inlined_call_operand.vmem [shape: f32[1,128], index: 3, kind: input, shape index: {}]   ;;  %s365_s4 = inlined_call_operand.vmem [shape: f32[1,16], index: 4, kind: input, shape index: {}]   ;;  %s366_s5 = inlined_call_operand.vmem [shape: f32[1,16], index: 5, kind: input, shape index: {}]   ;;  %s367_s0 = inlined_call_operand.vmem [shape: bf16[32,128], index: 0, kind: input, shape index: {}]   ;;  %s368_s6 = inlined_call_operand.vmem [shape: bf16[32,16], index: 6, kind: output, shape index: {}]  }
   0x1   :  { %v237_v0 = vld [vmem:[%s362_s1 + $0x38] sm:$0xff]  ;;  %v236_v1 = vld [vmem:[%s362_s1 + $0x30] sm:$0xff]  ;;  %28 = vst.msk [vmem:[#allocation2] sm:$0xff] %vm27_vm0, %v260_v2  ;;  %v235_v3 = vld [vmem:[%s362_s1 + $0x28] sm:$0xff] }
   0x2   :  { %130 = vmatpush.bf16.msra.mxu0 %v237_v0  ;;  %247 = vmatpush.bf16.msra.mxu1 %v237_v0  ;;  %29 = vst.msk [vmem:[#allocation2 + $0x8] sm:$0xff] %vm27_vm0, %v260_v2  ;;  %v234_v4 = vld [vmem:[%s362_s1 + $0x20] sm:$0xff]  ;;  %v246_v6 = vld [vmem:[%s367_s0 + $0x8] sm:$0xff]   ;;  %v233_v12 = vld [vmem:[%s362_s1 + $0x18] sm:$0xff] }
   0x3   :  { %30 = vst.msk [vmem:[#allocation2 + $0x10] sm:$0xff] %vm27_vm0, %v260_v2  ;;  %v239_v5 = vld [vmem:[%s367_s0] sm:$0xff]   ;;  %v244_v10 = vunpack.c.l.bf16 %v246_v6  ;;  %v245_v11 = vunpack.c.h.bf16 %v246_v6  ;;  %v232_v18 = vld [vmem:[%s362_s1 + $0x10] sm:$0xff]  ;;  %v231_v23 = vld [vmem:[%s362_s1 + $0x8] sm:$0xff] }
   0x4   :  { %31 = vst.msk [vmem:[#allocation2 + $0x18] sm:$0xff] %vm27_vm0, %v260_v2  ;;  %v240_v7 = vunpack.c.l.bf16 %v239_v5  ;;  %v241_v8 = vunpack.c.h.bf16 %v239_v5  ;;  %v256_v9 = vld [vmem:[%s363_s2] ss:$0 sm:$0xff] }
   0x5   :  { %v257_v15 = vld [vmem:[%s364_s3] ss:$0 sm:$0xff]  ;;  %v46_v16 = vmul.f32 %v256_v9, %v244_v10  ;;  %v47_v17 = vmul.f32 %v256_v9, %v245_v11 }
   0x6   :  { %131 = vmatpush.bf16.msra.mxu0 %v236_v1  ;;  %248 = vmatpush.bf16.msra.mxu1 %v236_v1  ;;  %v44_v13 = vmul.f32 %v256_v9, %v240_v7  ;;  %v45_v14 = vmul.f32 %v256_v9, %v241_v8  ;;  %v230_v28 = vld [vmem:[%s362_s1] sm:$0xff] }
   0x7   :  { %v54_v21 = vadd.f32 %v257_v15, %v46_v16  ;;  %v55_v22 = vadd.f32 %v257_v15, %v47_v17  ;;  %v258_v39 = vld [vmem:[%s365_s4] ss:$0 sm:$0xff] }
   0x8   :  { %v52_v19 = vadd.f32 %v257_v15, %v44_v13  ;;  %v53_v20 = vadd.f32 %v257_v15, %v45_v14  ;;  %v62_v31 = vld [vmem:[#allocation2] sm:$0xff] }
   0x9   :  { %v58_v26 = vmax.f32 %v54_v21, 0.0  ;;  %v59_v27 = vmax.f32 %v55_v22, 0.0  ;;  %v63_v37 = vld [vmem:[#allocation2 + $0x8] sm:$0xff]  ;;  %v259_v42 = vld [vmem:[%s366_s5] ss:$0 sm:$0xff] }
   0xa   :  { %132 = vmatpush.bf16.msra.mxu0 %v235_v3  ;;  %249 = vmatpush.bf16.msra.mxu1 %v235_v3  ;;  %v56_v24 = vmax.f32 %v52_v19, 0.0  ;;  %v57_v25 = vmax.f32 %v53_v20, 0.0  ;;  %v64_v32 = vld [vmem:[#allocation2 + $0x10] sm:$0xff] }
   0xb   :  { %v61_v30 = vpack.c.bf16 %v59_v27, %v58_v26  ;;  %v65_v38 = vld [vmem:[#allocation2 + $0x18] sm:$0xff] }
   0xc   :  { %v60_v29 = vpack.c.bf16 %v57_v25, %v56_v24 }
   0xe   :  { %133 = vmatpush.bf16.msra.mxu0 %v234_v4  ;;  %250 = vmatpush.bf16.msra.mxu1 %v234_v4 }
  0x12   :  { %134 = vmatpush.bf16.msra.mxu0 %v233_v12  ;;  %251 = vmatpush.bf16.msra.mxu1 %v233_v12 }
  0x16   :  { %135 = vmatpush.bf16.msra.mxu0 %v232_v18  ;;  %252 = vmatpush.bf16.msra.mxu1 %v232_v18 }
  0x1a   :  { %136 = vmatpush.bf16.msra.mxu0 %v231_v23  ;;  %253 = vmatpush.bf16.msra.mxu1 %v231_v23 }
  0x1e   :  { %137 = vmatpush.bf16.msra.mxu0 %v230_v28  ;;  %254 = vmatpush.bf16.msra.mxu1 %v230_v28 }
  0x21   :  { %138 = vmatmul.bf16.vlgmr.msra.gmra.mxu0 %v60_v29  ;;  %143 = vmatmul.bf16.vlgmr.msra.gmra.mxu1 %v61_v30 }
  0x9e   :  { %v139_v33 = vpop.f32.mrf.mxu0  ;;  %v144_v34 = vpop.f32.mrf.mxu1 }
  0x9f   :  { %v149_v35 = vadd.f32 %v139_v33, %v62_v31  ;;  %v151_v36 = vadd.f32 %v144_v34, %v64_v32 }
  0xa1   :  { %154 = vst.msk [vmem:[#allocation2] sm:$0xff] %vm27_vm0, %v149_v35 }
  0xa2   :  { %156 = vst.msk [vmem:[#allocation2 + $0x10] sm:$0xff] %vm27_vm0, %v151_v36 }
  0xa6   :  { %v141_v40 = vpop.f32.mrf.mxu0  ;;  %v146_v41 = vpop.f32.mrf.mxu1 }
  0xa7   :  { %v150_v43 = vadd.f32 %v141_v40, %v63_v37  ;;  %v152_v44 = vadd.f32 %v146_v41, %v65_v38 }
  0xa8   :  { %v161_v45 = vld [vmem:[#allocation2] sm:$0xff] }
  0xa9   :  { %v169_v46 = vmul.f32 %v258_v39, %v161_v45  ;;  %v163_v47 = vld [vmem:[#allocation2 + $0x10] sm:$0xff]  ;;  %155 = vst.msk [vmem:[#allocation2 + $0x8] sm:$0xff] %vm27_vm0, %v150_v43 }
  0xaa   :  { %v171_v48 = vmul.f32 %v258_v39, %v163_v47  ;;  %157 = vst.msk [vmem:[#allocation2 + $0x18] sm:$0xff] %vm27_vm0, %v152_v44 }
  0xab   :  { %v177_v49 = vadd.f32 %v259_v42, %v169_v46 }
  0xac   :  { %v179_v50 = vadd.f32 %v259_v42, %v171_v48 }
  0xad   :  { %v181_v51 = vmax.f32 %v177_v49, 0.0 }
  0xae   :  { %v183_v52 = vmax.f32 %v179_v50, 0.0 }
  0xaf   :  { %v185_v53 = vpack.c.bf16 %v181_v51, %v181_v51 }
  0xb0   :  { %v187_v54 = vpack.c.bf16 %v183_v52, %v183_v52  ;;  %v162_v55 = vld [vmem:[#allocation2 + $0x8] sm:$0xff] }
  0xb1   :  { %190 = vst.msk [vmem:[%s368_s6] sm:$0xf] %vm189_vm1, %v185_v53  ;;  %v170_v56 = vmul.f32 %v258_v39, %v162_v55  ;;  %v164_v57 = vld [vmem:[#allocation2 + $0x18] sm:$0xff] }
  0xb2   :  { %192 = vst.msk [vmem:[%s368_s6 + $0x8] sm:$0xf] %vm189_vm1, %v187_v54  ;;  %v172_v58 = vmul.f32 %v258_v39, %v164_v57 }
  0xb3   :  { %v178_v59 = vadd.f32 %v259_v42, %v170_v56 }
  0xb4   :  { %v180_v60 = vadd.f32 %v259_v42, %v172_v58 }
  0xb5   :  { %v182_v61 = vmax.f32 %v178_v59, 0.0 }
  0xb6   :  { %v184_v62 = vmax.f32 %v180_v60, 0.0 }
  0xb7   :  { %v186_v63 = vpack.c.bf16 %v182_v61, %v182_v61 }
  0xb8   :  { %v188_v0 = vpack.c.bf16 %v184_v62, %v184_v62 }
  0xb9   :  { %191 = vst.msk [vmem:[%s368_s6 + $0x4] sm:$0xf] %vm189_vm1, %v186_v63 }
  0xba   :  { %193 = vst.msk [vmem:[%s368_s6 + $0xc] sm:$0xf] %vm189_vm1, %v188_v0 }

// kernel: densenet_forward.33
= control target key start
LH: loop header
LB: loop body
LE: loop exit
PB: predicated region body
PF: predicated region fallthrough
CT: control target
= control target key end

     0   :  { %vm16_vm0 = vcmask 588800   ;;  %v212_v1 = vmov 0.0   ;;  %vm75_vm1 = vcmask 130048   ;;  %vm164_vm2 = vcmask 584704   ;;  %s305_s1 = inlined_call_operand.vmem [shape: bf16[16,72], index: 1, kind: input, shape index: {}]   ;;  %s306_s0 = inlined_call_operand.vmem [shape: bf16[72,16], index: 0, kind: input, shape index: {}]   ;;  %s307_s2 = inlined_call_operand.vmem [shape: bf16[72,72], index: 2, kind: output, shape index: {}]  }
   0x1   :  { %v207_v0 = vld [vmem:[%s305_s1] sm:$0xff]  ;;  %21 = vst.msk [vmem:[#allocation2 + $0x20] sm:$0xff] %vm16_vm0, %v212_v1  ;;  %v205_v2 = vld [vmem:[%s306_s0 + $0x10] sm:$0xff]  ;;  %v204_v5 = vld [vmem:[%s306_s0 + $0x8] sm:$0xff] }
   0x2   :  { %v203_v3 = vld [vmem:[%s306_s0] sm:$0xff]  ;;  %17 = vst.msk [vmem:[#allocation2] sm:$0xff] %vm16_vm0, %v212_v1  ;;  %209 = vmatpush.bf16.msra.mxu2 %v207_v0  ;;  %98 = vmatpush.bf16.msra.mxu0 %v207_v0  ;;  %v206_v8 = vld [vmem:[%s306_s0 + $0x18] sm:$0xff] }
   0x3   :  { %v34_v4 = vld [vmem:[%s306_s0 + $0x20] sm:$0xf]  ;;  %18 = vst.msk [vmem:[#allocation2 + $0x8] sm:$0xff] %vm16_vm0, %v212_v1  ;;  %208 = vmatpush.bf16.msra.mxu1 %v207_v0  ;;  %210 = vmatpush.bf16.msra.mxu3 %v207_v0 }
   0x4   :  { %v63_v6 = vunpack.c.l.b16 %v34_v4  ;;  %19 = vst.msk [vmem:[#allocation2 + $0x10] sm:$0xff] %vm16_vm0, %v212_v1 }
   0x5   :  { %20 = vst.msk [vmem:[#allocation2 + $0x18] sm:$0xff] %vm16_vm0, %v212_v1  ;;  %200 = vmatmul.msk.bf16.vlgmr.msra.gmra.mxu2 %vm75_vm1, %v205_v2  ;;  %198 = vmatmul.msk.bf16.vlgmr.msra.gmra.mxu0 %vm75_vm1, %v203_v3 }
   0x6   :  { %v68_v7 = vpack.c.b16 %v63_v6, %v63_v6  ;;  %22 = vst.msk [vmem:[#allocation2 + $0x28] sm:$0xff] %vm16_vm0, %v212_v1  ;;  %199 = vmatmul.msk.bf16.vlgmr.msra.gmra.mxu1 %vm75_vm1, %v204_v5 }
   0x7   :  { %23 = vst.msk [vmem:[#allocation2 + $0x30] sm:$0xff] %vm16_vm0, %v212_v1 }
   0x8   :  { %202 = vmatmul.msk.bf16.vlgmr.msra.gmra.mxu3 %vm75_vm1, %v68_v7  ;;  %24 = vst.msk [vmem:[#allocation2 + $0x38] sm:$0xff] %vm16_vm0, %v212_v1  ;;  %v39_v15 = vld [vmem:[#allocation2 + $0x20] sm:$0xff] }
   0x9   :  { %25 = vst.msk [vmem:[#allocation2 + $0x40] sm:$0xff] %vm16_vm0, %v212_v1  ;;  %v35_v9 = vld [vmem:[#allocation2] sm:$0xff] }
   0xa   :  { %v36_v18 = vld [vmem:[#allocation2 + $0x8] sm:$0xff] }
   0xb   :  { %v37_v10 = vld [vmem:[#allocation2 + $0x10] sm:$0xff] }
   0xc   :  { %v38_v20 = vld [vmem:[#allocation2 + $0x18] sm:$0xff] }
   0xd   :  { %v40_v31 = vld [vmem:[#allocation2 + $0x28] sm:$0xff] }
   0xe   :  { %v41_v43 = vld [vmem:[#allocation2 + $0x30] sm:$0xff] }
   0xf   :  { %v42_v48 = vld [vmem:[#allocation2 + $0x38] sm:$0xff] }
  0x10   :  { %v43_v16 = vld [vmem:[#allocation2 + $0x40] sm:$0xff] }
  0x15   :  { %201 = vmatmul.msk.bf16.gmra.mxu2 %vm75_vm1, %v206_v8 }
  0x82   :  { %v100_v11 = vpop.f32.mrf.mxu0 }
  0x83   :  { %v124_v12 = vadd.f32 %v100_v11, %v35_v9  ;;  %v105_v13 = vpop.f32.mrf.mxu1 }
  0x84   :  { %v126_v14 = vadd.f32 %v105_v13, %v37_v10 }
  0x85   :  { %134 = vst.msk [vmem:[#allocation2] sm:$0xff] %vm16_vm0, %v124_v12 }
  0x86   :  { %136 = vst.msk [vmem:[#allocation2 + $0x10] sm:$0xff] %vm16_vm0, %v126_v14 }
  0x88   :  { %v110_v17 = vpop.f32.mrf.mxu2 }
  0x89   :  { %v128_v19 = vadd.f32 %v110_v17, %v39_v15 }
  0x8a   :  { %v102_v22 = vpop.f32.mrf.mxu0 }
  0x8b   :  { %v120_v21 = vpop.f32.mrf.mxu3  ;;  %138 = vst.msk [vmem:[#allocation2 + $0x20] sm:$0xff] %vm16_vm0, %v128_v19  ;;  %v125_v24 = vadd.f32 %v102_v22, %v36_v18  ;;  %v107_v25 = vpop.f32.mrf.mxu1 }
  0x8c   :  { %v132_v23 = vadd.f32 %v120_v21, %v43_v16  ;;  %v146_v26 = vld [vmem:[#allocation2] sm:$0xff]  ;;  %v127_v27 = vadd.f32 %v107_v25, %v38_v20 }
  0x8d   :  { %v155_v28 = vpack.c.bf16 %v146_v26, %v146_v26  ;;  %v148_v29 = vld [vmem:[#allocation2 + $0x10] sm:$0xff]  ;;  %135 = vst.msk [vmem:[#allocation2 + $0x8] sm:$0xff] %vm16_vm0, %v125_v24 }
  0x8e   :  { %142 = vst.msk [vmem:[#allocation2 + $0x40] sm:$0xff] %vm16_vm0, %v132_v23  ;;  %v157_v30 = vpack.c.bf16 %v148_v29, %v148_v29 }
  0x8f   :  { %137 = vst.msk [vmem:[#allocation2 + $0x18] sm:$0xff] %vm16_vm0, %v127_v27 }
  0x90   :  { %165 = vst.msk [vmem:[%s307_s2] sm:$0xf] %vm164_vm2, %v155_v28  ;;  %v112_v32 = vpop.f32.mrf.mxu2 }
  0x91   :  { %167 = vst.msk [vmem:[%s307_s2 + $0x8] sm:$0xf] %vm164_vm2, %v157_v30  ;;  %v129_v33 = vadd.f32 %v112_v32, %v40_v31 }
  0x92   :  { %v150_v35 = vld [vmem:[#allocation2 + $0x20] sm:$0xff] }
  0x93   :  { %v122_v34 = vpop.f32.mrf.mxu3  ;;  %v159_v36 = vpack.c.bf16 %v150_v35, %v150_v35  ;;  %139 = vst.msk [vmem:[#allocation2 + $0x28] sm:$0xff] %vm16_vm0, %v129_v33 }
  0x94   :  { %v147_v38 = vld [vmem:[#allocation2 + $0x8] sm:$0xff] }
  0x95   :  { %v154_v37 = vld [vmem:[#allocation2 + $0x40] sm:$0xff]  ;;  %169 = vst.msk [vmem:[%s307_s2 + $0x10] sm:$0xf] %vm164_vm2, %v159_v36  ;;  %v156_v40 = vpack.c.bf16 %v147_v38, %v147_v38 }
  0x96   :  { %v163_v39 = vpack.c.bf16 %v154_v37, %v154_v37  ;;  %v149_v41 = vld [vmem:[#allocation2 + $0x18] sm:$0xff] }
  0x97   :  { %v158_v42 = vpack.c.bf16 %v149_v41, %v149_v41  ;;  %166 = vst.msk [vmem:[%s307_s2 + $0x4] sm:$0xf] %vm164_vm2, %v156_v40 }
  0x98   :  { %173 = vst.msk [vmem:[%s307_s2 + $0x20] sm:$0xf] %vm164_vm2, %v163_v39  ;;  %v115_v44 = vpop.f32.mrf.mxu2 }
  0x99   :  { %168 = vst.msk [vmem:[%s307_s2 + $0xc] sm:$0xf] %vm164_vm2, %v158_v42  ;;  %v130_v45 = vadd.f32 %v115_v44, %v41_v43 }
  0x9a   :  { %v151_v46 = vld [vmem:[#allocation2 + $0x28] sm:$0xff] }
  0x9b   :  { %v160_v47 = vpack.c.bf16 %v151_v46, %v151_v46  ;;  %140 = vst.msk [vmem:[#allocation2 + $0x30] sm:$0xff] %vm16_vm0, %v130_v45 }
  0x9d   :  { %170 = vst.msk [vmem:[%s307_s2 + $0x14] sm:$0xf] %vm164_vm2, %v160_v47 }
  0xa0   :  { %v117_v49 = vpop.f32.mrf.mxu2 }
  0xa1   :  { %v131_v50 = vadd.f32 %v117_v49, %v42_v48 }
  0xa2   :  { %v152_v51 = vld [vmem:[#allocation2 + $0x30] sm:$0xff] }
  0xa3   :  { %v161_v52 = vpack.c.bf16 %v152_v51, %v152_v51  ;;  %141 = vst.msk [vmem:[#allocation2 + $0x38] sm:$0xff] %vm16_vm0, %v131_v50 }
  0xa5   :  { %171 = vst.msk [vmem:[%s307_s2 + $0x18] sm:$0xf] %vm164_vm2, %v161_v52 }
  0xaa   :  { %v153_v53 = vld [vmem:[#allocation2 + $0x38] sm:$0xff] }
  0xab   :  { %v162_v54 = vpack.c.bf16 %v153_v53, %v153_v53 }
  0xad   :  { %172 = vst.msk [vmem:[%s307_s2 + $0x1c] sm:$0xf] %vm164_vm2, %v162_v54 }

// kernel: densenet_forward.36
= control target key start
LH: loop header
LB: loop body
LE: loop exit
PB: predicated region body
PF: predicated region fallthrough
CT: control target
= control target key end

     0   :  { %vm21_vm0 = vcmask 130048   ;;  %v232_v2 = vmov 0.0   ;;  %vm163_vm1 = vcmask 125952   ;;  %s314_s1 = inlined_call_operand.vmem [shape: bf16[128,16], index: 1, kind: input, shape index: {}]   ;;  %s315_s2 = inlined_call_operand.vmem [shape: f32[1,128], index: 2, kind: input, shape index: {}]   ;;  %s316_s3 = inlined_call_operand.vmem [shape: f32[1,128], index: 3, kind: input, shape index: {}]   ;;  %s317_s0 = inlined_call_operand.vmem [shape: bf16[32,128], index: 0, kind: input, shape index: {}]   ;;  %s318_s4 = inlined_call_operand.vmem [shape: bf16[32,16], index: 4, kind: output, shape index: {}]  }
   0x1   :  { %v211_v0 = vld [vmem:[%s314_s1 + $0x38] sm:$0xff]  ;;  %v210_v1 = vld [vmem:[%s314_s1 + $0x30] sm:$0xff]  ;;  %22 = vst.msk [vmem:[#allocation2] sm:$0xff] %vm21_vm0, %v232_v2  ;;  %v209_v3 = vld [vmem:[%s314_s1 + $0x28] sm:$0xff] }
   0x2   :  { %124 = vmatpush.bf16.msra.mxu0 %v211_v0  ;;  %221 = vmatpush.bf16.msra.mxu1 %v211_v0  ;;  %23 = vst.msk [vmem:[#allocation2 + $0x8] sm:$0xff] %vm21_vm0, %v232_v2  ;;  %v208_v4 = vld [vmem:[%s314_s1 + $0x20] sm:$0xff]  ;;  %v220_v6 = vld [vmem:[%s317_s0 + $0x8] sm:$0xff]   ;;  %v207_v12 = vld [vmem:[%s314_s1 + $0x18] sm:$0xff] }
   0x3   :  { %24 = vst.msk [vmem:[#allocation2 + $0x10] sm:$0xff] %vm21_vm0, %v232_v2  ;;  %v213_v5 = vld [vmem:[%s317_s0] sm:$0xff]   ;;  %v218_v10 = vunpack.c.l.bf16 %v220_v6  ;;  %v219_v11 = vunpack.c.h.bf16 %v220_v6  ;;  %v206_v18 = vld [vmem:[%s314_s1 + $0x10] sm:$0xff]  ;;  %v205_v23 = vld [vmem:[%s314_s1 + $0x8] sm:$0xff] }
   0x4   :  { %25 = vst.msk [vmem:[#allocation2 + $0x18] sm:$0xff] %vm21_vm0, %v232_v2  ;;  %v214_v7 = vunpack.c.l.bf16 %v213_v5  ;;  %v215_v8 = vunpack.c.h.bf16 %v213_v5  ;;  %v230_v9 = vld [vmem:[%s315_s2] ss:$0 sm:$0xff] }
   0x5   :  { %v231_v15 = vld [vmem:[%s316_s3] ss:$0 sm:$0xff]  ;;  %v40_v16 = vmul.f32 %v230_v9, %v218_v10  ;;  %v41_v17 = vmul.f32 %v230_v9, %v219_v11 }
   0x6   :  { %125 = vmatpush.bf16.msra.mxu0 %v210_v1  ;;  %222 = vmatpush.bf16.msra.mxu1 %v210_v1  ;;  %v38_v13 = vmul.f32 %v230_v9, %v214_v7  ;;  %v39_v14 = vmul.f32 %v230_v9, %v215_v8  ;;  %v204_v28 = vld [vmem:[%s314_s1] sm:$0xff] }
   0x7   :  { %v48_v21 = vadd.f32 %v231_v15, %v40_v16  ;;  %v49_v22 = vadd.f32 %v231_v15, %v41_v17 }
   0x8   :  { %v46_v19 = vadd.f32 %v231_v15, %v38_v13  ;;  %v47_v20 = vadd.f32 %v231_v15, %v39_v14  ;;  %v56_v31 = vld [vmem:[#allocation2] sm:$0xff] }
   0x9   :  { %v52_v26 = vmax.f32 %v48_v21, 0.0  ;;  %v53_v27 = vmax.f32 %v49_v22, 0.0  ;;  %v57_v37 = vld [vmem:[#allocation2 + $0x8] sm:$0xff] }
   0xa   :  { %126 = vmatpush.bf16.msra.mxu0 %v209_v3  ;;  %223 = vmatpush.bf16.msra.mxu1 %v209_v3  ;;  %v50_v24 = vmax.f32 %v46_v19, 0.0  ;;  %v51_v25 = vmax.f32 %v47_v20, 0.0  ;;  %v58_v32 = vld [vmem:[#allocation2 + $0x10] sm:$0xff] }
   0xb   :  { %v55_v30 = vpack.c.bf16 %v53_v27, %v52_v26  ;;  %v59_v38 = vld [vmem:[#allocation2 + $0x18] sm:$0xff] }
   0xc   :  { %v54_v29 = vpack.c.bf16 %v51_v25, %v50_v24 }
   0xe   :  { %127 = vmatpush.bf16.msra.mxu0 %v208_v4  ;;  %224 = vmatpush.bf16.msra.mxu1 %v208_v4 }
  0x12   :  { %128 = vmatpush.bf16.msra.mxu0 %v207_v12  ;;  %225 = vmatpush.bf16.msra.mxu1 %v207_v12 }
  0x16   :  { %129 = vmatpush.bf16.msra.mxu0 %v206_v18  ;;  %226 = vmatpush.bf16.msra.mxu1 %v206_v18 }
  0x1a   :  { %130 = vmatpush.bf16.msra.mxu0 %v205_v23  ;;  %227 = vmatpush.bf16.msra.mxu1 %v205_v23 }
  0x1e   :  { %131 = vmatpush.bf16.msra.mxu0 %v204_v28  ;;  %228 = vmatpush.bf16.msra.mxu1 %v204_v28 }
  0x21   :  { %132 = vmatmul.bf16.vlgmr.msra.gmra.mxu0 %v54_v29  ;;  %137 = vmatmul.bf16.vlgmr.msra.gmra.mxu1 %v55_v30 }
  0x9e   :  { %v133_v33 = vpop.f32.mrf.mxu0  ;;  %v138_v34 = vpop.f32.mrf.mxu1 }
  0x9f   :  { %v143_v35 = vadd.f32 %v133_v33, %v56_v31  ;;  %v145_v36 = vadd.f32 %v138_v34, %v58_v32 }
  0xa1   :  { %148 = vst.msk [vmem:[#allocation2] sm:$0xff] %vm21_vm0, %v143_v35 }
  0xa2   :  { %150 = vst.msk [vmem:[#allocation2 + $0x10] sm:$0xff] %vm21_vm0, %v145_v36 }
  0xa6   :  { %v135_v39 = vpop.f32.mrf.mxu0  ;;  %v140_v40 = vpop.f32.mrf.mxu1 }
  0xa7   :  { %v144_v41 = vadd.f32 %v135_v39, %v57_v37  ;;  %v146_v42 = vadd.f32 %v140_v40, %v59_v38 }
  0xa8   :  { %v155_v43 = vld [vmem:[#allocation2] sm:$0xff] }
  0xa9   :  { %v159_v44 = vpack.c.bf16 %v155_v43, %v155_v43  ;;  %v157_v45 = vld [vmem:[#allocation2 + $0x10] sm:$0xff]  ;;  %149 = vst.msk [vmem:[#allocation2 + $0x8] sm:$0xff] %vm21_vm0, %v144_v41 }
  0xaa   :  { %v161_v46 = vpack.c.bf16 %v157_v45, %v157_v45  ;;  %151 = vst.msk [vmem:[#allocation2 + $0x18] sm:$0xff] %vm21_vm0, %v146_v42 }
  0xab   :  { %164 = vst.msk [vmem:[%s318_s4] sm:$0xf] %vm163_vm1, %v159_v44 }
  0xac   :  { %166 = vst.msk [vmem:[%s318_s4 + $0x8] sm:$0xf] %vm163_vm1, %v161_v46 }
  0xb0   :  { %v156_v47 = vld [vmem:[#allocation2 + $0x8] sm:$0xff] }
  0xb1   :  { %v160_v48 = vpack.c.bf16 %v156_v47, %v156_v47  ;;  %v158_v49 = vld [vmem:[#allocation2 + $0x18] sm:$0xff] }
  0xb2   :  { %v162_v50 = vpack.c.bf16 %v158_v49, %v158_v49 }
  0xb3   :  { %165 = vst.msk [vmem:[%s318_s4 + $0x4] sm:$0xf] %vm163_vm1, %v160_v48 }
  0xb4   :  { %167 = vst.msk [vmem:[%s318_s4 + $0xc] sm:$0xf] %vm163_vm1, %v162_v50 }

// kernel: densenet_forward.37
= control target key start
LH: loop header
LB: loop body
LE: loop exit
PB: predicated region body
PF: predicated region fallthrough
CT: control target
= control target key end

     0   :  { %vm27_vm0 = vcmask 130048   ;;  %v191_v2 = vmov 0.0   ;;  %vm140_vm1 = vcmask 125952   ;;  %s271_s1 = inlined_call_operand.vmem [shape: bf16[128,16], index: 1, kind: input, shape index: {}]   ;;  %s272_s2 = inlined_call_operand.vmem [shape: f32[1,128], index: 2, kind: input, shape index: {}]   ;;  %s273_s3 = inlined_call_operand.vmem [shape: f32[1,128], index: 3, kind: input, shape index: {}]   ;;  %s274_s4 = inlined_call_operand.vmem [shape: f32[1,16], index: 4, kind: input, shape index: {}]   ;;  %s275_s5 = inlined_call_operand.vmem [shape: f32[1,16], index: 5, kind: input, shape index: {}]   ;;  %s276_s0 = inlined_call_operand.vmem [shape: bf16[8,128], index: 0, kind: input, shape index: {}]   ;;  %s277_s6 = inlined_call_operand.vmem [shape: bf16[8,16], index: 6, kind: output, shape index: {}]  }
   0x1   :  { %v185_v0 = vld [vmem:[%s271_s1 + $0x38] sm:$0xff]  ;;  %v184_v1 = vld [vmem:[%s271_s1 + $0x30] sm:$0xff]  ;;  %28 = vst.msk [vmem:[#allocation2] sm:$0xff] %vm27_vm0, %v191_v2  ;;  %v183_v3 = vld [vmem:[%s271_s1 + $0x28] sm:$0xff] }
   0x2   :  { %108 = vmatpush.bf16.msra.mxu0 %v185_v0  ;;  %v182_v4 = vld [vmem:[%s271_s1 + $0x20] sm:$0xff]  ;;  %v181_v8 = vld [vmem:[%s271_s1 + $0x18] sm:$0xff]  ;;  %v180_v11 = vld [vmem:[%s271_s1 + $0x10] sm:$0xff] }
   0x3   :  { %v29_v5 = vld [vmem:[%s276_s0] sm:$0xf]  ;;  %v179_v13 = vld [vmem:[%s271_s1 + $0x8] sm:$0xff] }
   0x4   :  { %v30_v6 = vunpack.c.l.bf16 %v29_v5  ;;  %v187_v7 = vld [vmem:[%s272_s2] ss:$0 sm:$0xff] }
   0x5   :  { %v188_v10 = vld [vmem:[%s273_s3] ss:$0 sm:$0xff] }
   0x6   :  { %109 = vmatpush.bf16.msra.mxu0 %v184_v1  ;;  %v35_v9 = vmul.f32 %v187_v7, %v30_v6  ;;  %v178_v15 = vld [vmem:[%s271_s1] sm:$0xff] }
   0x7   :  { %v189_v20 = vld [vmem:[%s274_s4] ss:$0 sm:$0xff] }
   0x8   :  { %v40_v12 = vadd.f32 %v188_v10, %v35_v9  ;;  %v43_v17 = vld [vmem:[#allocation2] sm:$0xff] }
   0x9   :  { %v190_v22 = vld [vmem:[%s275_s5] ss:$0 sm:$0xff] }
   0xa   :  { %110 = vmatpush.bf16.msra.mxu0 %v183_v3  ;;  %v41_v14 = vmax.f32 %v40_v12, 0.0 }
   0xc   :  { %v42_v16 = vpack.c.bf16 %v41_v14, %v41_v14 }
   0xe   :  { %111 = vmatpush.bf16.msra.mxu0 %v182_v4 }
  0x12   :  { %112 = vmatpush.bf16.msra.mxu0 %v181_v8 }
  0x16   :  { %113 = vmatpush.bf16.msra.mxu0 %v180_v11 }
  0x1a   :  { %114 = vmatpush.bf16.msra.mxu0 %v179_v13 }
  0x1e   :  { %115 = vmatpush.bf16.msra.mxu0 %v178_v15 }
  0x21   :  { %116 = vmatmul.bf16.vlgmr.msra.gmra.mxu0 %v42_v16 }
  0x9e   :  { %v117_v18 = vpop.f32.mrf.mxu0 }
  0x9f   :  { %v121_v19 = vadd.f32 %v117_v18, %v43_v17 }
  0xa1   :  { %123 = vst.msk [vmem:[#allocation2] sm:$0xff] %vm27_vm0, %v121_v19 }
  0xa6   :  { %v119_v21 = vpop.f32.mrf.mxu0 }
  0xa8   :  { %v127_v23 = vld [vmem:[#allocation2] sm:$0xff] }
  0xa9   :  { %v132_v24 = vmul.f32 %v189_v20, %v127_v23 }
  0xab   :  { %v137_v25 = vadd.f32 %v190_v22, %v132_v24 }
  0xad   :  { %v138_v26 = vmax.f32 %v137_v25, 0.0 }
  0xaf   :  { %v139_v27 = vpack.c.bf16 %v138_v26, %v138_v26 }
  0xb1   :  { %141 = vst.msk [vmem:[%s277_s6] sm:$0xf] %vm140_vm1, %v139_v27 }

// kernel: densenet_forward.38
= control target key start
LH: loop header
LB: loop body
LE: loop exit
PB: predicated region body
PF: predicated region fallthrough
CT: control target
= control target key end

     0   :  { %vm16_vm0 = vcmask 588800   ;;  %v121_v1 = vmov 0.0   ;;  %vm47_vm1 = vcmask 130048   ;;  %vm93_vm2 = vcmask 584704   ;;  %s166_s1 = inlined_call_operand.vmem [shape: bf16[16,72], index: 1, kind: input, shape index: {}]   ;;  %s167_s0 = inlined_call_operand.vmem [shape: bf16[32,16], index: 0, kind: input, shape index: {}]   ;;  %s168_s2 = inlined_call_operand.vmem [shape: bf16[32,72], index: 2, kind: output, shape index: {}]  }
   0x1   :  { %v118_v0 = vld [vmem:[%s166_s1] sm:$0xff]  ;;  %17 = vst.msk [vmem:[#allocation2] sm:$0xff] %vm16_vm0, %v121_v1  ;;  %v117_v3 = vld [vmem:[%s167_s0 + $0x8] sm:$0xff] }
   0x2   :  { %v116_v2 = vld [vmem:[%s167_s0] sm:$0xff]  ;;  %18 = vst.msk [vmem:[#allocation2 + $0x8] sm:$0xff] %vm16_vm0, %v121_v1  ;;  %61 = vmatpush.bf16.msra.mxu0 %v118_v0  ;;  %119 = vmatpush.bf16.msra.mxu1 %v118_v0 }
   0x3   :  { %19 = vst.msk [vmem:[#allocation2 + $0x10] sm:$0xff] %vm16_vm0, %v121_v1 }
   0x4   :  { %20 = vst.msk [vmem:[#allocation2 + $0x18] sm:$0xff] %vm16_vm0, %v121_v1 }
   0x5   :  { %114 = vmatmul.msk.bf16.vlgmr.msra.gmra.mxu0 %vm47_vm1, %v116_v2  ;;  %115 = vmatmul.msk.bf16.vlgmr.msra.gmra.mxu1 %vm47_vm1, %v117_v3 }
   0x8   :  { %v25_v4 = vld [vmem:[#allocation2] sm:$0xff] }
   0x9   :  { %v26_v10 = vld [vmem:[#allocation2 + $0x8] sm:$0xff] }
   0xa   :  { %v27_v5 = vld [vmem:[#allocation2 + $0x10] sm:$0xff] }
   0xb   :  { %v28_v11 = vld [vmem:[#allocation2 + $0x18] sm:$0xff] }
  0x82   :  { %v63_v6 = vpop.f32.mrf.mxu0  ;;  %v68_v7 = vpop.f32.mrf.mxu1 }
  0x83   :  { %v73_v8 = vadd.f32 %v63_v6, %v25_v4  ;;  %v75_v9 = vadd.f32 %v68_v7, %v27_v5 }
  0x85   :  { %78 = vst.msk [vmem:[#allocation2] sm:$0xff] %vm16_vm0, %v73_v8 }
  0x86   :  { %80 = vst.msk [vmem:[#allocation2 + $0x10] sm:$0xff] %vm16_vm0, %v75_v9 }
  0x8a   :  { %v65_v12 = vpop.f32.mrf.mxu0  ;;  %v70_v13 = vpop.f32.mrf.mxu1 }
  0x8b   :  { %v74_v14 = vadd.f32 %v65_v12, %v26_v10  ;;  %v76_v15 = vadd.f32 %v70_v13, %v28_v11 }
  0x8c   :  { %v85_v16 = vld [vmem:[#allocation2] sm:$0xff] }
  0x8d   :  { %v89_v17 = vpack.c.bf16 %v85_v16, %v85_v16  ;;  %v87_v18 = vld [vmem:[#allocation2 + $0x10] sm:$0xff]  ;;  %79 = vst.msk [vmem:[#allocation2 + $0x8] sm:$0xff] %vm16_vm0, %v74_v14 }
  0x8e   :  { %v91_v19 = vpack.c.bf16 %v87_v18, %v87_v18  ;;  %81 = vst.msk [vmem:[#allocation2 + $0x18] sm:$0xff] %vm16_vm0, %v76_v15 }
  0x8f   :  { %94 = vst.msk [vmem:[%s168_s2] sm:$0xf] %vm93_vm2, %v89_v17 }
  0x90   :  { %96 = vst.msk [vmem:[%s168_s2 + $0x8] sm:$0xf] %vm93_vm2, %v91_v19 }
  0x94   :  { %v86_v20 = vld [vmem:[#allocation2 + $0x8] sm:$0xff] }
  0x95   :  { %v90_v21 = vpack.c.bf16 %v86_v20, %v86_v20  ;;  %v88_v22 = vld [vmem:[#allocation2 + $0x18] sm:$0xff] }
  0x96   :  { %v92_v23 = vpack.c.bf16 %v88_v22, %v88_v22 }
  0x97   :  { %95 = vst.msk [vmem:[%s168_s2 + $0x4] sm:$0xf] %vm93_vm2, %v90_v21 }
  0x98   :  { %97 = vst.msk [vmem:[%s168_s2 + $0xc] sm:$0xf] %vm93_vm2, %v92_v23 }

// kernel: densenet_forward.41
= control target key start
LH: loop header
LB: loop body
LE: loop exit
PB: predicated region body
PF: predicated region fallthrough
CT: control target
= control target key end

     0   :  { %9 = vsyncpa [#allocation4], 0  ;;  %s137_s18 = smov [#allocation3]   ;;  %s185_s0 = inlined_call_operand.vmem [shape: bf16[8,32], index: 0, kind: input, shape index: {}]   ;;  %s186_s1 = inlined_call_operand.vmem [shape: bf16[32,10], index: 1, kind: input, shape index: {}]   ;;  %s187_s2 = inlined_call_operand.vmem [shape: f32[1,10], index: 2, kind: input, shape index: {}]   ;;  %s188_s3 = inlined_call_operand.hbm [shape: f32[1,10], index: 3, kind: input, shape index: {}]   ;;  %s189_s4 = inlined_call_operand.vmem [shape: f32[8,10], index: 4, kind: output, shape index: {}]  }
   0x1   :  { %s21_s17 = sshll.u32 %s188_s3, 4  ;;  %s23_s19 = sshll.u32 %s137_s18, 4  ;;  %s22_s17 = int_to_ptr.hbm [resolvable:$true] %s21_s17  ;;  %s24_s19 = int_to_ptr.vmem [resolvable:$true] %s23_s19 }
   0x2   :  { %26 = dma.hbm_to_vmem [thread:$0]  %s22_s17, 16, %s24_s19, [#allocation4]  }
   0x3   :  { %135 = dma.done.wait [#allocation4], 16  }
   0x4   :  { %136 = vsyncadd [#allocation4], 4294967280  ;;  %vm36_vm0 = vcmask 80896   ;;  %v138_v0 = vmov 0.0   ;;  %v106_v1 = vld [vmem:[%s186_s1 + $0x8] sm:$0xff]  ;;  %v105_v2 = vld [vmem:[%s186_s1] sm:$0xff] }
   0x5   :  { %37 = vst.msk [vmem:[#allocation2] sm:$0xff] %vm36_vm0, %v138_v0  ;;  %66 = vmatpush.bf16.msra.mxu0 %v106_v1  ;;  %v38_v3 = vld [vmem:[%s185_s0] sm:$0xf]  ;;  %vm56_vm1 = vcmask 261120   ;;  %v110_v9 = vld [vmem:[#allocation3] ss:$0 sm:$0xff] }
   0x6   :  { %v109_v7 = vld [vmem:[%s187_s2] ss:$0 sm:$0xff] }
   0x9   :  { %67 = vmatpush.bf16.msra.mxu0 %v105_v2 }
   0xc   :  { %104 = vmatmul.msk.bf16.vlgmr.msra.gmra.mxu0 %vm56_vm1, %v38_v3  ;;  %v39_v4 = vld [vmem:[#allocation2] sm:$0xff] }
  0x89   :  { %v69_v5 = vpop.f32.mrf.mxu0 }
  0x8a   :  { %v73_v6 = vadd.f32 %v69_v5, %v39_v4 }
  0x8c   :  { %75 = vst.msk [vmem:[#allocation2] sm:$0xff] %vm36_vm0, %v73_v6 }
  0x91   :  { %v71_v8 = vpop.f32.mrf.mxu0 }
  0x93   :  { %v79_v10 = vld [vmem:[#allocation2] sm:$0xff] }
  0x94   :  { %v84_v11 = vmul.f32 %v109_v7, %v79_v10 }
  0x96   :  { %v89_v12 = vadd.f32 %v110_v9, %v84_v11 }
  0x98   :  { %90 = vst.msk [vmem:[%s189_s4] sm:$0xff] %vm36_vm0, %v89_v12 }
  0x99   :  { %95 = vsyncpa [#allocation4], 1 }

</bundles_post_ra>
